<compile_context>
chip_gen: v6e
topology: v6e:2x2x1
jax: 0.10.0
libtpu: 0.0.40
codegen_flags: <defaults>
</compile_context>

<pallas_src>
import math
import functools

import jax
import jax.numpy as jnp
from jax.experimental import pallas as pl
from jax.experimental.pallas import tpu as pltpu


# ----------------------------- fused encoder kernel --------------------------

def _encoder_kernel(x_ref, pos_ref,
                    qs_w2_ref, qs_b2_ref,
                    w_xv_ref, b_xv_ref,
                    wqk_ref, bqk_ref,
                    wo_ref, bo_ref,
                    ln1_g_ref, ln1_b_ref,
                    w1_ref, b1_ref,
                    w2_ref, b2_ref,
                    ln2_g_ref, ln2_b_ref,
                    y_ref, kw_ref,
                    carry_ref,
                    *, nhead, eps):
    L, D = x_ref.shape[1], x_ref.shape[2]
    hd = D // nhead
    layer = pl.program_id(1)

    # Layer 0: seed the VMEM-resident activation carry with the encoder input.
    @pl.when(layer == 0)
    def _():
        carry_ref[...] = x_ref[0]

    x = carry_ref[...]          # (L, D) f32 current layer input (= src / previous output)
    pos = pos_ref[0]            # (L, D) f32 positional embedding

    def mm(a, w, b=None):
        # bf16 operands on the MXU, f32 accumulation; weights pre-transposed (Din, Dout).
        y = jnp.dot(a.astype(w.dtype), w, preferred_element_type=jnp.float32)
        return y if b is None else y + b

    def ln(a, g, b):
        mu = jnp.mean(a, axis=-1, keepdims=True)
        var = jnp.mean(jnp.square(a - mu), axis=-1, keepdims=True)
        return (a - mu) * jax.lax.rsqrt(var + eps) * g + b

    # ---- fused [query_scale layer-1 | v in-projection]: both consume x -----
    hv = mm(x, w_xv_ref[0], b_xv_ref[0])        # (L, 2D)
    h1 = jnp.maximum(hv[:, :D], 0.0)            # query_scale hidden (ReLU)
    v = hv[:, D:]                               # value in-projection

    pos_scales = mm(h1, qs_w2_ref[...], qs_b2_ref[...])
    qk_in = x + pos * pos_scales                # q = k = with_pos_embed(src, pos*pos_scales)

    # ---- fused q/k in-projection (q half pre-scaled by 1/sqrt(head_dim)) ---
    qk = mm(qk_in, wqk_ref[0], bqk_ref[0])      # (L, 2D) = [q | k]
    q, k = qk[:, :D], qk[:, D:]

    # ---- batched multi-head attention (all heads in one issue) -------------
    def split_heads(t):                         # (L, D) -> (nhead, L, hd)
        return jnp.transpose(t.reshape(L, nhead, hd), (1, 0, 2))

    qh = split_heads(q).astype(jnp.bfloat16)
    kh = split_heads(k).astype(jnp.bfloat16)
    vh = split_heads(v).astype(jnp.bfloat16)

    s = jnp.einsum('hqd,hkd->hqk', qh, kh, preferred_element_type=jnp.float32)
    s = s - jnp.max(s, axis=-1, keepdims=True)
    p = jnp.exp(s)
    p = p / jnp.sum(p, axis=-1, keepdims=True)   # exact normalization (K_weights is an output)
    kw_ref[0, 0] = jnp.mean(p, axis=0)           # head-averaged attention weights (L, L)

    ctx = jnp.einsum('hqk,hkd->hqd', p.astype(jnp.bfloat16), vh,
                     preferred_element_type=jnp.float32)
    attn = jnp.transpose(ctx, (1, 0, 2)).reshape(L, D)

    # ---- out-projection + residual + norm1 ----------------------------------
    src = ln(x + mm(attn, wo_ref[0], bo_ref[0]), ln1_g_ref[0], ln1_b_ref[0])

    # ---- FFN + residual + norm2 ---------------------------------------------
    ff = jnp.maximum(mm(src, w1_ref[0], b1_ref[0]), 0.0)
    out = ln(src + mm(ff, w2_ref[0], b2_ref[0]), ln2_g_ref[0], ln2_b_ref[0])

    carry_ref[...] = out                         # carry to the next layer (stays in VMEM)

    @pl.when(layer == pl.num_programs(1) - 1)
    def _():
        y_ref[0] = out                           # write the final-layer output only


# ------------------------------- encoder wrapper -----------------------------

def transformer_encoder_forward(params, src, pos, *, nhead, eps=1e-5):
    """src, pos: (L, B, D) sequence-first (PyTorch convention).
    Returns (output (L, B, D), K_weights (num_layers, B, L, L))."""
    Lq, B, D = src.shape
    L = Lq
    num_layers = params["wqk"].shape[0]
    F = params["w1"].shape[2]

    # Work batch-first internally: (1, L, D) blocks keep (L, D)=(32, 256) as the last two
    # dims which is (8,128)-friendly.  The three tiny activation transposes are negligible.
    x = jnp.transpose(src, (1, 0, 2))
    p = jnp.transpose(pos, (1, 0, 2))

    act = lambda b, l: (b, 0, 0)          # per-batch activation block, constant over layers
    shared2 = lambda b, l: (0, 0)         # shared query_scale layer-2 weights
    perlayer = lambda b, l: (l, 0, 0)     # stacked per-layer weights, indexed by layer

    in_specs = [
        pl.BlockSpec((1, L, D), act),              # x
        pl.BlockSpec((1, L, D), act),              # pos
        pl.BlockSpec((D, D), shared2),             # query_scale layer-2 weight
        pl.BlockSpec((1, D), shared2),             # query_scale layer-2 bias
        pl.BlockSpec((1, D, 2 * D), perlayer),     # fused [qs layer-1 | v] weight
        pl.BlockSpec((1, 1, 2 * D), perlayer),     # fused [qs layer-1 | v] bias
        pl.BlockSpec((1, D, 2 * D), perlayer),     # fused q/k in-projection weight
        pl.BlockSpec((1, 1, 2 * D), perlayer),     # fused q/k in-projection bias
        pl.BlockSpec((1, D, D), perlayer),         # attention out-projection weight
        pl.BlockSpec((1, 1, D), perlayer),         # attention out-projection bias
        pl.BlockSpec((1, 1, D), perlayer),         # norm1 gamma
        pl.BlockSpec((1, 1, D), perlayer),         # norm1 beta
        pl.BlockSpec((1, D, F), perlayer),         # linear1 weight
        pl.BlockSpec((1, 1, F), perlayer),         # linear1 bias
        pl.BlockSpec((1, F, D), perlayer),         # linear2 weight
        pl.BlockSpec((1, 1, D), perlayer),         # linear2 bias
        pl.BlockSpec((1, 1, D), perlayer),         # norm2 gamma
        pl.BlockSpec((1, 1, D), perlayer),         # norm2 beta
    ]
    out_specs = (
        pl.BlockSpec((1, L, D), act),                                # final output (per batch)
        pl.BlockSpec((1, 1, L, L), lambda b, l: (l, b, 0, 0)),       # per-layer attn weights
    )

    y, kw = pl.pallas_call(
        functools.partial(_encoder_kernel, nhead=nhead, eps=eps),
        out_shape=(jax.ShapeDtypeStruct((B, L, D), jnp.float32),
                   jax.ShapeDtypeStruct((num_layers, B, L, L), jnp.float32)),
        grid=(B, num_layers),
        in_specs=in_specs,
        out_specs=out_specs,
        scratch_shapes=[pltpu.VMEM((L, D), jnp.float32)],            # activation carry
        compiler_params=pltpu.CompilerParams(
            dimension_semantics=("parallel", "arbitrary")),
    )(x, p,
      params["qs_w2"], params["qs_b2"],
      params["w_xv"], params["b_xv"],
      params["wqk"], params["bqk"],
      params["wo"], params["bo"],
      params["ln1_g"], params["ln1_b"],
      params["w1"], params["b1"], params["w2"], params["b2"],
      params["ln2_g"], params["ln2_b"])

    output = jnp.transpose(y, (1, 0, 2))
    # self.norm is None for DAB-DETR's encoder (normalize_before=False) -> no final norm.
    return output, kw


# --------------------------- parameter construction --------------------------

def _init_linear(key, din, dout):
    # PyTorch nn.Linear-style init; weight stored pre-transposed to (Din, Dout).
    kw_, kb_ = jax.random.split(key)
    bound = 1.0 / math.sqrt(din)
    w = jax.random.uniform(kw_, (din, dout), jnp.float32, -bound, bound)
    b = jax.random.uniform(kb_, (1, dout), jnp.float32, -bound, bound)
    return w, b


def init_encoder_params(key, num_layers, d_model, nhead, dim_feedforward,
                        wdtype=jnp.bfloat16):
    """Build stacked (num_layers, ...) parameters, pre-fused and pre-scaled for the kernel."""
    hd = d_model // nhead
    scale = 1.0 / math.sqrt(hd)
    keys = jax.random.split(key, 2 + 6 * num_layers)

    # Encoder-level query_scale MLP (shared by every layer).
    qs_w1, qs_b1 = _init_linear(keys[0], d_model, d_model)
    qs_w2, qs_b2 = _init_linear(keys[1], d_model, d_model)

    names = ["w_xv", "b_xv", "wqk", "bqk", "wo", "bo", "w1", "b1", "w2", "b2",
             "ln1_g", "ln1_b", "ln2_g", "ln2_b"]
    per = {n: [] for n in names}
    for i in range(num_layers):
        ks = keys[2 + 6 * i: 2 + 6 * (i + 1)]
        wq, bq = _init_linear(ks[0], d_model, d_model)
        wk, bk = _init_linear(ks[1], d_model, d_model)
        wv, bv = _init_linear(ks[2], d_model, d_model)
        wo, bo = _init_linear(ks[3], d_model, d_model)
        w1, b1 = _init_linear(ks[4], d_model, dim_feedforward)
        w2, b2 = _init_linear(ks[5], dim_feedforward, d_model)
        # Fuse the two matmuls that consume x: [query_scale layer-1 | v in-projection].
        per["w_xv"].append(jnp.concatenate([qs_w1, wv], axis=1))
        per["b_xv"].append(jnp.concatenate([qs_b1, bv], axis=1))
        # Fuse q/k and fold the 1/sqrt(head_dim) scale into the q half (weight AND bias).
        per["wqk"].append(jnp.concatenate([wq * scale, wk], axis=1))
        per["bqk"].append(jnp.concatenate([bq * scale, bk], axis=1))
        per["wo"].append(wo); per["bo"].append(bo)
        per["w1"].append(w1); per["b1"].append(b1)
        per["w2"].append(w2); per["b2"].append(b2)
        per["ln1_g"].append(jnp.ones((1, d_model), jnp.float32))
        per["ln1_b"].append(jnp.zeros((1, d_model), jnp.float32))
        per["ln2_g"].append(jnp.ones((1, d_model), jnp.float32))
        per["ln2_b"].append(jnp.zeros((1, d_model), jnp.float32))

    params = {n: jnp.stack(v) for n, v in per.items()}
    for n in ("w_xv", "wqk", "wo", "w1", "w2"):       # matmul weights in bf16
        params[n] = params[n].astype(wdtype)
    params["qs_w2"] = qs_w2.astype(wdtype)
    params["qs_b2"] = qs_b2
    return params


# --------------------------------- main ---------------------------------------

if __name__ == "__main__":
    num_layers = 2
    d_model = 256
    nhead = 8
    dim_feedforward = 512
    seq = 32            # flattened H*W of the feature map
    batch = 2

    key = jax.random.PRNGKey(0)
    kp, k1, k2 = jax.random.split(key, 3)
    params = init_encoder_params(kp, num_layers, d_model, nhead, dim_feedforward)

    src = jax.random.normal(k1, (seq, batch, d_model), jnp.float32)
    pos = jax.random.normal(k2, (seq, batch, d_model), jnp.float32)

    fwd = jax.jit(functools.partial(transformer_encoder_forward, nhead=nhead))
    output, k_weights = jax.block_until_ready(fwd(params, src, pos))

    assert output.shape == (seq, batch, d_model)
    assert k_weights.shape == (num_layers, batch, seq, seq)
    assert jnp.all(jnp.isfinite(output)) and jnp.all(jnp.isfinite(k_weights))
    # Softmax rows of the head-averaged attention weights should sum to ~1.
    assert jnp.allclose(jnp.sum(k_weights, axis=-1), 1.0, atol=1e-3)
    print("KERNEL_OK")
</pallas_src>

<mosaic_0001>
module attributes {stable_mosaic.version = 11 : i64} {
  func.func @_encoder_kernel(%arg0: i32, %arg1: i32, %arg2: memref<1x32x256xf32, #tpu.memory_space<vmem>>, %arg3: memref<1x32x256xf32, #tpu.memory_space<vmem>>, %arg4: memref<256x256xbf16, #tpu.memory_space<vmem>>, %arg5: memref<1x256xf32, #tpu.memory_space<vmem>>, %arg6: memref<1x256x512xbf16, #tpu.memory_space<vmem>>, %arg7: memref<1x1x512xf32, #tpu.memory_space<vmem>>, %arg8: memref<1x256x512xbf16, #tpu.memory_space<vmem>>, %arg9: memref<1x1x512xf32, #tpu.memory_space<vmem>>, %arg10: memref<1x256x256xbf16, #tpu.memory_space<vmem>>, %arg11: memref<1x1x256xf32, #tpu.memory_space<vmem>>, %arg12: memref<1x1x256xf32, #tpu.memory_space<vmem>>, %arg13: memref<1x1x256xf32, #tpu.memory_space<vmem>>, %arg14: memref<1x256x512xbf16, #tpu.memory_space<vmem>>, %arg15: memref<1x1x512xf32, #tpu.memory_space<vmem>>, %arg16: memref<1x512x256xbf16, #tpu.memory_space<vmem>>, %arg17: memref<1x1x256xf32, #tpu.memory_space<vmem>>, %arg18: memref<1x1x256xf32, #tpu.memory_space<vmem>>, %arg19: memref<1x1x256xf32, #tpu.memory_space<vmem>>, %arg20: memref<1x32x256xf32, #tpu.memory_space<vmem>>, %arg21: memref<1x1x32x32xf32, #tpu.memory_space<vmem>>, %arg22: memref<32x256xf32, #tpu.memory_space<vmem>>) attributes {dimension_semantics = [#tpu.dimension_semantics<parallel>, #tpu.dimension_semantics<arbitrary>], iteration_bounds = array<i64: 2, 2>, scalar_prefetch = 0 : i64, scratch_operands = 1 : i64, tpu.core_type = #tpu.core_type<tc>, window_params = [{transform_indices = @transform_0, window_bounds = array<i64: 1, 32, 256>}, {transform_indices = @transform_1, window_bounds = array<i64: 1, 32, 256>}, {pipeline_mode = #tpu.pipeline_mode<synchronous>, transform_indices = @transform_2, window_bounds = array<i64: 256, 256>}, {pipeline_mode = #tpu.pipeline_mode<synchronous>, transform_indices = @transform_3, window_bounds = array<i64: 1, 256>}, {transform_indices = @transform_4, window_bounds = array<i64: 1, 256, 512>}, {transform_indices = @transform_5, window_bounds = array<i64: 1, 1, 512>}, {transform_indices = @transform_6, window_bounds = array<i64: 1, 256, 512>}, {transform_indices = @transform_7, window_bounds = array<i64: 1, 1, 512>}, {transform_indices = @transform_8, window_bounds = array<i64: 1, 256, 256>}, {transform_indices = @transform_9, window_bounds = array<i64: 1, 1, 256>}, {transform_indices = @transform_10, window_bounds = array<i64: 1, 1, 256>}, {transform_indices = @transform_11, window_bounds = array<i64: 1, 1, 256>}, {transform_indices = @transform_12, window_bounds = array<i64: 1, 256, 512>}, {transform_indices = @transform_13, window_bounds = array<i64: 1, 1, 512>}, {transform_indices = @transform_14, window_bounds = array<i64: 1, 512, 256>}, {transform_indices = @transform_15, window_bounds = array<i64: 1, 1, 256>}, {transform_indices = @transform_16, window_bounds = array<i64: 1, 1, 256>}, {transform_indices = @transform_17, window_bounds = array<i64: 1, 1, 256>}, {transform_indices = @transform_18, window_bounds = array<i64: 1, 32, 256>}, {transform_indices = @transform_19, window_bounds = array<i64: 1, 1, 32, 32>}]} {
    %c0_i32 = arith.constant 0 : i32
    %0 = arith.cmpi eq, %arg1, %c0_i32 : i32
    %1 = arith.extui %0 : i1 to i32
    %c0_i32_0 = arith.constant 0 : i32
    %2 = arith.cmpi ne, %1, %c0_i32_0 : i32
    scf.if %2 {
      %c0_81 = arith.constant 0 : index
      %c0_82 = arith.constant 0 : index
      %c0_83 = arith.constant 0 : index
      %149 = vector.load %arg2[%c0_81, %c0_82, %c0_83] : memref<1x32x256xf32, #tpu.memory_space<vmem>>, vector<1x32x256xf32>
      %150 = vector.shape_cast %149 : vector<1x32x256xf32> to vector<32x256xf32>
      %c0_84 = arith.constant 0 : index
      %c0_85 = arith.constant 0 : index
      %151 = vector.load %arg22[%c0_84, %c0_85] : memref<32x256xf32, #tpu.memory_space<vmem>>, vector<32x256xf32>
      tpu.vector_store %arg22[%c0_84, %c0_85], %150 {strides = array<i32>} : memref<32x256xf32, #tpu.memory_space<vmem>>, vector<32x256xf32>,
    } else {
    }
    %c0 = arith.constant 0 : index
    %c0_1 = arith.constant 0 : index
    %3 = vector.load %arg22[%c0, %c0_1] : memref<32x256xf32, #tpu.memory_space<vmem>>, vector<32x256xf32>
    %c0_2 = arith.constant 0 : index
    %c0_3 = arith.constant 0 : index
    %c0_4 = arith.constant 0 : index
    %4 = vector.load %arg3[%c0_2, %c0_3, %c0_4] : memref<1x32x256xf32, #tpu.memory_space<vmem>>, vector<1x32x256xf32>
    %5 = vector.shape_cast %4 : vector<1x32x256xf32> to vector<32x256xf32>
    %c0_5 = arith.constant 0 : index
    %c0_6 = arith.constant 0 : index
    %c0_7 = arith.constant 0 : index
    %6 = vector.load %arg6[%c0_5, %c0_6, %c0_7] : memref<1x256x512xbf16, #tpu.memory_space<vmem>>, vector<1x256x512xbf16>
    %7 = vector.shape_cast %6 : vector<1x256x512xbf16> to vector<256x512xbf16>
    %c0_8 = arith.constant 0 : index
    %c0_9 = arith.constant 0 : index
    %c0_10 = arith.constant 0 : index
    %8 = vector.load %arg7[%c0_8, %c0_9, %c0_10] : memref<1x1x512xf32, #tpu.memory_space<vmem>>, vector<1x1x512xf32>
    %9 = vector.shape_cast %8 : vector<1x1x512xf32> to vector<1x512xf32>
    %10 = arith.truncf %3 : vector<32x256xf32> to vector<32x256xbf16>
    %cst = arith.constant dense<0.000000e+00> : vector<32x512xf32>
    %11 = tpu.matmul %10, %7, %cst {dimension_numbers = #tpu.dot_dimension_numbers<[1], [0], [0], [1], [0, 0, 1, 1], [], []>} : vector<32x256xbf16>, vector<256x512xbf16>, vector<32x512xf32> -> vector<32x512xf32>
    %12 = vector.broadcast %9 : vector<1x512xf32> to vector<32x512xf32>
    %13 = arith.addf %11, %12 : vector<32x512xf32>
    %14 = vector.extract_strided_slice %13 {offsets = [0, 0], sizes = [32, 256], strides = [1, 1]} : vector<32x512xf32> to vector<32x256xf32>
    %cst_11 = arith.constant 0.000000e+00 : f32
    %15 = vector.broadcast %cst_11 : f32 to vector<32x256xf32>
    %16 = arith.maximumf %14, %15 : vector<32x256xf32>
    %17 = vector.extract_strided_slice %13 {offsets = [0, 256], sizes = [32, 256], strides = [1, 1]} : vector<32x512xf32> to vector<32x256xf32>
    %c0_12 = arith.constant 0 : index
    %c0_13 = arith.constant 0 : index
    %18 = vector.load %arg4[%c0_12, %c0_13] : memref<256x256xbf16, #tpu.memory_space<vmem>>, vector<256x256xbf16>
    %c0_14 = arith.constant 0 : index
    %c0_15 = arith.constant 0 : index
    %19 = vector.load %arg5[%c0_14, %c0_15] : memref<1x256xf32, #tpu.memory_space<vmem>>, vector<1x256xf32>
    %20 = arith.truncf %16 : vector<32x256xf32> to vector<32x256xbf16>
    %cst_16 = arith.constant dense<0.000000e+00> : vector<32x256xf32>
    %21 = tpu.matmul %20, %18, %cst_16 {dimension_numbers = #tpu.dot_dimension_numbers<[1], [0], [0], [1], [0, 0, 1, 1], [], []>} : vector<32x256xbf16>, vector<256x256xbf16>, vector<32x256xf32> -> vector<32x256xf32>
    %22 = vector.broadcast %19 : vector<1x256xf32> to vector<32x256xf32>
    %23 = arith.addf %21, %22 : vector<32x256xf32>
    %24 = arith.mulf %5, %23 : vector<32x256xf32>
    %25 = arith.addf %3, %24 : vector<32x256xf32>
    %c0_17 = arith.constant 0 : index
    %c0_18 = arith.constant 0 : index
    %c0_19 = arith.constant 0 : index
    %26 = vector.load %arg8[%c0_17, %c0_18, %c0_19] : memref<1x256x512xbf16, #tpu.memory_space<vmem>>, vector<1x256x512xbf16>
    %27 = vector.shape_cast %26 : vector<1x256x512xbf16> to vector<256x512xbf16>
    %c0_20 = arith.constant 0 : index
    %c0_21 = arith.constant 0 : index
    %c0_22 = arith.constant 0 : index
    %28 = vector.load %arg9[%c0_20, %c0_21, %c0_22] : memref<1x1x512xf32, #tpu.memory_space<vmem>>, vector<1x1x512xf32>
    %29 = vector.shape_cast %28 : vector<1x1x512xf32> to vector<1x512xf32>
    %30 = arith.truncf %25 : vector<32x256xf32> to vector<32x256xbf16>
    %cst_23 = arith.constant dense<0.000000e+00> : vector<32x512xf32>
    %31 = tpu.matmul %30, %27, %cst_23 {dimension_numbers = #tpu.dot_dimension_numbers<[1], [0], [0], [1], [0, 0, 1, 1], [], []>} : vector<32x256xbf16>, vector<256x512xbf16>, vector<32x512xf32> -> vector<32x512xf32>
    %32 = vector.broadcast %29 : vector<1x512xf32> to vector<32x512xf32>
    %33 = arith.addf %31, %32 : vector<32x512xf32>
    %34 = vector.extract_strided_slice %33 {offsets = [0, 0], sizes = [32, 256], strides = [1, 1]} : vector<32x512xf32> to vector<32x256xf32>
    %35 = vector.extract_strided_slice %33 {offsets = [0, 256], sizes = [32, 256], strides = [1, 1]} : vector<32x512xf32> to vector<32x256xf32>
    %36 = vector.shape_cast %34 : vector<32x256xf32> to vector<32x8x32xf32>
    %37 = tpu.transpose %36, [1, 0, 2] : vector<32x8x32xf32> -> vector<8x32x32xf32>
    %38 = arith.truncf %37 : vector<8x32x32xf32> to vector<8x32x32xbf16>
    %39 = vector.shape_cast %35 : vector<32x256xf32> to vector<32x8x32xf32>
    %40 = tpu.transpose %39, [1, 0, 2] : vector<32x8x32xf32> -> vector<8x32x32xf32>
    %41 = arith.truncf %40 : vector<8x32x32xf32> to vector<8x32x32xbf16>
    %42 = vector.shape_cast %17 : vector<32x256xf32> to vector<32x8x32xf32>
    %43 = tpu.transpose %42, [1, 0, 2] : vector<32x8x32xf32> -> vector<8x32x32xf32>
    %44 = arith.truncf %43 : vector<8x32x32xf32> to vector<8x32x32xbf16>
    "tpu.trace_start"() <{level = 10 : i32, message = "hqd,hkd->hqk"}> : () -> ()
    %cst_24 = arith.constant dense<0.000000e+00> : vector<8x32x32xf32>
    %45 = tpu.matmul %38, %41, %cst_24 {dimension_numbers = #tpu.dot_dimension_numbers<[2], [2], [1], [1], [0, 0, 0, 1, 1, 1], [0], [0]>} : vector<8x32x32xbf16>, vector<8x32x32xbf16>, vector<8x32x32xf32> -> vector<8x32x32xf32>
    "tpu.trace_stop"() : () -> ()
    %cst_25 = arith.constant dense<0xFF800000> : vector<8x32xf32>
    %46 = vector.multi_reduction <maximumf>, %45, %cst_25 [2] : vector<8x32x32xf32> to vector<8x32xf32>
    %47 = vector.shape_cast %46 : vector<8x32xf32> to vector<8x32x1xf32>
    %48 = vector.broadcast %47 : vector<8x32x1xf32> to vector<8x32x32xf32>
    %49 = arith.subf %45, %48 : vector<8x32x32xf32>
    %50 = math.exp %49 : vector<8x32x32xf32>
    %cst_26 = arith.constant dense<0.000000e+00> : vector<8x32xf32>
    %51 = vector.multi_reduction <add>, %50, %cst_26 [2] : vector<8x32x32xf32> to vector<8x32xf32>
    %52 = vector.shape_cast %51 : vector<8x32xf32> to vector<8x32x1xf32>
    %53 = vector.broadcast %52 : vector<8x32x1xf32> to vector<8x32x32xf32>
    %54 = arith.divf %50, %53 : vector<8x32x32xf32>
    %cst_27 = arith.constant dense<0.000000e+00> : vector<32x32xf32>
    %55 = vector.multi_reduction <add>, %54, %cst_27 [0] : vector<8x32x32xf32> to vector<32x32xf32>
    %cst_28 = arith.constant 8.000000e+00 : f32
    %56 = vector.broadcast %cst_28 : f32 to vector<32x32xf32>
    %57 = arith.divf %55, %56 : vector<32x32xf32>
    %c0_29 = arith.constant 0 : index
    %c0_30 = arith.constant 0 : index
    %c0_31 = arith.constant 0 : index
    %c0_32 = arith.constant 0 : index
    %58 = vector.load %arg21[%c0_29, %c0_30, %c0_31, %c0_32] : memref<1x1x32x32xf32, #tpu.memory_space<vmem>>, vector<1x1x32x32xf32>
    %59 = vector.shape_cast %58 : vector<1x1x32x32xf32> to vector<32x32xf32>
    %60 = vector.shape_cast %57 : vector<32x32xf32> to vector<1x1x32x32xf32>
    tpu.vector_store %arg21[%c0_29, %c0_30, %c0_31, %c0_32], %60 {strides = array<i32>} : memref<1x1x32x32xf32, #tpu.memory_space<vmem>>, vector<1x1x32x32xf32>,
    %61 = arith.truncf %54 : vector<8x32x32xf32> to vector<8x32x32xbf16>
    "tpu.trace_start"() <{level = 10 : i32, message = "hqk,hkd->hqd"}> : () -> ()
    %cst_33 = arith.constant dense<0.000000e+00> : vector<8x32x32xf32>
    %62 = tpu.matmul %61, %44, %cst_33 {dimension_numbers = #tpu.dot_dimension_numbers<[2], [1], [1], [2], [0, 0, 0, 1, 1, 2], [0], [0]>} : vector<8x32x32xbf16>, vector<8x32x32xbf16>, vector<8x32x32xf32> -> vector<8x32x32xf32>
    "tpu.trace_stop"() : () -> ()
    %63 = tpu.transpose %62, [1, 0, 2] : vector<8x32x32xf32> -> vector<32x8x32xf32>
    %64 = vector.shape_cast %63 : vector<32x8x32xf32> to vector<32x256xf32>
    %c0_34 = arith.constant 0 : index
    %c0_35 = arith.constant 0 : index
    %c0_36 = arith.constant 0 : index
    %65 = vector.load %arg10[%c0_34, %c0_35, %c0_36] : memref<1x256x256xbf16, #tpu.memory_space<vmem>>, vector<1x256x256xbf16>
    %66 = vector.shape_cast %65 : vector<1x256x256xbf16> to vector<256x256xbf16>
    %c0_37 = arith.constant 0 : index
    %c0_38 = arith.constant 0 : index
    %c0_39 = arith.constant 0 : index
    %67 = vector.load %arg11[%c0_37, %c0_38, %c0_39] : memref<1x1x256xf32, #tpu.memory_space<vmem>>, vector<1x1x256xf32>
    %68 = vector.shape_cast %67 : vector<1x1x256xf32> to vector<1x256xf32>
    %69 = arith.truncf %64 : vector<32x256xf32> to vector<32x256xbf16>
    %cst_40 = arith.constant dense<0.000000e+00> : vector<32x256xf32>
    %70 = tpu.matmul %69, %66, %cst_40 {dimension_numbers = #tpu.dot_dimension_numbers<[1], [0], [0], [1], [0, 0, 1, 1], [], []>} : vector<32x256xbf16>, vector<256x256xbf16>, vector<32x256xf32> -> vector<32x256xf32>
    %71 = vector.broadcast %68 : vector<1x256xf32> to vector<32x256xf32>
    %72 = arith.addf %70, %71 : vector<32x256xf32>
    %73 = arith.addf %3, %72 : vector<32x256xf32>
    %c0_41 = arith.constant 0 : index
    %c0_42 = arith.constant 0 : index
    %c0_43 = arith.constant 0 : index
    %74 = vector.load %arg12[%c0_41, %c0_42, %c0_43] : memref<1x1x256xf32, #tpu.memory_space<vmem>>, vector<1x1x256xf32>
    %75 = vector.shape_cast %74 : vector<1x1x256xf32> to vector<1x256xf32>
    %c0_44 = arith.constant 0 : index
    %c0_45 = arith.constant 0 : index
    %c0_46 = arith.constant 0 : index
    %76 = vector.load %arg13[%c0_44, %c0_45, %c0_46] : memref<1x1x256xf32, #tpu.memory_space<vmem>>, vector<1x1x256xf32>
    %77 = vector.shape_cast %76 : vector<1x1x256xf32> to vector<1x256xf32>
    %cst_47 = arith.constant dense<0.000000e+00> : vector<32xf32>
    %78 = vector.multi_reduction <add>, %73, %cst_47 [1] : vector<32x256xf32> to vector<32xf32>
    %79 = vector.shape_cast %78 : vector<32xf32> to vector<32x1xf32>
    %cst_48 = arith.constant 2.560000e+02 : f32
    %80 = vector.broadcast %cst_48 : f32 to vector<32x1xf32>
    %81 = arith.divf %79, %80 : vector<32x1xf32>
    %82 = vector.broadcast %81 : vector<32x1xf32> to vector<32x256xf32>
    %83 = arith.subf %73, %82 : vector<32x256xf32>
    %84 = arith.mulf %83, %83 : vector<32x256xf32>
    %cst_49 = arith.constant dense<0.000000e+00> : vector<32xf32>
    %85 = vector.multi_reduction <add>, %84, %cst_49 [1] : vector<32x256xf32> to vector<32xf32>
    %86 = vector.shape_cast %85 : vector<32xf32> to vector<32x1xf32>
    %cst_50 = arith.constant 2.560000e+02 : f32
    %87 = vector.broadcast %cst_50 : f32 to vector<32x1xf32>
    %88 = arith.divf %86, %87 : vector<32x1xf32>
    %89 = vector.broadcast %81 : vector<32x1xf32> to vector<32x256xf32>
    %90 = arith.subf %73, %89 : vector<32x256xf32>
    %cst_51 = arith.constant 9.99999974E-6 : f32
    %91 = vector.broadcast %cst_51 : f32 to vector<32x1xf32>
    %92 = arith.addf %88, %91 : vector<32x1xf32>
    %93 = math.rsqrt %92 : vector<32x1xf32>
    %94 = vector.broadcast %93 : vector<32x1xf32> to vector<32x256xf32>
    %95 = arith.mulf %90, %94 : vector<32x256xf32>
    %96 = vector.broadcast %75 : vector<1x256xf32> to vector<32x256xf32>
    %97 = arith.mulf %95, %96 : vector<32x256xf32>
    %98 = vector.broadcast %77 : vector<1x256xf32> to vector<32x256xf32>
    %99 = arith.addf %97, %98 : vector<32x256xf32>
    %c0_52 = arith.constant 0 : index
    %c0_53 = arith.constant 0 : index
    %c0_54 = arith.constant 0 : index
    %100 = vector.load %arg14[%c0_52, %c0_53, %c0_54] : memref<1x256x512xbf16, #tpu.memory_space<vmem>>, vector<1x256x512xbf16>
    %101 = vector.shape_cast %100 : vector<1x256x512xbf16> to vector<256x512xbf16>
    %c0_55 = arith.constant 0 : index
    %c0_56 = arith.constant 0 : index
    %c0_57 = arith.constant 0 : index
    %102 = vector.load %arg15[%c0_55, %c0_56, %c0_57] : memref<1x1x512xf32, #tpu.memory_space<vmem>>, vector<1x1x512xf32>
    %103 = vector.shape_cast %102 : vector<1x1x512xf32> to vector<1x512xf32>
    %104 = arith.truncf %99 : vector<32x256xf32> to vector<32x256xbf16>
    %cst_58 = arith.constant dense<0.000000e+00> : vector<32x512xf32>
    %105 = tpu.matmul %104, %101, %cst_58 {dimension_numbers = #tpu.dot_dimension_numbers<[1], [0], [0], [1], [0, 0, 1, 1], [], []>} : vector<32x256xbf16>, vector<256x512xbf16>, vector<32x512xf32> -> vector<32x512xf32>
    %106 = vector.broadcast %103 : vector<1x512xf32> to vector<32x512xf32>
    %107 = arith.addf %105, %106 : vector<32x512xf32>
    %cst_59 = arith.constant 0.000000e+00 : f32
    %108 = vector.broadcast %cst_59 : f32 to vector<32x512xf32>
    %109 = arith.maximumf %107, %108 : vector<32x512xf32>
    %c0_60 = arith.constant 0 : index
    %c0_61 = arith.constant 0 : index
    %c0_62 = arith.constant 0 : index
    %110 = vector.load %arg16[%c0_60, %c0_61, %c0_62] : memref<1x512x256xbf16, #tpu.memory_space<vmem>>, vector<1x512x256xbf16>
    %111 = vector.shape_cast %110 : vector<1x512x256xbf16> to vector<512x256xbf16>
    %c0_63 = arith.constant 0 : index
    %c0_64 = arith.constant 0 : index
    %c0_65 = arith.constant 0 : index
    %112 = vector.load %arg17[%c0_63, %c0_64, %c0_65] : memref<1x1x256xf32, #tpu.memory_space<vmem>>, vector<1x1x256xf32>
    %113 = vector.shape_cast %112 : vector<1x1x256xf32> to vector<1x256xf32>
    %114 = arith.truncf %109 : vector<32x512xf32> to vector<32x512xbf16>
    %cst_66 = arith.constant dense<0.000000e+00> : vector<32x256xf32>
    %115 = tpu.matmul %114, %111, %cst_66 {dimension_numbers = #tpu.dot_dimension_numbers<[1], [0], [0], [1], [0, 0, 1, 1], [], []>} : vector<32x512xbf16>, vector<512x256xbf16>, vector<32x256xf32> -> vector<32x256xf32>
    %116 = vector.broadcast %113 : vector<1x256xf32> to vector<32x256xf32>
    %117 = arith.addf %115, %116 : vector<32x256xf32>
    %118 = arith.addf %99, %117 : vector<32x256xf32>
    %c0_67 = arith.constant 0 : index
    %c0_68 = arith.constant 0 : index
    %c0_69 = arith.constant 0 : index
    %119 = vector.load %arg18[%c0_67, %c0_68, %c0_69] : memref<1x1x256xf32, #tpu.memory_space<vmem>>, vector<1x1x256xf32>
    %120 = vector.shape_cast %119 : vector<1x1x256xf32> to vector<1x256xf32>
    %c0_70 = arith.constant 0 : index
    %c0_71 = arith.constant 0 : index
    %c0_72 = arith.constant 0 : index
    %121 = vector.load %arg19[%c0_70, %c0_71, %c0_72] : memref<1x1x256xf32, #tpu.memory_space<vmem>>, vector<1x1x256xf32>
    %122 = vector.shape_cast %121 : vector<1x1x256xf32> to vector<1x256xf32>
    %cst_73 = arith.constant dense<0.000000e+00> : vector<32xf32>
    %123 = vector.multi_reduction <add>, %118, %cst_73 [1] : vector<32x256xf32> to vector<32xf32>
    %124 = vector.shape_cast %123 : vector<32xf32> to vector<32x1xf32>
    %cst_74 = arith.constant 2.560000e+02 : f32
    %125 = vector.broadcast %cst_74 : f32 to vector<32x1xf32>
    %126 = arith.divf %124, %125 : vector<32x1xf32>
    %127 = vector.broadcast %126 : vector<32x1xf32> to vector<32x256xf32>
    %128 = arith.subf %118, %127 : vector<32x256xf32>
    %129 = arith.mulf %128, %128 : vector<32x256xf32>
    %cst_75 = arith.constant dense<0.000000e+00> : vector<32xf32>
    %130 = vector.multi_reduction <add>, %129, %cst_75 [1] : vector<32x256xf32> to vector<32xf32>
    %131 = vector.shape_cast %130 : vector<32xf32> to vector<32x1xf32>
    %cst_76 = arith.constant 2.560000e+02 : f32
    %132 = vector.broadcast %cst_76 : f32 to vector<32x1xf32>
    %133 = arith.divf %131, %132 : vector<32x1xf32>
    %134 = vector.broadcast %126 : vector<32x1xf32> to vector<32x256xf32>
    %135 = arith.subf %118, %134 : vector<32x256xf32>
    %cst_77 = arith.constant 9.99999974E-6 : f32
    %136 = vector.broadcast %cst_77 : f32 to vector<32x1xf32>
    %137 = arith.addf %133, %136 : vector<32x1xf32>
    %138 = math.rsqrt %137 : vector<32x1xf32>
    %139 = vector.broadcast %138 : vector<32x1xf32> to vector<32x256xf32>
    %140 = arith.mulf %135, %139 : vector<32x256xf32>
    %141 = vector.broadcast %120 : vector<1x256xf32> to vector<32x256xf32>
    %142 = arith.mulf %140, %141 : vector<32x256xf32>
    %143 = vector.broadcast %122 : vector<1x256xf32> to vector<32x256xf32>
    %144 = arith.addf %142, %143 : vector<32x256xf32>
    %c0_78 = arith.constant 0 : index
    %c0_79 = arith.constant 0 : index
    %145 = vector.load %arg22[%c0_78, %c0_79] : memref<32x256xf32, #tpu.memory_space<vmem>>, vector<32x256xf32>
    tpu.vector_store %arg22[%c0_78, %c0_79], %144 {strides = array<i32>} : memref<32x256xf32, #tpu.memory_space<vmem>>, vector<32x256xf32>,
    %c1_i32 = arith.constant 1 : i32
    %146 = arith.cmpi eq, %arg1, %c1_i32 : i32
    %147 = arith.extui %146 : i1 to i32
    %c0_i32_80 = arith.constant 0 : i32
    %148 = arith.cmpi ne, %147, %c0_i32_80 : i32
    scf.if %148 {
      %c0_81 = arith.constant 0 : index
      %c0_82 = arith.constant 0 : index
      %c0_83 = arith.constant 0 : index
      %149 = vector.load %arg20[%c0_81, %c0_82, %c0_83] : memref<1x32x256xf32, #tpu.memory_space<vmem>>, vector<1x32x256xf32>
      %150 = vector.shape_cast %149 : vector<1x32x256xf32> to vector<32x256xf32>
      %151 = vector.shape_cast %144 : vector<32x256xf32> to vector<1x32x256xf32>
      tpu.vector_store %arg20[%c0_81, %c0_82, %c0_83], %151 {strides = array<i32>} : memref<1x32x256xf32, #tpu.memory_space<vmem>>, vector<1x32x256xf32>,
    } else {
    }
    return
  }
  func.func @transform_0(%arg0: i32, %arg1: i32) -> (i32, i32, i32) {
    %c0_i32 = arith.constant 0 : i32
    %c0_i32_0 = arith.constant 0 : i32
    %c0_i32_1 = arith.constant 0 : i32
    return %arg0, %c0_i32, %c0_i32_0 : i32, i32, i32
  }
  func.func @transform_1(%arg0: i32, %arg1: i32) -> (i32, i32, i32) {
    %c0_i32 = arith.constant 0 : i32
    %c0_i32_0 = arith.constant 0 : i32
    %c0_i32_1 = arith.constant 0 : i32
    return %arg0, %c0_i32, %c0_i32_0 : i32, i32, i32
  }
  func.func @transform_2(%arg0: i32, %arg1: i32) -> (i32, i32) {
    %c0_i32 = arith.constant 0 : i32
    %c0_i32_0 = arith.constant 0 : i32
    %c0_i32_1 = arith.constant 0 : i32
    return %c0_i32, %c0_i32_0 : i32, i32
  }
  func.func @transform_3(%arg0: i32, %arg1: i32) -> (i32, i32) {
    %c0_i32 = arith.constant 0 : i32
    %c0_i32_0 = arith.constant 0 : i32
    %c0_i32_1 = arith.constant 0 : i32
    return %c0_i32, %c0_i32_0 : i32, i32
  }
  func.func @transform_4(%arg0: i32, %arg1: i32) -> (i32, i32, i32) {
    %c0_i32 = arith.constant 0 : i32
    %c0_i32_0 = arith.constant 0 : i32
    %c0_i32_1 = arith.constant 0 : i32
    return %arg1, %c0_i32, %c0_i32_0 : i32, i32, i32
  }
  func.func @transform_5(%arg0: i32, %arg1: i32) -> (i32, i32, i32) {
    %c0_i32 = arith.constant 0 : i32
    %c0_i32_0 = arith.constant 0 : i32
    %c0_i32_1 = arith.constant 0 : i32
    return %arg1, %c0_i32, %c0_i32_0 : i32, i32, i32
  }
  func.func @transform_6(%arg0: i32, %arg1: i32) -> (i32, i32, i32) {
    %c0_i32 = arith.constant 0 : i32
    %c0_i32_0 = arith.constant 0 : i32
    %c0_i32_1 = arith.constant 0 : i32
    return %arg1, %c0_i32, %c0_i32_0 : i32, i32, i32
  }
  func.func @transform_7(%arg0: i32, %arg1: i32) -> (i32, i32, i32) {
    %c0_i32 = arith.constant 0 : i32
    %c0_i32_0 = arith.constant 0 : i32
    %c0_i32_1 = arith.constant 0 : i32
    return %arg1, %c0_i32, %c0_i32_0 : i32, i32, i32
  }
  func.func @transform_8(%arg0: i32, %arg1: i32) -> (i32, i32, i32) {
    %c0_i32 = arith.constant 0 : i32
    %c0_i32_0 = arith.constant 0 : i32
    %c0_i32_1 = arith.constant 0 : i32
    return %arg1, %c0_i32, %c0_i32_0 : i32, i32, i32
  }
  func.func @transform_9(%arg0: i32, %arg1: i32) -> (i32, i32, i32) {
    %c0_i32 = arith.constant 0 : i32
    %c0_i32_0 = arith.constant 0 : i32
    %c0_i32_1 = arith.constant 0 : i32
    return %arg1, %c0_i32, %c0_i32_0 : i32, i32, i32
  }
  func.func @transform_10(%arg0: i32, %arg1: i32) -> (i32, i32, i32) {
    %c0_i32 = arith.constant 0 : i32
    %c0_i32_0 = arith.constant 0 : i32
    %c0_i32_1 = arith.constant 0 : i32
    return %arg1, %c0_i32, %c0_i32_0 : i32, i32, i32
  }
  func.func @transform_11(%arg0: i32, %arg1: i32) -> (i32, i32, i32) {
    %c0_i32 = arith.constant 0 : i32
    %c0_i32_0 = arith.constant 0 : i32
    %c0_i32_1 = arith.constant 0 : i32
    return %arg1, %c0_i32, %c0_i32_0 : i32, i32, i32
  }
  func.func @transform_12(%arg0: i32, %arg1: i32) -> (i32, i32, i32) {
    %c0_i32 = arith.constant 0 : i32
    %c0_i32_0 = arith.constant 0 : i32
    %c0_i32_1 = arith.constant 0 : i32
    return %arg1, %c0_i32, %c0_i32_0 : i32, i32, i32
  }
  func.func @transform_13(%arg0: i32, %arg1: i32) -> (i32, i32, i32) {
    %c0_i32 = arith.constant 0 : i32
    %c0_i32_0 = arith.constant 0 : i32
    %c0_i32_1 = arith.constant 0 : i32
    return %arg1, %c0_i32, %c0_i32_0 : i32, i32, i32
  }
  func.func @transform_14(%arg0: i32, %arg1: i32) -> (i32, i32, i32) {
    %c0_i32 = arith.constant 0 : i32
    %c0_i32_0 = arith.constant 0 : i32
    %c0_i32_1 = arith.constant 0 : i32
    return %arg1, %c0_i32, %c0_i32_0 : i32, i32, i32
  }
  func.func @transform_15(%arg0: i32, %arg1: i32) -> (i32, i32, i32) {
    %c0_i32 = arith.constant 0 : i32
    %c0_i32_0 = arith.constant 0 : i32
    %c0_i32_1 = arith.constant 0 : i32
    return %arg1, %c0_i32, %c0_i32_0 : i32, i32, i32
  }
  func.func @transform_16(%arg0: i32, %arg1: i32) -> (i32, i32, i32) {
    %c0_i32 = arith.constant 0 : i32
    %c0_i32_0 = arith.constant 0 : i32
    %c0_i32_1 = arith.constant 0 : i32
    return %arg1, %c0_i32, %c0_i32_0 : i32, i32, i32
  }
  func.func @transform_17(%arg0: i32, %arg1: i32) -> (i32, i32, i32) {
    %c0_i32 = arith.constant 0 : i32
    %c0_i32_0 = arith.constant 0 : i32
    %c0_i32_1 = arith.constant 0 : i32
    return %arg1, %c0_i32, %c0_i32_0 : i32, i32, i32
  }
  func.func @transform_18(%arg0: i32, %arg1: i32) -> (i32, i32, i32) {
    %c0_i32 = arith.constant 0 : i32
    %c0_i32_0 = arith.constant 0 : i32
    %c0_i32_1 = arith.constant 0 : i32
    return %arg0, %c0_i32, %c0_i32_0 : i32, i32, i32
  }
  func.func @transform_19(%arg0: i32, %arg1: i32) -> (i32, i32, i32, i32) {
    %c0_i32 = arith.constant 0 : i32
    %c0_i32_0 = arith.constant 0 : i32
    %c0_i32_1 = arith.constant 0 : i32
    return %arg1, %arg0, %c0_i32, %c0_i32_0 : i32, i32, i32, i32
  }
}

</mosaic_0001>

<bundles_post_ra>
// kernel: transformer_encoder_forward.1
= control target key start
LH: loop header
LB: loop body
LE: loop exit
PB: predicated region body
PF: predicated region fallthrough
CT: control target
= control target key end

     0   :  { %s16167_s0 = inlined_call_operand.vmem [shape: f32[2,32,256], index: 0, kind: input, shape index: {}]   ;;  %s16168_s1 = inlined_call_operand.vmem [shape: f32[2,32,256], index: 1, kind: input, shape index: {}]   ;;  %s16169_s2 = inlined_call_operand.hbm [shape: bf16[256,256], index: 2, kind: input, shape index: {}]   ;;  %s16170_s3 = inlined_call_operand.hbm [shape: f32[1,256], index: 3, kind: input, shape index: {}]   ;;  %s16171_s4 = inlined_call_operand.hbm [shape: bf16[2,256,512], index: 4, kind: input, shape index: {}]   ;;  %s16172_s5 = inlined_call_operand.vmem [shape: f32[2,1,512], index: 5, kind: input, shape index: {}]   ;;  %s16173_s6 = inlined_call_operand.hbm [shape: bf16[2,256,512], index: 6, kind: input, shape index: {}]   ;;  %s16174_s7 = inlined_call_operand.vmem [shape: f32[2,1,512], index: 7, kind: input, shape index: {}]   ;;  %s16175_s8 = inlined_call_operand.vmem [shape: bf16[2,256,256], index: 8, kind: input, shape index: {}]   ;;  %s16176_s9 = inlined_call_operand.vmem [shape: f32[2,1,256], index: 9, kind: input, shape index: {}]   ;;  %s16177_s10 = inlined_call_operand.hbm [shape: f32[2,1,256], index: 10, kind: input, shape index: {}]   ;;  %s16178_s11 = inlined_call_operand.hbm [shape: f32[2,1,256], index: 11, kind: input, shape index: {}]   ;;  %s16179_s12 = inlined_call_operand.hbm [shape: bf16[2,256,512], index: 12, kind: input, shape index: {}]   ;;  %s16180_s13 = inlined_call_operand.vmem [shape: f32[2,1,512], index: 13, kind: input, shape index: {}]   ;;  %s16181_s14 = inlined_call_operand.hbm [shape: bf16[2,512,256], index: 14, kind: input, shape index: {}]   ;;  %s16182_s15 = inlined_call_operand.hbm [shape: f32[2,1,256], index: 15, kind: input, shape index: {}]   ;;  %s16183_s16 = inlined_call_operand.hbm [shape: f32[2,1,256], index: 16, kind: input, shape index: {}]   ;;  %s16184_s17 = inlined_call_operand.hbm [shape: f32[2,1,256], index: 17, kind: input, shape index: {}]   ;;  %s16185_s18 = inlined_call_operand.vmem [shape: f32[2,32,256], index: 18, kind: output, shape index: {0}]   ;;  %s16186_s19 = inlined_call_operand.hbm [shape: f32[2,2,32,32], index: 19, kind: output, shape index: {1}]  }
   0x1   :  { %16286 = sst [smem:[#allocation81_spill]] %s16167_s0 }
   0x2   :  { %16287 = sst [smem:[#allocation82_spill]] %s16168_s1 }
   0x3   :  { %16288 = sst [smem:[#allocation83_spill]] %s16169_s2 }
   0x4   :  { %16289 = sst [smem:[#allocation84_spill]] %s16170_s3 }
   0x5   :  { %16290 = sst [smem:[#allocation85_spill]] %s16171_s4 }
   0x6   :  { %16291 = sst [smem:[#allocation86_spill]] %s16172_s5 }
   0x7   :  { %16292 = sst [smem:[#allocation87_spill]] %s16173_s6 }
   0x8   :  { %16293 = sst [smem:[#allocation88_spill]] %s16174_s7 }
   0x9   :  { %16294 = sst [smem:[#allocation89_spill]] %s16175_s8 }
   0xa   :  { %16295 = sst [smem:[#allocation90_spill]] %s16176_s9 }
   0xb   :  { %16296 = sst [smem:[#allocation91_spill]] %s16177_s10 }
   0xc   :  { %16297 = sst [smem:[#allocation92_spill]] %s16178_s11 }
   0xd   :  { %16298 = sst [smem:[#allocation93_spill]] %s16179_s12 }
   0xe   :  { %16299 = sst [smem:[#allocation94_spill]] %s16180_s13 }
   0xf   :  { %16300 = sst [smem:[#allocation95_spill]] %s16181_s14 }
  0x10   :  { %16301 = sst [smem:[#allocation96_spill]] %s16182_s15 }
  0x11   :  { %16302 = sst [smem:[#allocation97_spill]] %s16183_s16 }
  0x12   :  { %16303 = sst [smem:[#allocation98_spill]] %s16184_s17 }
  0x13   :  { %16304 = sst [smem:[#allocation99_spill]] %s16185_s18 }
  0x14   :  { %16305 = sst [smem:[#allocation100_spill]] %s16186_s19 }
  0x15   :  { %25 = vsyncpa [#allocation4], 0 }
  0x16   :  { %26 = vsyncpa [#allocation7], 0 }
  0x17   :  { %27 = vsyncpa [#allocation5], 0 }
  0x18   :  { %29 = vsyncpa [#allocation5 + $0x1], 0  ;;  %s12714_s0 = smov 0   ;;  %s12716_s30 = smov 0  }
  0x19   :  { %s12718_s20 = smov 0   ;;  %s12720_s21 = smov 0  }
  0x1a   :  { %s12722_s1 = smov 0   ;;  %s12724_s22 = smov 0  }
  0x1b   :  { %s12726_s2 = smov 0   ;;  %s12728_s23 = smov 0  }
  0x1c   :  { %s12730_s24 = smov 0   ;;  %s12732_s25 = smov 0  }
  0x1d   :  { %s12734_s3 = smov 0  }
  0x1e LB: > { %16306 = sst [smem:[#allocation22_spill]] %s12549_s0  ;;  %s12768_s26 = sadd.s32 4294967295, %s12589_s3   ;;  %s12589_s3 = sphi %s12734_s3, %s35_s3   ;;  %s12585_s25 = sphi %s12732_s25, %s16538_s25   ;;  %s12581_s24 = sphi %s12730_s24, %s16537_s24   ;;  %s12577_s23 = sphi %s12728_s23, %s16536_s23   ;;  %s12573_s2 = sphi %s12726_s2, %s16535_s2   ;;  %s12569_s22 = sphi %s12724_s22, %s16534_s22   ;;  %s12565_s1 = sphi %s12722_s1, %s16533_s1   ;;  %s12561_s21 = sphi %s12720_s21, %s16532_s21   ;;  %s12557_s20 = sphi %s12718_s20, %s16531_s20   ;;  %s12553_s30 = sphi %s12716_s30, %s16530_s30   ;;  %s12549_s0 = sphi %s12714_s0, %s16529_s0  }
  0x1f   : > { %16307 = sst [smem:[#allocation23_spill]] %s12553_s30  ;;  %s10517_s27 = sadd.s32 4294967294, %s12589_s3  }
  0x20   : > { %16308 = sst [smem:[#allocation24_spill]] %s12557_s20  ;;  %p155_p0 = scmp.ne.s32.totalorder %s12569_s22, %s12565_s1 }
  0x21   : > { %16309 = sst [smem:[#allocation25_spill]] %s12565_s1  ;;  %p156_p1 = scmp.eq.s32.totalorder %s12589_s3, 0 }
  0x22   : > { %16310 = sst [smem:[#allocation26_spill]] %s12569_s22  ;;  %p161_p2 = scmp.ne.s32.totalorder %s12565_s1, %s12561_s21 }
  0x23   : > { %16311 = sst [smem:[#allocation27_spill]] %s12573_s2  ;;  %p16190_p3 = scmp.eq.s32.totalorder %s12768_s26, 0 }
  0x24   : > { %16312 = sst [smem:[#allocation28_spill]] %s12577_s23  ;;  %p12778_p4 = por %p156_p1, %p155_p0 }
  0x25   : > { %16313 = sst [smem:[#allocation29_spill]] %s12581_s24  ;;  %p550_p5 = scmp.ne.s32.totalorder %s12557_s20, %s12553_s30 }
  0x26   : > { %16314 = sst [smem:[#allocation30_spill]] %s12585_s25  ;;  %p12786_p6 = por %p16190_p3, %p161_p2 }
  0x27   : > { %16315 = sst [smem:[#allocation31_spill]] %s12589_s3  ;;  %p551_p7 = scmp.eq.s32.totalorder %s12768_s26, 3 }
  0x28   : > { %16316 = sst [smem:[#allocation32_spill]] %s12768_s26  ;;  %p556_p8 = scmp.ne.s32.totalorder %s12553_s30, %s12549_s0 }
  0x29   : > { %s16318_s18 = scalar_select %p12786_p6, 1, 0 }
  0x2a   : > { %p557_p9 = scmp.eq.s32.totalorder %s10517_s27, 3  ;;  %p12793_p10 = por %p551_p7, %p550_p5 }
  0x2b   : > { %16319 = sst [smem:[#allocation33_spill]] %s16318_s18  ;;  %p10518_p11 = scmp.ge.s32.totalorder %s12589_s3, 1 }
  0x2c   : > { %s16320_s21 = scalar_select %p12793_p10, 1, 0 }
  0x2d   : > { %p12798_p12 = por %p557_p9, %p556_p8  ;;  %p564_p13 = scmp.lt.s32.totalorder %s12589_s3, 5 }
  0x2e   : > { %16321 = sst [smem:[#allocation34_spill]] %s16320_s21  ;;  %s12591_s13 = smov [#allocation3]  }
  0x2f   : > { %s16322_s29 = scalar_select %p12798_p12, 1, 0 }
  0x30   : > { %p12803_p0 = pnand %p10518_p11, %p564_p13  ;;  %s576_s9 = sshll.u32 %s12591_s13, 4  ;;  %s577_s9 = int_to_ptr.vmem [resolvable:$true] %s576_s9 }
  0x31   : > { %16323 = sst [smem:[#allocation35_spill]] %s16322_s29  ;;  %p11352_p2 = scmp.lt.s32.totalorder %s12589_s3, 4 }
  0x32   : > { %s16324_s28 = scalar_select %p12803_p0, 1, 0 }
  0x33   : > { %p11311_p1 = pneg %p12803_p0  ;;  %p12818_p7 = pnand %p11352_p2, %p12778_p4 }
  0x34   : > { %16325 = sst [smem:[#allocation36_spill]] %s16324_s28  ;;  %s12168_s0 = scalar_lea.vmem %s577_s9, 4096 }
  0x35   : > { %p12812_p5 = pnand %p11311_p1, %p16190_p3  ;;  %p12169_p9 = scmp.ne.s32.totalorder %s577_s9, %s12168_s0 }
  0x36   : > { %p12176_p12 = scmp.lt.s32.totalorder %s577_s9, %s577_s9  ;;  %p12177_p1 = scmp.lt.s32.totalorder %s12168_s0, %s12168_s0 }
  0x37   : > { %s16326_s27 = scalar_select %p12812_p5, 1, 0 }
  0x38   : > { %p12159_p8 = pneg %p12812_p5  ;;  %p12178_p3 = por %p12177_p1, %p12176_p12 }
  0x39   : > { %16327 = sst [smem:[#allocation37_spill]] %s16326_s27 }
  0x3a   : > { %p12171_p11 = pnand %p12169_p9, %p12159_p8 }
  0x3c   : > { %p12172_p13 = pneg %p12171_p11 }
  0x3e   : > { %p12179_p10 = pnand %p12178_p3, %p12172_p13 }
  0x40   : > { %12182 = shalt.err (!%p12179_p10)
}
  0x41   : > { %s16200_s13 = smov 128   ;;  %s16201_s19 = smov 8  }
  0x42   : > { %s16329_s8 = sld [smem:[#allocation83_spill]]  ;;  %s44_s7 = sadd.s32 1, %s12581_s24 }
  0x43   : > { %s47_s5 = sadd.s32 1, %s12585_s25  ;;  %p45_p3 = scmp.ge.s32.totalorder %s44_s7, 2 }
  0x44   : > { %s617_s2 = sand.u32 1, %s12589_s3   ;;  %s16205_s23 = sand.u32 1, %s12569_s22  }
  0x45   : > { %s16540_s7 = smov (%p45_p3, %s44_s7), 0  ;;  %s16542_s5 = smov (!%p45_p3, %s47_s5), %s12585_s25 }
  0x46   : > { %16330 = sst [smem:[#allocation38_spill]] %s16540_s7  ;;  %s145_s30 = ssub.s32 %s12581_s24, %s16540_s7 }
  0x47   : > { %s12846_s18 = sshll.u32 %s16205_s23, 9  ;;  %p49_p4 = scmp.ge.s32.totalorder %s16542_s5, 2 }
  0x48   : > { %11314 = dma.hbm_to_vmem [thread:$0]  (!%p12812_p5), %s16329_s8, 4096, %s577_s9, [#allocation4], %s16200_s13, %s16200_s13, %s16201_s19  }
  0x49   : > { %p146_p10 = scmp.eq.s32.totalorder %s145_s30, 0  ;;  %s12849_s8 = sshll.u32 %s12581_s24, 13 }
  0x4a   : > { %s16544_s5 = smov (%p49_p4, %s16542_s5), 0  ;;  %s16332_s9 = sadd.s32 1, %s12569_s22 }
  0x4b   : > { %16331 = sst [smem:[#allocation39_spill]] %s16544_s5  ;;  %s536_s0 = ssub.s32 %s12585_s25, %s16544_s5 }
  0x4c   : > { %s12856_s21 = scalar_select %p146_p10, %s12569_s22, %s16332_s9  }
  0x4d   : > { %s16334_s4 = sld [smem:[#allocation85_spill]]  ;;  %s537_s3 = sor.u32 %s536_s0, %s145_s30 }
  0x4e   : > { %16333 = sst [smem:[#allocation40_spill]] %s12856_s21  ;;  %s621_s23 = scalar_lea.vmem [#allocation8], %s12846_s18 }
  0x4f   : > { %s628_s1 = sshll.u32 %s621_s23, 4  ;;  %p538_p12 = scmp.eq.s32.totalorder %s537_s3, 0  ;;  %s629_s1 = int_to_ptr.vmem [resolvable:$true] %s628_s1 }
  0x50   : > { %s16335_s26 = sadd.s32 1, %s12557_s20  ;;  %s12870_s17 = scalar_lea.sflag [#allocation4], %s617_s2 }
  0x51   : > { %s12868_s28 = scalar_select %p538_p12, %s12557_s20, %s16335_s26  }
  0x52   : > { %p12874_p2 = pneg %p12818_p7  ;;  %s12196_s9 = scalar_lea.vmem %s629_s1, 8192 }
  0x53   : > { %s627_s7 = scalar_lea.hbm %s16334_s4, %s12849_s8  ;;  %16336 = sst [smem:[#allocation41_spill]] %s12868_s28 }
  0x54   : > { %p12197_p9 = scmp.ne.s32.totalorder %s629_s1, %s12196_s9  ;;  %s12594_s30 = smov [#allocation8]  }
  0x55   : > { %s12201_s23 = sshll.u32 %s12594_s30, 4  ;;  %s12202_s23 = int_to_ptr.vmem [resolvable:$false] %s12201_s23 }
  0x56   : > { %p12199_p11 = pnand %p12197_p9, %p12874_p2  ;;  %s12203_s3 = scalar_lea.vmem %s12202_s23, 16384 }
  0x57   : > { %p12204_p1 = scmp.lt.s32.totalorder %s629_s1, %s12202_s23  ;;  %p12205_p3 = scmp.lt.s32.totalorder %s12203_s3, %s12196_s9 }
  0x58   : > { %p12200_p13 = pneg %p12199_p11 }
  0x59   : > { %p12206_p4 = por %p12205_p3, %p12204_p1 }
  0x5b   : > { %p12207_p10 = pnand %p12206_p4, %p12200_p13 }
  0x5d   : > { %12210 = shalt.err (!%p12207_p10)
}
  0x5e   : > { %s16214_s2 = smov 256   ;;  %s16215_s26 = smov 16  }
  0x5f   : > { %11321 = dma.hbm_to_vmem [thread:$0]  (!%p12818_p7), %s627_s7, 8192, %s629_s1, %s12870_s17, %s16214_s2, %s16214_s2, %s16215_s26  }
  0x60   : > { %s16338_s6 = sld [smem:[#allocation87_spill]]  ;;  %s649_s9 = scalar_lea.vmem [#allocation9], %s12846_s18 }
  0x61   : > { %s656_s30 = sshll.u32 %s649_s9, 4  ;;  %s16339_s23 = sand.u32 1, %s12569_s22   ;;  %s657_s30 = int_to_ptr.vmem [resolvable:$true] %s656_s30 }
  0x62   : > { %s12893_s3 = sshll.u32 %s16339_s23, 1  ;;  %s12224_s4 = scalar_lea.vmem %s657_s30, 8192 }
  0x63   : > { %p12225_p12 = scmp.ne.s32.totalorder %s657_s30, %s12224_s4  ;;  %s12597_s5 = smov [#allocation9]  }
  0x64   : > { %s12229_s25 = sshll.u32 %s12597_s5, 4  ;;  %s12230_s25 = int_to_ptr.vmem [resolvable:$false] %s12229_s25 }
  0x65   : > { %p12227_p9 = pnand %p12225_p12, %p12874_p2  ;;  %s12231_s21 = scalar_lea.vmem %s12230_s25, 16384 }
  0x66   : > { %s655_s0 = scalar_lea.hbm %s16338_s6, %s12849_s8  ;;  %p12232_p13 = scmp.lt.s32.totalorder %s657_s30, %s12230_s25 }
  0x67   : > { %p12228_p11 = pneg %p12227_p9  ;;  %p12233_p1 = scmp.lt.s32.totalorder %s12231_s21, %s12224_s4 }
  0x69   : > { %p12234_p3 = por %p12233_p1, %p12232_p13 }
  0x6b   : > { %p12235_p4 = pnand %p12234_p3, %p12228_p11 }
  0x6d   : > { %12238 = shalt.err (!%p12235_p4)
}
  0x6e   : > { %11324 = dma.hbm_to_vmem [thread:$0]  (!%p12818_p7), %s655_s0, 8192, %s657_s30, %s12870_s17, %s16214_s2, %s16214_s2, %s16215_s26  }
  0x6f   : > { %s12904_s7 = sshll.u32 %s12581_s24, 5  ;;  %s692_s5 = scalar_lea.vmem [#allocation10], %s12893_s3 }
  0x70   : > { %s700_s1 = sshll.u32 %s692_s5, 4  ;;  %s16340_s10 = sld [smem:[#allocation91_spill]]  ;;  %s701_s1 = int_to_ptr.vmem [resolvable:$true] %s700_s1 }
  0x71   : > { %s12252_s13 = scalar_lea.vmem %s701_s1, 32  ;;  %s12598_s19 = smov [#allocation10]  }
  0x72   : > { %p12253_p10 = scmp.ne.s32.totalorder %s701_s1, %s12252_s13  ;;  %s12257_s9 = sshll.u32 %s12598_s19, 4  ;;  %s12258_s9 = int_to_ptr.vmem [resolvable:$false] %s12257_s9 }
  0x73   : > { %s12259_s23 = scalar_lea.vmem %s12258_s9, 64  ;;  %p12260_p11 = scmp.lt.s32.totalorder %s701_s1, %s12258_s9 }
  0x74   : > { %p12255_p12 = pnand %p12253_p10, %p12874_p2  ;;  %p12261_p13 = scmp.lt.s32.totalorder %s12259_s23, %s12252_s13 }
  0x76   : > { %s698_s21 = scalar_lea.hbm %s16340_s10, %s12904_s7  ;;  %p12256_p9 = pneg %p12255_p12 }
  0x77   : > { %p12262_p1 = por %p12261_p13, %p12260_p11 }
  0x79   : > { %p12263_p3 = pnand %p12262_p1, %p12256_p9 }
  0x7b   : > { %12266 = shalt.err (!%p12263_p3)
}
  0x7c   : > { %11327 = dma.hbm_to_vmem [thread:$0]  (!%p12818_p7), %s698_s21, 32, %s701_s1, %s12870_s17  }
  0x7d   : > { %s16341_s11 = sld [smem:[#allocation92_spill]]  ;;  %s711_s25 = scalar_lea.vmem [#allocation11], %s12893_s3 }
  0x7e   : > { %s719_s4 = sshll.u32 %s711_s25, 4  ;;  %s16342_s12 = sld [smem:[#allocation93_spill]]  ;;  %s720_s4 = int_to_ptr.vmem [resolvable:$true] %s719_s4 }
  0x7f   : > { %s12280_s23 = scalar_lea.vmem %s720_s4, 32  ;;  %s12599_s2 = smov [#allocation11]  }
  0x80   : > { %p12281_p4 = scmp.ne.s32.totalorder %s720_s4, %s12280_s23  ;;  %s12285_s26 = sshll.u32 %s12599_s2, 4  ;;  %s12286_s26 = int_to_ptr.vmem [resolvable:$false] %s12285_s26 }
  0x81   : > { %s12287_s1 = scalar_lea.vmem %s12286_s26, 64  ;;  %p12288_p9 = scmp.lt.s32.totalorder %s720_s4, %s12286_s26 }
  0x82   : > { %p12283_p10 = pnand %p12281_p4, %p12874_p2  ;;  %p12289_p11 = scmp.lt.s32.totalorder %s12287_s1, %s12280_s23 }
  0x83   : > { %s717_s5 = scalar_lea.hbm %s16341_s11, %s12904_s7 }
  0x84   : > { %s736_s9 = scalar_lea.hbm %s16342_s12, %s12849_s8  ;;  %p12284_p12 = pneg %p12283_p10 }
  0x85   : > { %p12290_p13 = por %p12289_p11, %p12288_p9 }
  0x87   : > { %p12291_p1 = pnand %p12290_p13, %p12284_p12 }
  0x89   : > { %12294 = shalt.err (!%p12291_p1)
}
  0x8a   : > { %11330 = dma.hbm_to_vmem [thread:$0]  (!%p12818_p7), %s717_s5, 32, %s720_s4, %s12870_s17  }
  0x8b   : > { %s730_s21 = scalar_lea.vmem [#allocation12], %s12846_s18  ;;  %s16343_s14 = sld [smem:[#allocation95_spill]] }
  0x8c   : > { %s737_s0 = sshll.u32 %s730_s21, 4  ;;  %s12600_s26 = smov [#allocation12]   ;;  %s738_s0 = int_to_ptr.vmem [resolvable:$true] %s737_s0 }
  0x8d   : > { %s12308_s19 = scalar_lea.vmem %s738_s0, 8192  ;;  %s12313_s13 = sshll.u32 %s12600_s26, 4  ;;  %s12314_s13 = int_to_ptr.vmem [resolvable:$false] %s12313_s13 }
  0x8e   : > { %p12309_p3 = scmp.ne.s32.totalorder %s738_s0, %s12308_s19  ;;  %s12315_s23 = scalar_lea.vmem %s12314_s13, 16384 }
  0x8f   : > { %p12316_p12 = scmp.lt.s32.totalorder %s738_s0, %s12314_s13  ;;  %p12317_p9 = scmp.lt.s32.totalorder %s12315_s23, %s12308_s19 }
  0x90   : > { %p12311_p4 = pnand %p12309_p3, %p12874_p2 }
  0x91   : > { %p12318_p11 = por %p12317_p9, %p12316_p12 }
  0x92   : > { %p12312_p10 = pneg %p12311_p4 }
  0x94   : > { %p12319_p13 = pnand %p12318_p11, %p12312_p10 }
  0x96   : > { %12322 = shalt.err (!%p12319_p13)
}
  0x97   : > { %s16344_s5 = smov 16   ;;  %s16345_s4 = smov 256  }
  0x98   : > { %11333 = dma.hbm_to_vmem [thread:$0]  (!%p12818_p7), %s736_s9, 8192, %s738_s0, %s12870_s17, %s16345_s4, %s16345_s4, %s16344_s5  }
  0x99   : > { %s758_s30 = scalar_lea.vmem [#allocation13], %s12846_s18  ;;  %s16346_s15 = sld [smem:[#allocation96_spill]] }
  0x9a   : > { %s765_s25 = sshll.u32 %s758_s30, 4  ;;  %s12601_s2 = smov [#allocation13]   ;;  %s766_s25 = int_to_ptr.vmem [resolvable:$true] %s765_s25 }
  0x9b   : > { %s12336_s23 = scalar_lea.vmem %s766_s25, 8192  ;;  %s12341_s1 = sshll.u32 %s12601_s2, 4  ;;  %s12342_s1 = int_to_ptr.vmem [resolvable:$false] %s12341_s1 }
  0x9c   : > { %p12337_p1 = scmp.ne.s32.totalorder %s766_s25, %s12336_s23  ;;  %s12343_s21 = scalar_lea.vmem %s12342_s1, 16384 }
  0x9d   : > { %p12344_p10 = scmp.lt.s32.totalorder %s766_s25, %s12342_s1  ;;  %p12345_p12 = scmp.lt.s32.totalorder %s12343_s21, %s12336_s23 }
  0x9e   : > { %p12339_p3 = pnand %p12337_p1, %p12874_p2 }
  0x9f   : > { %s785_s13 = scalar_lea.hbm %s16346_s15, %s12904_s7  ;;  %p12346_p9 = por %p12345_p12, %p12344_p10 }
  0xa0   : > { %p12340_p4 = pneg %p12339_p3 }
  0xa2   : > { %p12347_p11 = pnand %p12346_p9, %p12340_p4 }
  0xa4   : > { %12350 = shalt.err (!%p12347_p11)
}
  0xa5   : > { %s16347_s18 = smov 8   ;;  %s16348_s9 = smov 128  }
  0xa6   : > { %s16349_s4 = scalar_lea.hbm %s16343_s14, %s12849_s8  ;;  %s779_s2 = scalar_lea.vmem [#allocation14], %s12893_s3 }
  0xa7   : > { %11336 = dma.hbm_to_vmem [thread:$0]  (!%p12818_p7), %s16349_s4, 8192, %s766_s25, %s12870_s17, %s16348_s9, %s16348_s9, %s16347_s18  }
  0xa8   : > { %s787_s30 = sshll.u32 %s779_s2, 4  ;;  %s16350_s16 = sld [smem:[#allocation97_spill]]  ;;  %s788_s30 = int_to_ptr.vmem [resolvable:$true] %s787_s30 }
  0xa9   : > { %s12364_s1 = scalar_lea.vmem %s788_s30, 32  ;;  %s12602_s21 = smov [#allocation14]  }
  0xaa   : > { %p12365_p13 = scmp.ne.s32.totalorder %s788_s30, %s12364_s1  ;;  %s12369_s0 = sshll.u32 %s12602_s21, 4  ;;  %s12370_s0 = int_to_ptr.vmem [resolvable:$false] %s12369_s0 }
  0xab   : > { %s12371_s8 = scalar_lea.vmem %s12370_s0, 64  ;;  %p12372_p4 = scmp.lt.s32.totalorder %s788_s30, %s12370_s0 }
  0xac   : > { %p12367_p1 = pnand %p12365_p13, %p12874_p2  ;;  %p12373_p10 = scmp.lt.s32.totalorder %s12371_s8, %s12364_s1 }
  0xae   : > { %s804_s23 = scalar_lea.hbm %s16350_s16, %s12904_s7  ;;  %p12368_p3 = pneg %p12367_p1 }
  0xaf   : > { %p12374_p12 = por %p12373_p10, %p12372_p4 }
  0xb1   : > { %p12375_p9 = pnand %p12374_p12, %p12368_p3 }
  0xb3   : > { %12378 = shalt.err (!%p12375_p9)
}
  0xb4   : > { %11339 = dma.hbm_to_vmem [thread:$0]  (!%p12818_p7), %s785_s13, 32, %s788_s30, %s12870_s17  }
  0xb5   : > { %s798_s9 = scalar_lea.vmem [#allocation15], %s12893_s3  ;;  %s12603_s4 = smov [#allocation6]  }
  0xb6   : > { %s806_s5 = sshll.u32 %s798_s9, 4  ;;  %s590_s2 = sshll.u32 %s12603_s4, 4  ;;  %s807_s5 = int_to_ptr.vmem [resolvable:$true] %s806_s5  ;;  %s591_s2 = int_to_ptr.vmem [resolvable:$true] %s590_s2 }
  0xb7   : > { %s12392_s19 = scalar_lea.vmem %s807_s5, 32  ;;  %s12604_s26 = smov [#allocation15]  }
  0xb8   : > { %p12393_p11 = scmp.ne.s32.totalorder %s807_s5, %s12392_s19  ;;  %s12397_s1 = sshll.u32 %s12604_s26, 4  ;;  %s12398_s1 = int_to_ptr.vmem [resolvable:$false] %s12397_s1 }
  0xb9   : > { %s12399_s21 = scalar_lea.vmem %s12398_s1, 64  ;;  %p12400_p3 = scmp.lt.s32.totalorder %s807_s5, %s12398_s1 }
  0xba   : > { %p12395_p13 = pnand %p12393_p11, %p12874_p2  ;;  %p12401_p4 = scmp.lt.s32.totalorder %s12399_s21, %s12392_s19 }
  0xbc   : > { %p12396_p1 = pneg %p12395_p13  ;;  %p12402_p10 = por %p12401_p4, %p12400_p3 }
  0xbe   : > { %p12403_p12 = pnand %p12402_p10, %p12396_p1 }
  0xc0   : > { %12406 = shalt.err (!%p12403_p12)
}
  0xc1   : > { %11342 = dma.hbm_to_vmem [thread:$0]  (!%p12818_p7), %s804_s23, 32, %s807_s5, %s12870_s17  }
  0xc2   : > { %s12418_s8 = scalar_lea.vmem %s591_s2, 32  ;;  %p12426_p3 = scmp.lt.s32.totalorder %s591_s2, %s591_s2 }
  0xc3   : > { %p12419_p9 = scmp.ne.s32.totalorder %s591_s2, %s12418_s8  ;;  %p12427_p1 = scmp.lt.s32.totalorder %s12418_s8, %s12418_s8 }
  0xc5   : > { %p12421_p11 = pnand %p12419_p9, %p12159_p8  ;;  %p12428_p4 = por %p12427_p1, %p12426_p3 }
  0xc7   : > { %p12422_p13 = pneg %p12421_p11 }
  0xc9   : > { %p12429_p10 = pnand %p12428_p4, %p12422_p13 }
  0xcb   : > { %12432 = shalt.err (!%p12429_p10)
}
  0xcc   : > { %s16352_s9 = sld [smem:[#allocation84_spill]]  ;;  %s817_s26 = scalar_lea.vmem [#allocation16], %s12893_s3 }
  0xcd   : > { %s16353_s4 = sld [smem:[#allocation98_spill]]  ;;  %s825_s1 = sshll.u32 %s817_s26, 4  ;;  %s826_s1 = int_to_ptr.vmem [resolvable:$true] %s825_s1 }
  0xce   : > { %s12446_s21 = scalar_lea.vmem %s826_s1, 32  ;;  %s12605_s13 = smov [#allocation16]  }
  0xcf   : > { %p12447_p8 = scmp.ne.s32.totalorder %s826_s1, %s12446_s21  ;;  %s12451_s30 = sshll.u32 %s12605_s13, 4  ;;  %s12452_s30 = int_to_ptr.vmem [resolvable:$false] %s12451_s30 }
  0xd0   : > { %s12453_s0 = scalar_lea.vmem %s12452_s30, 64  ;;  %p12454_p11 = scmp.lt.s32.totalorder %s826_s1, %s12452_s30 }
  0xd1   : > { %p12449_p12 = pnand %p12447_p8, %p12874_p2  ;;  %p12455_p13 = scmp.lt.s32.totalorder %s12453_s0, %s12446_s21 }
  0xd2   : > { %11317 = dma.hbm_to_vmem [thread:$0]  (!%p12812_p5), %s16352_s9, 32, %s591_s2, [#allocation7]  }
  0xd3   : > { %s823_s19 = scalar_lea.hbm %s16353_s4, %s12904_s7  ;;  %p12450_p9 = pneg %p12449_p12 }
  0xd4   : > { %p12456_p3 = por %p12455_p13, %p12454_p11 }
  0xd6   : > { %p12457_p5 = pnand %p12456_p3, %p12450_p9 }
  0xd8   : > { %12460 = shalt.err (!%p12457_p5)
}
  0xd9   : > { %11345 = dma.hbm_to_vmem [thread:$0]  (!%p12818_p7), %s823_s19, 32, %s826_s1, %s12870_s17  }
  0xda   : > { %834 = sbr.rel (%p12803_p0) target bundleno = 3451 (0xd7b), region = 92 }
  0xdf   : > { %s16355_s7 = sld [smem:[#allocation32_spill]] }
  0xe5   : > { %p16356_p1 = scmp.eq.s32.totalorder %s16355_s7, 0 }
  0xe7   : > { %12532 = dma.done.wait (%p16356_p1), [#allocation4], 4096   ;;  %p16357_p2 = pmov %p16356_p1 }
  0xe8   : > { %p16358_p4 = pmov %p16356_p1 }
  0xe9   : > { %12534 = vsyncadd (%p16357_p2), [#allocation4], 4294963200 }
  0xea   : > { %12536 = dma.done.wait (%p16358_p4), [#allocation7], 32   ;;  %p16359_p10 = pmov %p16356_p1 }
  0xeb   : > { %s16360_s27 = sld [smem:[#allocation25_spill]]  ;;  %s844_s2 = sand.u32 1, %s16355_s7  }
  0xec   : > { %12538 = vsyncadd (%p16359_p10), [#allocation7], 4294967264  ;;  %s845_s25 = scalar_lea.sflag [#allocation4], %s844_s2 }
  0xf1   : > { %s846_s17 = sand.u32 1, %s16360_s27  }
  0xf2   : > { %s10552_s8 = sshll.u32 %s846_s17, 9 }
  0xf3   : > { %s13022_s18 = scalar_lea.vmem [#allocation8], %s10552_s8 }
  0xf4   : > { %12540 = dma.done.wait (%p12786_p6), %s845_s25, 32928  }
  0xf5   : > { %12542 = vsyncadd (%p12786_p6), %s845_s25, 4294934368  ;;  %s16362_s9 = sld [smem:[#allocation23_spill]]  ;;  %s13028_s4 = sshll.u32 %s846_s17, 1 }
  0xf6   : > { %s16363_s23 = sld [smem:[#allocation28_spill]]  ;;  %s13080_s7 = scalar_lea.vmem [#allocation12], %s10552_s8 }
  0xf7   : > { %s16364_s5 = sld [smem:[#allocation27_spill]]  ;;  %s902_s14 = scalar_lea.vmem [#allocation14], %s13028_s4 }
  0xf8   : > { %s16365_s0 = sld [smem:[#allocation81_spill]]  ;;  %s920_s15 = scalar_lea.vmem [#allocation16], %s13028_s4 }
  0xf9   : > { %s16366_s29 = sld [smem:[#allocation82_spill]] }
  0xfa   : > { %s16368_s6 = sld [smem:[#allocation88_spill]] }
  0xfb   : > { %s16216_s19 = sand.u32 1, %s16362_s9   ;;  %s16370_s16 = sld [smem:[#allocation90_spill]] }
  0xfc   : > { %s10561_s26 = sshll.u32 %s16216_s19, 5  ;;  %p1051_p0 = scmp.lt.s32.totalorder %s16363_s23, 1 }
  0xfd   : > { %p1061_p7 = scmp.lt.s32.totalorder %s16364_s5, 1  ;;  %s16371_s20 = sld [smem:[#allocation94_spill]] }
  0xfe   : > { %s16546_s23 = smov (!%p1051_p0, %s16363_s23), 1  ;;  %s16372_s13 = sld [smem:[#allocation99_spill]] }
  0xff   : > { %s1062_s1 = scalar_select %p1061_p7, %s16364_s5, 1 }
 0x100   : > { %s11071_s21 = sshll.u32 %s16546_s23, 6  ;;  %p10574_p6 = scmp.ne.s32.totalorder %s16364_s5, 0 }
 0x101   : > { %s13040_s3 = scalar_lea.vmem %s16365_s0, %s11071_s21  ;;  %s13045_s2 = scalar_lea.vmem %s16366_s29, %s11071_s21 }
 0x102   : > { %s13047_s17 = sshll.u32 %s1062_s1, 2  ;;  %s11073_s25 = sshll.u32 %s1062_s1, 8 }
 0x103   : > { %s1068_s10 = scalar_lea.vmem %s16368_s6, %s13047_s17  ;;  %s16369_s29 = sld [smem:[#allocation89_spill]] }
 0x104   : > { %s10570_s12 = sshll.u32 %s1062_s1, 1  ;;  %s1081_s9 = scalar_lea.vmem %s16371_s20, %s13047_s17 }
 0x105   : > { %s13065_s24 = scalar_lea.vmem %s16370_s16, %s10570_s12  ;;  %s13074_s30 = scalar_lea.vmem %s16372_s13, %s11071_s21 }
 0x106   : > { %s13076_s6 = scalar_lea.vmem [#allocation9], %s10552_s8  ;;  %s866_s0 = scalar_lea.vmem [#allocation10], %s13028_s4 }
 0x107   : > { %s13082_s1 = scalar_lea.vmem [#allocation13], %s10552_s8  ;;  %s911_s12 = scalar_lea.vmem [#allocation15], %s13028_s4 }
 0x108   : > { %s13087_s16 = scalar_lea.vmem [#allocation17], %s10561_s26  ;;  %1091 = sbr.rel (%p10574_p6) target bundleno = 274 (0x112), region = 140 }
 0x109   : > { %s13060_s11 = scalar_lea.vmem %s16369_s29, %s11073_s25  ;;  %s875_s25 = scalar_lea.vmem [#allocation11], %s13028_s4 }
 0x10d   : > { %v1092_v0 = vld [vmem:[%s13040_s3] sm:$0xff]  ;;  %v1093_v1 = vld [vmem:[%s13040_s3 + $0x8] sm:$0xff]  ;;  %v1094_v2 = vld [vmem:[%s13040_s3 + $0x10] sm:$0xff] }
 0x10e   : > { %1100 = vst [vmem:[#allocation2 + $0x30] sm:$0xff] %v1092_v0  ;;  %1101 = vst [vmem:[#allocation2] sm:$0xff] %v1093_v1  ;;  %v1095_v3 = vld [vmem:[%s13040_s3 + $0x18] sm:$0xff]  ;;  %v1096_v4 = vld [vmem:[%s13040_s3 + $0x20] sm:$0xff] }
 0x10f   : > { %1102 = vst [vmem:[#allocation2 + $0x18] sm:$0xff] %v1094_v2  ;;  %v1097_v5 = vld [vmem:[%s13040_s3 + $0x28] sm:$0xff]  ;;  %1103 = vst [vmem:[#allocation2 + $0x10] sm:$0xff] %v1095_v3  ;;  %v1098_v6 = vld [vmem:[%s13040_s3 + $0x30] sm:$0xff] }
 0x110   : > { %1104 = vst [vmem:[#allocation2 + $0x8] sm:$0xff] %v1096_v4  ;;  %1105 = vst [vmem:[#allocation2 + $0x20] sm:$0xff] %v1097_v5  ;;  %v1099_v7 = vld [vmem:[%s13040_s3 + $0x38] sm:$0xff] }
 0x111   : > { %1106 = vst [vmem:[#allocation2 + $0x28] sm:$0xff] %v1098_v6  ;;  %1107 = vst [vmem:[#allocation2 + $0x38] sm:$0xff] %v1099_v7 }
 0x112 PF: > { %v11517_v8 = vld [vmem:[%s13022_s18 + $0xe4] ss:$16 sps:$4 sm:$0xff]   ;;  %v11519_v9 = vld [vmem:[%s13022_s18 + $0xe0] ss:$16 sps:$4 sm:$0xff]   ;;  %s16375_s28 = sld [smem:[#allocation86_spill]]  ;;  %s12606_s21 = smov 96  }
 0x113   : > { %1534 = vmatprep.subr.bf16.mxu0 %v11517_v8  ;;  %v11520_v10 = vld [vmem:[%s13022_s18 + $0xc4] ss:$16 sps:$4 sm:$0xff]   ;;  %v11522_v11 = vld [vmem:[%s13022_s18 + $0xc0] ss:$16 sps:$4 sm:$0xff]   ;;  %s12608_s3 = smov 32   ;;  %vm5993_vm0 = vcmask 261120  }
 0x114   : > { %1535 = vmatpush1.bf16.msra.mxu0 %v11519_v9  ;;  %v11523_v12 = vld [vmem:[%s13022_s18 + $0xa4] ss:$16 sps:$4 sm:$0xff]   ;;  %v11525_v13 = vld [vmem:[%s13022_s18 + $0xa0] ss:$16 sps:$4 sm:$0xff]   ;;  %vm8547_vm1 = vcmask 523264   ;;  %vm8552_vm2 = vcmask 785408  }
 0x115   : > { %1536 = vmatprep.subr.bf16.mxu0 %v11520_v10  ;;  %v11526_v14 = vld [vmem:[%s13022_s18 + $0x84] ss:$16 sps:$4 sm:$0xff]   ;;  %v11528_v15 = vld [vmem:[%s13022_s18 + $0x80] ss:$16 sps:$4 sm:$0xff]   ;;  %s16516_s4 = sld [smem:[#allocation27_spill]] }
 0x116   : > { %v11529_v16 = vld [vmem:[%s13022_s18 + $0x64] ss:$16 sps:$4 sm:$0xff]   ;;  %v11531_v17 = vld [vmem:[%s13022_s18 + $0x60] ss:$16 sps:$4 sm:$0xff]  }
 0x117   : > { %v11532_v18 = vld [vmem:[%s13022_s18 + $0x44] ss:$16 sps:$4 sm:$0xff]   ;;  %v11534_v19 = vld [vmem:[%s13022_s18 + $0x40] ss:$16 sps:$4 sm:$0xff]  }
 0x118   : > { %1537 = vmatpush1.bf16.msra.mxu0 %v11522_v11  ;;  %v11535_v20 = vld [vmem:[%s13022_s18 + $0x24] ss:$16 sps:$4 sm:$0xff]   ;;  %v11537_v24 = vld [vmem:[%s13022_s18 + $0x20] ss:$16 sps:$4 sm:$0xff]   ;;  %s16376_s8 = scalar_lea.vmem %s16375_s28, %s13047_s17 }
 0x119   : > { %1538 = vmatprep.subr.bf16.mxu0 %v11523_v12  ;;  %v1109_v21 = vld [vmem:[#allocation2] sm:$0xff]  ;;  %v1111_v22 = vld [vmem:[#allocation2 + $0x10] sm:$0xff]  ;;  %v1110_v44 = vld [vmem:[#allocation2 + $0x18] sm:$0xff] }
 0x11a   : > { %v1190_v23 = vpack.c.bf16 %v1111_v22, %v1109_v21  ;;  %v11538_v25 = vld [vmem:[%s13022_s18 + $0x4] ss:$16 sps:$4 sm:$0xff]   ;;  %v11540_v26 = vld [vmem:[%s13022_s18] ss:$16 sps:$4 sm:$0xff]   ;;  %v11615_v21 = vld [vmem:[%s13022_s18 + $0xe8] ss:$16 sps:$4 sm:$0xff]  }
 0x11b   : > { %v11541_v27 = vld [vmem:[%s13022_s18 + $0x1e4] ss:$16 sps:$4 sm:$0xff]   ;;  %v11543_v28 = vld [vmem:[%s13022_s18 + $0x1e0] ss:$16 sps:$4 sm:$0xff]   ;;  %v11616_v22 = vld [vmem:[%s13022_s18 + $0xcc] ss:$16 sps:$4 sm:$0xff]  }
 0x11c   : > { %1539 = vmatpush1.bf16.msra.mxu0 %v11525_v13  ;;  %1566 = vmatprep.mubr.bf16.mxu0 %v1190_v23  ;;  %v11544_v29 = vld [vmem:[%s13022_s18 + $0x1c4] ss:$16 sps:$4 sm:$0xff]   ;;  %v11546_v30 = vld [vmem:[%s13022_s18 + $0x1c0] ss:$16 sps:$4 sm:$0xff]   ;;  %p11055_p8 = scmp.ne.s32.totalorder %s16516_s4, 1 }
 0x11d   : > { %1540 = vmatprep.subr.bf16.mxu0 %v11526_v14  ;;  %1619 = vmatprep.mubr.bf16.mxu1 %v1190_v23  ;;  %v11547_v31 = vld [vmem:[%s13022_s18 + $0x1a4] ss:$16 sps:$4 sm:$0xff]   ;;  %v11549_v32 = vld [vmem:[%s13022_s18 + $0x1a0] ss:$16 sps:$4 sm:$0xff]   ;;  %v11618_v23 = vld [vmem:[%s13022_s18 + $0xc8] ss:$16 sps:$4 sm:$0xff]  }
 0x11e   : > { %v11550_v33 = vld [vmem:[%s13022_s18 + $0x184] ss:$16 sps:$4 sm:$0xff]   ;;  %v11552_v34 = vld [vmem:[%s13022_s18 + $0x180] ss:$16 sps:$4 sm:$0xff]  }
 0x11f   : > { %v11553_v35 = vld [vmem:[%s13022_s18 + $0x164] ss:$16 sps:$4 sm:$0xff]   ;;  %v11555_v36 = vld [vmem:[%s13022_s18 + $0x160] ss:$16 sps:$4 sm:$0xff]  }
 0x120   : > { %1541 = vmatpush1.bf16.msra.mxu0 %v11528_v15  ;;  %v11556_v37 = vld [vmem:[%s13022_s18 + $0x144] ss:$16 sps:$4 sm:$0xff]   ;;  %v11558_v38 = vld [vmem:[%s13022_s18 + $0x140] ss:$16 sps:$4 sm:$0xff]  }
 0x121   : > { %1542 = vmatprep.subr.bf16.mxu0 %v11529_v16  ;;  %v11559_v39 = vld [vmem:[%s13022_s18 + $0x124] ss:$16 sps:$4 sm:$0xff]   ;;  %v11561_v40 = vld [vmem:[%s13022_s18 + $0x120] ss:$16 sps:$4 sm:$0xff]  }
 0x122   : > { %v11562_v41 = vld [vmem:[%s13022_s18 + $0x104] ss:$16 sps:$4 sm:$0xff]   ;;  %v11564_v42 = vld [vmem:[%s13022_s18 + $0x100] ss:$16 sps:$4 sm:$0xff]  }
 0x123   : > { %v1108_v43 = vld [vmem:[#allocation2 + $0x30] sm:$0xff]  ;;  %v1113_v45 = vld [vmem:[#allocation2 + $0x20] sm:$0xff]  ;;  %v1115_v46 = vld [vmem:[#allocation2 + $0x38] sm:$0xff] }
 0x124   : > { %1543 = vmatpush1.bf16.msra.mxu0 %v11531_v17  ;;  %v11567_v47 = vld [vmem:[#allocation3 + $0x74] ss:$8 sps:$4 sm:$0xff]   ;;  %v11565_v48 = vld [vmem:[#allocation3 + $0x70] ss:$8 sps:$4 sm:$0xff]   ;;  %v13130_v49 = vpack.c.bf16 %v1110_v44, %v1108_v43  ;;  %v11570_v50 = vld [vmem:[#allocation3 + $0x64] ss:$8 sps:$4 sm:$0xff]   ;;  %v13132_v51 = vpack.c.bf16 %v1115_v46, %v1113_v45 }
 0x125   : > { %1544 = vmatprep.subr.bf16.mxu0 %v11532_v18  ;;  %v1112_v52 = vld [vmem:[#allocation2 + $0x8] sm:$0xff]  ;;  %v11573_v55 = vld [vmem:[#allocation3 + $0x54] ss:$8 sps:$4 sm:$0xff]   ;;  %v11571_v56 = vld [vmem:[#allocation3 + $0x50] ss:$8 sps:$4 sm:$0xff]  }
 0x126   : > { %v1114_v53 = vld [vmem:[#allocation2 + $0x28] sm:$0xff]  ;;  %v11579_v60 = vld [vmem:[#allocation3 + $0x34] ss:$8 sps:$4 sm:$0xff]   ;;  %v11577_v61 = vld [vmem:[#allocation3 + $0x30] ss:$8 sps:$4 sm:$0xff]  }
 0x127   : > { %v11568_v54 = vld [vmem:[#allocation3 + $0x60] ss:$8 sps:$4 sm:$0xff]   ;;  %v13136_v57 = vpack.c.bf16 %v1114_v53, %v1112_v52  ;;  %v11576_v58 = vld [vmem:[#allocation3 + $0x44] ss:$8 sps:$4 sm:$0xff]   ;;  %v11585_v0 = vld [vmem:[#allocation3 + $0x14] ss:$8 sps:$4 sm:$0xff]  }
 0x128   : > { %1545 = vmatpush1.bf16.msra.mxu0 %v11534_v19  ;;  %v11574_v59 = vld [vmem:[#allocation3 + $0x40] ss:$8 sps:$4 sm:$0xff]   ;;  %v11582_v62 = vld [vmem:[#allocation3 + $0x24] ss:$8 sps:$4 sm:$0xff]   ;;  %v11583_v1 = vld [vmem:[#allocation3 + $0x10] ss:$8 sps:$4 sm:$0xff]  }
 0x129   : > { %1546 = vmatprep.subr.bf16.mxu0 %v11535_v20  ;;  %v11580_v63 = vld [vmem:[#allocation3 + $0x20] ss:$8 sps:$4 sm:$0xff]   ;;  %v11588_v2 = vld [vmem:[#allocation3 + $0x4] ss:$8 sps:$4 sm:$0xff]   ;;  %v11591_v4 = vld [vmem:[#allocation3 + $0xf4] ss:$8 sps:$4 sm:$0xff]  }
 0x12a   : > { %v11586_v3 = vld [vmem:[#allocation3] ss:$8 sps:$4 sm:$0xff]   ;;  %v11589_v5 = vld [vmem:[#allocation3 + $0xf0] ss:$8 sps:$4 sm:$0xff]   ;;  %v11594_v6 = vld [vmem:[#allocation3 + $0xe4] ss:$8 sps:$4 sm:$0xff]  }
 0x12b   : > { %v11592_v7 = vld [vmem:[#allocation3 + $0xe0] ss:$8 sps:$4 sm:$0xff]   ;;  %v11597_v8 = vld [vmem:[#allocation3 + $0xd4] ss:$8 sps:$4 sm:$0xff]   ;;  %v11595_v9 = vld [vmem:[#allocation3 + $0xd0] ss:$8 sps:$4 sm:$0xff]  }
 0x12c   : > { %1547 = vmatpush1.bf16.msra.mxu0 %v11537_v24  ;;  %v11600_v10 = vld [vmem:[#allocation3 + $0xc4] ss:$8 sps:$4 sm:$0xff]   ;;  %v11598_v11 = vld [vmem:[#allocation3 + $0xc0] ss:$8 sps:$4 sm:$0xff]   ;;  %v11603_v12 = vld [vmem:[#allocation3 + $0xb4] ss:$8 sps:$4 sm:$0xff]  }
 0x12d   : > { %1548 = vmatprep.subr.bf16.mxu0 %v11538_v25  ;;  %v11601_v13 = vld [vmem:[#allocation3 + $0xb0] ss:$8 sps:$4 sm:$0xff]   ;;  %v11606_v14 = vld [vmem:[#allocation3 + $0xa4] ss:$8 sps:$4 sm:$0xff]   ;;  %v11604_v15 = vld [vmem:[#allocation3 + $0xa0] ss:$8 sps:$4 sm:$0xff]  }
 0x12e   : > { %v11609_v16 = vld [vmem:[#allocation3 + $0x94] ss:$8 sps:$4 sm:$0xff]   ;;  %v11607_v17 = vld [vmem:[#allocation3 + $0x90] ss:$8 sps:$4 sm:$0xff]   ;;  %v11612_v18 = vld [vmem:[#allocation3 + $0x84] ss:$8 sps:$4 sm:$0xff]  }
 0x12f   : > { %v11610_v19 = vld [vmem:[#allocation3 + $0x80] ss:$8 sps:$4 sm:$0xff]  }
 0x130   : > { %1549 = vmatpush1.bf16.msra.mxu0 %v11540_v26  ;;  %v11613_v20 = vld [vmem:[%s13022_s18 + $0xec] ss:$16 sps:$4 sm:$0xff]   ;;  %v11621_v25 = vld [vmem:[%s13022_s18 + $0xa8] ss:$16 sps:$4 sm:$0xff]  }
 0x131   : > { %1550 = vmatprep.subr.bf16.mxu0 %v11541_v27  ;;  %1587 = vmatprep.subr.bf16.mxu1 %v11613_v20  ;;  %v11619_v24 = vld [vmem:[%s13022_s18 + $0xac] ss:$16 sps:$4 sm:$0xff]   ;;  %v11624_v27 = vld [vmem:[%s13022_s18 + $0x88] ss:$16 sps:$4 sm:$0xff]  }
 0x132   : > { %1588 = vmatpush1.bf16.msra.mxu1 %v11615_v21  ;;  %v11622_v26 = vld [vmem:[%s13022_s18 + $0x8c] ss:$16 sps:$4 sm:$0xff]   ;;  %v11648_v44 = vld [vmem:[%s13022_s18 + $0x188] ss:$16 sps:$4 sm:$0xff]  }
 0x133   : > { %1589 = vmatprep.subr.bf16.mxu1 %v11616_v22  ;;  %v11646_v43 = vld [vmem:[%s13022_s18 + $0x18c] ss:$16 sps:$4 sm:$0xff]   ;;  %v11651_v46 = vld [vmem:[%s13022_s18 + $0x168] ss:$16 sps:$4 sm:$0xff]  }
 0x134   : > { %1551 = vmatpush2.bf16.msra.mxu0 %v11543_v28  ;;  %v11666_v28 = vld [vmem:[%s13076_s6 + $0xec] ss:$16 sps:$4 sm:$0xff]   ;;  %v11657_v52 = vld [vmem:[%s13022_s18 + $0x128] ss:$16 sps:$4 sm:$0xff]  }
 0x135   : > { %1552 = vmatprep.subr.bf16.mxu0 %v11544_v29  ;;  %v11625_v29 = vld [vmem:[%s13022_s18 + $0x6c] ss:$16 sps:$4 sm:$0xff]  }
 0x136   : > { %1590 = vmatpush1.bf16.msra.mxu1 %v11618_v23  ;;  %v11649_v45 = vld [vmem:[%s13022_s18 + $0x16c] ss:$16 sps:$4 sm:$0xff]  }
 0x137   : > { %1591 = vmatprep.subr.bf16.mxu1 %v11619_v24  ;;  %v11658_v53 = vld [vmem:[%s13022_s18 + $0x10c] ss:$16 sps:$4 sm:$0xff]  }
 0x138   : > { %1553 = vmatpush2.bf16.msra.mxu0 %v11546_v30  ;;  %v11627_v30 = vld [vmem:[%s13022_s18 + $0x68] ss:$16 sps:$4 sm:$0xff]  }
 0x139   : > { %1554 = vmatprep.subr.bf16.mxu0 %v11547_v31  ;;  %v11628_v31 = vld [vmem:[%s13022_s18 + $0x4c] ss:$16 sps:$4 sm:$0xff]  }
 0x13a   : > { %1592 = vmatpush1.bf16.msra.mxu1 %v11621_v25 }
 0x13b   : > { %1593 = vmatprep.subr.bf16.mxu1 %v11622_v26 }
 0x13c   : > { %1555 = vmatpush2.bf16.msra.mxu0 %v11549_v32  ;;  %v11630_v32 = vld [vmem:[%s13022_s18 + $0x48] ss:$16 sps:$4 sm:$0xff]  }
 0x13d   : > { %1556 = vmatprep.subr.bf16.mxu0 %v11550_v33  ;;  %v11631_v33 = vld [vmem:[%s13022_s18 + $0x2c] ss:$16 sps:$4 sm:$0xff]  }
 0x13e   : > { %1594 = vmatpush1.bf16.msra.mxu1 %v11624_v27 }
 0x13f   : > { %1595 = vmatprep.subr.bf16.mxu1 %v11625_v29 }
 0x140   : > { %1557 = vmatpush2.bf16.msra.mxu0 %v11552_v34  ;;  %v11633_v34 = vld [vmem:[%s13022_s18 + $0x28] ss:$16 sps:$4 sm:$0xff]  }
 0x141   : > { %1558 = vmatprep.subr.bf16.mxu0 %v11553_v35  ;;  %v11634_v35 = vld [vmem:[%s13022_s18 + $0xc] ss:$16 sps:$4 sm:$0xff]  }
 0x142   : > { %1596 = vmatpush1.bf16.msra.mxu1 %v11627_v30 }
 0x143   : > { %1597 = vmatprep.subr.bf16.mxu1 %v11628_v31 }
 0x144   : > { %1559 = vmatpush2.bf16.msra.mxu0 %v11555_v36  ;;  %v11636_v36 = vld [vmem:[%s13022_s18 + $0x8] ss:$16 sps:$4 sm:$0xff]  }
 0x145   : > { %1560 = vmatprep.subr.bf16.mxu0 %v11556_v37  ;;  %v11637_v37 = vld [vmem:[%s13022_s18 + $0x1ec] ss:$16 sps:$4 sm:$0xff]  }
 0x146   : > { %1598 = vmatpush1.bf16.msra.mxu1 %v11630_v32 }
 0x147   : > { %1599 = vmatprep.subr.bf16.mxu1 %v11631_v33 }
 0x148   : > { %1561 = vmatpush2.bf16.msra.mxu0 %v11558_v38  ;;  %v11639_v38 = vld [vmem:[%s13022_s18 + $0x1e8] ss:$16 sps:$4 sm:$0xff]  }
 0x149   : > { %1562 = vmatprep.subr.bf16.mxu0 %v11559_v39  ;;  %v11640_v39 = vld [vmem:[%s13022_s18 + $0x1cc] ss:$16 sps:$4 sm:$0xff]  }
 0x14a   : > { %1600 = vmatpush1.bf16.msra.mxu1 %v11633_v34 }
 0x14b   : > { %1601 = vmatprep.subr.bf16.mxu1 %v11634_v35 }
 0x14c   : > { %1563 = vmatpush2.bf16.msra.mxu0 %v11561_v40  ;;  %v11642_v40 = vld [vmem:[%s13022_s18 + $0x1c8] ss:$16 sps:$4 sm:$0xff]  }
 0x14d   : > { %1564 = vmatprep.subr.bf16.mxu0 %v11562_v41  ;;  %v11643_v41 = vld [vmem:[%s13022_s18 + $0x1ac] ss:$16 sps:$4 sm:$0xff]  }
 0x14e   : > { %1602 = vmatpush1.bf16.msra.mxu1 %v11636_v36 }
 0x14f   : > { %1603 = vmatprep.subr.bf16.mxu1 %v11637_v37  ;;  %v11664_v37 = vld [vmem:[%s13076_s6 + $0xe8] ss:$16 sps:$4 sm:$0xff]  }
 0x150   : > { %1565 = vmatpush2.bf16.msra.mxu0 %v11564_v42  ;;  %v11645_v42 = vld [vmem:[%s13022_s18 + $0x1a8] ss:$16 sps:$4 sm:$0xff]  }
 0x151   : > { %1856 = vmatprep.subr.bf16.mxu0 %v11567_v47  ;;  %v11652_v47 = vld [vmem:[%s13022_s18 + $0x14c] ss:$16 sps:$4 sm:$0xff]  }
 0x152   : > { %1604 = vmatpush2.bf16.msra.mxu1 %v11639_v38 }
 0x153   : > { %1567 = vmatmul.mubr.bf16.vlgmr.msra.gmra.mxu0 %v13130_v49  ;;  %1605 = vmatprep.subr.bf16.mxu1 %v11640_v39 }
 0x154   : > { %1576 = vmatprep.mubr.bf16.mxu0 %v13132_v51  ;;  %1857 = vmatpush1.bf16.msra.mxu0 %v11565_v48  ;;  %v11654_v48 = vld [vmem:[%s13022_s18 + $0x148] ss:$16 sps:$4 sm:$0xff]  }
 0x155   : > { %1858 = vmatprep.subr.bf16.mxu0 %v11570_v50  ;;  %v11655_v50 = vld [vmem:[%s13022_s18 + $0x12c] ss:$16 sps:$4 sm:$0xff]  }
 0x156   : > { %1606 = vmatpush2.bf16.msra.mxu1 %v11642_v40  ;;  %v11672_v40 = vld [vmem:[%s13076_s6 + $0xcc] ss:$16 sps:$4 sm:$0xff]  }
 0x157   : > { %1607 = vmatprep.subr.bf16.mxu1 %v11643_v41 }
 0x158   : > { %1859 = vmatpush1.bf16.msra.mxu0 %v11568_v54  ;;  %v11660_v54 = vld [vmem:[%s13022_s18 + $0x108] ss:$16 sps:$4 sm:$0xff]  }
 0x159   : > { %1860 = vmatprep.subr.bf16.mxu0 %v11573_v55  ;;  %v11663_v55 = vld [vmem:[%s13076_s6 + $0xe4] ss:$16 sps:$4 sm:$0xff]  }
 0x15a   : > { %1608 = vmatpush2.bf16.msra.mxu1 %v11645_v42 }
 0x15b   : > { %1577 = vmatmul.mubr.bf16.gmra.mxu0 %v13136_v57  ;;  %1609 = vmatprep.subr.bf16.mxu1 %v11646_v43 }
 0x15c   : > { %1861 = vmatpush1.bf16.msra.mxu0 %v11571_v56  ;;  %v11661_v56 = vld [vmem:[%s13076_s6 + $0xe0] ss:$16 sps:$4 sm:$0xff]  }
 0x15d   : > { %1862 = vmatprep.subr.bf16.mxu0 %v11576_v58  ;;  %v11669_v58 = vld [vmem:[%s13076_s6 + $0xc4] ss:$16 sps:$4 sm:$0xff]  }
 0x15e   : > { %1610 = vmatpush2.bf16.msra.mxu1 %v11648_v44 }
 0x15f   : > { %1611 = vmatprep.subr.bf16.mxu1 %v11649_v45 }
 0x160   : > { %1863 = vmatpush1.bf16.msra.mxu0 %v11574_v59  ;;  %v11667_v59 = vld [vmem:[%s13076_s6 + $0xc0] ss:$16 sps:$4 sm:$0xff]  }
 0x161   : > { %1864 = vmatprep.subr.bf16.mxu0 %v11579_v60  ;;  %v11675_v60 = vld [vmem:[%s13076_s6 + $0xa4] ss:$16 sps:$4 sm:$0xff]  }
 0x162   : > { %1612 = vmatpush2.bf16.msra.mxu1 %v11651_v46 }
 0x163   : > { %1613 = vmatprep.subr.bf16.mxu1 %v11652_v47  ;;  %v11670_v47 = vld [vmem:[%s13076_s6 + $0xc8] ss:$16 sps:$4 sm:$0xff]  }
 0x164   : > { %1865 = vmatpush1.bf16.msra.mxu0 %v11577_v61  ;;  %v11673_v61 = vld [vmem:[%s13076_s6 + $0xa0] ss:$16 sps:$4 sm:$0xff]  }
 0x165   : > { %1866 = vmatprep.subr.bf16.mxu0 %v11582_v62  ;;  %v11681_v62 = vld [vmem:[%s13076_s6 + $0x84] ss:$16 sps:$4 sm:$0xff]  }
 0x166   : > { %1614 = vmatpush2.bf16.msra.mxu1 %v11654_v48  ;;  %v11678_v48 = vld [vmem:[%s13076_s6 + $0xac] ss:$16 sps:$4 sm:$0xff]  }
 0x167   : > { %1615 = vmatprep.subr.bf16.mxu1 %v11655_v50 }
 0x168   : > { %1867 = vmatpush1.bf16.msra.mxu0 %v11580_v63  ;;  %v11687_v63 = vld [vmem:[%s13076_s6 + $0x64] ss:$16 sps:$4 sm:$0xff]  }
 0x169   : > { %1868 = vmatprep.subr.bf16.mxu0 %v11585_v0  ;;  %v11693_v0 = vld [vmem:[%s13076_s6 + $0x44] ss:$16 sps:$4 sm:$0xff]  }
 0x16a   : > { %1616 = vmatpush2.bf16.msra.mxu1 %v11657_v52 }
 0x16b   : > { %1617 = vmatprep.subr.bf16.mxu1 %v11658_v53 }
 0x16c   : > { %1869 = vmatpush1.bf16.msra.mxu0 %v11583_v1  ;;  %v11691_v1 = vld [vmem:[%s13076_s6 + $0x40] ss:$16 sps:$4 sm:$0xff]  }
 0x16d   : > { %1870 = vmatprep.subr.bf16.mxu0 %v11588_v2  ;;  %v11699_v2 = vld [vmem:[%s13076_s6 + $0x24] ss:$16 sps:$4 sm:$0xff]  }
 0x16e   : > { %1618 = vmatpush2.bf16.msra.mxu1 %v11660_v54  ;;  %v11676_v54 = vld [vmem:[%s13076_s6 + $0xa8] ss:$16 sps:$4 sm:$0xff]  }
 0x16f   : > { %2335 = vmatprep.subr.bf16.mxu1 %v11663_v55  ;;  %v11684_v55 = vld [vmem:[%s13076_s6 + $0x8c] ss:$16 sps:$4 sm:$0xff]  }
 0x170   : > { %1871 = vmatpush1.bf16.msra.mxu0 %v11586_v3  ;;  %v11705_v3 = vld [vmem:[%s13076_s6 + $0x4] ss:$16 sps:$4 sm:$0xff]  }
 0x171   : > { %1872 = vmatprep.subr.bf16.mxu0 %v11591_v4  ;;  %1620 = vmatmul.mubr.bf16.vlgmr.msra.gmra.mxu1 %v13130_v49  ;;  %v11679_v49 = vld [vmem:[%s13076_s6 + $0x80] ss:$16 sps:$4 sm:$0xff]  }
 0x172   : > { %2336 = vmatpush1.bf16.msra.mxu1 %v11661_v56  ;;  %1629 = vmatprep.mubr.bf16.mxu1 %v13132_v51  ;;  %v11685_v51 = vld [vmem:[%s13076_s6 + $0x60] ss:$16 sps:$4 sm:$0xff]   ;;  %v11682_v56 = vld [vmem:[%s13076_s6 + $0x88] ss:$16 sps:$4 sm:$0xff]  }
 0x173   : > { %2337 = vmatprep.subr.bf16.mxu1 %v11669_v58  ;;  %v11703_v4 = vld [vmem:[%s13076_s6] ss:$16 sps:$4 sm:$0xff]   ;;  %v11690_v58 = vld [vmem:[%s13076_s6 + $0x6c] ss:$16 sps:$4 sm:$0xff]  }
 0x174   : > { %1873 = vmatpush2.bf16.msra.mxu0 %v11589_v5  ;;  %v11711_v5 = vld [vmem:[%s13076_s6 + $0x1e4] ss:$16 sps:$4 sm:$0xff]  }
 0x175   : > { %1874 = vmatprep.subr.bf16.mxu0 %v11594_v6  ;;  %v11709_v6 = vld [vmem:[%s13076_s6 + $0x1e0] ss:$16 sps:$4 sm:$0xff]  }
 0x176   : > { %2338 = vmatpush1.bf16.msra.mxu1 %v11667_v59  ;;  %v11688_v59 = vld [vmem:[%s13076_s6 + $0x68] ss:$16 sps:$4 sm:$0xff]  }
 0x177   : > { %2339 = vmatprep.subr.bf16.mxu1 %v11675_v60  ;;  %v11696_v60 = vld [vmem:[%s13076_s6 + $0x4c] ss:$16 sps:$4 sm:$0xff]  }
 0x178   : > { %1875 = vmatpush2.bf16.msra.mxu0 %v11592_v7  ;;  %v1194_v7 = vlaneseq }
 0x179   : > { %1876 = vmatprep.subr.bf16.mxu0 %v11597_v8  ;;  %1630 = vmatmul.mubr.bf16.gmra.mxu1 %v13136_v57  ;;  %v11697_v57 = vld [vmem:[%s13076_s6 + $0x20] ss:$16 sps:$4 sm:$0xff]   ;;  %v11717_v8 = vld [vmem:[%s13076_s6 + $0x1c4] ss:$16 sps:$4 sm:$0xff]  }
 0x17a   : > { %2340 = vmatpush1.bf16.msra.mxu1 %v11673_v61  ;;  %v11694_v61 = vld [vmem:[%s13076_s6 + $0x48] ss:$16 sps:$4 sm:$0xff]  }
 0x17b   : > { %2341 = vmatprep.subr.bf16.mxu1 %v11681_v62  ;;  %v11702_v62 = vld [vmem:[%s13076_s6 + $0x2c] ss:$16 sps:$4 sm:$0xff]  }
 0x17c   : > { %1877 = vmatpush2.bf16.msra.mxu0 %v11595_v9  ;;  %v11715_v9 = vld [vmem:[%s13076_s6 + $0x1c0] ss:$16 sps:$4 sm:$0xff]  }
 0x17d   : > { %1878 = vmatprep.subr.bf16.mxu0 %v11600_v10  ;;  %v13195_v10 = vshrl.u32 %v1194_v7, 7  ;;  %v11735_v7 = vld [vmem:[%s13076_s6 + $0x164] ss:$16 sps:$4 sm:$0xff]  }
 0x17e   : > { %2342 = vmatpush1.bf16.msra.mxu1 %v11679_v49  ;;  %v11700_v49 = vld [vmem:[%s13076_s6 + $0x28] ss:$16 sps:$4 sm:$0xff]  }
 0x17f   : > { %2343 = vmatprep.subr.bf16.mxu1 %v11687_v63  ;;  %v11708_v63 = vld [vmem:[%s13076_s6 + $0xc] ss:$16 sps:$4 sm:$0xff]  }
 0x180   : > { %1879 = vmatpush2.bf16.msra.mxu0 %v11598_v11  ;;  %v11723_v11 = vld [vmem:[%s13076_s6 + $0x1a4] ss:$16 sps:$4 sm:$0xff]  }
 0x181   : > { %1880 = vmatprep.subr.bf16.mxu0 %v11603_v12  ;;  %v13199_v12 = vsub.s32 1, %v13195_v10 }
 0x182   : > { %2344 = vmatpush1.bf16.msra.mxu1 %v11685_v51  ;;  %v11706_v51 = vld [vmem:[%s13076_s6 + $0x8] ss:$16 sps:$4 sm:$0xff]  }
 0x183   : > { %2345 = vmatprep.subr.bf16.mxu1 %v11693_v0  ;;  %16373 = vst [vmem:[#allocation42_spill] sm:$0xff] %v13199_v12  ;;  %v11714_v0 = vld [vmem:[%s13076_s6 + $0x1ec] ss:$16 sps:$4 sm:$0xff]  }
 0x184   : > { %1881 = vmatpush2.bf16.msra.mxu0 %v11601_v13  ;;  %v11721_v13 = vld [vmem:[%s13076_s6 + $0x1a0] ss:$16 sps:$4 sm:$0xff]  }
 0x185   : > { %1882 = vmatprep.subr.bf16.mxu0 %v11606_v14  ;;  %v13203_v14 = vsub.s32 0, %v13195_v10 }
 0x186   : > { %2346 = vmatpush1.bf16.msra.mxu1 %v11691_v1  ;;  %v11712_v1 = vld [vmem:[%s13076_s6 + $0x1e8] ss:$16 sps:$4 sm:$0xff]  }
 0x187   : > { %2347 = vmatprep.subr.bf16.mxu1 %v11699_v2  ;;  %16374 = vst [vmem:[#allocation43_spill] sm:$0xff] %v13203_v14  ;;  %v11720_v2 = vld [vmem:[%s13076_s6 + $0x1cc] ss:$16 sps:$4 sm:$0xff]  }
 0x188   : > { %1883 = vmatpush2.bf16.msra.mxu0 %v11604_v15  ;;  %v11729_v15 = vld [vmem:[%s13076_s6 + $0x184] ss:$16 sps:$4 sm:$0xff]  }
 0x189   : > { %1884 = vmatprep.subr.bf16.mxu0 %v11609_v16  ;;  %v13211_v16 = vld [vmem:[%s16376_s8] sm:$0xf] }
 0x18a   : > { %2348 = vmatpush1.bf16.msra.mxu1 %v11697_v57  ;;  %v1197_v20 = vrot.slane %v13211_v16, %v13203_v14  ;;  %v11718_v57 = vld [vmem:[%s13076_s6 + $0x1c8] ss:$16 sps:$4 sm:$0xff]  }
 0x18b   : > { %2349 = vmatprep.subr.bf16.mxu1 %v11705_v3  ;;  %v11726_v3 = vld [vmem:[%s13076_s6 + $0x1ac] ss:$16 sps:$4 sm:$0xff]  }
 0x18c   : > { %1885 = vmatpush2.bf16.msra.mxu0 %v11607_v17 }
 0x18d   : > { %1886 = vmatprep.subr.bf16.mxu0 %v11612_v18  ;;  %v1201_v18 = vrot.slane %v13211_v16, %v13199_v12 }
 0x18e   : > { %2350 = vmatpush1.bf16.msra.mxu1 %v11703_v4  ;;  %v11724_v4 = vld [vmem:[%s13076_s6 + $0x1a8] ss:$16 sps:$4 sm:$0xff]  }
 0x18f   : > { %2351 = vmatprep.subr.bf16.mxu1 %v11711_v5  ;;  %v11732_v5 = vld [vmem:[%s13076_s6 + $0x18c] ss:$16 sps:$4 sm:$0xff]  }
 0x190   : > { %1887 = vmatpush2.bf16.msra.mxu0 %v11610_v19  ;;  %v11727_v19 = vld [vmem:[%s13076_s6 + $0x180] ss:$16 sps:$4 sm:$0xff]  }
 0x191   : > { %2388 = vmatprep.subr.bf16.mxu0 %v11666_v28 }
 0x192   : > { %2352 = vmatpush2.bf16.msra.mxu1 %v11709_v6  ;;  %v11730_v6 = vld [vmem:[%s13076_s6 + $0x188] ss:$16 sps:$4 sm:$0xff]  }
 0x193   : > { %2353 = vmatprep.subr.bf16.mxu1 %v11717_v8  ;;  %v11738_v8 = vld [vmem:[%s13076_s6 + $0x16c] ss:$16 sps:$4 sm:$0xff]  }
 0x196   : > { %2354 = vmatpush2.bf16.msra.mxu1 %v11715_v9  ;;  %v11733_v9 = vld [vmem:[%s13076_s6 + $0x160] ss:$16 sps:$4 sm:$0xff]  }
 0x197   : > { %2355 = vmatprep.subr.bf16.mxu1 %v11723_v11  ;;  %v11736_v11 = vld [vmem:[%s13076_s6 + $0x168] ss:$16 sps:$4 sm:$0xff]  }
 0x19a   : > { %2356 = vmatpush2.bf16.msra.mxu1 %v11721_v13  ;;  %v11741_v13 = vld [vmem:[%s13076_s6 + $0x144] ss:$16 sps:$4 sm:$0xff]  }
 0x19b   : > { %2357 = vmatprep.subr.bf16.mxu1 %v11729_v15  ;;  %v11744_v15 = vld [vmem:[%s13076_s6 + $0x14c] ss:$16 sps:$4 sm:$0xff]  }
 0x19e   : > { %2358 = vmatpush2.bf16.msra.mxu1 %v11727_v19  ;;  %v11747_v19 = vld [vmem:[%s13076_s6 + $0x124] ss:$16 sps:$4 sm:$0xff]  }
 0x19f   : > { %2359 = vmatprep.subr.bf16.mxu1 %v11735_v7  ;;  %v12145_v7 = vld [vmem:[#allocation2 + $0x20] sm:$0xff] }
 0x1a2   : > { %2360 = vmatpush2.bf16.msra.mxu1 %v11733_v9 }
 0x1a3   : > { %2361 = vmatprep.subr.bf16.mxu1 %v11741_v13 }
 0x213   : > { %v1568_v17 = vpop.f32.mrf.mxu0 }
 0x214   : > { %v1569_v25 = vadd.f32 %v1568_v17, %v1197_v20  ;;  %v11739_v17 = vld [vmem:[%s13076_s6 + $0x140] ss:$16 sps:$4 sm:$0xff]  }
 0x215   : > { %v1570_v21 = vpop.f32.mrf.mxu0  ;;  %2362 = vmatpush2.bf16.msra.mxu1 %v11739_v17 }
 0x216   : > { %v1571_v23 = vadd.f32 %v1570_v21, %v1201_v18  ;;  %v1640_v32 = vmax.f32 %v1569_v25, 0.0  ;;  %v11745_v21 = vld [vmem:[%s13076_s6 + $0x120] ss:$16 sps:$4 sm:$0xff]   ;;  %2363 = vmatprep.subr.bf16.mxu1 %v11747_v19 }
 0x217   : > { %v1572_v22 = vpop.f32.mrf.mxu0  ;;  %v11751_v25 = vld [vmem:[%s13076_s6 + $0x100] ss:$16 sps:$4 sm:$0xff]  }
 0x218   : > { %v1573_v24 = vadd.f32 %v1572_v22, %v1197_v20  ;;  %v1641_v30 = vmax.f32 %v1571_v23, 0.0  ;;  %v11748_v22 = vld [vmem:[%s13076_s6 + $0x128] ss:$16 sps:$4 sm:$0xff]   ;;  %v11753_v23 = vld [vmem:[%s13076_s6 + $0x104] ss:$16 sps:$4 sm:$0xff]  }
 0x219   : > { %v1574_v26 = vpop.f32.mrf.mxu0  ;;  %2364 = vmatpush2.bf16.msra.mxu1 %v11745_v21 }
 0x21a   : > { %v1575_v27 = vadd.f32 %v1574_v26, %v1201_v18  ;;  %v1642_v28 = vmax.f32 %v1573_v24, 0.0  ;;  %v11756_v24 = vld [vmem:[%s13076_s6 + $0x10c] ss:$16 sps:$4 sm:$0xff]   ;;  %v11754_v26 = vld [vmem:[%s13076_s6 + $0x108] ss:$16 sps:$4 sm:$0xff]   ;;  %2365 = vmatprep.subr.bf16.mxu1 %v11753_v23 }
 0x21b   : > { %v1578_v29 = vpop.f32.mrf.mxu0 }
 0x21c   : > { %v1643_v31 = vmax.f32 %v1575_v27, 0.0  ;;  %v1579_v33 = vadd.f32 %v1578_v29, %v1197_v20  ;;  %v1681_v38 = vpack.c.bf16 %v1642_v28, %v1640_v32  ;;  %v1680_v27 = vld [vmem:[#allocation6] sm:$0x3] }
 0x21d   : > { %v1580_v34 = vpop.f32.mrf.mxu0  ;;  %2366 = vmatpush2.bf16.msra.mxu1 %v11751_v25  ;;  %v1693_v28 = vrot.slane %v1680_v27, %v13199_v12  ;;  %v1689_v29 = vrot.slane %v1680_v27, %v13203_v14 }
 0x21e   : > { %v1682_v35 = vpack.c.bf16 %v1643_v31, %v1641_v30  ;;  %v1581_v36 = vadd.f32 %v1580_v34, %v1201_v18  ;;  %v1644_v42 = vmax.f32 %v1579_v33, 0.0  ;;  %v1117_v34 = vld [vmem:[%s13045_s2 + $0x8] sm:$0xff] }
 0x21f   : > { %v1582_v39 = vpop.f32.mrf.mxu0 }
 0x220   : > { %v1583_v41 = vadd.f32 %v1582_v39, %v1197_v20  ;;  %1888 = vmatprep.mubr.bf16.mxu0 %v1682_v35  ;;  %v1645_v44 = vmax.f32 %v1581_v36, 0.0  ;;  %v11750_v20 = vld [vmem:[%s13076_s6 + $0x12c] ss:$16 sps:$4 sm:$0xff]  }
 0x221   : > { %v1584_v43 = vpop.f32.mrf.mxu0  ;;  %1889 = vmatmul.mubr.bf16.vlgmr.msra.gmra.mxu0 %v1681_v38  ;;  %v1118_v35 = vld [vmem:[%s13045_s2 + $0x10] sm:$0xff]  ;;  %v1119_v39 = vld [vmem:[%s13045_s2 + $0x18] sm:$0xff] }
 0x222   : > { %v1646_v45 = vmax.f32 %v1583_v41, 0.0  ;;  %v1585_v46 = vadd.f32 %v1584_v43, %v1201_v18  ;;  %2389 = vmatpush1.bf16.msra.mxu0 %v11664_v37  ;;  %v11742_v18 = vld [vmem:[%s13076_s6 + $0x148] ss:$16 sps:$4 sm:$0xff]   ;;  %v1116_v37 = vld [vmem:[%s13045_s2] sm:$0xff] }
 0x223   : > { %2390 = vmatprep.subr.bf16.mxu0 %v11672_v40 }
 0x224   : > { %v1647_v50 = vmax.f32 %v1585_v46, 0.0  ;;  %v1683_v52 = vpack.c.bf16 %v1646_v45, %v1644_v42 }
 0x226   : > { %v1684_v53 = vpack.c.bf16 %v1647_v50, %v1645_v44  ;;  %2391 = vmatpush1.bf16.msra.mxu0 %v11670_v47  ;;  %v12141_v47 = vld [vmem:[#allocation2 + $0x18] sm:$0xff] }
 0x227   : > { %2392 = vmatprep.subr.bf16.mxu0 %v11678_v48 }
 0x228   : > { %1898 = vmatprep.mubr.bf16.mxu0 %v1684_v53 }
 0x229   : > { %1899 = vmatmul.mubr.bf16.gmra.mxu0 %v1683_v52  ;;  %v1121_v52 = vld [vmem:[%s13045_s2 + $0x28] sm:$0xff] }
 0x22a   : > { %2393 = vmatpush1.bf16.msra.mxu0 %v11676_v54  ;;  %v12142_v54 = vld [vmem:[#allocation2] sm:$0xff] }
 0x22b   : > { %2394 = vmatprep.subr.bf16.mxu0 %v11684_v55 }
 0x22e   : > { %2395 = vmatpush1.bf16.msra.mxu0 %v11682_v56  ;;  %v12143_v56 = vld [vmem:[#allocation2 + $0x10] sm:$0xff] }
 0x22f   : > { %2396 = vmatprep.subr.bf16.mxu0 %v11690_v58 }
 0x232   : > { %2397 = vmatpush1.bf16.msra.mxu0 %v11688_v59  ;;  %v1120_v59 = vld [vmem:[%s13045_s2 + $0x20] sm:$0xff] }
 0x233   : > { %2398 = vmatprep.subr.bf16.mxu0 %v11696_v60 }
 0x236   : > { %2399 = vmatpush1.bf16.msra.mxu0 %v11694_v61  ;;  %v12144_v61 = vld [vmem:[#allocation2 + $0x30] sm:$0xff] }
 0x237   : > { %2400 = vmatprep.subr.bf16.mxu0 %v11702_v62 }
 0x23a   : > { %2401 = vmatpush1.bf16.msra.mxu0 %v11700_v49  ;;  %v1122_v49 = vld [vmem:[%s13045_s2 + $0x30] sm:$0xff] }
 0x23b   : > { %2402 = vmatprep.subr.bf16.mxu0 %v11708_v63 }
 0x23e   : > { %2403 = vmatpush1.bf16.msra.mxu0 %v11706_v51 }
 0x23f   : > { %2404 = vmatprep.subr.bf16.mxu0 %v11714_v0 }
 0x242   : > { %2405 = vmatpush2.bf16.msra.mxu0 %v11712_v1 }
 0x243   : > { %2406 = vmatprep.subr.bf16.mxu0 %v11720_v2 }
 0x246   : > { %2407 = vmatpush2.bf16.msra.mxu0 %v11718_v57 }
 0x247   : > { %2408 = vmatprep.subr.bf16.mxu0 %v11726_v3  ;;  %v1123_v3 = vld [vmem:[%s13045_s2 + $0x38] sm:$0xff] }
 0x24a   : > { %2409 = vmatpush2.bf16.msra.mxu0 %v11724_v4 }
 0x24b   : > { %2410 = vmatprep.subr.bf16.mxu0 %v11732_v5 }
 0x24e   : > { %2411 = vmatpush2.bf16.msra.mxu0 %v11730_v6 }
 0x24f   : > { %2412 = vmatprep.subr.bf16.mxu0 %v11738_v8 }
 0x252   : > { %2413 = vmatpush2.bf16.msra.mxu0 %v11736_v11  ;;  %v12146_v11 = vld [vmem:[#allocation2 + $0x8] sm:$0xff] }
 0x253   : > { %2414 = vmatprep.subr.bf16.mxu0 %v11744_v15  ;;  %v12147_v15 = vld [vmem:[#allocation2 + $0x28] sm:$0xff] }
 0x256   : > { %2415 = vmatpush2.bf16.msra.mxu0 %v11742_v18  ;;  %v12148_v18 = vld [vmem:[#allocation2 + $0x38] sm:$0xff] }
 0x257   : > { %2416 = vmatprep.subr.bf16.mxu0 %v11750_v20 }
 0x25a   : > { %2417 = vmatpush2.bf16.msra.mxu0 %v11748_v22  ;;  %v13267_v22 = vpop.f32.mrf.mxu1 }
 0x25b   : > { %2418 = vmatprep.subr.bf16.mxu0 %v11756_v24 }
 0x25c   : > { %v13269_v23 = vpop.f32.mrf.mxu1 }
 0x25e   : > { %2419 = vmatpush2.bf16.msra.mxu0 %v11754_v26  ;;  %v13271_v24 = vpop.f32.mrf.mxu1 }
 0x260   : > { %v13273_v25 = vpop.f32.mrf.mxu1 }
 0x262   : > { %v13275_v26 = vpop.f32.mrf.mxu1 }
 0x264   : > { %v13277_v27 = vpop.f32.mrf.mxu1 }
 0x2e1   : > { %v1890_v30 = vpop.f32.mrf.mxu0 }
 0x2e2   : > { %v1891_v33 = vadd.f32 %v1890_v30, %v1689_v29 }
 0x2e3   : > { %v1892_v31 = vpop.f32.mrf.mxu0 }
 0x2e4   : > { %v1893_v32 = vadd.f32 %v1892_v31, %v1693_v28  ;;  %v1909_v44 = vmul.f32 %v1891_v33, %v1116_v37  ;;  %v13291_v31 = vpop.f32.mrf.mxu1 }
 0x2e5   : > { %v1894_v36 = vpop.f32.mrf.mxu0 }
 0x2e6   : > { %v1895_v38 = vadd.f32 %v1894_v36, %v1689_v29  ;;  %v1910_v41 = vmul.f32 %v1893_v32, %v1117_v34  ;;  %v1917_v62 = vadd.f32 %v12144_v61, %v1909_v44  ;;  %v13295_v34 = vpop.f32.mrf.mxu1 }
 0x2e7   : > { %v1896_v40 = vpop.f32.mrf.mxu0 }
 0x2e8   : > { %v1911_v42 = vmul.f32 %v1895_v38, %v1118_v35  ;;  %v1897_v43 = vadd.f32 %v1896_v40, %v1693_v28  ;;  %v1918_v55 = vadd.f32 %v12142_v54, %v1910_v41 }
 0x2e9   : > { %v1900_v45 = vpop.f32.mrf.mxu0 }
 0x2ea   : > { %v1912_v46 = vmul.f32 %v1897_v43, %v1119_v39  ;;  %v1919_v48 = vadd.f32 %v12141_v47, %v1911_v42  ;;  %v1901_v50 = vadd.f32 %v1900_v45, %v1689_v29 }
 0x2eb   : > { %v1902_v53 = vpop.f32.mrf.mxu0 }
 0x2ec   : > { %v1920_v58 = vadd.f32 %v12143_v56, %v1912_v46  ;;  %v1903_v60 = vadd.f32 %v1902_v53, %v1693_v28  ;;  %v1990_v2 = vpack.c.bf16 %v1919_v48, %v1917_v62  ;;  %v1913_v57 = vmul.f32 %v1901_v50, %v1120_v59 }
 0x2ed   : > { %v1904_v63 = vpop.f32.mrf.mxu0  ;;  %v13356_v59 = vsub.s32 3, %v13195_v10 }
 0x2ee   : > { %v1914_v51 = vmul.f32 %v1903_v60, %v1121_v52  ;;  %v1905_v0 = vadd.f32 %v1904_v63, %v1689_v29  ;;  %v1991_v1 = vpack.c.bf16 %v1920_v58, %v1918_v55  ;;  %v1921_v13 = vadd.f32 %v12146_v11, %v1913_v57 }
 0x2ef   : > { %v1906_v4 = vpop.f32.mrf.mxu0  ;;  %v13287_v29 = vsub.s32 2, %v13195_v10  ;;  %16379 = vst [vmem:[#allocation45_spill] sm:$0xff] %v13356_v59  ;;  %v12609_v11 = vmov 1983009808  }
 0x2f0   : > { %v1915_v5 = vmul.f32 %v1905_v0, %v1122_v49  ;;  %v1907_v6 = vadd.f32 %v1906_v4, %v1693_v28  ;;  %2367 = vmatprep.mubr.bf16.mxu1 %v1991_v1  ;;  %2420 = vmatprep.mubr.bf16.mxu0 %v1991_v1  ;;  %v1922_v8 = vadd.f32 %v12145_v7, %v1914_v51  ;;  %v13284_v28 = vld [vmem:[%s1068_s10] sm:$0xf]  ;;  %s12607_s10 = smov 64  }
 0x2f1   : > { %2368 = vmatmul.mubr.bf16.vlgmr.msra.gmra.mxu1 %v1990_v2  ;;  %2421 = vmatmul.mubr.bf16.vlgmr.msra.gmra.mxu0 %v1990_v2  ;;  %16378 = vst [vmem:[#allocation44_spill] sm:$0xff] %v13287_v29  ;;  %v2006_v30 = vrot.slane %v13284_v28, %v13287_v29  ;;  %v1998_v39 = vrot.slane %v13284_v28, %v13203_v14 }
 0x2f2   : > { %v1916_v9 = vmul.f32 %v1907_v6, %v1123_v3  ;;  %v1923_v17 = vadd.f32 %v12147_v15, %v1915_v5  ;;  %v2010_v60 = vrot.slane %v13284_v28, %v13356_v59  ;;  %v2002_v63 = vrot.slane %v13284_v28, %v13199_v12 }
 0x2f3   : > { %v1205_v5 = vrot.slane %v13211_v16, %v13287_v29 }
 0x2f4   : > { %v1924_v19 = vadd.f32 %v12148_v18, %v1916_v9  ;;  %v1992_v21 = vpack.c.bf16 %v1923_v17, %v1921_v13  ;;  %v13459_v9 = vrot.slane %v13211_v16, %v13356_v59  ;;  %v2524_v13 = vunpack.c.l.s4 %v12609_v11 }
 0x2f5   : > { %v13433_v6 = vadd.f32 %v13291_v31, %v1205_v5  ;;  %v13440_v7 = vadd.f32 %v13275_v26, %v1205_v5  ;;  %v13466_v15 = vadd.f32 %v13271_v24, %v1205_v5 }
 0x2f6   : > { %v1993_v20 = vpack.c.bf16 %v1924_v19, %v1922_v8  ;;  %v13447_v8 = vadd.f32 %v13267_v22, %v1205_v5  ;;  %v13470_v17 = vadd.f32 %v13295_v34, %v13459_v9  ;;  %v2525_v16 = vunpack.c.0.s8 %v2524_v13 }
 0x2f7   : > { %16382 = vst [vmem:[#allocation48_spill] sm:$0xff] %v13433_v6  ;;  %16383 = vst [vmem:[#allocation49_spill] sm:$0xff] %v13440_v7  ;;  %v13478_v19 = vadd.f32 %v13277_v27, %v13459_v9  ;;  %v12610_v22 = vmov 1934713408   ;;  %v13489_v28 = vadd.f32 %v13269_v23, %v13459_v9 }
 0x2f8   : > { %2377 = vmatprep.mubr.bf16.mxu1 %v1993_v20  ;;  %2430 = vmatprep.mubr.bf16.mxu0 %v1993_v20  ;;  %16384 = vst [vmem:[#allocation50_spill] sm:$0xff] %v13447_v8  ;;  %16385 = vst [vmem:[#allocation51_spill] sm:$0xff] %v13466_v15  ;;  %v2588_v24 = vunpack.c.l.s4 %v12610_v22  ;;  %v13485_v26 = vsub.s32 %v2525_v16, %v13195_v10 }
 0x2f9   : > { %2378 = vmatmul.mubr.bf16.gmra.mxu1 %v1992_v21  ;;  %2431 = vmatmul.mubr.bf16.gmra.mxu0 %v1992_v21  ;;  %16386 = vst [vmem:[#allocation52_spill] sm:$0xff] %v13470_v17  ;;  %16387 = vst [vmem:[#allocation53_spill] sm:$0xff] %v13478_v19 }
 0x2fa   : > { %16388 = vst [vmem:[#allocation54_spill] sm:$0xff] %v13489_v28 }
 0x3b1   : > { %v2422_v32 = vpop.f32.mrf.mxu0  ;;  %v2369_v38 = vpop.f32.mrf.mxu1 }
 0x3b2   : > { %v13293_v33 = vadd.f32 %v2422_v32, %v2006_v30  ;;  %v13311_v42 = vadd.f32 %v2369_v38, %v1998_v39 }
 0x3b3   : > { %v2424_v35 = vpop.f32.mrf.mxu0  ;;  %v2371_v40 = vpop.f32.mrf.mxu1 }
 0x3b4   : > { %3629 = vrot.lane.b32.xlu0 %v13293_v33, %s12606_s21  ;;  %v13380_v49 = vadd.f32 %v2424_v35, %v2010_v60  ;;  %v13400_v2 = vadd.f32 %v2371_v40, %v2002_v63 }
 0x3b5   : > { %v2426_v36 = vpop.f32.mrf.mxu0  ;;  %v2373_v43 = vpop.f32.mrf.mxu1 }
 0x3b6   : > { %v13299_v37 = vadd.f32 %v2426_v36, %v2006_v30  ;;  %v13317_v45 = vadd.f32 %v2373_v43, %v1998_v39  ;;  %v2589_v36 = vunpack.c.0.s8 %v2588_v24 }
 0x3b7   : > { %v2428_v41 = vpop.f32.mrf.mxu0  ;;  %v2375_v52 = vpop.f32.mrf.mxu1 }
 0x3b8   : > { %3631 = vrot.lane.b32.xlu1 %v13299_v37, %s12606_s21  ;;  %3641 = vrot.lane.b32.xlu0 %v13293_v33, %s12607_s10  ;;  %v13370_v62 = vadd.f32 %v2428_v41, %v2010_v60  ;;  %v13388_v51 = vadd.f32 %v2375_v52, %v2002_v63  ;;  %v13510_v52 = vsub.s32 %v2589_v36, %v13195_v10 }
 0x3b9   : > { %v2432_v44 = vpop.f32.mrf.mxu0  ;;  %v2379_v53 = vpop.f32.mrf.mxu1 }
 0x3ba   : > { %v13319_v46 = vadd.f32 %v2432_v44, %v2006_v30  ;;  %v13343_v55 = vadd.f32 %v2379_v53, %v1998_v39 }
 0x3bb   : > { %v2434_v47 = vpop.f32.mrf.mxu0  ;;  %v2381_v54 = vpop.f32.mrf.mxu1 }
 0x3bc   : > { %3643 = vrot.lane.b32.xlu1 %v13299_v37, %s12607_s10  ;;  %3653 = vrot.lane.b32.xlu0 %v13293_v33, %s12608_s3  ;;  %v13364_v61 = vadd.f32 %v2434_v47, %v2010_v60  ;;  %v13414_v57 = vadd.f32 %v2381_v54, %v2002_v63 }
 0x3bd   : > { %v2436_v48 = vpop.f32.mrf.mxu0  ;;  %v2383_v56 = vpop.f32.mrf.mxu1 }
 0x3be   : > { %v13329_v50 = vadd.f32 %v2436_v48, %v2006_v30  ;;  %v13349_v58 = vadd.f32 %v2383_v56, %v1998_v39  ;;  %16380 = vst [vmem:[#allocation46_spill] sm:$0xff] %v13414_v57 }
 0x3bf   : > { %v2438_v0 = vpop.f32.mrf.mxu0  ;;  %v2385_v3 = vpop.f32.mrf.mxu1 }
 0x3c0   : > { %3655 = vrot.lane.b32.xlu1 %v13299_v37, %s12608_s3  ;;  %2445 = vrot.lane.b32.xlu0 %v13311_v42, %s12606_s21  ;;  %v13394_v1 = vadd.f32 %v2438_v0, %v2010_v60  ;;  %v13420_v4 = vadd.f32 %v2385_v3, %v2002_v63 }
 0x3c2   : > { %16381 = vst [vmem:[#allocation47_spill] sm:$0xff] %v13420_v4 }
 0x3c4   : > { %2447 = vrot.lane.b32.xlu1 %v13317_v45, %s12606_s21  ;;  %3633 = vrot.lane.b32.xlu0 %v13319_v46, %s12606_s21 }
 0x3c8   : > { %3645 = vrot.lane.b32.xlu1 %v13319_v46, %s12607_s10  ;;  %3657 = vrot.lane.b32.xlu0 %v13319_v46, %s12608_s3 }
 0x3cc   : > { %3647 = vrot.lane.b32.xlu1 %v13329_v50, %s12607_s10  ;;  %3635 = vrot.lane.b32.xlu0 %v13329_v50, %s12606_s21 }
 0x3d0   : > { %3659 = vrot.lane.b32.xlu1 %v13329_v50, %s12608_s3  ;;  %2457 = vrot.lane.b32.xlu0 %v13311_v42, %s12607_s10 }
 0x3d4   : > { %2459 = vrot.lane.b32.xlu1 %v13317_v45, %s12607_s10  ;;  %2469 = vrot.lane.b32.xlu0 %v13311_v42, %s12608_s3 }
 0x3d8   : > { %2471 = vrot.lane.b32.xlu1 %v13317_v45, %s12608_s3  ;;  %2449 = vrot.lane.b32.xlu0 %v13343_v55, %s12606_s21 }
 0x3dc   : > { %2451 = vrot.lane.b32.xlu1 %v13349_v58, %s12606_s21  ;;  %2461 = vrot.lane.b32.xlu0 %v13343_v55, %s12607_s10 }
 0x3e0   : > { %2463 = vrot.lane.b32.xlu1 %v13349_v58, %s12607_s10  ;;  %2473 = vrot.lane.b32.xlu0 %v13343_v55, %s12608_s3 }
 0x3e4   : > { %2475 = vrot.lane.b32.xlu1 %v13349_v58, %s12608_s3  ;;  %3673 = vrot.lane.b32.xlu0 %v13364_v61, %s12606_s21 }
 0x3e8   : > { %3671 = vrot.lane.b32.xlu1 %v13370_v62, %s12606_s21  ;;  %3685 = vrot.lane.b32.xlu0 %v13364_v61, %s12607_s10 }
 0x3ec   : > { %3683 = vrot.lane.b32.xlu1 %v13370_v62, %s12607_s10  ;;  %3697 = vrot.lane.b32.xlu0 %v13364_v61, %s12608_s3 }
 0x3f0   : > { %3695 = vrot.lane.b32.xlu1 %v13370_v62, %s12608_s3  ;;  %3669 = vrot.lane.b32.xlu0 %v13380_v49, %s12606_s21 }
 0x3f4   : > { %2487 = vrot.lane.b32.xlu1 %v13388_v51, %s12606_s21  ;;  %3681 = vrot.lane.b32.xlu0 %v13380_v49, %s12607_s10 }
 0x3f8   : > { %3675 = vrot.lane.b32.xlu1 %v13394_v1, %s12606_s21  ;;  %3693 = vrot.lane.b32.xlu0 %v13380_v49, %s12608_s3 }
 0x3fc   : > { %3687 = vrot.lane.b32.xlu1 %v13394_v1, %s12607_s10  ;;  %2485 = vrot.lane.b32.xlu0 %v13400_v2, %s12606_s21 }
 0x400   : > { %3699 = vrot.lane.b32.xlu1 %v13394_v1, %s12608_s3  ;;  %2497 = vrot.lane.b32.xlu0 %v13400_v2, %s12607_s10 }
 0x404   : > { %2499 = vrot.lane.b32.xlu1 %v13388_v51, %s12607_s10  ;;  %2509 = vrot.lane.b32.xlu0 %v13400_v2, %s12608_s3 }
 0x408   : > { %2511 = vrot.lane.b32.xlu1 %v13388_v51, %s12608_s3  ;;  %2489 = vrot.lane.b32.xlu0 %v13414_v57, %s12606_s21 }
 0x40c   : > { %2491 = vrot.lane.b32.xlu1 %v13420_v4, %s12606_s21  ;;  %2501 = vrot.lane.b32.xlu0 %v13414_v57, %s12607_s10 }
 0x410   : > { %2503 = vrot.lane.b32.xlu1 %v13420_v4, %s12607_s10  ;;  %2513 = vrot.lane.b32.xlu0 %v13414_v57, %s12608_s3 }
 0x414   : > { %2515 = vrot.lane.b32.xlu1 %v13420_v4, %s12608_s3  ;;  %4819 = vrot.lane.b32.xlu0 %v13433_v6, %s12606_s21 }
 0x418   : > { %4817 = vrot.lane.b32.xlu1 %v13440_v7, %s12606_s21  ;;  %4841 = vrot.lane.b32.xlu0 %v13440_v7, %s12608_s3 }
 0x41c   : > { %4829 = vrot.lane.b32.xlu1 %v13440_v7, %s12607_s10  ;;  %4813 = vrot.lane.b32.xlu0 %v13447_v8, %s12606_s21 }
 0x420   : > { %4831 = vrot.lane.b32.xlu1 %v13433_v6, %s12607_s10  ;;  %4825 = vrot.lane.b32.xlu0 %v13447_v8, %s12607_s10 }
 0x424   : > { %4843 = vrot.lane.b32.xlu1 %v13433_v6, %s12608_s3  ;;  %4837 = vrot.lane.b32.xlu0 %v13447_v8, %s12608_s3 }
 0x426   : > { %v3630_v18 = vpop.permute.xlu0 %3629 }
 0x428   : > { %4815 = vrot.lane.b32.xlu1 %v13466_v15, %s12606_s21  ;;  %4859 = vrot.lane.b32.xlu0 %v13470_v17, %s12606_s21 }
 0x42a   : > { %v3632_v20 = vpop.permute.xlu1 %3631  ;;  %v3642_v21 = vpop.permute.xlu0 %3641 }
 0x42b   : > { %v3705_v31 = vcombine.low %v13293_v33, %v3642_v21  ;;  %v3706_v32 = vcombine.high %v13293_v33, %v3642_v21 }
 0x42c   : > { %4827 = vrot.lane.b32.xlu1 %v13466_v15, %s12607_s10  ;;  %4881 = vrot.lane.b32.xlu0 %v13478_v19, %s12608_s3 }
 0x42d   : > { %v3713_v33 = vrot.slane %v3705_v31, %v13485_v26  ;;  %v3720_v43 = vrot.slane %v3706_v32, %v13485_v26 }
 0x42e   : > { %v3644_v30 = vpop.permute.xlu1 %3643  ;;  %v3654_v27 = vpop.permute.xlu0 %3653 }
 0x42f   : > { %v3721_v34 = vcombine.low %v3630_v18, %v3654_v27  ;;  %v3722_v35 = vcombine.high %v3630_v18, %v3654_v27  ;;  %v3841_v38 = vcombine.low %v13299_v37, %v3644_v30  ;;  %v3842_v44 = vcombine.high %v13299_v37, %v3644_v30 }
 0x430   : > { %4839 = vrot.lane.b32.xlu1 %v13466_v15, %s12608_s3  ;;  %4853 = vrot.lane.b32.xlu0 %v13489_v28, %s12606_s21 }
 0x431   : > { %v3729_v23 = vrot.slane %v3721_v34, %v13485_v26  ;;  %v3736_v39 = vrot.slane %v3722_v35, %v13485_v26  ;;  %v3849_v53 = vrot.slane %v3841_v38, %v13485_v26  ;;  %v3856_v11 = vrot.slane %v3842_v44, %v13485_v26 }
 0x432   : > { %v3656_v40 = vpop.permute.xlu1 %3655  ;;  %v13500_v41 = vpop.permute.xlu0 %2445 }
 0x433   : > { %v3857_v47 = vcombine.low %v3632_v20, %v3656_v40  ;;  %v3858_v48 = vcombine.high %v3632_v20, %v3656_v40  ;;  %v3769_v54 = vcombine.low %v3713_v33, %v3729_v23  ;;  %v3770_v56 = vcombine.high %v3713_v33, %v3729_v23 }
 0x434   : > { %4857 = vrot.lane.b32.xlu1 %v13478_v19, %s12606_s21  ;;  %4865 = vrot.lane.b32.xlu0 %v13489_v28, %s12607_s10  ;;  %v3785_v60 = vcombine.low %v3720_v43, %v3736_v39  ;;  %v3786_v63 = vcombine.high %v3720_v43, %v3736_v39 }
 0x435   : > { %v3865_v0 = vrot.slane %v3857_v47, %v13485_v26  ;;  %v3872_v37 = vrot.slane %v3858_v48, %v13485_v26  ;;  %v3777_v10 = vrot.slane %v3769_v54, %v13510_v52  ;;  %v3784_v16 = vrot.slane %v3770_v56, %v13510_v52 }
 0x436   : > { %v13515_v3 = vpop.permute.xlu1 %2447  ;;  %v3634_v5 = vpop.permute.xlu0 %3633  ;;  %v3793_v20 = vrot.slane %v3785_v60, %v13510_v52  ;;  %v3800_v21 = vrot.slane %v3786_v63, %v13510_v52 }
 0x437   : > { %v3905_v13 = vcombine.low %v3849_v53, %v3865_v0  ;;  %v3906_v18 = vcombine.high %v3849_v53, %v3865_v0  ;;  %v3921_v22 = vcombine.low %v3856_v11, %v3872_v37  ;;  %v3922_v24 = vcombine.high %v3856_v11, %v3872_v37 }
 0x438   : > { %4869 = vrot.lane.b32.xlu1 %v13478_v19, %s12607_s10  ;;  %v10767_v23 = vcombine.low %v3777_v10, %v3784_v16  ;;  %v10769_v39 = vcombine.high %v3777_v10, %v3784_v16  ;;  %v10771_v48 = vcombine.low %v3793_v20, %v3800_v21  ;;  %v10773_v53 = vcombine.high %v3793_v20, %v3800_v21 }
 0x439   : > { %v3913_v36 = vrot.slane %v3905_v13, %v13510_v52  ;;  %v3920_v38 = vrot.slane %v3906_v18, %v13510_v52  ;;  %v3929_v54 = vrot.slane %v3921_v22, %v13510_v52  ;;  %v3936_v56 = vrot.slane %v3922_v24, %v13510_v52 }
 0x43a   : > { %v3646_v30 = vpop.permute.xlu1 %3645  ;;  %v3658_v27 = vpop.permute.xlu0 %3657  ;;  %v13539_v0 = vrot.slane %v10767_v23, %v13485_v26  ;;  %v13542_v37 = vrot.slane %v10769_v39, %v13485_v26  ;;  %v13546_v13 = vadd.f32 %v13273_v25, %v13459_v9  ;;  %v13550_v22 = vrot.slane %v10771_v48, %v13485_v26 }
 0x43b   : > { %v3977_v31 = vcombine.low %v13319_v46, %v3646_v30  ;;  %v3978_v32 = vcombine.high %v13319_v46, %v3646_v30  ;;  %v3993_v34 = vcombine.low %v3634_v5, %v3658_v27  ;;  %v3994_v35 = vcombine.high %v3634_v5, %v3658_v27 }
 0x43c   : > { %4871 = vrot.lane.b32.xlu1 %v13470_v17, %s12607_s10  ;;  %v10775_v60 = vcombine.low %v3913_v36, %v3920_v38  ;;  %v10777_v63 = vcombine.high %v3913_v36, %v3920_v38  ;;  %16389 = vst [vmem:[#allocation55_spill] sm:$0xff] %v13539_v0  ;;  %16390 = vst [vmem:[#allocation56_spill] sm:$0xff] %v13542_v37  ;;  %v13553_v24 = vrot.slane %v10773_v53, %v13485_v26 }
 0x43d   : > { %v3985_v40 = vrot.slane %v3977_v31, %v13485_v26  ;;  %v4001_v33 = vrot.slane %v3993_v34, %v13485_v26  ;;  %v3992_v43 = vrot.slane %v3978_v32, %v13485_v26  ;;  %v4008_v44 = vrot.slane %v3994_v35, %v13485_v26  ;;  %16391 = vst [vmem:[#allocation57_spill] sm:$0xff] %v13546_v13 }
 0x43e   : > { %v3648_v46 = vpop.permute.xlu1 %3647  ;;  %v3636_v47 = vpop.permute.xlu0 %3635  ;;  %16392 = vst [vmem:[#allocation58_spill] sm:$0xff] %v13550_v22  ;;  %16393 = vst [vmem:[#allocation59_spill] sm:$0xff] %v13553_v24  ;;  %v10779_v30 = vcombine.low %v3929_v54, %v3936_v56  ;;  %v10781_v27 = vcombine.high %v3929_v54, %v3936_v56  ;;  %v13556_v31 = vrot.slane %v10775_v60, %v13485_v26 }
 0x43f   : > { %v4041_v5 = vcombine.low %v3985_v40, %v4001_v33  ;;  %v4042_v11 = vcombine.high %v3985_v40, %v4001_v33  ;;  %v4057_v18 = vcombine.low %v3992_v43, %v4008_v44  ;;  %v4058_v10 = vcombine.high %v3992_v43, %v4008_v44 }
 0x440   : > { %4883 = vrot.lane.b32.xlu1 %v13470_v17, %s12608_s3  ;;  %v4113_v16 = vcombine.low %v13329_v50, %v3648_v46  ;;  %16394 = vst [vmem:[#allocation60_spill] sm:$0xff] %v13556_v31  ;;  %v13559_v25 = vrot.slane %v10777_v63, %v13485_v26  ;;  %v4114_v36 = vcombine.high %v13329_v50, %v3648_v46 }
 0x441   : > { %v4049_v34 = vrot.slane %v4041_v5, %v13510_v52  ;;  %v4056_v35 = vrot.slane %v4042_v11, %v13510_v52  ;;  %v4313_v38 = vcombine.low %v13539_v0, %v13542_v37  ;;  %v4065_v23 = vrot.slane %v4057_v18, %v13510_v52 }
 0x442   : > { %v3660_v20 = vpop.permute.xlu1 %3659  ;;  %v2458_v21 = vpop.permute.xlu0 %2457  ;;  %16395 = vst [vmem:[#allocation61_spill] sm:$0xff] %v13559_v25  ;;  %v4072_v39 = vrot.slane %v4058_v10, %v13510_v52  ;;  %v4121_v40 = vrot.slane %v4113_v16, %v13485_v26  ;;  %v13577_v46 = vrot.slane %v10779_v30, %v13485_v26  ;;  %v4128_v5 = vrot.slane %v4114_v36, %v13485_v26 }
 0x443   : > { %v4129_v9 = vcombine.low %v3636_v47, %v3660_v20  ;;  %v4130_v32 = vcombine.high %v3636_v47, %v3660_v20  ;;  %v2521_v48 = vcombine.low %v13311_v42, %v2458_v21  ;;  %v2522_v60 = vcombine.high %v13311_v42, %v2458_v21 }
 0x444   : > { %4855 = vrot.lane.b32.xlu1 %v13546_v13, %s12606_s21  ;;  %16396 = vst [vmem:[#allocation62_spill] sm:$0xff] %v13577_v46  ;;  %v10783_v63 = vcombine.low %v4049_v34, %v4056_v35  ;;  %v4345_v18 = vcombine.low %v13550_v22, %v13553_v24  ;;  %v10785_v10 = vcombine.high %v4049_v34, %v4056_v35 }
 0x445   : > { %v4137_v33 = vrot.slane %v4129_v9, %v13485_v26  ;;  %v4144_v47 = vrot.slane %v4130_v32, %v13485_v26  ;;  %v13591_v42 = vrot.slane %v4313_v38, %v13510_v52  ;;  %v10787_v21 = vcombine.low %v4065_v23, %v4072_v39 }
 0x446   : > { %v2460_v43 = vpop.permute.xlu1 %2459  ;;  %v2470_v44 = vpop.permute.xlu0 %2469  ;;  %v10789_v9 = vcombine.high %v4065_v23, %v4072_v39  ;;  %v2529_v36 = vrot.slane %v2521_v48, %v13485_v26  ;;  %v13598_v34 = vrot.slane %v10783_v63, %v13485_v26  ;;  %v13602_v38 = vrot.slane %v4345_v18, %v13510_v52 }
 0x447   : > { %v2537_v53 = vcombine.low %v13500_v41, %v2470_v44  ;;  %v2538_v50 = vcombine.high %v13500_v41, %v2470_v44  ;;  %v4177_v54 = vcombine.low %v4121_v40, %v4137_v33  ;;  %v4178_v56 = vcombine.high %v4121_v40, %v4137_v33 }
 0x448   : > { %4867 = vrot.lane.b32.xlu1 %v13546_v13, %s12607_s10  ;;  %v13587_v41 = vrot.slane %v10781_v27, %v13485_v26  ;;  %v4193_v32 = vcombine.low %v4128_v5, %v4144_v47  ;;  %v4194_v44 = vcombine.high %v4128_v5, %v4144_v47  ;;  %v2536_v27 = vrot.slane %v2522_v60, %v13485_v26 }
 0x449   : > { %v2545_v11 = vrot.slane %v2537_v53, %v13485_v26  ;;  %v2552_v16 = vrot.slane %v2538_v50, %v13485_v26  ;;  %v4185_v40 = vrot.slane %v4177_v54, %v13510_v52  ;;  %v4192_v33 = vrot.slane %v4178_v56, %v13510_v52 }
 0x44a   : > { %16397 = vst [vmem:[#allocation63_spill] sm:$0xff] %v13587_v41  ;;  %v2472_v20 = vpop.permute.xlu1 %2471  ;;  %v2450_v30 = vpop.permute.xlu0 %2449  ;;  %v2657_v35 = vcombine.low %v13317_v45, %v2460_v43  ;;  %v13605_v23 = vrot.slane %v10785_v10, %v13485_v26  ;;  %v13610_v56 = vrot.slane %v10787_v21, %v13485_v26  ;;  %v13613_v60 = vrot.slane %v10789_v9, %v13485_v26 }
 0x44b   : > { %v2585_v53 = vcombine.low %v2529_v36, %v2545_v11  ;;  %v2586_v39 = vcombine.high %v2529_v36, %v2545_v11  ;;  %v2601_v48 = vcombine.low %v2536_v27, %v2552_v16  ;;  %v2602_v50 = vcombine.high %v2536_v27, %v2552_v16 }
 0x44c   : > { %v4201_v63 = vrot.slane %v4193_v32, %v13510_v52  ;;  %v2658_v5 = vcombine.high %v13317_v45, %v2460_v43  ;;  %v4208_v18 = vrot.slane %v4194_v44, %v13510_v52  ;;  %v10791_v10 = vcombine.low %v4185_v40, %v4192_v33 }
 0x44d   : > { %v10793_v29 = vcombine.high %v4185_v40, %v4192_v33  ;;  %v2673_v11 = vcombine.low %v13515_v3, %v2472_v20  ;;  %v2665_v16 = vrot.slane %v2657_v35, %v13485_v26  ;;  %v2593_v36 = vrot.slane %v2585_v53, %v13510_v52 }
 0x44e   : > { %v13607_v54 = vpop.permute.xlu1 %2451  ;;  %v2462_v47 = vpop.permute.xlu0 %2461  ;;  %v2674_v21 = vcombine.high %v13515_v3, %v2472_v20  ;;  %v2600_v9 = vrot.slane %v2586_v39, %v13510_v52  ;;  %v13625_v32 = vrot.slane %v2601_v48, %v13510_v52  ;;  %v13628_v45 = vrot.slane %v2602_v50, %v13510_v52 }
 0x44f   : > { %v2793_v27 = vcombine.low %v13343_v55, %v2462_v47  ;;  %v2794_v43 = vcombine.high %v13343_v55, %v2462_v47  ;;  %v2672_v44 = vrot.slane %v2658_v5, %v13485_v26  ;;  %v2681_v35 = vrot.slane %v2673_v11, %v13485_v26 }
 0x450   : > { %v13634_v20 = vrot.slane %v10791_v10, %v13485_v26  ;;  %v13637_v39 = vrot.slane %v10793_v29, %v13485_v26  ;;  %v10795_v48 = vcombine.low %v4201_v63, %v4208_v18  ;;  %v10797_v59 = vcombine.high %v4201_v63, %v4208_v18 }
 0x451   : > { %v2688_v50 = vrot.slane %v2674_v21, %v13485_v26  ;;  %v2801_v55 = vrot.slane %v2793_v27, %v13485_v26  ;;  %v10735_v12 = vcombine.low %v2593_v36, %v2600_v9  ;;  %v10737_v11 = vcombine.high %v2593_v36, %v2600_v9 }
 0x452   : > { %v2464_v40 = vpop.permute.xlu1 %2463  ;;  %v2474_v33 = vpop.permute.xlu0 %2473  ;;  %v2808_v10 = vrot.slane %v2794_v43, %v13485_v26  ;;  %v2721_v29 = vcombine.low %v2665_v16, %v2681_v35  ;;  %v2722_v14 = vcombine.high %v2665_v16, %v2681_v35  ;;  %v13647_v18 = vrot.slane %v10795_v48, %v13485_v26 }
 0x453   : > { %v2809_v53 = vcombine.low %v2450_v30, %v2474_v33  ;;  %v2810_v3 = vcombine.high %v2450_v30, %v2474_v33  ;;  %v10739_v30 = vcombine.low %v13625_v32, %v13628_v45  ;;  %v2929_v21 = vcombine.low %v13349_v58, %v2464_v40 }
 0x454   : > { %v2737_v36 = vcombine.low %v2672_v44, %v2688_v50  ;;  %v2738_v9 = vcombine.high %v2672_v44, %v2688_v50  ;;  %v13655_v17 = vrot.slane %v10797_v59, %v13485_v26  ;;  %v13658_v16 = vrot.slane %v10735_v12, %v13485_v26 }
 0x455   : > { %v2817_v47 = vrot.slane %v2809_v53, %v13485_v26  ;;  %v2824_v5 = vrot.slane %v2810_v3, %v13485_v26  ;;  %v13661_v35 = vrot.slane %v10737_v11, %v13485_v26  ;;  %v10741_v48 = vcombine.high %v13625_v32, %v13628_v45 }
 0x456   : > { %v2476_v33 = vpop.permute.xlu1 %2475  ;;  %v13650_v3 = vpop.permute.xlu0 %3673  ;;  %v13668_v44 = vrot.slane %v10739_v30, %v13485_v26  ;;  %v2736_v50 = vrot.slane %v2722_v14, %v13510_v52  ;;  %v2930_v59 = vcombine.high %v13349_v58, %v2464_v40  ;;  %v2745_v32 = vrot.slane %v2737_v36, %v13510_v52 }
 0x457   : > { %v2857_v28 = vcombine.low %v2801_v55, %v2817_v47  ;;  %v2858_v63 = vcombine.high %v2801_v55, %v2817_v47  ;;  %v2873_v27 = vcombine.low %v2808_v10, %v2824_v5  ;;  %v2874_v53 = vcombine.high %v2808_v10, %v2824_v5 }
 0x458   : > { %v2945_v5 = vcombine.low %v13607_v54, %v2476_v33  ;;  %v2946_v11 = vcombine.high %v13607_v54, %v2476_v33  ;;  %v2752_v45 = vrot.slane %v2738_v9, %v13510_v52  ;;  %v2937_v30 = vrot.slane %v2929_v21, %v13485_v26 }
 0x459   : > { %v2865_v13 = vrot.slane %v2857_v28, %v13510_v52  ;;  %v2872_v43 = vrot.slane %v2858_v63, %v13510_v52  ;;  %v2729_v28 = vrot.slane %v2721_v29, %v13510_v52  ;;  %v2881_v12 = vrot.slane %v2873_v27, %v13510_v52 }
 0x45a   : > { %v13665_v55 = vpop.permute.xlu1 %3671  ;;  %v2888_v47 = vrot.slane %v2874_v53, %v13510_v52  ;;  %v2953_v14 = vrot.slane %v2945_v5, %v13485_v26  ;;  %v2960_v58 = vrot.slane %v2946_v11, %v13485_v26  ;;  %v4585_v40 = vcombine.low %v13598_v34, %v13605_v23  ;;  %v13684_v63 = vpop.permute.xlu0 %3685 }
 0x45b   : > { %v10751_v10 = vcombine.low %v2865_v13, %v2872_v43  ;;  %v10753_v29 = vcombine.high %v2865_v13, %v2872_v43  ;;  %v10743_v54 = vcombine.low %v2729_v28, %v2736_v50  ;;  %v10745_v33 = vcombine.high %v2729_v28, %v2736_v50 }
 0x45c   : > { %v2944_v53 = vrot.slane %v2930_v59, %v13485_v26  ;;  %v4617_v21 = vcombine.low %v13610_v56, %v13613_v60  ;;  %v10755_v36 = vcombine.low %v2881_v12, %v2888_v47  ;;  %v10757_v13 = vcombine.high %v2881_v12, %v2888_v47 }
 0x45d   : > { %v2993_v9 = vcombine.low %v2937_v30, %v2953_v14  ;;  %v2994_v43 = vcombine.high %v2937_v30, %v2953_v14  ;;  %v10747_v5 = vcombine.low %v2745_v32, %v2752_v45  ;;  %v10749_v11 = vcombine.high %v2745_v32, %v2752_v45 }
 0x45e   : > { %v13686_v27 = vpop.permute.xlu1 %3683  ;;  %v13692_v19 = vrot.slane %v10751_v10, %v13485_v26  ;;  %v4721_v15 = vcombine.low %v13634_v20, %v13637_v39  ;;  %v13697_v8 = vrot.slane %v10753_v29, %v13485_v26  ;;  %v3009_v28 = vcombine.low %v2944_v53, %v2960_v58 }
 0x45f   : > { %v3010_v50 = vcombine.high %v2944_v53, %v2960_v58  ;;  %v13700_v59 = vrot.slane %v4585_v40, %v13510_v52  ;;  %v13705_v47 = vrot.slane %v4617_v21, %v13510_v52  ;;  %v4753_v45 = vcombine.low %v13647_v18, %v13655_v17  ;;  %v3698_v40 = vpop.permute.xlu0 %3697 }
 0x460   : > { %16398 = vst [vmem:[#allocation64_spill] sm:$0xff] %v13692_v19  ;;  %16399 = vst [vmem:[#allocation65_spill] sm:$0xff] %v13697_v8  ;;  %v13708_v32 = vrot.slane %v4721_v15, %v13510_v52  ;;  %v4449_v30 = vcombine.low %v13556_v31, %v13559_v25  ;;  %v13715_v10 = vrot.slane %v10755_v36, %v13485_v26 }
 0x461   : > { %v13718_v29 = vrot.slane %v10757_v13, %v13485_v26  ;;  %v3001_v14 = vrot.slane %v2993_v9, %v13510_v52  ;;  %v3008_v58 = vrot.slane %v2994_v43, %v13510_v52  ;;  %v13723_v15 = vrot.slane %v10741_v48, %v13485_v26 }
 0x462   : > { %v13702_v12 = vpop.permute.xlu1 %3695  ;;  %v13726_v53 = vrot.slane %v4753_v45, %v13510_v52  ;;  %v13729_v21 = vrot.slane %v4449_v30, %v13510_v52  ;;  %v4481_v36 = vcombine.low %v13577_v46, %v13587_v41  ;;  %v13734_v13 = vrot.slane %v10743_v54, %v13485_v26 }
 0x463   : > { %16400 = vst [vmem:[#allocation66_spill] sm:$0xff] %v13718_v29  ;;  %v13737_v9 = vrot.slane %v10745_v33, %v13485_v26  ;;  %v3017_v43 = vrot.slane %v3009_v28, %v13510_v52  ;;  %v3024_v48 = vrot.slane %v3010_v50, %v13510_v52  ;;  %v13742_v6 = vrot.slane %v10747_v5, %v13485_v26  ;;  %v13769_v25 = vpop.permute.xlu0 %3669 }
 0x464   : > { %16401 = vst [vmem:[#allocation67_spill] sm:$0xff] %v13734_v13  ;;  %v4649_v45 = vcombine.low %v13700_v59, %v13705_v47  ;;  %v4785_v30 = vcombine.low %v13708_v32, %v13726_v53  ;;  %v13749_v7 = vrot.slane %v4481_v36, %v13510_v52  ;;  %v13754_v33 = vrot.slane %v10749_v11, %v13485_v26 }
 0x465   : > { %16402 = vst [vmem:[#allocation68_spill] sm:$0xff] %v13737_v9  ;;  %16403 = vst [vmem:[#allocation69_spill] sm:$0xff] %v13742_v6  ;;  %v10759_v50 = vcombine.low %v3001_v14, %v3008_v58  ;;  %v4377_v57 = vcombine.low %v13591_v42, %v13602_v38  ;;  %v4009_v46 = vcombine.low %v13364_v61, %v13684_v63 }
 0x466   : > { %v13751_v54 = vpop.permute.xlu1 %2487  ;;  %16404 = vst [vmem:[#allocation70_spill] sm:$0xff] %v13754_v33  ;;  %v4794_v4 = vpack.c.bf16 %v4785_v30, %v4649_v45  ;;  %v4513_v36 = vcombine.low %v13729_v21, %v13749_v7  ;;  %v10761_v41 = vcombine.high %v3001_v14, %v3008_v58  ;;  %v10763_v11 = vcombine.low %v3017_v43, %v3024_v48 }
 0x467   : > { %v4010_v31 = vcombine.high %v13364_v61, %v13684_v63  ;;  %v4025_v28 = vcombine.low %v13650_v3, %v3698_v40  ;;  %v10765_v5 = vcombine.high %v3017_v43, %v3024_v48  ;;  %v4026_v22 = vcombine.high %v13650_v3, %v3698_v40  ;;  %v13812_v37 = vpop.permute.xlu0 %3681 }
 0x468   : > { %11267 = vmatprep.subr.msk.bf16.mxu1 %vm5993_vm0, %v4794_v4  ;;  %v6004_v45 = vsel %vm5993_vm0, %v4794_v4, 0  ;;  %v4793_v30 = vpack.c.bf16 %v4513_v36, %v4377_v57  ;;  %v13775_v24 = vrot.slane %v10759_v50, %v13485_v26  ;;  %v3129_v61 = vcombine.low %v13658_v16, %v13661_v35 }
 0x469   : > { %11140 = vmatpush3.bf16.xpose.msra.mxu1 %v6004_v45  ;;  %v4033_v14 = vrot.slane %v4025_v28, %v13485_v26  ;;  %v3161_v63 = vcombine.low %v13668_v44, %v13723_v15  ;;  %v4017_v58 = vrot.slane %v4009_v46, %v13485_v26  ;;  %v4040_v57 = vrot.slane %v4026_v22, %v13485_v26 }
 0x46a   : > { %11268 = vmatprep.subr.msk.bf16.mxu1 %vm5993_vm0, %v4793_v30  ;;  %v3265_v4 = vcombine.low %v13734_v13, %v13737_v9  ;;  %v3297_v3 = vcombine.low %v13742_v6, %v13754_v33  ;;  %v13789_v40 = vpop.permute.xlu1 %3675  ;;  %v13792_v43 = vrot.slane %v10761_v41, %v13485_v26  ;;  %v4024_v48 = vrot.slane %v4010_v31, %v13485_v26 }
 0x46b   : > { %v13796_v28 = vrot.slane %v3129_v61, %v13510_v52  ;;  %v13799_v46 = vrot.slane %v3161_v63, %v13510_v52  ;;  %v13802_v22 = vrot.slane %v10763_v11, %v13485_v26  ;;  %v4073_v50 = vcombine.low %v4017_v58, %v4033_v14 }
 0x46c   : > { %v13805_v36 = vrot.slane %v3265_v4, %v13510_v52  ;;  %v13808_v45 = vrot.slane %v3297_v3, %v13510_v52  ;;  %v3873_v41 = vcombine.low %v13370_v62, %v13686_v27  ;;  %v4074_v31 = vcombine.high %v4017_v58, %v4033_v14 }
 0x46d   : > { %v4089_v0 = vcombine.low %v4024_v48, %v4040_v57  ;;  %v4090_v61 = vcombine.high %v4024_v48, %v4040_v57  ;;  %v3193_v63 = vcombine.low %v13796_v28, %v13799_v46  ;;  %v4650_v4 = vcombine.high %v13700_v59, %v13705_v47 }
 0x46e   : > { %v3329_v11 = vcombine.low %v13805_v36, %v13808_v45  ;;  %v4786_v3 = vcombine.high %v13708_v32, %v13726_v53  ;;  %v13823_v6 = vrot.slane %v10765_v5, %v13485_v26  ;;  %v3874_v14 = vcombine.high %v13370_v62, %v13686_v27  ;;  %v13833_v13 = vpop.permute.xlu1 %3687 }
 0x46f   : > { %v3889_v58 = vcombine.low %v13665_v55, %v13702_v12  ;;  %v3890_v57 = vcombine.high %v13665_v55, %v13702_v12  ;;  %v4081_v48 = vrot.slane %v4073_v50, %v13510_v52  ;;  %v6001_v59 = vsel %vm5993_vm0, %v4793_v30, 0 }
 0x470   : > { %v3609_v33 = vpack.c.bf16 %v3329_v11, %v3193_v63  ;;  %v4796_v47 = vpack.c.bf16 %v4786_v3, %v4650_v4  ;;  %v4088_v32 = vrot.slane %v4074_v31, %v13510_v52  ;;  %v4097_v53 = vrot.slane %v4089_v0, %v13510_v52 }
 0x471   : > { %v4104_v62 = vrot.slane %v4090_v61, %v13510_v52  ;;  %11142 = vmatpush3.bf16.xpose.msra.mxu1 %v6001_v59  ;;  %v3897_v27 = vrot.slane %v3889_v58, %v13485_v26  ;;  %v3881_v12 = vrot.slane %v3873_v41, %v13485_v26  ;;  %v3904_v5 = vrot.slane %v3890_v57, %v13485_v26 }
 0x472   : > { %11143 = vmatprep.mubr.msk.bf16.mxu1 %vm5993_vm0, %v3609_v33  ;;  %11269 = vmatprep.subr.msk.bf16.mxu1 %vm5993_vm0, %v4796_v47  ;;  %v16405_v0 = vcombine.low %v13692_v19, %v13697_v8  ;;  %v3537_v31 = vcombine.low %v13775_v24, %v13792_v43  ;;  %v3569_v41 = vcombine.low %v13802_v22, %v13823_v6  ;;  %v3694_v33 = vpop.permute.xlu0 %3693  ;;  %v3700_v9 = vpop.permute.xlu1 %3699 }
 0x473   : > { %v16406_v61 = vcombine.low %v13715_v10, %v13718_v29  ;;  %v3888_v11 = vrot.slane %v3874_v14, %v13485_v26  ;;  %v3937_v4 = vcombine.low %v3881_v12, %v3897_v27  ;;  %v3938_v3 = vcombine.high %v3881_v12, %v3897_v27 }
 0x474   : > { %v13849_v30 = vrot.slane %v16405_v0, %v13510_v52  ;;  %v10784_v58 = vcombine.low %v4081_v48, %v4088_v32  ;;  %v10786_v57 = vcombine.high %v4081_v48, %v4088_v32  ;;  %v10788_v59 = vcombine.low %v4097_v53, %v4104_v62 }
 0x475   : > { %v13861_v63 = vrot.slane %v16406_v61, %v13510_v52  ;;  %v10790_v0 = vcombine.high %v4097_v53, %v4104_v62  ;;  %v3953_v55 = vcombine.low %v3888_v11, %v3904_v5  ;;  %v3954_v8 = vcombine.high %v3888_v11, %v3904_v5 }
 0x476   : > { %v3753_v19 = vcombine.low %v13769_v25, %v3694_v33  ;;  %v13868_v29 = vrot.slane %v3537_v31, %v13510_v52  ;;  %v13873_v27 = vrot.slane %v3569_v41, %v13510_v52  ;;  %v3754_v48 = vcombine.high %v13769_v25, %v3694_v33  ;;  %v13894_v33 = vpop.permute.xlu0 %2485 }
 0x477   : > { %v3945_v32 = vrot.slane %v3937_v4, %v13510_v52  ;;  %v3952_v53 = vrot.slane %v3938_v3, %v13510_v52  ;;  %v3737_v62 = vcombine.low %v13380_v49, %v13812_v37  ;;  %v3738_v12 = vcombine.high %v13380_v49, %v13812_v37 }
 0x478   : > { %v13883_v5 = vrot.slane %v10784_v58, %v13485_v26  ;;  %v13886_v31 = vrot.slane %v10786_v57, %v13485_v26  ;;  %v13889_v41 = vrot.slane %v10788_v59, %v13485_v26  ;;  %v13892_v25 = vrot.slane %v10790_v0, %v13485_v26 }
 0x479   : > { %v3961_v61 = vrot.slane %v3953_v55, %v13510_v52  ;;  %v3968_v11 = vrot.slane %v3954_v8, %v13510_v52  ;;  %v3761_v49 = vrot.slane %v3753_v19, %v13485_v26  ;;  %v6065_v37 = vsel %vm5993_vm0, %v4796_v47, 0  ;;  %v13909_v19 = vpop.permute.xlu1 %2499 }
 0x47a   : > { %16407 = vst [vmem:[#allocation71_spill] sm:$0xff] %v13889_v41  ;;  %v3768_v4 = vrot.slane %v3754_v48, %v13485_v26  ;;  %v3465_v3 = vcombine.low %v13849_v30, %v13861_v63  ;;  %v3601_v58 = vcombine.low %v13868_v29, %v13873_v27  ;;  %v4514_v57 = vcombine.high %v13729_v21, %v13749_v7 }
 0x47b   : > { %v10776_v59 = vcombine.low %v3945_v32, %v3952_v53  ;;  %v10778_v0 = vcombine.high %v3945_v32, %v3952_v53  ;;  %v3745_v55 = vrot.slane %v3737_v62, %v13485_v26  ;;  %v3752_v8 = vrot.slane %v3738_v12, %v13485_v26 }
 0x47c   : > { %v3610_v47 = vpack.c.bf16 %v3601_v58, %v3465_v3  ;;  %v4378_v48 = vcombine.high %v13591_v42, %v13602_v38  ;;  %v3194_v14 = vcombine.high %v13796_v28, %v13799_v46  ;;  %v3330_v50 = vcombine.high %v13805_v36, %v13808_v45  ;;  %v13919_v58 = vpop.permute.xlu0 %2497 }
 0x47d   : > { %v10780_v41 = vcombine.low %v3961_v61, %v3968_v11  ;;  %v10782_v7 = vcombine.high %v3961_v61, %v3968_v11  ;;  %v3801_v21 = vcombine.low %v3745_v55, %v3761_v49  ;;  %v3802_v32 = vcombine.high %v3745_v55, %v3761_v49 }
 0x47e   : > { %v3817_v53 = vcombine.low %v3752_v8, %v3768_v4  ;;  %11144 = vmatmul.mubr.msk.bf16.vlgmr.msra.gmra.mxu1 %vm5993_vm0, %v3610_v47  ;;  %v4795_v62 = vpack.c.bf16 %v4514_v57, %v4378_v48  ;;  %v3611_v12 = vpack.c.bf16 %v3330_v50, %v3194_v14  ;;  %v4161_v3 = vcombine.low %v13789_v40, %v3700_v9 }
 0x47f   : > { %v13922_v42 = vrot.slane %v10776_v59, %v13485_v26  ;;  %v3818_v38 = vcombine.high %v3752_v8, %v3768_v4  ;;  %11148 = vmatpush3.bf16.xpose.msra.mxu1 %v6065_v37  ;;  %v4145_v28 = vcombine.low %v13394_v1, %v13833_v13  ;;  %v4162_v46 = vcombine.high %v13789_v40, %v3700_v9  ;;  %v13941_v40 = vpop.permute.xlu1 %2511 }
 0x480   : > { %v13928_v36 = vrot.slane %v10778_v0, %v13485_v26  ;;  %11270 = vmatprep.subr.msk.bf16.mxu1 %vm5993_vm0, %v4795_v62  ;;  %11151 = vmatprep.mubr.msk.bf16.mxu1 %vm5993_vm0, %v3611_v12  ;;  %v4146_v45 = vcombine.high %v13394_v1, %v13833_v13  ;;  %v4586_v50 = vcombine.high %v13598_v34, %v13605_v23 }
 0x481   : > { %16408 = vst [vmem:[#allocation72_spill] sm:$0xff] %v13922_v42  ;;  %v3809_v14 = vrot.slane %v3801_v21, %v13510_v52  ;;  %v3816_v61 = vrot.slane %v3802_v32, %v13510_v52  ;;  %v4169_v11 = vrot.slane %v4161_v3, %v13485_v26  ;;  %v4618_v9 = vcombine.high %v13610_v56, %v13613_v60 }
 0x482   : > { %16409 = vst [vmem:[#allocation73_spill] sm:$0xff] %v13928_v36  ;;  %v13944_v49 = vrot.slane %v10780_v41, %v13485_v26  ;;  %v13947_v37 = vrot.slane %v10782_v7, %v13485_v26  ;;  %v4176_v1 = vrot.slane %v4162_v46, %v13485_v26  ;;  %v4722_v34 = vcombine.high %v13634_v20, %v13637_v39  ;;  %v2510_v20 = vpop.permute.xlu0 %2509 }
 0x483   : > { %v4153_v23 = vrot.slane %v4145_v28, %v13485_v26  ;;  %v13954_v13 = vrot.slane %v4586_v50, %v13510_v52  ;;  %v13957_v56 = vrot.slane %v4618_v9, %v13510_v52  ;;  %v4754_v60 = vcombine.high %v13647_v18, %v13655_v17  ;;  %v13978_v12 = vpop.permute.xlu1 %2491 }
 0x484   : > { %16410 = vst [vmem:[#allocation74_spill] sm:$0xff] %v13944_v49  ;;  %16411 = vst [vmem:[#allocation75_spill] sm:$0xff] %v13947_v37  ;;  %v3825_v41 = vrot.slane %v3817_v53, %v13510_v52  ;;  %v3832_v4 = vrot.slane %v3818_v38, %v13510_v52  ;;  %v4160_v57 = vrot.slane %v4146_v45, %v13485_v26  ;;  %v6062_v18 = vsel %vm5993_vm0, %v4795_v62, 0 }
 0x485   : > { %v13965_v59 = vrot.slane %v4722_v34, %v13510_v52  ;;  %v10768_v39 = vcombine.low %v3809_v14, %v3816_v61  ;;  %v4209_v0 = vcombine.low %v4153_v23, %v4169_v11  ;;  %v4210_v55 = vcombine.high %v4153_v23, %v4169_v11 }
 0x486   : > { %v13968_v8 = vrot.slane %v4754_v60, %v13510_v52  ;;  %v4225_v47 = vcombine.low %v4160_v57, %v4176_v1  ;;  %v4226_v48 = vcombine.high %v4160_v57, %v4176_v1  ;;  %v2553_v17 = vcombine.low %v13400_v2, %v13919_v58  ;;  %v14004_v23 = vpop.permute.xlu0 %2489 }
 0x487   : > { %v10770_v7 = vcombine.high %v3809_v14, %v3816_v61  ;;  %11150 = vmatpush3.bf16.xpose.msra.mxu1 %v6062_v18  ;;  %v4651_v21 = vcombine.low %v13954_v13, %v13957_v56  ;;  %v2569_v53 = vcombine.low %v13894_v33, %v2510_v20  ;;  %v10772_v3 = vcombine.low %v3825_v41, %v3832_v4 }
 0x488   : > { %v4787_v32 = vcombine.low %v13965_v59, %v13968_v8  ;;  %v10774_v38 = vcombine.high %v3825_v41, %v3832_v4  ;;  %v2554_v28 = vcombine.high %v13400_v2, %v13919_v58  ;;  %v2570_v46 = vcombine.high %v13894_v33, %v2510_v20 }
 0x489   : > { %v4217_v62 = vrot.slane %v4209_v0, %v13510_v52  ;;  %v4224_v45 = vrot.slane %v4210_v55, %v13510_v52  ;;  %v2577_v14 = vrot.slane %v2569_v53, %v13485_v26  ;;  %v13987_v61 = vrot.slane %v4225_v47, %v13510_v52 }
 0x48a   : > { %v4798_v50 = vpack.c.bf16 %v4787_v32, %v4651_v21  ;;  %v13990_v11 = vrot.slane %v4226_v48, %v13510_v52  ;;  %v2561_v9 = vrot.slane %v2553_v17, %v13485_v26  ;;  %v2584_v1 = vrot.slane %v2570_v46, %v13485_v26  ;;  %v2502_v53 = vpop.permute.xlu0 %2501 }
 0x48b   : > { %v13995_v2 = vrot.slane %v10768_v39, %v13485_v26  ;;  %v2705_v33 = vcombine.low %v13751_v54, %v13941_v40  ;;  %v3466_v58 = vcombine.high %v13849_v30, %v13861_v63  ;;  %v3602_v34 = vcombine.high %v13868_v29, %v13873_v27  ;;  %v14014_v63 = vpop.permute.xlu1 %2503 }
 0x48c   : > { %11271 = vmatprep.subr.msk.bf16.mxu1 %vm5993_vm0, %v4798_v50  ;;  %v14007_v60 = vrot.slane %v10770_v7, %v13485_v26  ;;  %v2568_v41 = vrot.slane %v2554_v28, %v13485_v26  ;;  %v2617_v4 = vcombine.low %v2561_v9, %v2577_v14  ;;  %v2618_v57 = vcombine.high %v2561_v9, %v2577_v14 }
 0x48d   : > { %16412 = vst [vmem:[#allocation76_spill] sm:$0xff] %v13995_v2  ;;  %v10792_v20 = vcombine.low %v4217_v62, %v4224_v45  ;;  %v2689_v39 = vcombine.low %v13388_v51, %v13909_v19  ;;  %v2706_v0 = vcombine.high %v13751_v54, %v13941_v40  ;;  %v3612_v30 = vpack.c.bf16 %v3602_v34, %v3466_v58  ;;  %v16417_v58 = vld [vmem:[#allocation68_spill] sm:$0xff]  ;;  %v16418_v34 = vld [vmem:[#allocation67_spill] sm:$0xff] }
 0x48e   : > { %16413 = vst [vmem:[#allocation77_spill] sm:$0xff] %v14007_v60  ;;  %v10794_v29 = vcombine.high %v4217_v62, %v4224_v45  ;;  %v10796_v27 = vcombine.low %v13987_v61, %v13990_v11  ;;  %v2690_v55 = vcombine.high %v13388_v51, %v13909_v19  ;;  %v2633_v47 = vcombine.low %v2568_v41, %v2584_v1 }
 0x48f   : > { %v2634_v48 = vcombine.high %v2568_v41, %v2584_v1  ;;  %v14021_v17 = vrot.slane %v2705_v33, %v13485_v26  ;;  %11152 = vmatmul.mubr.msk.bf16.vlgmr.msra.gmra.mxu1 %vm5993_vm0, %v3612_v30  ;;  %v6126_v18 = vsel %vm5993_vm0, %v4798_v50, 0  ;;  %v3130_v54 = vcombine.high %v13658_v16, %v13661_v35  ;;  %v2516_v9 = vpop.permute.xlu1 %2515  ;;  %v16422_v30 = vld [vmem:[#allocation55_spill] sm:$0xff] }
 0x490   : > { %v14028_v40 = vrot.slane %v10772_v3, %v13485_v26  ;;  %v14031_v7 = vrot.slane %v10774_v38, %v13485_v26  ;;  %v14034_v51 = vrot.slane %v2617_v4, %v13510_v52  ;;  %v14037_v19 = vrot.slane %v2618_v57, %v13510_v52  ;;  %11156 = vmatpush3.bf16.xpose.msra.mxu1 %v6126_v18  ;;  %v16419_v4 = vld [vmem:[#allocation70_spill] sm:$0xff]  ;;  %v16420_v57 = vld [vmem:[#allocation69_spill] sm:$0xff] }
 0x491   : > { %v14040_v21 = vrot.slane %v10792_v20, %v13485_v26  ;;  %v14045_v16 = vrot.slane %v2689_v39, %v13485_v26  ;;  %v14048_v35 = vrot.slane %v2706_v0, %v13485_v26  ;;  %v14051_v3 = vrot.slane %v10794_v29, %v13485_v26  ;;  %v16425_v18 = vld [vmem:[#allocation61_spill] sm:$0xff] }
 0x492   : > { %16414 = vst [vmem:[#allocation78_spill] sm:$0xff] %v14028_v40  ;;  %16415 = vst [vmem:[#allocation79_spill] sm:$0xff] %v14031_v7  ;;  %v14054_v38 = vrot.slane %v10796_v27, %v13485_v26  ;;  %v14057_v28 = vrot.slane %v2690_v55, %v13485_v26  ;;  %v14060_v46 = vrot.slane %v2633_v47, %v13510_v52  ;;  %v16423_v47 = vld [vmem:[#allocation59_spill] sm:$0xff] }
 0x493   : > { %v14063_v62 = vrot.slane %v2634_v48, %v13510_v52  ;;  %v2753_v45 = vcombine.low %v14045_v16, %v14021_v17  ;;  %v14068_v50 = vrot.slane %v3130_v54, %v13510_v52  ;;  %v3162_v14 = vcombine.high %v13668_v44, %v13723_v15  ;;  %v16421_v15 = vld [vmem:[#allocation56_spill] sm:$0xff]  ;;  %v16424_v48 = vld [vmem:[#allocation58_spill] sm:$0xff]  ;;  %v14125_v1 = vpop.permute.xlu1 %4817 }
 0x494   : > { %16416 = vst [vmem:[#allocation80_spill] sm:$0xff] %v14054_v38  ;;  %v2754_v33 = vcombine.high %v14045_v16, %v14021_v17  ;;  %v3266_v41 = vcombine.high %v16418_v34, %v16417_v58  ;;  %v3298_v20 = vcombine.high %v16420_v57, %v16419_v4  ;;  %v2769_v0 = vcombine.low %v14057_v28, %v14048_v35  ;;  %v16426_v54 = vld [vmem:[#allocation60_spill] sm:$0xff]  ;;  %v16427_v34 = vld [vmem:[#allocation63_spill] sm:$0xff]  ;;  %v16428_v4 = vld [vmem:[#allocation62_spill] sm:$0xff] }
 0x495   : > { %v14085_v44 = vrot.slane %v3162_v14, %v13510_v52  ;;  %v4314_v29 = vcombine.high %v16422_v30, %v16421_v15  ;;  %v4346_v17 = vcombine.high %v16424_v48, %v16423_v47  ;;  %v4450_v16 = vcombine.high %v16426_v54, %v16425_v18  ;;  %v2514_v30 = vpop.permute.xlu0 %2513 }
 0x496   : > { %v14090_v27 = vrot.slane %v3266_v41, %v13510_v52  ;;  %v14093_v55 = vrot.slane %v3298_v20, %v13510_v52  ;;  %v4482_v57 = vcombine.high %v16428_v4, %v16427_v34  ;;  %v16429_v41 = vld [vmem:[#allocation46_spill] sm:$0xff]  ;;  %v2770_v54 = vcombine.high %v14057_v28, %v14048_v35  ;;  %v16430_v4 = vld [vmem:[#allocation47_spill] sm:$0xff] }
 0x497   : > { %v3195_v58 = vcombine.low %v14068_v50, %v14085_v44  ;;  %v14102_v14 = vrot.slane %v4314_v29, %v13510_v52  ;;  %v2825_v15 = vcombine.low %v16429_v41, %v2502_v53  ;;  %v14110_v47 = vrot.slane %v4346_v17, %v13510_v52 }
 0x498   : > { %v3331_v20 = vcombine.low %v14090_v27, %v14093_v55  ;;  %v14113_v48 = vrot.slane %v4450_v16, %v13510_v52  ;;  %v2826_v18 = vcombine.high %v16429_v41, %v2502_v53  ;;  %v10740_v29 = vcombine.low %v14060_v46, %v14063_v62 }
 0x499   : > { %v14121_v34 = vrot.slane %v4482_v57, %v13510_v52  ;;  %v2961_v39 = vcombine.low %v16430_v4, %v14014_v63  ;;  %v2833_v16 = vrot.slane %v2825_v15, %v13485_v26  ;;  %v2962_v53 = vcombine.high %v16430_v4, %v14014_v63  ;;  %v14150_v42 = vpop.permute.xlu0 %4819 }
 0x49a   : > { %v3613_v17 = vpack.c.bf16 %v3331_v20, %v3195_v58  ;;  %v2841_v41 = vcombine.low %v14004_v23, %v2514_v30  ;;  %v4379_v32 = vcombine.low %v14102_v14, %v14110_v47  ;;  %v2840_v28 = vrot.slane %v2826_v18, %v13485_v26 }
 0x49b   : > { %v4515_v35 = vcombine.low %v14113_v48, %v14121_v34  ;;  %v2842_v57 = vcombine.high %v14004_v23, %v2514_v30  ;;  %v4652_v15 = vcombine.high %v13954_v13, %v13957_v56  ;;  %v4788_v63 = vcombine.high %v13965_v59, %v13968_v8 }
 0x49c   : > { %11159 = vmatprep.mubr.msk.bf16.mxu1 %vm5993_vm0, %v3613_v17  ;;  %v2849_v58 = vrot.slane %v2841_v41, %v13485_v26  ;;  %v2977_v20 = vcombine.low %v13978_v12, %v2516_v9  ;;  %v2969_v49 = vrot.slane %v2961_v39, %v13485_v26  ;;  %v2978_v18 = vcombine.high %v13978_v12, %v2516_v9 }
 0x49d   : > { %v4797_v4 = vpack.c.bf16 %v4515_v35, %v4379_v32  ;;  %v2856_v37 = vrot.slane %v2842_v57, %v13485_v26  ;;  %v14147_v17 = vpack.c.bf16 %v4788_v63, %v4652_v15  ;;  %v14155_v32 = vpop.permute.xlu1 %4829  ;;  %v10742_v12 = vcombine.high %v14060_v46, %v14063_v62 }
 0x49e   : > { %v2889_v23 = vcombine.low %v2833_v16, %v2849_v58  ;;  %v2890_v30 = vcombine.high %v2833_v16, %v2849_v58  ;;  %v2985_v41 = vrot.slane %v2977_v20, %v13485_v26  ;;  %v2992_v8 = vrot.slane %v2978_v18, %v13485_v26  ;;  %v14191_v18 = vpop.permute.xlu0 %4841 }
 0x49f   : > { %11272 = vmatprep.subr.msk.bf16.mxu1 %vm5993_vm0, %v4797_v4  ;;  %v2905_v13 = vcombine.low %v2840_v28, %v2856_v37  ;;  %v2906_v56 = vcombine.high %v2840_v28, %v2856_v37  ;;  %v6123_v59 = vsel %vm5993_vm0, %v4797_v4, 0  ;;  %v2761_v9 = vrot.slane %v2753_v45, %v13510_v52 }
 0x4a0   : > { %v2768_v39 = vrot.slane %v2754_v33, %v13510_v52  ;;  %v2777_v16 = vrot.slane %v2769_v0, %v13510_v52  ;;  %11158 = vmatpush3.bf16.xpose.msra.mxu1 %v6123_v59  ;;  %v2784_v35 = vrot.slane %v2770_v54, %v13510_v52  ;;  %v2976_v37 = vrot.slane %v2962_v53, %v13485_v26 }
 0x4a1   : > { %11273 = vmatprep.subr.msk.bf16.mxu1 %vm5993_vm0, %v14147_v17  ;;  %v3025_v28 = vcombine.low %v2969_v49, %v2985_v41  ;;  %v3026_v57 = vcombine.high %v2969_v49, %v2985_v41  ;;  %v2897_v58 = vrot.slane %v2889_v23, %v13510_v52  ;;  %v2904_v46 = vrot.slane %v2890_v30, %v13510_v52 }
 0x4a2   : > { %v2913_v62 = vrot.slane %v2905_v13, %v13510_v52  ;;  %v2920_v45 = vrot.slane %v2906_v56, %v13510_v52  ;;  %v16431_v33 = vcombine.high %v13987_v61, %v13990_v11  ;;  %v16433_v54 = vcombine.low %v14034_v51, %v14037_v19  ;;  %v14198_v56 = vpop.permute.xlu1 %4831 }
 0x4a3   : > { %v3041_v49 = vcombine.low %v2976_v37, %v2992_v8  ;;  %v3042_v15 = vcombine.high %v2976_v37, %v2992_v8  ;;  %v16434_v63 = vcombine.high %v14034_v51, %v14037_v19  ;;  %v14189_v4 = vrot.slane %v10740_v29, %v13485_v26 }
 0x4a4   : > { %v14174_v0 = vrot.slane %v16431_v33, %v13485_v26  ;;  %v14180_v53 = vrot.slane %v16433_v54, %v13485_v26  ;;  %v10744_v61 = vcombine.low %v2761_v9, %v2768_v39  ;;  %v10746_v11 = vcombine.high %v2761_v9, %v2768_v39  ;;  %v16436_v39 = vld [vmem:[#allocation64_spill] sm:$0xff] }
 0x4a5   : > { %v14186_v20 = vrot.slane %v16434_v63, %v13485_v26  ;;  %16435 = vst [vmem:[#allocation67_spill] sm:$0xff] %v14189_v4  ;;  %v14194_v23 = vrot.slane %v10742_v12, %v13485_v26  ;;  %v10748_v30 = vcombine.low %v2777_v16, %v2784_v35  ;;  %v3033_v41 = vrot.slane %v3025_v28, %v13510_v52  ;;  %v16437_v12 = vld [vmem:[#allocation65_spill] sm:$0xff] }
 0x4a6   : > { %16432 = vst [vmem:[#allocation68_spill] sm:$0xff] %v14174_v0  ;;  %v3040_v13 = vrot.slane %v3026_v57, %v13510_v52  ;;  %v10752_v51 = vcombine.low %v2897_v58, %v2904_v46  ;;  %v10754_v19 = vcombine.high %v2897_v58, %v2904_v46  ;;  %v10756_v59 = vcombine.low %v2913_v62, %v2920_v45  ;;  %v16441_v58 = vld [vmem:[#allocation66_spill] sm:$0xff] }
 0x4a7   : > { %v10758_v8 = vcombine.high %v2913_v62, %v2920_v45  ;;  %v10750_v29 = vcombine.high %v2777_v16, %v2784_v35  ;;  %v3049_v37 = vrot.slane %v3041_v49, %v13510_v52  ;;  %v3056_v9 = vrot.slane %v3042_v15, %v13510_v52 }
 0x4a8   : > { %v16438_v33 = vcombine.high %v16436_v39, %v16437_v12  ;;  %v14209_v28 = vrot.slane %v10744_v61, %v13485_v26  ;;  %v14212_v57 = vrot.slane %v10746_v11, %v13485_v26  ;;  %v16442_v16 = vcombine.high %v13715_v10, %v16441_v58  ;;  %v16447_v39 = vld [vmem:[#allocation49_spill] sm:$0xff] }
 0x4a9   : > { %v16443_v46 = vcombine.high %v13775_v24, %v13792_v43  ;;  %v14227_v45 = vrot.slane %v10748_v30, %v13485_v26  ;;  %v10760_v49 = vcombine.low %v3033_v41, %v3040_v13  ;;  %v10762_v15 = vcombine.high %v3033_v41, %v3040_v13  ;;  %v14247_v30 = vpop.permute.xlu0 %4813 }
 0x4aa   : > { %v14206_v54 = vrot.slane %v16438_v33, %v13510_v52  ;;  %16439 = vst [vmem:[#allocation70_spill] sm:$0xff] %v14209_v28  ;;  %16440 = vst [vmem:[#allocation69_spill] sm:$0xff] %v14212_v57  ;;  %v14218_v35 = vrot.slane %v16442_v16, %v13510_v52  ;;  %v16445_v63 = vcombine.high %v13802_v22, %v13823_v6 }
 0x4ab   : > { %v14224_v62 = vrot.slane %v16443_v46, %v13510_v52  ;;  %16444 = vst [vmem:[#allocation56_spill] sm:$0xff] %v14227_v45  ;;  %v14236_v10 = vrot.slane %v10752_v51, %v13485_v26  ;;  %v14239_v11 = vrot.slane %v10754_v19, %v13485_v26  ;;  %v14242_v24 = vrot.slane %v10756_v59, %v13485_v26  ;;  %v14255_v51 = vpop.permute.xlu1 %4843 }
 0x4ac   : > { %v14233_v61 = vrot.slane %v16445_v63, %v13510_v52  ;;  %v14245_v43 = vrot.slane %v10758_v8, %v13485_v26  ;;  %v10764_v41 = vcombine.low %v3049_v37, %v3056_v9  ;;  %v3467_v6 = vcombine.low %v14206_v54, %v14218_v35 }
 0x4ad   : > { %16446 = vst [vmem:[#allocation55_spill] sm:$0xff] %v14239_v11  ;;  %v3332_v13 = vcombine.high %v14090_v27, %v14093_v55  ;;  %v10766_v19 = vcombine.high %v3049_v37, %v3056_v9  ;;  %v3196_v59 = vcombine.high %v14068_v50, %v14085_v44  ;;  %v4516_v8 = vcombine.high %v14113_v48, %v14121_v34 }
 0x4ae   : > { %v3603_v22 = vcombine.low %v14224_v62, %v14233_v61  ;;  %v5161_v12 = vcombine.low %v16447_v39, %v14155_v32  ;;  %v14264_v33 = vrot.slane %v10760_v49, %v13485_v26  ;;  %v14267_v58 = vrot.slane %v10762_v15, %v13485_v26  ;;  %v4826_v49 = vpop.permute.xlu0 %4825 }
 0x4af   : > { %v4380_v27 = vcombine.high %v14102_v14, %v14110_v47  ;;  %v14272_v55 = vrot.slane %v10750_v29, %v13485_v26  ;;  %v5177_v44 = vcombine.low %v14125_v1, %v14191_v18  ;;  %v3615_v48 = vpack.c.bf16 %v3332_v13, %v3196_v59 }
 0x4b0   : > { %v3614_v16 = vpack.c.bf16 %v3603_v22, %v3467_v6  ;;  %v6187_v37 = vsel %vm5993_vm0, %v14147_v17, 0  ;;  %v4601_v14 = vcombine.low %v13883_v5, %v13886_v31  ;;  %v5162_v29 = vcombine.high %v16447_v39, %v14155_v32  ;;  %v14302_v22 = vpop.permute.xlu1 %4815 }
 0x4b1   : > { %16448 = vst [vmem:[#allocation59_spill] sm:$0xff] %v14272_v55  ;;  %v4799_v9 = vpack.c.bf16 %v4516_v8, %v4380_v27  ;;  %v5169_v46 = vrot.slane %v5161_v12, %v13485_v26  ;;  %v14292_v15 = vrot.slane %v10764_v41, %v13485_v26  ;;  %v14295_v17 = vrot.slane %v10766_v19, %v13485_v26  ;;  %v16449_v41 = vld [vmem:[#allocation48_spill] sm:$0xff]  ;;  %v16450_v19 = vld [vmem:[#allocation71_spill] sm:$0xff] }
 0x4b2   : > { %11160 = vmatmul.mubr.msk.bf16.vlgmr.msra.gmra.mxu1 %vm5993_vm0, %v3614_v16  ;;  %v5178_v6 = vcombine.high %v14125_v1, %v14191_v18  ;;  %v5185_v13 = vrot.slane %v5177_v44, %v13485_v26  ;;  %v5297_v59 = vcombine.low %v16449_v41, %v14198_v56  ;;  %v4633_v8 = vcombine.low %v16450_v19, %v13892_v25  ;;  %v4838_v47 = vpop.permute.xlu0 %4837 }
 0x4b3   : > { %11164 = vmatpush3.bf16.xpose.msra.mxu1 %v6187_v37  ;;  %11167 = vmatprep.mubr.msk.bf16.mxu1 %vm5993_vm0, %v3615_v48  ;;  %v14312_v39 = vrot.slane %v4601_v14, %v13510_v52  ;;  %v4737_v1 = vcombine.low %v14040_v21, %v14051_v3  ;;  %v4769_v18 = vcombine.low %v14054_v38, %v14174_v0 }
 0x4b4   : > { %11274 = vmatprep.subr.msk.bf16.mxu1 %vm5993_vm0, %v4799_v9  ;;  %v5313_v12 = vcombine.low %v14150_v42, %v14255_v51  ;;  %v5176_v16 = vrot.slane %v5162_v29, %v13485_v26  ;;  %v5225_v27 = vcombine.low %v5169_v46, %v5185_v13  ;;  %v5226_v44 = vcombine.high %v5169_v46, %v5185_v13  ;;  %v16451_v46 = vld [vmem:[#allocation50_spill] sm:$0xff] }
 0x4b5   : > { %v14322_v48 = vrot.slane %v4633_v8, %v13510_v52  ;;  %v5192_v37 = vrot.slane %v5178_v6, %v13485_v26  ;;  %v14326_v14 = vrot.slane %v4737_v1, %v13510_v52  ;;  %v14329_v34 = vrot.slane %v4769_v18, %v13510_v52 }
 0x4b6   : > { %v5314_v32 = vcombine.high %v14150_v42, %v14255_v51  ;;  %v5298_v63 = vcombine.high %v16449_v41, %v14198_v56  ;;  %v5305_v29 = vrot.slane %v5297_v59, %v13485_v26  ;;  %v4889_v13 = vcombine.low %v16451_v46, %v4826_v49  ;;  %v14344_v51 = vpop.permute.xlu1 %4827 }
 0x4b7   : > { %v4890_v8 = vcombine.high %v16451_v46, %v4826_v49  ;;  %v6184_v6 = vsel %vm5993_vm0, %v4799_v9, 0  ;;  %v4653_v1 = vcombine.low %v14312_v39, %v14322_v48  ;;  %v4789_v18 = vcombine.low %v14326_v14, %v14329_v34 }
 0x4b8   : > { %v5321_v42 = vrot.slane %v5313_v12, %v13485_v26  ;;  %v14347_v56 = vrot.slane %v5225_v27, %v13510_v52  ;;  %v14350_v41 = vrot.slane %v5226_v44, %v13510_v52  ;;  %v5241_v49 = vcombine.low %v5176_v16, %v5192_v37 }
 0x4b9   : > { %v5242_v59 = vcombine.high %v5176_v16, %v5192_v37  ;;  %v4802_v9 = vpack.c.bf16 %v4789_v18, %v4653_v1  ;;  %v5328_v46 = vrot.slane %v5314_v32, %v13485_v26  ;;  %v4905_v50 = vcombine.low %v14247_v30, %v4838_v47 }
 0x4ba   : > { %v3604_v38 = vcombine.high %v14224_v62, %v14233_v61  ;;  %v5312_v44 = vrot.slane %v5298_v63, %v13485_v26  ;;  %v4906_v0 = vcombine.high %v14247_v30, %v4838_v47  ;;  %v4897_v16 = vrot.slane %v4889_v13, %v13485_v26  ;;  %v4840_v18 = vpop.permute.xlu1 %4839 }
 0x4bb   : > { %11166 = vmatpush3.bf16.xpose.msra.mxu1 %v6184_v6  ;;  %v5361_v32 = vcombine.low %v5305_v29, %v5321_v42  ;;  %v5362_v37 = vcombine.high %v5305_v29, %v5321_v42  ;;  %v3468_v6 = vcombine.high %v14206_v54, %v14218_v35  ;;  %v14367_v62 = vrot.slane %v5241_v49, %v13510_v52 }
 0x4bc   : > { %11275 = vmatprep.subr.msk.bf16.mxu1 %vm5993_vm0, %v4802_v9  ;;  %v14370_v61 = vrot.slane %v5242_v59, %v13510_v52  ;;  %v4904_v30 = vrot.slane %v4890_v8, %v13485_v26  ;;  %v5377_v13 = vcombine.low %v5312_v44, %v5328_v46  ;;  %v4913_v29 = vrot.slane %v4905_v50, %v13485_v26 }
 0x4bd   : > { %v3616_v1 = vpack.c.bf16 %v3604_v38, %v3468_v6  ;;  %v4920_v54 = vrot.slane %v4906_v0, %v13485_v26  ;;  %v3145_v35 = vcombine.low %v14180_v53, %v14186_v20  ;;  %v3177_v42 = vcombine.low %v14189_v4, %v14194_v23 }
 0x4be   : > { %v3281_v49 = vcombine.low %v14209_v28, %v14212_v57  ;;  %v14386_v8 = vrot.slane %v5361_v32, %v13510_v52  ;;  %v14389_v59 = vrot.slane %v5362_v37, %v13510_v52  ;;  %v5378_v50 = vcombine.high %v5312_v44, %v5328_v46 }
 0x4bf   : > { %v6248_v38 = vsel %vm5993_vm0, %v4802_v9, 0  ;;  %v14394_v0 = vrot.slane %v3145_v35, %v13510_v52  ;;  %v14397_v6 = vrot.slane %v3177_v42, %v13510_v52  ;;  %v3313_v32 = vcombine.low %v14227_v45, %v14272_v55  ;;  %v16452_v9 = vld [vmem:[#allocation72_spill] sm:$0xff]  ;;  %v16454_v35 = vld [vmem:[#allocation74_spill] sm:$0xff] }
 0x4c0   : > { %v14400_v27 = vrot.slane %v3281_v49, %v13510_v52  ;;  %v4329_v46 = vcombine.low %v13995_v2, %v14007_v60  ;;  %v4361_v44 = vcombine.low %v14028_v40, %v14031_v7  ;;  %v4465_v37 = vcombine.low %v16452_v9, %v13928_v36  ;;  %v14427_v36 = vpop.permute.xlu1 %4857 }
 0x4c1   : > { %v4953_v42 = vcombine.low %v4897_v16, %v4913_v29  ;;  %v4954_v47 = vcombine.high %v4897_v16, %v4913_v29  ;;  %v4969_v63 = vcombine.low %v4904_v30, %v4920_v54  ;;  %v14413_v49 = vrot.slane %v3313_v32, %v13510_v52  ;;  %v14429_v16 = vpop.permute.xlu0 %4859 }
 0x4c2   : > { %11168 = vmatmul.mubr.msk.bf16.vlgmr.msra.gmra.mxu1 %vm5993_vm0, %v3616_v1  ;;  %v16453_v1 = vld [vmem:[#allocation75_spill] sm:$0xff]  ;;  %v14416_v12 = vrot.slane %v4329_v46, %v13510_v52  ;;  %v14419_v2 = vrot.slane %v4361_v44, %v13510_v52  ;;  %v14422_v40 = vrot.slane %v4465_v37, %v13510_v52  ;;  %v3197_v29 = vcombine.low %v14394_v0, %v14397_v6 }
 0x4c3   : > { %11172 = vmatpush3.bf16.xpose.msra.mxu1 %v6248_v38  ;;  %v4497_v38 = vcombine.low %v16454_v35, %v16453_v1  ;;  %v4970_v35 = vcombine.high %v4904_v30, %v4920_v54  ;;  %v3333_v32 = vcombine.low %v14400_v27, %v14413_v49  ;;  %v5041_v46 = vcombine.low %v14302_v22, %v4840_v18 }
 0x4c4   : > { %v4381_v44 = vcombine.low %v14416_v12, %v14419_v2  ;;  %v5042_v30 = vcombine.high %v14302_v22, %v4840_v18  ;;  %v14444_v54 = vrot.slane %v5377_v13, %v13510_v52  ;;  %v4790_v45 = vcombine.high %v14326_v14, %v14329_v34 }
 0x4c5   : > { %v14425_v9 = vrot.slane %v4497_v38, %v13510_v52  ;;  %v16455_v38 = vld [vmem:[#allocation51_spill] sm:$0xff]  ;;  %v3617_v7 = vpack.c.bf16 %v3333_v32, %v3197_v29  ;;  %v14451_v55 = vrot.slane %v5378_v50, %v13510_v52  ;;  %v5049_v57 = vrot.slane %v5041_v46, %v13485_v26  ;;  %v4870_v50 = vpop.permute.xlu1 %4869 }
 0x4c6   : > { %v5025_v1 = vcombine.low %v16455_v38, %v14344_v51  ;;  %v5026_v60 = vcombine.high %v16455_v38, %v14344_v51  ;;  %v4654_v4 = vcombine.high %v14312_v39, %v14322_v48  ;;  %v14457_v22 = vrot.slane %v4953_v42, %v13510_v52  ;;  %v4882_v42 = vpop.permute.xlu0 %4881 }
 0x4c7   : > { %v4517_v37 = vcombine.low %v14422_v40, %v14425_v9  ;;  %v14460_v13 = vrot.slane %v4954_v47, %v13510_v52  ;;  %v14463_v51 = vrot.slane %v4969_v63, %v13510_v52  ;;  %11175 = vmatprep.mubr.msk.bf16.mxu1 %vm5993_vm0, %v3617_v7  ;;  %v5056_v34 = vrot.slane %v5042_v30, %v13485_v26 }
 0x4c8   : > { %v14468_v14 = vrot.slane %v4970_v35, %v13510_v52  ;;  %v5033_v39 = vrot.slane %v5025_v1, %v13485_v26  ;;  %v4804_v18 = vpack.c.bf16 %v4790_v45, %v4654_v4  ;;  %v10819_v47 = vcombine.low %v14367_v62, %v14370_v61 }
 0x4c9   : > { %v4801_v28 = vpack.c.bf16 %v4517_v37, %v4381_v44  ;;  %v10821_v63 = vcombine.high %v14367_v62, %v14370_v61  ;;  %v10823_v7 = vcombine.low %v14386_v8, %v14389_v59  ;;  %v5040_v35 = vrot.slane %v5026_v60, %v13485_v26 }
 0x4ca   : > { %v10825_v1 = vcombine.high %v14386_v8, %v14389_v59  ;;  %v5089_v29 = vcombine.low %v5033_v39, %v5049_v57  ;;  %v5209_v4 = vcombine.low %v14427_v36, %v4882_v42  ;;  %v10827_v45 = vcombine.low %v14444_v54, %v14451_v55 }
 0x4cb   : > { %11276 = vmatprep.subr.msk.bf16.mxu1 %vm5993_vm0, %v4801_v28  ;;  %v6245_v48 = vsel %vm5993_vm0, %v4801_v28, 0  ;;  %v5090_v28 = vcombine.high %v5033_v39, %v5049_v57  ;;  %v10829_v62 = vcombine.high %v14444_v54, %v14451_v55  ;;  %v5105_v61 = vcombine.low %v5040_v35, %v5056_v34 }
 0x4cc   : > { %11174 = vmatpush3.bf16.xpose.msra.mxu1 %v6245_v48  ;;  %v16456_v60 = vcombine.low %v14236_v10, %v14239_v11  ;;  %v5106_v46 = vcombine.high %v5040_v35, %v5056_v34  ;;  %v5210_v44 = vcombine.high %v14427_v36, %v4882_v42  ;;  %v16457_v55 = vcombine.low %v14242_v24, %v14245_v43  ;;  %v4872_v42 = vpop.permute.xlu1 %4871 }
 0x4cd   : > { %11277 = vmatprep.subr.msk.bf16.mxu1 %vm5993_vm0, %v4804_v18  ;;  %v16458_v38 = vcombine.low %v14264_v33, %v14267_v58  ;;  %v16459_v54 = vcombine.low %v14292_v15, %v14295_v17  ;;  %v14522_v34 = vrot.slane %v5089_v29, %v13510_v52  ;;  %v14525_v48 = vrot.slane %v5090_v28, %v13510_v52  ;;  %v16460_v28 = vld [vmem:[#allocation53_spill] sm:$0xff] }
 0x4ce   : > { %v14492_v32 = vrot.slane %v16456_v60, %v13510_v52  ;;  %v14505_v37 = vrot.slane %v16457_v55, %v13510_v52  ;;  %v14528_v35 = vrot.slane %v5209_v4, %v13485_v26  ;;  %v14531_v60 = vrot.slane %v5105_v61, %v13510_v52 }
 0x4cf   : > { %v14511_v30 = vrot.slane %v16458_v38, %v13510_v52  ;;  %v14517_v39 = vrot.slane %v16459_v54, %v13510_v52  ;;  %v3334_v29 = vcombine.high %v14400_v27, %v14413_v49  ;;  %v14540_v54 = vrot.slane %v5106_v46, %v13510_v52 }
 0x4d0   : > { %v3469_v55 = vcombine.low %v14492_v32, %v14505_v37  ;;  %v5193_v36 = vcombine.low %v16460_v28, %v4870_v50  ;;  %v5194_v4 = vcombine.high %v16460_v28, %v4870_v50  ;;  %v3198_v61 = vcombine.high %v14394_v0, %v14397_v6 }
 0x4d1   : > { %v3605_v38 = vcombine.low %v14511_v30, %v14517_v39  ;;  %v14547_v59 = vrot.slane %v5210_v44, %v13485_v26  ;;  %v16461_v57 = vcombine.low %v14347_v56, %v14350_v41  ;;  %v16462_v27 = vcombine.high %v14347_v56, %v14350_v41 }
 0x4d2   : > { %v10807_v50 = vcombine.low %v14522_v34, %v14525_v48  ;;  %v10809_v0 = vcombine.high %v14522_v34, %v14525_v48  ;;  %v6309_v6 = vsel %vm5993_vm0, %v4804_v18, 0  ;;  %v3619_v46 = vpack.c.bf16 %v3334_v29, %v3198_v61 }
 0x4d3   : > { %v3618_v8 = vpack.c.bf16 %v3605_v38, %v3469_v55  ;;  %v14553_v11 = vrot.slane %v16461_v57, %v13485_v26  ;;  %v14559_v49 = vrot.slane %v16462_v27, %v13485_v26  ;;  %v14568_v57 = vrot.slane %v10819_v47, %v13485_v26  ;;  %v16463_v27 = vld [vmem:[#allocation52_spill] sm:$0xff] }
 0x4d4   : > { %v14571_v44 = vrot.slane %v10821_v63, %v13485_v26  ;;  %v14576_v41 = vrot.slane %v10823_v7, %v13485_v26  ;;  %v14586_v47 = vrot.slane %v5194_v4, %v13485_v26  ;;  %v4884_v63 = vpop.permute.xlu1 %4883  ;;  %v14595_v29 = vrot.slane %v10825_v1, %v13485_v26 }
 0x4d5   : > { %11176 = vmatmul.mubr.msk.bf16.vlgmr.msra.gmra.mxu1 %vm5993_vm0, %v3618_v8  ;;  %v5769_v56 = vcombine.low %v14553_v11, %v14559_v49  ;;  %v14583_v8 = vrot.slane %v5193_v36, %v13485_v26  ;;  %v14598_v28 = vrot.slane %v10827_v45, %v13485_v26  ;;  %v14601_v36 = vrot.slane %v10829_v62, %v13485_v26 }
 0x4d6   : > { %11180 = vmatpush3.bf16.xpose.msra.mxu1 %v6309_v6  ;;  %11183 = vmatprep.mubr.msk.bf16.mxu1 %vm5993_vm0, %v3619_v46  ;;  %v5801_v7 = vcombine.low %v14568_v57, %v14571_v44  ;;  %v4382_v4 = vcombine.high %v14416_v12, %v14419_v2  ;;  %v4518_v61 = vcombine.high %v14422_v40, %v14425_v9 }
 0x4d7   : > { %v14590_v38 = vrot.slane %v5769_v56, %v13510_v52  ;;  %v5329_v6 = vcombine.low %v16463_v27, %v4872_v42  ;;  %v5905_v1 = vcombine.low %v14576_v41, %v14595_v29  ;;  %v5330_v45 = vcombine.high %v16463_v27, %v4872_v42 }
 0x4d8   : > { %v14609_v46 = vrot.slane %v5801_v7, %v13510_v52  ;;  %v5345_v56 = vcombine.low %v14429_v16, %v4884_v63  ;;  %v5937_v62 = vcombine.low %v14598_v28, %v14601_v36  ;;  %v4803_v18 = vpack.c.bf16 %v4518_v61, %v4382_v4 }
 0x4d9   : > { %v5337_v2 = vrot.slane %v5329_v6, %v13485_v26  ;;  %v5346_v40 = vcombine.high %v14429_v16, %v4884_v63  ;;  %v14622_v9 = vrot.slane %v5905_v1, %v13510_v52  ;;  %v5344_v7 = vrot.slane %v5330_v45, %v13485_v26 }
 0x4da   : > { %v5833_v12 = vcombine.low %v14590_v38, %v14609_v46  ;;  %v5353_v42 = vrot.slane %v5345_v56, %v13485_v26  ;;  %v14627_v27 = vrot.slane %v5937_v62, %v13510_v52  ;;  %11278 = vmatprep.subr.msk.bf16.mxu1 %vm5993_vm0, %v4803_v18  ;;  %v6306_v61 = vsel %vm5993_vm0, %v4803_v18, 0 }
 0x4db   : > { %v5360_v4 = vrot.slane %v5346_v40, %v13485_v26  ;;  %v4602_v16 = vcombine.high %v13883_v5, %v13886_v31  ;;  %v4634_v1 = vcombine.high %v16450_v19, %v13892_v25  ;;  %v4738_v45 = vcombine.high %v14040_v21, %v14051_v3 }
 0x4dc   : > { %v5393_v63 = vcombine.low %v5337_v2, %v5353_v42  ;;  %v5394_v6 = vcombine.high %v5337_v2, %v5353_v42  ;;  %v5969_v56 = vcombine.low %v14622_v9, %v14627_v27  ;;  %v16464_v2 = vld [vmem:[#allocation68_spill] sm:$0xff]  ;;  %v5770_v34 = vcombine.high %v14553_v11, %v14559_v49 }
 0x4dd   : > { %v5409_v62 = vcombine.low %v5344_v7, %v5360_v4  ;;  %v5410_v55 = vcombine.high %v5344_v7, %v5360_v4  ;;  %v14641_v40 = vrot.slane %v4602_v16, %v13510_v52  ;;  %v14650_v31 = vrot.slane %v4634_v1, %v13510_v52  ;;  %v16465_v7 = vld [vmem:[#allocation80_spill] sm:$0xff] }
 0x4de   : > { %11182 = vmatpush3.bf16.xpose.msra.mxu1 %v6306_v61  ;;  %v14644_v18 = vrot.slane %v5393_v63, %v13510_v52  ;;  %v14647_v5 = vrot.slane %v5394_v6, %v13510_v52  ;;  %v14653_v25 = vrot.slane %v4738_v45, %v13510_v52  ;;  %v5978_v21 = vpack.c.bf16 %v5969_v56, %v5833_v12 }
 0x4df   : > { %v14656_v3 = vrot.slane %v5409_v62, %v13510_v52  ;;  %v14659_v19 = vrot.slane %v5410_v55, %v13510_v52  ;;  %v4770_v42 = vcombine.high %v16465_v7, %v16464_v2  ;;  %v5257_v4 = vcombine.low %v14583_v8, %v14528_v35  ;;  %v16478_v55 = vld [vmem:[#allocation59_spill] sm:$0xff] }
 0x4e0   : > { %v16466_v12 = vcombine.low %v14457_v22, %v14460_v13  ;;  %11203 = vmatprep.subr.bf16.mxu0 %v5978_v21  ;;  %v16467_v45 = vcombine.high %v14457_v22, %v14460_v13  ;;  %v5258_v62 = vcombine.high %v14583_v8, %v14528_v35  ;;  %v5273_v2 = vcombine.low %v14586_v47, %v14547_v59 }
 0x4e1   : > { %v14680_v1 = vrot.slane %v4770_v42, %v13510_v52  ;;  %11204 = vmatpush3.bf16.msra.mxu0 %v5978_v21  ;;  %v16468_v7 = vcombine.low %v14463_v51, %v14468_v14  ;;  %v16469_v42 = vcombine.high %v14463_v51, %v14468_v14  ;;  %v5274_v13 = vcombine.high %v14586_v47, %v14547_v59 }
 0x4e2   : > { %v14673_v63 = vrot.slane %v16466_v12, %v13485_v26  ;;  %v14686_v56 = vrot.slane %v16467_v45, %v13485_v26  ;;  %v4655_v35 = vcombine.low %v14641_v40, %v14650_v31  ;;  %v14718_v51 = vrot.slane %v10807_v50, %v13485_v26 }
 0x4e3   : > { %v14696_v12 = vrot.slane %v16468_v7, %v13485_v26  ;;  %v14702_v22 = vrot.slane %v16469_v42, %v13485_v26  ;;  %v4791_v8 = vcombine.low %v14653_v25, %v14680_v1  ;;  %v14724_v14 = vrot.slane %v10809_v0, %v13485_v26 }
 0x4e4   : > { %v5497_v21 = vcombine.low %v14673_v63, %v14686_v56  ;;  %v16470_v59 = vcombine.low %v14531_v60, %v14540_v54  ;;  %v16471_v50 = vcombine.high %v14531_v60, %v14540_v54  ;;  %v14757_v11 = vrot.slane %v5770_v34, %v13510_v52 }
 0x4e5   : > { %v5529_v45 = vcombine.low %v14696_v12, %v14702_v22  ;;  %v4806_v7 = vpack.c.bf16 %v4791_v8, %v4655_v35  ;;  %v5633_v0 = vcombine.low %v14718_v51, %v14724_v14  ;;  %v5802_v35 = vcombine.high %v14568_v57, %v14571_v44 }
 0x4e6   : > { %v14730_v47 = vrot.slane %v16470_v59, %v13485_v26  ;;  %v14733_v42 = vrot.slane %v5497_v21, %v13510_v52  ;;  %v14739_v6 = vrot.slane %v16471_v50, %v13485_v26  ;;  %v5906_v8 = vcombine.high %v14576_v41, %v14595_v29  ;;  %16472 = vst [vmem:[#allocation58_spill] sm:$0xff] %v14757_v11 }
 0x4e7   : > { %v14744_v48 = vrot.slane %v5529_v45, %v13510_v52  ;;  %v5265_v21 = vrot.slane %v5257_v4, %v13510_v52  ;;  %11279 = vmatprep.subr.msk.bf16.mxu1 %vm5993_vm0, %v4806_v7  ;;  %v5938_v54 = vcombine.high %v14598_v28, %v14601_v36  ;;  %v5272_v49 = vrot.slane %v5258_v62, %v13510_v52 }
 0x4e8   : > { %v5665_v60 = vcombine.low %v14730_v47, %v14739_v6  ;;  %v14763_v57 = vrot.slane %v5633_v0, %v13510_v52  ;;  %v14766_v44 = vrot.slane %v5802_v35, %v13510_v52  ;;  %v14769_v41 = vrot.slane %v5906_v8, %v13510_v52  ;;  %v16475_v8 = vld [vmem:[#allocation67_spill] sm:$0xff] }
 0x4e9   : > { %v5281_v29 = vrot.slane %v5273_v2, %v13510_v52  ;;  %v5288_v4 = vrot.slane %v5274_v13, %v13510_v52  ;;  %v14777_v28 = vrot.slane %v5938_v54, %v13510_v52  ;;  %v5561_v36 = vcombine.low %v14733_v42, %v14744_v48  ;;  %v16476_v54 = vld [vmem:[#allocation69_spill] sm:$0xff] }
 0x4ea   : > { %16473 = vst [vmem:[#allocation61_spill] sm:$0xff] %v14766_v44  ;;  %16474 = vst [vmem:[#allocation60_spill] sm:$0xff] %v14769_v41  ;;  %v14774_v45 = vrot.slane %v5665_v60, %v13510_v52  ;;  %v5835_v62 = vcombine.low %v14757_v11, %v14766_v44  ;;  %v3470_v59 = vcombine.high %v14492_v32, %v14505_v37  ;;  %v6370_v34 = vsel %vm5993_vm0, %v4806_v7, 0  ;;  %v16477_v32 = vld [vmem:[#allocation70_spill] sm:$0xff]  ;;  %v16480_v44 = vld [vmem:[#allocation77_spill] sm:$0xff] }
 0x4eb   : > { %v3606_v2 = vcombine.high %v14511_v30, %v14517_v39  ;;  %v5971_v50 = vcombine.low %v14769_v41, %v14777_v28  ;;  %v3146_v0 = vcombine.high %v14180_v53, %v14186_v20  ;;  %v3178_v60 = vcombine.high %v16475_v8, %v14194_v23  ;;  %v16479_v30 = vld [vmem:[#allocation56_spill] sm:$0xff] }
 0x4ec   : > { %v5697_v13 = vcombine.low %v14763_v57, %v14774_v45  ;;  %v3282_v37 = vcombine.high %v16477_v32, %v16476_v54  ;;  %v3314_v39 = vcombine.high %v16479_v30, %v16478_v55  ;;  %v16481_v7 = vld [vmem:[#allocation76_spill] sm:$0xff] }
 0x4ed   : > { %v3620_v35 = vpack.c.bf16 %v3606_v2, %v3470_v59  ;;  %v14800_v61 = vpack.c.bf16 %v5971_v50, %v5835_v62  ;;  %v3160_v11 = vrot.slane %v3146_v0, %v13510_v52  ;;  %v4330_v41 = vcombine.high %v16481_v7, %v16480_v44  ;;  %v16482_v59 = vld [vmem:[#allocation79_spill] sm:$0xff]  ;;  %v16483_v2 = vld [vmem:[#allocation78_spill] sm:$0xff]  ;;  %v16485_v62 = vld [vmem:[#allocation72_spill] sm:$0xff] }
 0x4ee   : > { %v5977_v16 = vpack.c.bf16 %v5697_v13, %v5561_v36  ;;  %v3192_v53 = vrot.slane %v3178_v60, %v13510_v52  ;;  %v3296_v20 = vrot.slane %v3282_v37, %v13510_v52  ;;  %v3328_v23 = vrot.slane %v3314_v39, %v13510_v52  ;;  %v16484_v36 = vld [vmem:[#allocation73_spill] sm:$0xff]  ;;  %v16486_v44 = vld [vmem:[#allocation75_spill] sm:$0xff]  ;;  %v16487_v50 = vld [vmem:[#allocation74_spill] sm:$0xff] }
 0x4ef   : > { %11184 = vmatmul.mubr.msk.bf16.vlgmr.msra.gmra.mxu1 %vm5993_vm0, %v3620_v35  ;;  %v4362_v8 = vcombine.high %v16483_v2, %v16482_v59  ;;  %v14812_v55 = vrot.slane %v4330_v41, %v13510_v52  ;;  %v4466_v13 = vcombine.high %v16485_v62, %v16484_v36  ;;  %v4498_v0 = vcombine.high %v16487_v50, %v16486_v44 }
 0x4f0   : > { %11205 = vmatprep.subr.bf16.mxu0 %v5977_v16  ;;  %11188 = vmatpush3.bf16.xpose.msra.mxu1 %v6370_v34  ;;  %v3450_v35 = vcombine.high %v14242_v24, %v14245_v43  ;;  %v3199_v60 = vcombine.low %v3160_v11, %v3192_v53  ;;  %v3335_v54 = vcombine.low %v3296_v20, %v3328_v23 }
 0x4f1   : > { %11206 = vmatpush3.bf16.msra.mxu0 %v5977_v16  ;;  %v14821_v32 = vrot.slane %v4362_v8, %v13510_v52  ;;  %v10816_v37 = vcombine.low %v5265_v21, %v5272_v49  ;;  %v10818_v34 = vcombine.high %v5265_v21, %v5272_v49  ;;  %v4480_v41 = vrot.slane %v4466_v13, %v13510_v52 }
 0x4f2   : > { %11219 = vmatprep.subr.bf16.mxu0 %v14800_v61  ;;  %v4512_v30 = vrot.slane %v4498_v0, %v13510_v52  ;;  %v10820_v39 = vcombine.low %v5281_v29, %v5288_v4  ;;  %v10822_v7 = vcombine.high %v5281_v29, %v5288_v4  ;;  %v3621_v59 = vpack.c.bf16 %v3335_v54, %v3199_v60  ;;  %v16490_v29 = vld [vmem:[#allocation55_spill] sm:$0xff] }
 0x4f3   : > { %v4383_v24 = vcombine.low %v14812_v55, %v14821_v32  ;;  %v4792_v16 = vcombine.high %v14653_v25, %v14680_v1  ;;  %v16488_v21 = vcombine.high %v14264_v33, %v14267_v58  ;;  %v16489_v2 = vcombine.high %v14292_v15, %v14295_v17 }
 0x4f4   : > { %v4519_v43 = vcombine.low %v4480_v41, %v4512_v30  ;;  %11191 = vmatprep.mubr.msk.bf16.mxu1 %vm5993_vm0, %v3621_v59  ;;  %v16491_v4 = vcombine.high %v14236_v10, %v16490_v29  ;;  %v14850_v25 = vrot.slane %v3450_v35, %v13510_v52  ;;  %v5720_v33 = vrot.slane %v10816_v37, %v13485_v26 }
 0x4f5   : > { %v14834_v49 = vrot.slane %v16488_v21, %v13510_v52  ;;  %v14840_v8 = vrot.slane %v16489_v2, %v13510_v52  ;;  %v5736_v58 = vrot.slane %v10818_v34, %v13485_v26  ;;  %v4656_v15 = vcombine.high %v14641_v40, %v14650_v31 }
 0x4f6   : > { %v14847_v36 = vrot.slane %v16491_v4, %v13510_v52  ;;  %v4805_v1 = vpack.c.bf16 %v4519_v43, %v4383_v24  ;;  %v5752_v17 = vrot.slane %v10820_v39, %v13485_v26  ;;  %v5768_v62 = vrot.slane %v10822_v7, %v13485_v26 }
 0x4f7   : > { %v16492_v10 = vcombine.low %v14644_v18, %v14647_v5  ;;  %v3336_v44 = vcombine.high %v3296_v20, %v3328_v23  ;;  %v16493_v50 = vcombine.high %v14644_v18, %v14647_v5  ;;  %v4808_v40 = vpack.c.bf16 %v4792_v16, %v4656_v15 }
 0x4f8   : > { %11280 = vmatprep.subr.msk.bf16.mxu1 %vm5993_vm0, %v4805_v1  ;;  %v6367_v35 = vsel %vm5993_vm0, %v4805_v1, 0  ;;  %v3607_v31 = vcombine.low %v14834_v49, %v14840_v8  ;;  %v16494_v60 = vcombine.low %v14656_v3, %v14659_v19  ;;  %v16495_v20 = vcombine.high %v14656_v3, %v14659_v19 }
 0x4f9   : > { %v5856_v13 = vrot.slane %v16492_v10, %v13485_v26  ;;  %v5872_v0 = vrot.slane %v16493_v50, %v13485_v26  ;;  %11190 = vmatpush3.bf16.xpose.msra.mxu1 %v6367_v35  ;;  %v3471_v18 = vcombine.low %v14847_v36, %v14850_v25  ;;  %v3200_v5 = vcombine.high %v3160_v11, %v3192_v53 }
 0x4fa   : > { %v5888_v54 = vrot.slane %v16494_v60, %v13485_v26  ;;  %v5904_v23 = vrot.slane %v16495_v20, %v13485_v26  ;;  %11281 = vmatprep.subr.msk.bf16.mxu1 %vm5993_vm0, %v4808_v40  ;;  %v4384_v37 = vcombine.high %v14812_v55, %v14821_v32  ;;  %v4520_v34 = vcombine.high %v4480_v41, %v4512_v30 }
 0x4fb   : > { %v5498_v39 = vcombine.high %v14673_v63, %v14686_v56  ;;  %v5530_v7 = vcombine.high %v14696_v12, %v14702_v22  ;;  %v3623_v59 = vpack.c.bf16 %v3336_v44, %v3200_v5  ;;  %v5634_v3 = vcombine.high %v14718_v51, %v14724_v14 }
 0x4fc   : > { %v5666_v19 = vcombine.high %v14730_v47, %v14739_v6  ;;  %v5785_v11 = vcombine.low %v5720_v33, %v5736_v58  ;;  %v3622_v53 = vpack.c.bf16 %v3607_v31, %v3471_v18  ;;  %v5817_v32 = vcombine.low %v5752_v17, %v5768_v62 }
 0x4fd   : > { %v5512_v24 = vrot.slane %v5498_v39, %v13510_v52  ;;  %v5544_v55 = vrot.slane %v5530_v7, %v13510_v52  ;;  %v5648_v41 = vrot.slane %v5634_v3, %v13510_v52  ;;  %v5921_v12 = vcombine.low %v5856_v13, %v5872_v0 }
 0x4fe   : > { %v5680_v63 = vrot.slane %v5666_v19, %v13510_v52  ;;  %v5793_v56 = vrot.slane %v5785_v11, %v13510_v52  ;;  %v5825_v51 = vrot.slane %v5817_v32, %v13510_v52  ;;  %v5953_v14 = vcombine.low %v5888_v54, %v5904_v23  ;;  %v16498_v19 = vld [vmem:[#allocation60_spill] sm:$0xff] }
 0x4ff   : > { %v5563_v22 = vcombine.low %v5512_v24, %v5544_v55  ;;  %v5564_v30 = vcombine.high %v5512_v24, %v5544_v55  ;;  %v5929_v47 = vrot.slane %v5921_v12, %v13510_v52  ;;  %v5786_v16 = vcombine.high %v5720_v33, %v5736_v58 }
 0x500   : > { %v5699_v6 = vcombine.low %v5648_v41, %v5680_v63  ;;  %v5700_v43 = vcombine.high %v5648_v41, %v5680_v63  ;;  %11192 = vmatmul.mubr.msk.bf16.vlgmr.msra.gmra.mxu1 %vm5993_vm0, %v3622_v53  ;;  %v6431_v21 = vsel %vm5993_vm0, %v4808_v40, 0  ;;  %v4807_v2 = vpack.c.bf16 %v4520_v34, %v4384_v37  ;;  %v16499_v53 = vld [vmem:[#allocation61_spill] sm:$0xff] }
 0x501   : > { %v5961_v29 = vrot.slane %v5953_v14, %v13510_v52  ;;  %v5818_v4 = vcombine.high %v5752_v17, %v5768_v62  ;;  %11196 = vmatpush3.bf16.xpose.msra.mxu1 %v6431_v21  ;;  %11199 = vmatprep.mubr.msk.bf16.mxu1 %vm5993_vm0, %v3623_v59  ;;  %v5837_v15 = vcombine.low %v5793_v56, %v5825_v51 }
 0x502   : > { %v14902_v1 = vpack.c.bf16 %v5699_v6, %v5563_v22  ;;  %v14904_v10 = vpack.c.bf16 %v5700_v43, %v5564_v30  ;;  %11282 = vmatprep.subr.msk.bf16.mxu1 %vm5993_vm0, %v4807_v2  ;;  %v5838_v33 = vcombine.high %v5793_v56, %v5825_v51  ;;  %v5922_v50 = vcombine.high %v5856_v13, %v5872_v0 }
 0x503   : > { %v5973_v44 = vcombine.low %v5929_v47, %v5961_v29  ;;  %v5974_v58 = vcombine.high %v5929_v47, %v5961_v29  ;;  %v5800_v35 = vrot.slane %v5786_v16, %v13510_v52  ;;  %v5832_v40 = vrot.slane %v5818_v4, %v13510_v52 }
 0x504   : > { %v5954_v31 = vcombine.high %v5888_v54, %v5904_v23  ;;  %v5970_v17 = vcombine.high %v14622_v9, %v14627_v27  ;;  %v5936_v20 = vrot.slane %v5922_v50, %v13510_v52  ;;  %v5834_v5 = vcombine.high %v14590_v38, %v14609_v46 }
 0x505   : > { %v14911_v62 = vpack.c.bf16 %v5973_v44, %v5837_v15  ;;  %v14913_v60 = vpack.c.bf16 %v5974_v58, %v5838_v33  ;;  %v5839_v13 = vcombine.low %v5800_v35, %v5832_v40  ;;  %v5840_v37 = vcombine.high %v5800_v35, %v5832_v40 }
 0x506   : > { %v5968_v18 = vrot.slane %v5954_v31, %v13510_v52  ;;  %v6428_v54 = vsel %vm5993_vm0, %v4807_v2, 0  ;;  %v5980_v23 = vpack.c.bf16 %v5970_v17, %v5834_v5  ;;  %v3608_v39 = vcombine.high %v14834_v49, %v14840_v8  ;;  %v16500_v49 = vld [vmem:[#allocation58_spill] sm:$0xff] }
 0x507   : > { %v3472_v7 = vcombine.high %v14847_v36, %v14850_v25  ;;  %v5698_v38 = vcombine.high %v14763_v57, %v14774_v45  ;;  %v5562_v59 = vcombine.high %v14733_v42, %v14744_v48  ;;  %v5972_v11 = vcombine.high %v16498_v19, %v14777_v28 }
 0x508   : > { %v5975_v0 = vcombine.low %v5936_v20, %v5968_v18  ;;  %v5976_v34 = vcombine.high %v5936_v20, %v5968_v18  ;;  %v5836_v8 = vcombine.high %v16500_v49, %v16499_v53 }
 0x509   : > { %11198 = vmatpush3.bf16.xpose.msra.mxu1 %v6428_v54  ;;  %v3624_v46 = vpack.c.bf16 %v3608_v39, %v3472_v7  ;;  %v5979_v3 = vpack.c.bf16 %v5698_v38, %v5562_v59 }
 0x50a   : > { %v14920_v9 = vpack.c.bf16 %v5975_v0, %v5839_v13  ;;  %v14922_v27 = vpack.c.bf16 %v5976_v34, %v5840_v37  ;;  %11211 = vmatprep.subr.bf16.mxu1 %v5980_v23  ;;  %v14937_v24 = vpack.c.bf16 %v5972_v11, %v5836_v8 }
 0x50c   : > { %16496 = vst [vmem:[#allocation63_spill] sm:$0xff] %v14920_v9  ;;  %16497 = vst [vmem:[#allocation62_spill] sm:$0xff] %v14922_v27 }
 0x510   : > { %11200 = vmatmul.mubr.msk.bf16.vlgmr.msra.gmra.mxu1 %vm5993_vm0, %v3624_v46 }
 0x511   : > { %11212 = vmatpush3.bf16.msra.mxu1 %v5980_v23 }
 0x512   : > { %11213 = vmatprep.subr.bf16.mxu1 %v5979_v3 }
 0x515   : > { %11214 = vmatpush3.bf16.msra.mxu1 %v5979_v3 }
 0x516   : > { %11227 = vmatprep.subr.bf16.mxu1 %v14937_v24 }
 0x53e   : > { %v14940_v57 = vpop.f32.mrf.mxu1 }
 0x53f   : > { %v6488_v42 = vsel %vm5993_vm0, %v14940_v57, -inf }
 0x540   : > { %6489 = vmax.xlane.f32.xlu1 %v6488_v42  ;;  %v14944_v48 = vpop.f32.mrf.mxu1 }
 0x541   : > { %v6482_v45 = vsel %vm5993_vm0, %v14944_v48, -inf }
 0x542   : > { %6483 = vmax.xlane.f32.xlu0 %v6482_v45  ;;  %v14948_v28 = vpop.f32.mrf.mxu1 }
 0x543   : > { %v6491_v25 = vsel %vm5993_vm0, %v14948_v28, -inf }
 0x544   : > { %v14950_v36 = vpop.f32.mrf.mxu1 }
 0x545   : > { %v6485_v55 = vsel %vm5993_vm0, %v14950_v36, -inf }
 0x546   : > { %6492 = vmax.xlane.f32.xlu0 %v6491_v25  ;;  %6486 = vmax.xlane.f32.xlu1 %v6485_v55 }
 0x54f   : > { %v14956_v32 = vpop.f32.mrf.mxu1 }
 0x550   : > { %v6500_v41 = vsel %vm5993_vm0, %v14956_v32, -inf }
 0x551   : > { %6501 = vmax.xlane.f32.xlu1 %v6500_v41  ;;  %v14960_v63 = vpop.f32.mrf.mxu1 }
 0x552   : > { %v6494_v56 = vsel %vm5993_vm0, %v14960_v63, -inf }
 0x553   : > { %6495 = vmax.xlane.f32.xlu0 %v6494_v56  ;;  %v14964_v12 = vpop.f32.mrf.mxu1 }
 0x554   : > { %v6503_v22 = vsel %vm5993_vm0, %v14964_v12, -inf }
 0x555   : > { %v14968_v51 = vpop.f32.mrf.mxu1 }
 0x556   : > { %v6497_v14 = vsel %vm5993_vm0, %v14968_v51, -inf }
 0x557   : > { %6504 = vmax.xlane.f32.xlu0 %v6503_v22 }
 0x55b   : > { %6498 = vmax.xlane.f32.xlu0 %v6497_v14 }
 0x572   : > { %v14972_v30 = vpop.f32.mrf.mxu1 }
 0x573   : > { %v6512_v6 = vsel %vm5993_vm0, %v14972_v30, -inf }
 0x574   : > { %6513 = vmax.xlane.f32.xlu1 %v6512_v6  ;;  %v14976_v47 = vpop.f32.mrf.mxu1 }
 0x575   : > { %v6506_v16 = vsel %vm5993_vm0, %v14976_v47, -inf }
 0x576   : > { %v14978_v43 = vpop.f32.mrf.mxu1 }
 0x577   : > { %v6515_v21 = vsel %vm5993_vm0, %v14978_v43, -inf }
 0x578   : > { %6507 = vmax.xlane.f32.xlu1 %v6506_v16  ;;  %6516 = vmax.xlane.f32.xlu0 %v6515_v21  ;;  %v14984_v2 = vpop.f32.mrf.mxu1  ;;  %v15068_v21 = vpop.permute.xlu0 %4853 }
 0x579   : > { %v6509_v29 = vsel %vm5993_vm0, %v14984_v2, -inf }
 0x57c   : > { %6510 = vmax.xlane.f32.xlu0 %v6509_v29  ;;  %v15070_v29 = vpop.permute.xlu0 %4865 }
 0x582   : > { %v14988_v4 = vpop.f32.mrf.mxu1 }
 0x583   : > { %v6524_v15 = vsel %vm5993_vm0, %v14988_v4, -inf }
 0x584   : > { %6525 = vmax.xlane.f32.xlu1 %v6524_v15  ;;  %v14992_v44 = vpop.f32.mrf.mxu1  ;;  %v15072_v15 = vpop.permute.xlu1 %4855 }
 0x585   : > { %v6518_v58 = vsel %vm5993_vm0, %v14992_v44, -inf }
 0x586   : > { %v14994_v33 = vpop.f32.mrf.mxu1 }
 0x587   : > { %v6527_v50 = vsel %vm5993_vm0, %v14994_v33, -inf }
 0x588   : > { %6519 = vmax.xlane.f32.xlu1 %v6518_v58  ;;  %6528 = vmax.xlane.f32.xlu0 %v6527_v50  ;;  %v15000_v35 = vpop.f32.mrf.mxu1  ;;  %v16501_v50 = vld [vmem:[#allocation57_spill] sm:$0xff] }
 0x589   : > { %v6521_v40 = vsel %vm5993_vm0, %v15000_v35, -inf }
 0x58c   : > { %6522 = vmax.xlane.f32.xlu0 %v6521_v40  ;;  %v15076_v40 = vpop.permute.xlu1 %4867 }
 0x595   : > { %v15004_v31 = vpop.f32.mrf.mxu1 }
 0x596   : > { %v6536_v17 = vsel %vm5993_vm0, %v15004_v31, -inf }
 0x597   : > { %6537 = vmax.xlane.f32.xlu1 %v6536_v17  ;;  %v15008_v20 = vpop.f32.mrf.mxu1 }
 0x598   : > { %v6530_v5 = vsel %vm5993_vm0, %v15008_v20, -inf }
 0x599   : > { %v15010_v18 = vpop.f32.mrf.mxu1 }
 0x59a   : > { %v6539_v13 = vsel %vm5993_vm0, %v15010_v18, -inf }
 0x59b   : > { %6531 = vmax.xlane.f32.xlu1 %v6530_v5  ;;  %6540 = vmax.xlane.f32.xlu0 %v6539_v13  ;;  %v15016_v0 = vpop.f32.mrf.mxu1 }
 0x59c   : > { %v6533_v37 = vsel %vm5993_vm0, %v15016_v0, -inf }
 0x59f   : > { %6534 = vmax.xlane.f32.xlu0 %v6533_v37  ;;  %v16502_v37 = vld [vmem:[#allocation54_spill] sm:$0xff] }
 0x5af   : > { %v15020_v34 = vpop.f32.mrf.mxu1 }
 0x5b0   : > { %v6548_v54 = vsel %vm5993_vm0, %v15020_v34, -inf }
 0x5b1   : > { %6549 = vmax.xlane.f32.xlu1 %v6548_v54  ;;  %v15024_v23 = vpop.f32.mrf.mxu1 }
 0x5b2   : > { %v6542_v7 = vsel %vm5993_vm0, %v15024_v23, -inf }
 0x5b3   : > { %v15026_v39 = vpop.f32.mrf.mxu1 }
 0x5b4   : > { %v6551_v38 = vsel %vm5993_vm0, %v15026_v39, -inf }
 0x5b5   : > { %6543 = vmax.xlane.f32.xlu1 %v6542_v7  ;;  %6552 = vmax.xlane.f32.xlu0 %v6551_v38  ;;  %v15032_v46 = vpop.f32.mrf.mxu1 }
 0x5b6   : > { %v6545_v59 = vsel %vm5993_vm0, %v15032_v46, -inf }
 0x5b9   : > { %6546 = vmax.xlane.f32.xlu0 %v6545_v59 }
 0x5c0   : > { %v15036_v3 = vpop.f32.mrf.mxu1 }
 0x5c1   : > { %v6560_v19 = vsel %vm5993_vm0, %v15036_v3, -inf }
 0x5c2   : > { %6561 = vmax.xlane.f32.xlu1 %v6560_v19  ;;  %v15040_v11 = vpop.f32.mrf.mxu1 }
 0x5c3   : > { %v6554_v49 = vsel %vm5993_vm0, %v15040_v11, -inf }
 0x5c4   : > { %v15042_v53 = vpop.f32.mrf.mxu1 }
 0x5c5   : > { %v6563_v8 = vsel %vm5993_vm0, %v15042_v53, -inf }
 0x5c6   : > { %6555 = vmax.xlane.f32.xlu1 %v6554_v49  ;;  %6564 = vmax.xlane.f32.xlu0 %v6563_v8  ;;  %v15048_v42 = vpop.f32.mrf.mxu1 }
 0x5c7   : > { %v6557_v45 = vsel %vm5993_vm0, %v15048_v42, -inf }
 0x5c9   : > { %v6490_v5 = vpop.xlane.xlu1 %6489 }
 0x5ca   : > { %6558 = vmax.xlane.f32.xlu0 %v6557_v45  ;;  %v6580_v54 = vsub.f32 %v14940_v57, %v6490_v5 }
 0x5cb   : > { %v6484_v58 = vpop.xlane.xlu0 %6483 }
 0x5cc   : > { %v6578_v38 = vsub.f32 %v14944_v48, %v6484_v58  ;;  %v6614_v19 = vmul.f32 1.442695, %v6580_v54 }
 0x5ce   : > { %v6610_v45 = vmul.f32 1.442695, %v6578_v38  ;;  %11997 = vpow2.f32 %v6614_v19 }
 0x5cf   : > { %v6493_v17 = vpop.xlane.xlu0 %6492  ;;  %v6487_v7 = vpop.xlane.xlu1 %6486 }
 0x5d0   : > { %v15052_v25 = vpop.f32.mrf.mxu1  ;;  %v6581_v49 = vsub.f32 %v14948_v28, %v6493_v17  ;;  %11999 = vpow2.f32 %v6610_v45 }
 0x5d1   : > { %v6572_v55 = vsel %vm5993_vm0, %v15052_v25, -inf }
 0x5d2   : > { %6573 = vmax.xlane.f32.xlu1 %v6572_v55  ;;  %v15056_v41 = vpop.f32.mrf.mxu1  ;;  %v6579_v55 = vsub.f32 %v14950_v36, %v6487_v7 }
 0x5d3   : > { %v6566_v22 = vsel %vm5993_vm0, %v15056_v41, -inf }
 0x5d4   : > { %v15058_v56 = vpop.f32.mrf.mxu1  ;;  %v6612_v9 = vmul.f32 1.442695, %v6579_v55 }
 0x5d5   : > { %v6575_v14 = vsel %vm5993_vm0, %v15058_v56, -inf }
 0x5d6   : > { %6567 = vmax.xlane.f32.xlu1 %v6566_v22  ;;  %6576 = vmax.xlane.f32.xlu0 %v6575_v14  ;;  %v15064_v6 = vpop.f32.mrf.mxu1  ;;  %v6616_v22 = vmul.f32 1.442695, %v6581_v49 }
 0x5d7   : > { %v6569_v16 = vsel %vm5993_vm0, %v15064_v6, -inf }
 0x5d8   : > { %12001 = vpow2.f32 %v6616_v22 }
 0x5d9   : > { %12003 = vpow2.f32 %v6612_v9 }
 0x5da   : > { %6570 = vmax.xlane.f32.xlu0 %v6569_v16  ;;  %v6502_v8 = vpop.xlane.xlu1 %6501 }
 0x5db   : > { %v6584_v14 = vsub.f32 %v14956_v32, %v6502_v8 }
 0x5dc   : > { %v6496_v13 = vpop.xlane.xlu0 %6495 }
 0x5dd   : > { %v6582_v57 = vsub.f32 %v14960_v63, %v6496_v13  ;;  %v6622_v48 = vmul.f32 1.442695, %v6584_v14 }
 0x5df   : > { %v6618_v36 = vmul.f32 1.442695, %v6582_v57  ;;  %12005 = vpow2.f32 %v6622_v48 }
 0x5e0   : > { %v6505_v59 = vpop.xlane.xlu0 %6504 }
 0x5e1   : > { %v6585_v58 = vsub.f32 %v14964_v12, %v6505_v59  ;;  %12007 = vpow2.f32 %v6618_v36  ;;  %v15091_v12 = vpop.eup %11997 }
 0x5e2   : > { %v15093_v9 = vpop.eup %11999 }
 0x5e3   : > { %v6624_v54 = vmul.f32 1.442695, %v6585_v58  ;;  %v6674_v45 = vsel %vm5993_vm0, %v15093_v9, 0.0 }
 0x5e4   : > { %v6499_v16 = vpop.xlane.xlu0 %6498 }
 0x5e5   : > { %v6583_v32 = vsub.f32 %v14968_v51, %v6499_v16  ;;  %12009 = vpow2.f32 %v6624_v54  ;;  %v6680_v51 = vsel %vm5993_vm0, %v15091_v12, 0.0 }
 0x5e7   : > { %4879 = vrot.lane.b32.xlu1 %v16501_v50, %s12608_s3  ;;  %v6620_v13 = vmul.f32 1.442695, %v6583_v32 }
 0x5f0   : > { %4877 = vrot.lane.b32.xlu0 %v16502_v37, %s12608_s3 }
 0x5fd   : > { %v6514_v27 = vpop.xlane.xlu1 %6513 }
 0x5fe   : > { %v6588_v28 = vsub.f32 %v14972_v30, %v6514_v27 }
 0x600   : > { %v6630_v19 = vmul.f32 1.442695, %v6588_v28 }
 0x601   : > { %v6517_v5 = vpop.xlane.xlu0 %6516  ;;  %v6508_v17 = vpop.xlane.xlu1 %6507 }
 0x602   : > { %v6586_v7 = vsub.f32 %v14976_v47, %v6508_v17  ;;  %12011 = vpow2.f32 %v6630_v19  ;;  %v6589_v30 = vsub.f32 %v14978_v43, %v6517_v5  ;;  %v15098_v47 = vpop.eup %12001 }
 0x603   : > { %12013 = vpow2.f32 %v6620_v13  ;;  %v15101_v8 = vpop.eup %12003  ;;  %v6683_v55 = vsel %vm5993_vm0, %v15098_v47, 0.0 }
 0x604   : > { %v6626_v59 = vmul.f32 1.442695, %v6586_v7  ;;  %v6632_v22 = vmul.f32 1.442695, %v6589_v30  ;;  %v15107_v16 = vpop.eup %12005 }
 0x605   : > { %v6511_v38 = vpop.xlane.xlu0 %6510  ;;  %v15112_v58 = vpop.eup %12007  ;;  %v6692_v5 = vsel %vm5993_vm0, %v15107_v16, 0.0 }
 0x606   : > { %v6587_v63 = vsub.f32 %v14984_v2, %v6511_v38  ;;  %12015 = vpow2.f32 %v6626_v59  ;;  %v15117_v36 = vpop.eup %12009 }
 0x607   : > { %v6695_v7 = vsel %vm5993_vm0, %v15117_v36, 0.0 }
 0x608   : > { %v6628_v27 = vmul.f32 1.442695, %v6587_v63 }
 0x60a   : > { %12017 = vpow2.f32 %v6628_v27 }
 0x60b   : > { %6681 = vadd.xlane.f32.xlu1 %v6680_v51 }
 0x60d   : > { %v6526_v2 = vpop.xlane.xlu1 %6525 }
 0x60e   : > { %v6592_v49 = vsub.f32 %v14988_v4, %v6526_v2  ;;  %v6677_v4 = vsel %vm5993_vm0, %v15101_v8, 0.0 }
 0x60f   : > { %6675 = vadd.xlane.f32.xlu1 %v6674_v45  ;;  %6684 = vadd.xlane.f32.xlu0 %v6683_v55  ;;  %v15119_v32 = vpop.eup %12011 }
 0x610   : > { %v6638_v14 = vmul.f32 1.442695, %v6592_v49  ;;  %v15126_v63 = vpop.eup %12013  ;;  %v6704_v13 = vsel %vm5993_vm0, %v15119_v32, 0.0 }
 0x611   : > { %v6520_v43 = vpop.xlane.xlu1 %6519  ;;  %v6529_v57 = vpop.xlane.xlu0 %6528  ;;  %v6689_v27 = vsel %vm5993_vm0, %v15126_v63, 0.0 }
 0x612   : > { %12019 = vpow2.f32 %v6638_v14  ;;  %v6590_v48 = vsub.f32 %v14992_v44, %v6520_v43  ;;  %v6593_v17 = vsub.f32 %v14994_v33, %v6529_v57  ;;  %v6686_v44 = vsel %vm5993_vm0, %v15112_v58, 0.0 }
 0x613   : > { %12021 = vpow2.f32 %v6632_v22  ;;  %6693 = vadd.xlane.f32.xlu1 %v6692_v5  ;;  %6678 = vadd.xlane.f32.xlu0 %v6677_v4  ;;  %v15128_v33 = vpop.eup %12015 }
 0x614   : > { %v6634_v28 = vmul.f32 1.442695, %v6590_v48  ;;  %v6640_v38 = vmul.f32 1.442695, %v6593_v17 }
 0x615   : > { %v6523_v54 = vpop.xlane.xlu0 %6522 }
 0x616   : > { %12023 = vpow2.f32 %v6634_v28  ;;  %v6591_v19 = vsub.f32 %v15000_v35, %v6523_v54  ;;  %v6698_v35 = vsel %vm5993_vm0, %v15128_v33, 0.0 }
 0x617   : > { %6687 = vadd.xlane.f32.xlu1 %v6686_v44  ;;  %6696 = vadd.xlane.f32.xlu0 %v6695_v7  ;;  %v15132_v59 = vpop.eup %12017  ;;  %12025 = vpow2.f32 %v6640_v38 }
 0x618   : > { %v6636_v51 = vmul.f32 1.442695, %v6591_v19  ;;  %v6701_v30 = vsel %vm5993_vm0, %v15132_v59, 0.0 }
 0x61a   : > { %12027 = vpow2.f32 %v6636_v51 }
 0x61b   : > { %6690 = vadd.xlane.f32.xlu0 %v6689_v27  ;;  %6705 = vadd.xlane.f32.xlu1 %v6704_v13 }
 0x61f   : > { %v15140_v2 = vpop.eup %12019  ;;  %6699 = vadd.xlane.f32.xlu0 %v6698_v35  ;;  %6702 = vadd.xlane.f32.xlu1 %v6701_v30 }
 0x620   : > { %v15142_v49 = vpop.eup %12021  ;;  %v6538_v45 = vpop.xlane.xlu1 %6537  ;;  %v6716_v55 = vsel %vm5993_vm0, %v15140_v2, 0.0 }
 0x621   : > { %v6596_v14 = vsub.f32 %v15004_v31, %v6538_v45  ;;  %v6707_v43 = vsel %vm5993_vm0, %v15142_v49, 0.0 }
 0x623   : > { %v15146_v22 = vpop.eup %12023  ;;  %6708 = vadd.xlane.f32.xlu0 %v6707_v43  ;;  %v6646_v57 = vmul.f32 1.442695, %v6596_v14  ;;  %6717 = vadd.xlane.f32.xlu1 %v6716_v55 }
 0x624   : > { %v6532_v48 = vpop.xlane.xlu1 %6531  ;;  %v6541_v4 = vpop.xlane.xlu0 %6540  ;;  %v6710_v5 = vsel %vm5993_vm0, %v15146_v22, 0.0 }
 0x625   : > { %12029 = vpow2.f32 %v6646_v57  ;;  %v6594_v28 = vsub.f32 %v15008_v20, %v6532_v48  ;;  %v6597_v17 = vsub.f32 %v15010_v18, %v6541_v4  ;;  %v15155_v54 = vpop.eup %12025 }
 0x626   : > { %v6719_v19 = vsel %vm5993_vm0, %v15155_v54, 0.0 }
 0x627   : > { %v6642_v44 = vmul.f32 1.442695, %v6594_v28  ;;  %v6648_v31 = vmul.f32 1.442695, %v6597_v17  ;;  %6711 = vadd.xlane.f32.xlu0 %v6710_v5  ;;  %v15160_v13 = vpop.eup %12027 }
 0x628   : > { %v6535_v7 = vpop.xlane.xlu0 %6534  ;;  %v6713_v20 = vsel %vm5993_vm0, %v15160_v13, 0.0 }
 0x629   : > { %12031 = vpow2.f32 %v6642_v44  ;;  %v6595_v38 = vsub.f32 %v15016_v0, %v6535_v7 }
 0x62a   : > { %12033 = vpow2.f32 %v6648_v31 }
 0x62b   : > { %v6644_v27 = vmul.f32 1.442695, %v6595_v38  ;;  %6720 = vadd.xlane.f32.xlu0 %v6719_v19 }
 0x62d   : > { %12035 = vpow2.f32 %v6644_v27 }
 0x62f   : > { %6714 = vadd.xlane.f32.xlu0 %v6713_v20 }
 0x632   : > { %v15164_v18 = vpop.eup %12029 }
 0x633   : > { %v6728_v51 = vsel %vm5993_vm0, %v15164_v18, 0.0 }
 0x634   : > { %6729 = vadd.xlane.f32.xlu1 %v6728_v51 }
 0x636   : > { %v15168_v0 = vpop.eup %12031 }
 0x637   : > { %v15170_v35 = vpop.eup %12033  ;;  %v6722_v30 = vsel %vm5993_vm0, %v15168_v0, 0.0 }
 0x638   : > { %6723 = vadd.xlane.f32.xlu1 %v6722_v30  ;;  %v6731_v45 = vsel %vm5993_vm0, %v15170_v35, 0.0 }
 0x639   : > { %6732 = vadd.xlane.f32.xlu0 %v6731_v45 }
 0x63a   : > { %v15176_v55 = vpop.eup %12035  ;;  %v6550_v14 = vpop.xlane.xlu1 %6549 }
 0x63b   : > { %v6600_v43 = vsub.f32 %v15020_v34, %v6550_v14  ;;  %v6725_v57 = vsel %vm5993_vm0, %v15176_v55, 0.0 }
 0x63d   : > { %v6654_v48 = vmul.f32 1.442695, %v6600_v43  ;;  %6726 = vadd.xlane.f32.xlu0 %v6725_v57 }
 0x63e   : > { %v6544_v4 = vpop.xlane.xlu1 %6543  ;;  %v6553_v5 = vpop.xlane.xlu0 %6552 }
 0x63f   : > { %12037 = vpow2.f32 %v6654_v48  ;;  %v6598_v28 = vsub.f32 %v15024_v23, %v6544_v4  ;;  %v6601_v17 = vsub.f32 %v15026_v39, %v6553_v5 }
 0x641   : > { %v6650_v44 = vmul.f32 1.442695, %v6598_v28  ;;  %v6656_v31 = vmul.f32 1.442695, %v6601_v17 }
 0x642   : > { %v6547_v7 = vpop.xlane.xlu0 %6546 }
 0x643   : > { %12039 = vpow2.f32 %v6650_v44  ;;  %v6599_v38 = vsub.f32 %v15032_v46, %v6547_v7 }
 0x644   : > { %12041 = vpow2.f32 %v6656_v31 }
 0x645   : > { %v6652_v34 = vmul.f32 1.442695, %v6599_v38 }
 0x647   : > { %12043 = vpow2.f32 %v6652_v34 }
 0x64b   : > { %v6562_v19 = vpop.xlane.xlu1 %6561 }
 0x64c   : > { %v15184_v27 = vpop.eup %12037  ;;  %v6604_v20 = vsub.f32 %v15036_v3, %v6562_v19 }
 0x64d   : > { %v6740_v51 = vsel %vm5993_vm0, %v15184_v27, 0.0 }
 0x64e   : > { %v6662_v23 = vmul.f32 1.442695, %v6604_v20  ;;  %6741 = vadd.xlane.f32.xlu1 %v6740_v51 }
 0x64f   : > { %v6556_v39 = vpop.xlane.xlu1 %6555  ;;  %v6565_v30 = vpop.xlane.xlu0 %6564 }
 0x650   : > { %v15189_v45 = vpop.eup %12039  ;;  %12045 = vpow2.f32 %v6662_v23  ;;  %v6602_v46 = vsub.f32 %v15040_v11, %v6556_v39  ;;  %v6605_v14 = vsub.f32 %v15042_v53, %v6565_v30 }
 0x651   : > { %v15193_v43 = vpop.eup %12041  ;;  %v6734_v57 = vsel %vm5993_vm0, %v15189_v45, 0.0 }
 0x652   : > { %v6658_v3 = vmul.f32 1.442695, %v6602_v46  ;;  %v6664_v48 = vmul.f32 1.442695, %v6605_v14  ;;  %6735 = vadd.xlane.f32.xlu1 %v6734_v57  ;;  %v6743_v4 = vsel %vm5993_vm0, %v15193_v43, 0.0 }
 0x653   : > { %6744 = vadd.xlane.f32.xlu0 %v6743_v4  ;;  %v6559_v5 = vpop.xlane.xlu0 %6558 }
 0x654   : > { %v15199_v28 = vpop.eup %12043  ;;  %12047 = vpow2.f32 %v6658_v3  ;;  %v6603_v11 = vsub.f32 %v15048_v42, %v6559_v5 }
 0x655   : > { %v6737_v53 = vsel %vm5993_vm0, %v15199_v28, 0.0  ;;  %12049 = vpow2.f32 %v6664_v48 }
 0x656   : > { %v6660_v17 = vmul.f32 1.442695, %v6603_v11 }
 0x657   : > { %6738 = vadd.xlane.f32.xlu0 %v6737_v53 }
 0x658   : > { %12051 = vpow2.f32 %v6660_v17 }
 0x65b   : > { %v6574_v44 = vpop.xlane.xlu1 %6573 }
 0x65c   : > { %v6608_v31 = vsub.f32 %v15052_v25, %v6574_v44 }
 0x65d   : > { %v15205_v7 = vpop.eup %12045 }
 0x65e   : > { %v6670_v38 = vmul.f32 1.442695, %v6608_v31  ;;  %v6752_v34 = vsel %vm5993_vm0, %v15205_v7, 0.0 }
 0x65f   : > { %v6568_v19 = vpop.xlane.xlu1 %6567  ;;  %6753 = vadd.xlane.f32.xlu1 %v6752_v34  ;;  %v6577_v20 = vpop.xlane.xlu0 %6576 }
 0x660   : > { %12053 = vpow2.f32 %v6670_v38  ;;  %v6606_v42 = vsub.f32 %v15056_v41, %v6568_v19  ;;  %v6609_v25 = vsub.f32 %v15058_v56, %v6577_v20 }
 0x661   : > { %v15210_v51 = vpop.eup %12047 }
 0x662   : > { %v6666_v23 = vmul.f32 1.442695, %v6606_v42  ;;  %v6746_v39 = vsel %vm5993_vm0, %v15210_v51, 0.0  ;;  %v15214_v30 = vpop.eup %12049  ;;  %v6672_v4 = vmul.f32 1.442695, %v6609_v25  ;;  %v5057_v25 = vcombine.low %v16501_v50, %v15076_v40 }
 0x663   : > { %6747 = vadd.xlane.f32.xlu0 %v6746_v39  ;;  %v6571_v46 = vpop.xlane.xlu0 %6570  ;;  %v6755_v41 = vsel %vm5993_vm0, %v15214_v30, 0.0  ;;  %v4880_v38 = vpop.permute.xlu1 %4879 }
 0x664   : > { %12055 = vpow2.f32 %v6666_v23  ;;  %v6607_v14 = vsub.f32 %v15064_v6, %v6571_v46  ;;  %v5073_v23 = vcombine.low %v15072_v15, %v4880_v38 }
 0x665   : > { %v15218_v57 = vpop.eup %12051 }
 0x666   : > { %v6668_v3 = vmul.f32 1.442695, %v6607_v14  ;;  %v6749_v48 = vsel %vm5993_vm0, %v15218_v57, 0.0  ;;  %v4921_v14 = vcombine.low %v16502_v37, %v15070_v29 }
 0x667   : > { %6756 = vadd.xlane.f32.xlu0 %v6755_v41  ;;  %6750 = vadd.xlane.f32.xlu1 %v6749_v48  ;;  %v4878_v34 = vpop.permute.xlu0 %4877 }
 0x668   : > { %12057 = vpow2.f32 %v6668_v3  ;;  %v4937_v39 = vcombine.low %v15068_v21, %v4878_v34  ;;  %v4938_v46 = vcombine.high %v15068_v21, %v4878_v34  ;;  %v5074_v3 = vcombine.high %v15072_v15, %v4880_v38 }
 0x669   : > { %12059 = vpow2.f32 %v6672_v4  ;;  %v4922_v4 = vcombine.high %v16502_v37, %v15070_v29  ;;  %v4929_v15 = vrot.slane %v4921_v14, %v13485_v26 }
 0x66a   : > { %v4945_v21 = vrot.slane %v4937_v39, %v13485_v26  ;;  %v5088_v38 = vrot.slane %v5074_v3, %v13485_v26 }
 0x66b   : > { %v4936_v29 = vrot.slane %v4922_v4, %v13485_v26 }
 0x66d   : > { %v15224_v56 = vpop.eup %12053 }
 0x66e   : > { %v6764_v5 = vsel %vm5993_vm0, %v15224_v56, 0.0 }
 0x66f   : > { %6765 = vadd.xlane.f32.xlu1 %v6764_v5  ;;  %v5081_v5 = vrot.slane %v5073_v23, %v13485_v26 }
 0x671   : > { %v15228_v6 = vpop.eup %12055 }
 0x672   : > { %16503 = vst [vmem:[#allocation46_spill] sm:$0xff] %v15228_v6  ;;  %v6758_v11 = vsel %vm5993_vm0, %v15228_v6, 0.0 }
 0x673   : > { %6759 = vadd.xlane.f32.xlu0 %v6758_v11  ;;  %v5058_v11 = vcombine.high %v16501_v50, %v15076_v40  ;;  %v4985_v40 = vcombine.low %v4929_v15, %v4945_v21 }
 0x675   : > { %v15232_v53 = vpop.eup %12057  ;;  %v5072_v50 = vrot.slane %v5058_v11, %v13485_v26 }
 0x676   : > { %16504 = vst [vmem:[#allocation47_spill] sm:$0xff] %v15232_v53  ;;  %v6761_v17 = vsel %vm5993_vm0, %v15232_v53, 0.0  ;;  %v15236_v44 = vpop.eup %12059 }
 0x677   : > { %16505 = vst [vmem:[#allocation64_spill] sm:$0xff] %v15236_v44  ;;  %6762 = vadd.xlane.f32.xlu0 %v6761_v17  ;;  %v6767_v31 = vsel %vm5993_vm0, %v15236_v44, 0.0  ;;  %v5065_v17 = vrot.slane %v5057_v25, %v13485_v26  ;;  %v5137_v25 = vcombine.low %v5072_v50, %v5088_v38 }
 0x679   : > { %v5121_v37 = vcombine.low %v5065_v17, %v5081_v5 }
 0x67b   : > { %6768 = vadd.xlane.f32.xlu0 %v6767_v31  ;;  %v4952_v31 = vrot.slane %v4938_v46, %v13485_v26  ;;  %v5138_v46 = vcombine.high %v5072_v50, %v5088_v38  ;;  %v5129_v3 = vrot.slane %v5121_v37, %v13510_v52 }
 0x67d   : > { %v5001_v23 = vcombine.low %v4936_v29, %v4952_v31  ;;  %v5002_v39 = vcombine.high %v4936_v29, %v4952_v31  ;;  %v5152_v38 = vrot.slane %v5138_v46, %v13510_v52 }
 0x67f   : > { %v5009_v11 = vrot.slane %v5001_v23, %v13510_v52 }
 0x694   : > { %v6682_v19 = vpop.xlane.xlu1 %6681 }
 0x695   : > { %12061 = vrcp.f32 %v6682_v19 }
 0x698   : > { %v6676_v20 = vpop.xlane.xlu1 %6675  ;;  %v6685_v42 = vpop.xlane.xlu0 %6684 }
 0x699   : > { %12063 = vrcp.f32 %v6685_v42  ;;  %v4986_v42 = vcombine.high %v4929_v15, %v4945_v21  ;;  %v5016_v21 = vrot.slane %v5002_v39, %v13510_v52  ;;  %v5145_v15 = vrot.slane %v5137_v25, %v13510_v52 }
 0x69a   : > { %12065 = vrcp.f32 %v6676_v20  ;;  %v5122_v20 = vcombine.high %v5065_v17, %v5081_v5  ;;  %v4993_v5 = vrot.slane %v4985_v40, %v13510_v52 }
 0x69b   : > { %v5000_v17 = vrot.slane %v4986_v42, %v13510_v52  ;;  %v10806_v39 = vcombine.high %v5009_v11, %v5016_v21  ;;  %v10812_v46 = vcombine.low %v5145_v15, %v5152_v38  ;;  %v10814_v53 = vcombine.high %v5145_v15, %v5152_v38 }
 0x69c   : > { %v6694_v41 = vpop.xlane.xlu1 %6693  ;;  %v6679_v48 = vpop.xlane.xlu0 %6678 }
 0x69d   : > { %12067 = vrcp.f32 %v6694_v41  ;;  %v10800_v42 = vcombine.low %v4993_v5, %v5000_v17 }
 0x69e   : > { %12069 = vrcp.f32 %v6679_v48  ;;  %v5136_v48 = vrot.slane %v5122_v20, %v13510_v52 }
 0x6a0   : > { %v6688_v34 = vpop.xlane.xlu1 %6687  ;;  %v6697_v19 = vpop.xlane.xlu0 %6696  ;;  %v10808_v37 = vcombine.low %v5129_v3, %v5136_v48  ;;  %v10810_v40 = vcombine.high %v5129_v3, %v5136_v48 }
 0x6a1   : > { %12071 = vrcp.f32 %v6688_v34 }
 0x6a2   : > { %12073 = vrcp.f32 %v6697_v19  ;;  %v12062_v4 = vpop.eup %12061  ;;  %v15276_v3 = vrot.slane %v10808_v37, %v13485_v26 }
 0x6a3   : > { %v6775_v20 = vmul.f32 %v12062_v4, %v15091_v12 }
 0x6a4   : > { %v6691_v41 = vpop.xlane.xlu0 %6690  ;;  %v6706_v14 = vpop.xlane.xlu1 %6705 }
 0x6a5   : > { %12075 = vrcp.f32 %v6691_v41  ;;  %v10802_v41 = vcombine.high %v4993_v5, %v5000_v17  ;;  %v6864_v48 = vsel %vm5993_vm0, %v6775_v20, 0.0 }
 0x6a6   : > { %12077 = vrcp.f32 %v6706_v14  ;;  %v12064_v31 = vpop.eup %12063  ;;  %v10804_v14 = vcombine.low %v5009_v11, %v5016_v21 }
 0x6a7   : > { %v12066_v29 = vpop.eup %12065  ;;  %v6777_v44 = vmul.f32 %v12064_v31, %v15098_v47  ;;  %v15285_v17 = vrot.slane %v10802_v41, %v13485_v26  ;;  %v15291_v31 = vrot.slane %v10806_v39, %v13485_v26 }
 0x6a8   : > { %v6700_v34 = vpop.xlane.xlu0 %6699  ;;  %v6703_v19 = vpop.xlane.xlu1 %6702  ;;  %v6771_v6 = vmul.f32 %v12066_v29, %v15093_v9  ;;  %v15288_v21 = vrot.slane %v10804_v14, %v13485_v26  ;;  %v15301_v29 = vrot.slane %v10814_v53, %v13485_v26 }
 0x6a9   : > { %12079 = vrcp.f32 %v6700_v34  ;;  %v6904_v15 = vpack.c.bf16 %v6777_v44, %v6775_v20  ;;  %v15295_v34 = vrot.slane %v10810_v40, %v13485_v26  ;;  %v6879_v40 = vsel %vm5993_vm0, %v6777_v44, 0.0 }
 0x6aa   : > { %v12068_v50 = vpop.eup %12067  ;;  %12081 = vrcp.f32 %v6703_v19  ;;  %v15298_v19 = vrot.slane %v10812_v46, %v13485_v26  ;;  %v5545_v39 = vcombine.low %v15288_v21, %v15291_v31 }
 0x6ab   : > { %v12070_v23 = vpop.eup %12069  ;;  %v15271_v25 = vmul.f32 %v12068_v50, %v15107_v16  ;;  %v15282_v16 = vrot.slane %v10800_v42, %v13485_v26  ;;  %v6834_v42 = vsel %vm5993_vm0, %v6771_v6, 0.0 }
 0x6ac   : > { %v6773_v12 = vmul.f32 %v12070_v23, %v15101_v8  ;;  %v6709_v4 = vpop.xlane.xlu0 %6708 }
 0x6ad   : > { %12083 = vrcp.f32 %v6709_v4  ;;  %v6865_v5 = vsel %vm5993_vm0, %v15271_v25, 0.0  ;;  %v5513_v23 = vcombine.low %v15282_v16, %v15285_v17  ;;  %v5681_v4 = vcombine.low %v15298_v19, %v15301_v29 }
 0x6ae   : > { %v12072_v47 = vpop.eup %12071  ;;  %v6903_v9 = vpack.c.bf16 %v6773_v12, %v6771_v6  ;;  %v6866_v11 = vadd.f32 %v6865_v5, %v6864_v48  ;;  %v6849_v48 = vsel %vm5993_vm0, %v6773_v12, 0.0 }
 0x6af   : > { %v12074_v8 = vpop.eup %12073  ;;  %v6779_v38 = vmul.f32 %v12072_v47, %v15112_v58 }
 0x6b0   : > { %11207 = vmatprep.mubr.msk.bf16.mxu0 %vm5993_vm0, %v6903_v9  ;;  %v6785_v37 = vmul.f32 %v12074_v8, %v15117_v36  ;;  %v6712_v50 = vpop.xlane.xlu0 %6711  ;;  %v6718_v9 = vpop.xlane.xlu1 %6717 }
 0x6b1   : > { %11208 = vmatmul.mubr.msk.bf16.vlgmr.msra.gmra.mxu0 %vm5993_vm0, %v6904_v15  ;;  %v6835_v58 = vsel %vm5993_vm0, %v6779_v38, 0.0 }
 0x6b2   : > { %v12076_v20 = vpop.eup %12075  ;;  %11220 = vmatpush3.bf16.msra.mxu0 %v14800_v61  ;;  %v6836_v41 = vadd.f32 %v6835_v58, %v6834_v42  ;;  %v6880_v53 = vsel %vm5993_vm0, %v6785_v37, 0.0  ;;  %v5649_v61 = vcombine.low %v15276_v3, %v15295_v34  ;;  %v6906_v15 = vpack.c.bf16 %v6785_v37, %v15271_v25 }
 0x6b3   : > { %v12078_v14 = vpop.eup %12077  ;;  %11221 = vmatprep.subr.bf16.mxu0 %v14902_v1  ;;  %v6781_v36 = vmul.f32 %v12076_v20, %v15126_v63  ;;  %v6881_v6 = vadd.f32 %v6880_v53, %v6879_v40  ;;  %v15328_v42 = vrot.slane %v5513_v23, %v13510_v52 }
 0x6b4   : > { %v6721_v46 = vpop.xlane.xlu0 %6720  ;;  %v6791_v44 = vmul.f32 %v12078_v14, %v15119_v32  ;;  %v5657_v40 = vrot.slane %v5649_v61, %v13510_v52 }
 0x6b5   : > { %v6850_v5 = vsel %vm5993_vm0, %v6781_v36, 0.0  ;;  %v6905_v47 = vpack.c.bf16 %v6781_v36, %v6779_v38  ;;  %12085 = vrcp.f32 %v6721_v46 }
 0x6b6   : > { %v12080_v63 = vpop.eup %12079  ;;  %11222 = vmatpush3.bf16.msra.mxu0 %v14902_v1  ;;  %v6851_v8 = vadd.f32 %v6850_v5, %v6849_v48  ;;  %v6867_v32 = vsel %vm5993_vm0, %v6791_v44, 0.0  ;;  %12087 = vrcp.f32 %v6712_v50  ;;  %v5553_v1 = vrot.slane %v5545_v39, %v13510_v52 }
 0x6b7   : > { %v12082_v58 = vpop.eup %12081  ;;  %11235 = vmatprep.subr.bf16.mxu0 %v14911_v62  ;;  %11215 = vmatprep.mubr.msk.bf16.mxu1 %vm5993_vm0, %v6905_v47  ;;  %v6787_v12 = vmul.f32 %v12080_v63, %v15128_v33  ;;  %v15333_v38 = vadd.f32 %v6867_v32, %v6866_v11  ;;  %12089 = vrcp.f32 %v6718_v9  ;;  %v5689_v50 = vrot.slane %v5681_v4, %v13510_v52  ;;  %v16506_v9 = vld [vmem:[#allocation63_spill] sm:$0xff] }
 0x6b8   : > { %11216 = vmatmul.mubr.msk.bf16.vlgmr.msra.gmra.mxu1 %vm5993_vm0, %v6906_v15  ;;  %v6789_v25 = vmul.f32 %v12082_v58, %v15132_v59  ;;  %v6715_v37 = vpop.xlane.xlu0 %6714  ;;  %v5566_v58 = vcombine.high %v15328_v42, %v5553_v1 }
 0x6b9   : > { %11228 = vmatpush3.bf16.msra.mxu1 %v14937_v24  ;;  %v6837_v20 = vsel %vm5993_vm0, %v6787_v12, 0.0  ;;  %12091 = vrcp.f32 %v6715_v37  ;;  %v5565_v24 = vcombine.low %v15328_v42, %v5553_v1  ;;  %v5701_v46 = vcombine.low %v5657_v40, %v5689_v50 }
 0x6ba   : > { %v12084_v33 = vpop.eup %12083  ;;  %11229 = vmatprep.subr.bf16.mxu1 %v14904_v10  ;;  %v15343_v11 = vadd.f32 %v6837_v20, %v6836_v41  ;;  %v6852_v53 = vsel %vm5993_vm0, %v6789_v25, 0.0  ;;  %v6907_v23 = vpack.c.bf16 %v6789_v25, %v6787_v12  ;;  %v5650_v42 = vcombine.high %v15276_v3, %v15295_v34 }
 0x6bb   : > { %v6853_v14 = vadd.f32 %v6852_v53, %v6851_v8  ;;  %v6793_v59 = vmul.f32 %v12084_v33, %v15142_v49  ;;  %v5985_v4 = vpack.c.bf16 %v5701_v46, %v5565_v24  ;;  %v5702_v33 = vcombine.high %v5657_v40, %v5689_v50  ;;  %v16507_v53 = vld [vmem:[#allocation62_spill] sm:$0xff] }
 0x6bc   : > { %11223 = vmatprep.mubr.msk.bf16.mxu0 %vm5993_vm0, %v6907_v23  ;;  %v5682_v1 = vcombine.high %v15298_v19, %v15301_v29 }
 0x6bd   : > { %11230 = vmatpush3.bf16.msra.mxu1 %v14904_v10  ;;  %v6882_v36 = vsel %vm5993_vm0, %v6793_v59, 0.0  ;;  %v6908_v39 = vpack.c.bf16 %v6793_v59, %v6791_v44  ;;  %v6730_v61 = vpop.xlane.xlu1 %6729 }
 0x6be   : > { %11243 = vmatprep.subr.bf16.mxu1 %v14913_v60  ;;  %v6883_v41 = vadd.f32 %v6882_v36, %v6881_v6  ;;  %v5696_v3 = vrot.slane %v5682_v1, %v13510_v52 }
 0x6bf   : > { %11224 = vmatmul.mubr.msk.bf16.vlgmr.msra.gmra.mxu0 %vm5993_vm0, %v6908_v39 }
 0x6c0   : > { %11236 = vmatpush3.bf16.msra.mxu0 %v14911_v62 }
 0x6c1   : > { %11237 = vmatprep.subr.bf16.mxu0 %v5985_v4  ;;  %v6724_v48 = vpop.xlane.xlu1 %6723 }
 0x6c2   : > { %v12086_v49 = vpop.eup %12085  ;;  %v6733_v5 = vpop.xlane.xlu0 %6732 }
 0x6c3   : > { %v6801_v47 = vmul.f32 %v12086_v49, %v15155_v54  ;;  %v12088_v10 = vpop.eup %12087  ;;  %12093 = vrcp.f32 %v6733_v5 }
 0x6c4   : > { %11238 = vmatpush3.bf16.msra.mxu0 %v5985_v4  ;;  %v12090_v44 = vpop.eup %12089  ;;  %12095 = vrcp.f32 %v6724_v48  ;;  %v15360_v62 = vmul.f32 %v12088_v10, %v15146_v22  ;;  %v5987_v22 = vpack.c.bf16 %v5702_v33, %v5566_v58 }
 0x6c5   : > { %11251 = vmatprep.subr.bf16.mxu0 %v16506_v9  ;;  %v6884_v6 = vsel %vm5993_vm0, %v6801_v47, 0.0  ;;  %12097 = vrcp.f32 %v6730_v61  ;;  %v15364_v32 = vmul.f32 %v12090_v44, %v15140_v2  ;;  %v5514_v2 = vcombine.high %v15282_v16, %v15285_v17 }
 0x6c6   : > { %v12092_v63 = vpop.eup %12091  ;;  %v6727_v8 = vpop.xlane.xlu0 %6726  ;;  %v15357_v15 = vadd.f32 %v6884_v6, %v6883_v41 }
 0x6c7   : > { %12099 = vrcp.f32 %v6727_v8  ;;  %v6797_v54 = vmul.f32 %v12092_v63, %v15160_v13  ;;  %v6910_v20 = vpack.c.bf16 %v6801_v47, %v15364_v32  ;;  %v5546_v13 = vcombine.high %v15288_v21, %v15291_v31 }
 0x6c8   : > { %v5664_v21 = vrot.slane %v5650_v42, %v13510_v52  ;;  %v6869_v42 = vsel %vm5993_vm0, %v15364_v32, 0.0 }
 0x6c9   : > { %v6854_v12 = vsel %vm5993_vm0, %v6797_v54, 0.0  ;;  %v6909_v25 = vpack.c.bf16 %v6797_v54, %v15360_v62  ;;  %v5560_v23 = vrot.slane %v5546_v13, %v13510_v52 }
 0x6ca   : > { %v15369_v37 = vadd.f32 %v6854_v12, %v6853_v14  ;;  %v5703_v36 = vcombine.low %v5664_v21, %v5696_v3  ;;  %v5704_v58 = vcombine.high %v5664_v21, %v5696_v3 }
 0x6cb   : > { %11231 = vmatprep.mubr.msk.bf16.mxu1 %vm5993_vm0, %v6909_v25 }
 0x6cc   : > { %11232 = vmatmul.mubr.msk.bf16.vlgmr.msra.gmra.mxu1 %vm5993_vm0, %v6910_v20 }
 0x6cd   : > { %11244 = vmatpush3.bf16.msra.mxu1 %v14913_v60  ;;  %v5528_v60 = vrot.slane %v5514_v2, %v13510_v52 }
 0x6ce   : > { %11245 = vmatprep.subr.bf16.mxu1 %v5987_v22 }
 0x6cf   : > { %v5567_v29 = vcombine.low %v5528_v60, %v5560_v23  ;;  %v5568_v63 = vcombine.high %v5528_v60, %v5560_v23 }
 0x6d0   : > { %v12094_v40 = vpop.eup %12093 }
 0x6d1   : > { %11246 = vmatpush3.bf16.msra.mxu1 %v5987_v22  ;;  %v12096_v50 = vpop.eup %12095  ;;  %v15387_v17 = vmul.f32 %v12094_v40, %v15170_v35 }
 0x6d2   : > { %11259 = vmatprep.subr.bf16.mxu1 %v16507_v53  ;;  %v12098_v14 = vpop.eup %12097  ;;  %v15392_v31 = vmul.f32 %v12096_v50, %v15168_v0  ;;  %v5989_v0 = vpack.c.bf16 %v5703_v36, %v5567_v29 }
 0x6d3   : > { %v15398_v19 = vmul.f32 %v12098_v14, %v15164_v18 }
 0x6d4   : > { %v12100_v16 = vpop.eup %12099 }
 0x6d5   : > { %v15395_v34 = vmul.f32 %v12100_v16, %v15176_v55  ;;  %v6912_v35 = vpack.c.bf16 %v15387_v17, %v15398_v19  ;;  %v6871_v60 = vsel %vm5993_vm0, %v15398_v19, 0.0 }
 0x6d7   : > { %v6742_v59 = vpop.xlane.xlu1 %6741  ;;  %v6911_v24 = vpack.c.bf16 %v15395_v34, %v15392_v31 }
 0x6d9   : > { %11239 = vmatprep.mubr.msk.bf16.mxu0 %vm5993_vm0, %v6911_v24 }
 0x6da   : > { %11240 = vmatmul.mubr.msk.bf16.vlgmr.msra.gmra.mxu0 %vm5993_vm0, %v6912_v35 }
 0x6db   : > { %11252 = vmatpush3.bf16.msra.mxu0 %v16506_v9  ;;  %v6736_v55 = vpop.xlane.xlu1 %6735 }
 0x6dc   : > { %v6745_v39 = vpop.xlane.xlu0 %6744  ;;  %11253 = vmatprep.subr.bf16.mxu0 %v5989_v0 }
 0x6dd   : > { %12101 = vrcp.f32 %v6745_v39 }
 0x6de   : > { %12103 = vrcp.f32 %v6736_v55 }
 0x6df   : > { %11254 = vmatpush3.bf16.msra.mxu0 %v5989_v0  ;;  %12105 = vrcp.f32 %v6742_v59 }
 0x6e0   : > { %v6739_v18 = vpop.xlane.xlu0 %6738 }
 0x6e1   : > { %12107 = vrcp.f32 %v6739_v18 }
 0x6e8   : > { %v6754_v41 = vpop.xlane.xlu1 %6753 }
 0x6ea   : > { %v12102_v46 = vpop.eup %12101 }
 0x6eb   : > { %v12104_v61 = vpop.eup %12103  ;;  %v15408_v5 = vmul.f32 %v12102_v46, %v15193_v43  ;;  %v5991_v43 = vpack.c.bf16 %v5704_v58, %v5568_v63  ;;  %v6886_v46 = vsel %vm5993_vm0, %v15387_v17, 0.0  ;;  %v16510_v58 = vld [vmem:[#allocation64_spill] sm:$0xff] }
 0x6ec   : > { %v6748_v4 = vpop.xlane.xlu0 %6747  ;;  %v12106_v49 = vpop.eup %12105  ;;  %v6811_v47 = vmul.f32 %v12104_v61, %v15189_v45 }
 0x6ed   : > { %12109 = vrcp.f32 %v6748_v4  ;;  %v6815_v6 = vmul.f32 %v12106_v49, %v15184_v27 }
 0x6ee   : > { %v12108_v48 = vpop.eup %12107  ;;  %12111 = vrcp.f32 %v6754_v41 }
 0x6ef   : > { %v6813_v10 = vmul.f32 %v12108_v48, %v15199_v28  ;;  %v6914_v54 = vpack.c.bf16 %v15408_v5, %v6815_v6  ;;  %v6888_v48 = vsel %vm5993_vm0, %v15408_v5, 0.0 }
 0x6f0   : > { %v6751_v44 = vpop.xlane.xlu1 %6750  ;;  %v6757_v9 = vpop.xlane.xlu0 %6756 }
 0x6f1   : > { %12113 = vrcp.f32 %v6751_v44  ;;  %v6913_v8 = vpack.c.bf16 %v6813_v10, %v6811_v47  ;;  %v6858_v0 = vsel %vm5993_vm0, %v6813_v10, 0.0 }
 0x6f2   : > { %12115 = vrcp.f32 %v6757_v9 }
 0x6f3   : > { %11247 = vmatprep.mubr.msk.bf16.mxu1 %vm5993_vm0, %v6913_v8 }
 0x6f4   : > { %11248 = vmatmul.mubr.msk.bf16.vlgmr.msra.gmra.mxu1 %vm5993_vm0, %v6914_v54 }
 0x6f5   : > { %11260 = vmatpush3.bf16.msra.mxu1 %v16507_v53  ;;  %v6839_v53 = vsel %vm5993_vm0, %v15360_v62, 0.0  ;;  %v6843_v62 = vsel %vm5993_vm0, %v6811_v47, 0.0  ;;  %v16509_v47 = vld [vmem:[#allocation47_spill] sm:$0xff] }
 0x6f6   : > { %11261 = vmatprep.subr.bf16.mxu1 %v5991_v43  ;;  %v6840_v32 = vadd.f32 %v6839_v53, %v15343_v11  ;;  %v16508_v11 = vld [vmem:[#allocation46_spill] sm:$0xff] }
 0x6f8   : > { %v6766_v45 = vpop.xlane.xlu1 %6765 }
 0x6f9   : > { %11262 = vmatpush3.bf16.msra.mxu1 %v5991_v43  ;;  %12117 = vrcp.f32 %v6766_v45 }
 0x6fa   : > { %v12110_v28 = vpop.eup %12109 }
 0x6fb   : > { %v12112_v12 = vpop.eup %12111  ;;  %v6819_v33 = vmul.f32 %v12110_v28, %v15210_v51  ;;  %v6870_v51 = vadd.f32 %v6869_v42, %v15333_v38 }
 0x6fc   : > { %v6760_v27 = vpop.xlane.xlu0 %6759  ;;  %v6823_v2 = vmul.f32 %v12112_v12, %v15205_v7  ;;  %v6841_v7 = vsel %vm5993_vm0, %v15392_v31, 0.0  ;;  %v6856_v31 = vsel %vm5993_vm0, %v15395_v34, 0.0 }
 0x6fd   : > { %12119 = vrcp.f32 %v6760_v27  ;;  %v6872_v23 = vadd.f32 %v6871_v60, %v6870_v51  ;;  %v6842_v21 = vadd.f32 %v6841_v7, %v6840_v32  ;;  %v6845_v38 = vsel %vm5993_vm0, %v6819_v33, 0.0 }
 0x6fe   : > { %v12114_v25 = vpop.eup %12113  ;;  %v6875_v14 = vsel %vm5993_vm0, %v6823_v2, 0.0  ;;  %v6857_v18 = vadd.f32 %v6856_v31, %v15369_v37  ;;  %v6887_v37 = vadd.f32 %v6886_v46, %v15357_v15 }
 0x6ff   : > { %v12116_v20 = vpop.eup %12115  ;;  %v6821_v22 = vmul.f32 %v12114_v25, %v15218_v57  ;;  %v6844_v59 = vadd.f32 %v6843_v62, %v6842_v21 }
 0x700   : > { %v6825_v13 = vmul.f32 %v12116_v20, %v15214_v30  ;;  %v6763_v1 = vpop.xlane.xlu0 %6762  ;;  %v6873_v30 = vsel %vm5993_vm0, %v6815_v6, 0.0  ;;  %v6859_v49 = vadd.f32 %v6858_v0, %v6857_v18  ;;  %v6889_v54 = vadd.f32 %v6888_v48, %v6887_v37 }
 0x701   : > { %v6915_v40 = vpack.c.bf16 %v6821_v22, %v6819_v33  ;;  %12121 = vrcp.f32 %v6763_v1  ;;  %v6874_v3 = vadd.f32 %v6873_v30, %v6872_v23  ;;  %v6846_v55 = vadd.f32 %v6845_v38, %v6844_v59 }
 0x702   : > { %v6916_v50 = vpack.c.bf16 %v6825_v13, %v6823_v2  ;;  %v6860_v34 = vsel %vm5993_vm0, %v6821_v22, 0.0  ;;  %v6890_v17 = vsel %vm5993_vm0, %v6825_v13, 0.0 }
 0x703   : > { %11255 = vmatprep.mubr.msk.bf16.mxu0 %vm5993_vm0, %v6915_v40  ;;  %v6876_v24 = vadd.f32 %v6875_v14, %v6874_v3  ;;  %v6861_v9 = vadd.f32 %v6860_v34, %v6859_v49  ;;  %v6891_v45 = vadd.f32 %v6890_v17, %v6889_v54 }
 0x704   : > { %11256 = vmatmul.mubr.msk.bf16.vlgmr.msra.gmra.mxu0 %vm5993_vm0, %v6916_v50  ;;  %v6769_v57 = vpop.xlane.xlu0 %6768 }
 0x705   : > { %12123 = vrcp.f32 %v6769_v57 }
 0x706   : > { %v12118_v16 = vpop.eup %12117 }
 0x707   : > { %v6831_v19 = vmul.f32 %v12118_v16, %v15224_v56 }
 0x709   : > { %v6877_v36 = vsel %vm5993_vm0, %v6831_v19, 0.0 }
 0x70a   : > { %v12120_v29 = vpop.eup %12119  ;;  %v6878_v39 = vadd.f32 %v6877_v36, %v6876_v24 }
 0x70b   : > { %v6827_v35 = vmul.f32 %v12120_v29, %v16508_v11 }
 0x70c   : > { %v6897_v41 = vmul.f32 0.125, %v6878_v39 }
 0x70d   : > { %v6847_v56 = vsel %vm5993_vm0, %v6827_v35, 0.0 }
 0x70e   : > { %v6848_v61 = vadd.f32 %v6847_v56, %v6846_v55  ;;  %v12122_v4 = vpop.eup %12121  ;;  %6901 = vst.msk [vmem:[%s13087_s16 + $0x10] sm:$0xff] %vm5993_vm0, %v6897_v41 }
 0x70f   : > { %v6829_v10 = vmul.f32 %v12122_v4, %v16509_v47 }
 0x710   : > { %v6895_v44 = vmul.f32 0.125, %v6848_v61 }
 0x711   : > { %v6862_v6 = vsel %vm5993_vm0, %v6829_v10, 0.0  ;;  %v6917_v63 = vpack.c.bf16 %v6829_v10, %v6827_v35 }
 0x712   : > { %6899 = vst.msk [vmem:[%s13087_s16] sm:$0xff] %vm5993_vm0, %v6895_v44  ;;  %v12124_v8 = vpop.eup %12123  ;;  %v6863_v5 = vadd.f32 %v6862_v6, %v6861_v9 }
 0x713   : > { %11263 = vmatprep.mubr.msk.bf16.mxu1 %vm5993_vm0, %v6917_v63  ;;  %v6833_v43 = vmul.f32 %v12124_v8, %v16510_v58 }
 0x714   : > { %v6896_v28 = vmul.f32 0.125, %v6863_v5 }
 0x715   : > { %v6892_v15 = vsel %vm5993_vm0, %v6833_v43, 0.0  ;;  %v6918_v27 = vpack.c.bf16 %v6833_v43, %v6831_v19 }
 0x716   : > { %6900 = vst.msk [vmem:[%s13087_s16 + $0x8] sm:$0xff] %vm5993_vm0, %v6896_v28  ;;  %v6893_v12 = vadd.f32 %v6892_v15, %v6891_v45 }
 0x717   : > { %11264 = vmatmul.mubr.msk.bf16.vlgmr.msra.gmra.mxu1 %vm5993_vm0, %v6918_v27 }
 0x718   : > { %v6898_v25 = vmul.f32 0.125, %v6893_v12 }
 0x71a   : > { %6902 = vst.msk [vmem:[%s13087_s16 + $0x18] sm:$0xff] %vm5993_vm0, %v6898_v25 }
 0x771   : > { %v11209_v20 = vpop.f32.mrf.mxu0 }
 0x773   : > { %v6959_v33 = vpop.f32.mrf.mxu0 }
 0x775   : > { %v11210_v22 = vpop.f32.mrf.mxu0 }
 0x777   : > { %v6962_v2 = vpop.f32.mrf.mxu0 }
 0x778   : > { %v11217_v13 = vpop.f32.mrf.mxu1 }
 0x77a   : > { %v7014_v53 = vpop.f32.mrf.mxu1 }
 0x77c   : > { %v11218_v30 = vpop.f32.mrf.mxu1 }
 0x77e   : > { %v15466_v57 = vpop.f32.mrf.mxu1 }
 0x77f   : > { %v11225_v42 = vpop.f32.mrf.mxu0 }
 0x780   : > { %v7631_v1 = vcombine.low %v11209_v20, %v11225_v42  ;;  %v7632_v40 = vcombine.high %v11209_v20, %v11225_v42 }
 0x781   : > { %v7069_v50 = vpop.f32.mrf.mxu0 }
 0x782   : > { %v7359_v32 = vcombine.low %v6959_v33, %v7069_v50  ;;  %v7360_v23 = vcombine.high %v6959_v33, %v7069_v50  ;;  %v7639_v3 = vrot.slane %v7631_v1, %v13485_v26  ;;  %v7646_v38 = vrot.slane %v7632_v40, %v13485_v26 }
 0x783   : > { %v11226_v60 = vpop.f32.mrf.mxu0 }
 0x784   : > { %v7767_v51 = vcombine.low %v11210_v22, %v11226_v60  ;;  %v7768_v7 = vcombine.high %v11210_v22, %v11226_v60  ;;  %v7367_v19 = vrot.slane %v7359_v32, %v13485_v26  ;;  %v7374_v29 = vrot.slane %v7360_v23, %v13485_v26 }
 0x785   : > { %v7072_v14 = vpop.f32.mrf.mxu0 }
 0x786   : > { %v7775_v36 = vrot.slane %v7767_v51, %v13485_v26  ;;  %v7782_v0 = vrot.slane %v7768_v7, %v13485_v26  ;;  %v7495_v55 = vcombine.low %v6962_v2, %v7072_v14  ;;  %v7496_v39 = vcombine.high %v6962_v2, %v7072_v14 }
 0x788   : > { %v7503_v12 = vrot.slane %v7495_v55, %v13485_v26  ;;  %v7510_v25 = vrot.slane %v7496_v39, %v13485_v26 }
 0x78c   : > { %v11233_v62 = vpop.f32.mrf.mxu1 }
 0x78d   : > { %v7647_v16 = vcombine.low %v11217_v13, %v11233_v62  ;;  %v7648_v21 = vcombine.high %v11217_v13, %v11233_v62 }
 0x78e   : > { %v7124_v31 = vpop.f32.mrf.mxu1 }
 0x78f   : > { %v7655_v59 = vrot.slane %v7647_v16, %v13485_v26  ;;  %v7662_v24 = vrot.slane %v7648_v21, %v13485_v26  ;;  %v7375_v11 = vcombine.low %v7014_v53, %v7124_v31  ;;  %v7376_v35 = vcombine.high %v7014_v53, %v7124_v31 }
 0x790   : > { %v11234_v18 = vpop.f32.mrf.mxu1 }
 0x791   : > { %v7695_v56 = vcombine.low %v7639_v3, %v7655_v59  ;;  %v7696_v46 = vcombine.high %v7639_v3, %v7655_v59  ;;  %v7711_v34 = vcombine.low %v7646_v38, %v7662_v24  ;;  %v7712_v61 = vcombine.high %v7646_v38, %v7662_v24 }
 0x792   : > { %v7383_v41 = vrot.slane %v7375_v11, %v13485_v26  ;;  %v7390_v4 = vrot.slane %v7376_v35, %v13485_v26  ;;  %v7783_v49 = vcombine.low %v11218_v30, %v11234_v18  ;;  %v7784_v48 = vcombine.high %v11218_v30, %v11234_v18  ;;  %v7127_v27 = vpop.f32.mrf.mxu1 }
 0x793   : > { %v7703_v47 = vrot.slane %v7695_v56, %v13510_v52  ;;  %v7710_v10 = vrot.slane %v7696_v46, %v13510_v52  ;;  %v7719_v44 = vrot.slane %v7711_v34, %v13510_v52  ;;  %v7726_v37 = vrot.slane %v7712_v61, %v13510_v52 }
 0x794   : > { %v7423_v9 = vcombine.low %v7367_v19, %v7383_v41  ;;  %v7424_v17 = vcombine.high %v7367_v19, %v7383_v41  ;;  %v7439_v6 = vcombine.low %v7374_v29, %v7390_v4  ;;  %v7440_v63 = vcombine.high %v7374_v29, %v7390_v4 }
 0x795   : > { %v10879_v8 = vcombine.low %v7703_v47, %v7710_v10  ;;  %v10881_v54 = vcombine.high %v7703_v47, %v7710_v10  ;;  %v10883_v5 = vcombine.low %v7719_v44, %v7726_v37  ;;  %v10885_v58 = vcombine.high %v7719_v44, %v7726_v37 }
 0x796   : > { %v7431_v43 = vrot.slane %v7423_v9, %v13510_v52  ;;  %v7438_v45 = vrot.slane %v7424_v17, %v13510_v52  ;;  %v7447_v28 = vrot.slane %v7439_v6, %v13510_v52  ;;  %v7454_v15 = vrot.slane %v7440_v63, %v13510_v52 }
 0x797   : > { %v15489_v20 = vrot.slane %v10879_v8, %v13485_v26  ;;  %v15492_v33 = vrot.slane %v10881_v54, %v13485_v26  ;;  %v7791_v1 = vrot.slane %v7783_v49, %v13485_v26  ;;  %v7798_v40 = vrot.slane %v7784_v48, %v13485_v26 }
 0x798   : > { %v10863_v22 = vcombine.low %v7431_v43, %v7438_v45  ;;  %v10865_v2 = vcombine.high %v7431_v43, %v7438_v45  ;;  %v10867_v13 = vcombine.low %v7447_v28, %v7454_v15  ;;  %v10869_v42 = vcombine.high %v7447_v28, %v7454_v15 }
 0x799   : > { %v7511_v50 = vcombine.low %v15466_v57, %v7127_v27  ;;  %v7512_v53 = vcombine.high %v15466_v57, %v7127_v27  ;;  %v7831_v32 = vcombine.low %v7775_v36, %v7791_v1  ;;  %v7832_v23 = vcombine.high %v7775_v36, %v7791_v1 }
 0x79a   : > { %v7911_v60 = vrot.slane %v10863_v22, %v13485_v26  ;;  %v7927_v51 = vrot.slane %v10865_v2, %v13485_v26  ;;  %v7943_v7 = vrot.slane %v10867_v13, %v13485_v26  ;;  %v7959_v30 = vrot.slane %v10869_v42, %v13485_v26 }
 0x79b   : > { %v7847_v62 = vcombine.low %v7782_v0, %v7798_v40  ;;  %v7848_v14 = vcombine.high %v7782_v0, %v7798_v40  ;;  %v7519_v16 = vrot.slane %v7511_v50, %v13485_v26  ;;  %v7526_v21 = vrot.slane %v7512_v53, %v13485_v26 }
 0x79c   : > { %v7968_v3 = vcombine.high %v7911_v60, %v7927_v51  ;;  %v8000_v38 = vcombine.high %v7943_v7, %v7959_v30  ;;  %v7839_v57 = vrot.slane %v7831_v32, %v13510_v52  ;;  %v7846_v19 = vrot.slane %v7832_v23, %v13510_v52 }
 0x79d   : > { %v7855_v29 = vrot.slane %v7847_v62, %v13510_v52  ;;  %v7862_v31 = vrot.slane %v7848_v14, %v13510_v52  ;;  %v7559_v59 = vcombine.low %v7503_v12, %v7519_v16  ;;  %v7560_v24 = vcombine.high %v7503_v12, %v7519_v16  ;;  %v11762_v62 = vld [vmem:[%s13060_s11 + $0x64] ss:$8 sps:$4 sm:$0xff]  }
 0x79e   : > { %v7575_v11 = vcombine.low %v7510_v25, %v7526_v21  ;;  %v7576_v35 = vcombine.high %v7510_v25, %v7526_v21  ;;  %v10887_v36 = vcombine.low %v7839_v57, %v7846_v19  ;;  %v10889_v0 = vcombine.high %v7839_v57, %v7846_v19 }
 0x79f   : > { %v10891_v55 = vcombine.low %v7855_v29, %v7862_v31  ;;  %v10893_v39 = vcombine.high %v7855_v29, %v7862_v31  ;;  %v7567_v18 = vrot.slane %v7559_v59, %v13510_v52  ;;  %v7574_v56 = vrot.slane %v7560_v24, %v13510_v52  ;;  %v11760_v31 = vld [vmem:[%s13060_s11 + $0x60] ss:$8 sps:$4 sm:$0xff]  }
 0x7a0   : > { %v7583_v46 = vrot.slane %v7575_v11, %v13510_v52  ;;  %v7590_v34 = vrot.slane %v7576_v35, %v13510_v52  ;;  %v8215_v61 = vrot.slane %v10883_v5, %v13485_v26  ;;  %v8231_v41 = vrot.slane %v10885_v58, %v13485_v26 }
 0x7a1   : > { %v8319_v4 = vrot.slane %v10887_v36, %v13485_v26  ;;  %v8335_v49 = vrot.slane %v10889_v0, %v13485_v26  ;;  %v10871_v48 = vcombine.low %v7567_v18, %v7574_v56  ;;  %v10873_v47 = vcombine.high %v7567_v18, %v7574_v56  ;;  %v11765_v36 = vld [vmem:[%s13060_s11 + $0x54] ss:$8 sps:$4 sm:$0xff]  }
 0x7a2   : > { %v10875_v10 = vcombine.low %v7583_v46, %v7590_v34  ;;  %v10877_v44 = vcombine.high %v7583_v46, %v7590_v34  ;;  %v15517_v37 = vrot.slane %v7968_v3, %v13510_v52  ;;  %v15520_v9 = vrot.slane %v8000_v38, %v13510_v52 }
 0x7a3   : > { %v7967_v17 = vcombine.low %v7911_v60, %v7927_v51  ;;  %v7999_v6 = vcombine.low %v7943_v7, %v7959_v30  ;;  %v8047_v63 = vrot.slane %v10871_v48, %v13485_v26  ;;  %v8063_v8 = vrot.slane %v10873_v47, %v13485_v26  ;;  %v11757_v60 = vld [vmem:[%s13060_s11 + $0x70] ss:$8 sps:$4 sm:$0xff]   ;;  %v11759_v51 = vld [vmem:[%s13060_s11 + $0x74] ss:$8 sps:$4 sm:$0xff]   ;;  %v11768_v48 = vld [vmem:[%s13060_s11 + $0x44] ss:$8 sps:$4 sm:$0xff]  }
 0x7a4   : > { %v8079_v54 = vrot.slane %v10875_v10, %v13485_v26  ;;  %v8095_v5 = vrot.slane %v10877_v44, %v13485_v26  ;;  %v8351_v58 = vrot.slane %v10891_v55, %v13485_v26  ;;  %v8367_v43 = vrot.slane %v10893_v39, %v13485_v26  ;;  %8777 = vmatprep.subr.bf16.mxu0 %v11759_v51  ;;  %v11784_v51 = vld [vmem:[%s13060_s11 + $0xe0] ss:$8 sps:$4 sm:$0xff]  }
 0x7a5   : > { %v15529_v45 = vrot.slane %v7967_v17, %v13510_v52  ;;  %v15532_v28 = vrot.slane %v7999_v6, %v13510_v52  ;;  %v8104_v15 = vcombine.high %v8047_v63, %v8063_v8  ;;  %v8103_v12 = vcombine.low %v8047_v63, %v8063_v8  ;;  %8778 = vmatpush1.bf16.msra.mxu0 %v11757_v60  ;;  %v11766_v6 = vld [vmem:[%s13060_s11 + $0x40] ss:$8 sps:$4 sm:$0xff]   ;;  %v11771_v63 = vld [vmem:[%s13060_s11 + $0x34] ss:$8 sps:$4 sm:$0xff]   ;;  %v11769_v8 = vld [vmem:[%s13060_s11 + $0x30] ss:$8 sps:$4 sm:$0xff]  }
 0x7a6   : > { %v8136_v27 = vcombine.high %v8079_v54, %v8095_v5  ;;  %v8135_v25 = vcombine.low %v8079_v54, %v8095_v5  ;;  %v8033_v22 = vcombine.low %v15517_v37, %v15520_v9  ;;  %v8239_v2 = vcombine.low %v15489_v20, %v15492_v33  ;;  %8779 = vmatprep.subr.bf16.mxu0 %v11762_v62  ;;  %v11774_v54 = vld [vmem:[%s13060_s11 + $0x24] ss:$8 sps:$4 sm:$0xff]   ;;  %v11241_v5 = vpop.f32.mrf.mxu0 }
 0x7a7   : > { %v8271_v13 = vcombine.low %v8215_v61, %v8231_v41  ;;  %v8375_v42 = vcombine.low %v8319_v4, %v8335_v49  ;;  %v8118_v1 = vrot.slane %v8104_v15, %v13510_v52  ;;  %v15541_v50 = vrot.slane %v8103_v12, %v13510_v52  ;;  %v11780_v12 = vld [vmem:[%s13060_s11 + $0x4] ss:$8 sps:$4 sm:$0xff]  }
 0x7a8   : > { %v8150_v40 = vrot.slane %v8136_v27, %v13510_v52  ;;  %v15544_v53 = vrot.slane %v8135_v25, %v13510_v52  ;;  %v15549_v7 = vrot.slane %v8239_v2, %v13510_v52  ;;  %v8407_v23 = vcombine.low %v8351_v58, %v8367_v43  ;;  %v7179_v15 = vpop.f32.mrf.mxu0  ;;  %v11775_v27 = vld [vmem:[%s13060_s11 + $0x10] ss:$8 sps:$4 sm:$0xff]   ;;  %v11783_v2 = vld [vmem:[%s13060_s11 + $0xf4] ss:$8 sps:$4 sm:$0xff]  }
 0x7a9   : > { %v15552_v30 = vrot.slane %v8271_v13, %v13510_v52  ;;  %v15555_v32 = vrot.slane %v8375_v42, %v13510_v52  ;;  %v8032_v16 = vcombine.high %v15529_v45, %v15532_v28  ;;  %v8240_v3 = vcombine.high %v15489_v20, %v15492_v33  ;;  %8780 = vmatpush1.bf16.msra.mxu0 %v11760_v31  ;;  %v11781_v42 = vld [vmem:[%s13060_s11 + $0xf0] ss:$8 sps:$4 sm:$0xff]  }
 0x7aa   : > { %v8169_v14 = vcombine.low %v8118_v1, %v8150_v40  ;;  %v8168_v21 = vcombine.high %v15541_v50, %v15544_v53  ;;  %v15567_v57 = vrot.slane %v8407_v23, %v13510_v52  ;;  %v8272_v19 = vcombine.high %v8215_v61, %v8231_v41  ;;  %8781 = vmatprep.subr.bf16.mxu0 %v11765_v36  ;;  %v11242_v25 = vpop.f32.mrf.mxu0  ;;  %v11789_v23 = vld [vmem:[%s13060_s11 + $0xd4] ss:$8 sps:$4 sm:$0xff]  }
 0x7ab   : > { %v8304_v38 = vcombine.high %v15549_v7, %v15552_v30  ;;  %v8376_v29 = vcombine.high %v8319_v4, %v8335_v49  ;;  %v8170_v11 = vcombine.high %v8118_v1, %v8150_v40  ;;  %v8254_v35 = vrot.slane %v8240_v3, %v13510_v52  ;;  %v11763_v4 = vld [vmem:[%s13060_s11 + $0x50] ss:$8 sps:$4 sm:$0xff]   ;;  %v11786_v1 = vld [vmem:[%s13060_s11 + $0xe4] ss:$8 sps:$4 sm:$0xff]  }
 0x7ac   : > { %v11462_v59 = vpack.i.bf16 %v8169_v14, %v8033_v22  ;;  %v11457_v24 = vpack.i.bf16 %v8168_v21, %v8032_v16  ;;  %v8440_v20 = vcombine.high %v15555_v32, %v15567_v57  ;;  %v8286_v33 = vrot.slane %v8272_v19, %v13510_v52  ;;  %v11778_v22 = vld [vmem:[%s13060_s11] ss:$8 sps:$4 sm:$0xff]   ;;  %v7182_v13 = vpop.f32.mrf.mxu0  ;;  %v11787_v16 = vld [vmem:[%s13060_s11 + $0xd0] ss:$8 sps:$4 sm:$0xff]   ;;  %v11792_v21 = vld [vmem:[%s13060_s11 + $0xc4] ss:$8 sps:$4 sm:$0xff]  }
 0x7ad   : > { %v8390_v0 = vrot.slane %v8376_v29, %v13510_v52  ;;  %v8408_v55 = vcombine.high %v8351_v58, %v8367_v43  ;;  %v8034_v39 = vcombine.high %v15517_v37, %v15520_v9  ;;  %v8031_v18 = vcombine.low %v15529_v45, %v15532_v28  ;;  %8782 = vmatpush1.bf16.msra.mxu0 %v11763_v4  ;;  %v11772_v58 = vld [vmem:[%s13060_s11 + $0x20] ss:$8 sps:$4 sm:$0xff]   ;;  %v11777_v43 = vld [vmem:[%s13060_s11 + $0x14] ss:$8 sps:$4 sm:$0xff]  }
 0x7ae   : > { %11463 = vrot.lane.b32.xlu1 %v11462_v59, %s12607_s10  ;;  %11458 = vrot.lane.b32.xlu0 %v11457_v24, %s12608_s3  ;;  %v8167_v56 = vcombine.low %v15541_v50, %v15544_v53  ;;  %v15584_v46 = vpack.i.bf16 %v8440_v20, %v8304_v38  ;;  %v8305_v34 = vcombine.low %v8254_v35, %v8286_v33  ;;  %v11790_v19 = vld [vmem:[%s13060_s11 + $0xc0] ss:$8 sps:$4 sm:$0xff]   ;;  %v11795_v29 = vld [vmem:[%s13060_s11 + $0xb4] ss:$8 sps:$4 sm:$0xff]  }
 0x7af   : > { %v8422_v61 = vrot.slane %v8408_v55, %v13510_v52  ;;  %v8306_v41 = vcombine.high %v8254_v35, %v8286_v33  ;;  %v11467_v49 = vpack.i.bf16 %v8170_v11, %v8034_v39  ;;  %v8303_v47 = vcombine.low %v15549_v7, %v15552_v30  ;;  %8783 = vmatprep.subr.bf16.mxu0 %v11768_v48  ;;  %v11793_v20 = vld [vmem:[%s13060_s11 + $0xb0] ss:$8 sps:$4 sm:$0xff]  }
 0x7b0   : > { %v8439_v10 = vcombine.low %v15555_v32, %v15567_v57  ;;  %v8601_v32 = vld [vmem:[%s13065_s24] sm:$0x3] }
 0x7b1   : > { %v8441_v44 = vcombine.low %v8390_v0, %v8422_v61  ;;  %v8442_v37 = vcombine.high %v8390_v0, %v8422_v61  ;;  %8784 = vmatpush1.bf16.msra.mxu0 %v11766_v6  ;;  %v16511_v57 = vld [vmem:[#allocation43_spill] sm:$0xff] }
 0x7b2   : > { %11468 = vrot.lane.b32.xlu1 %v11467_v49, %s12606_s21  ;;  %8785 = vmatprep.subr.bf16.mxu0 %v11771_v63 }
 0x7b3   : > { %v15594_v9 = vpack.i.bf16 %v8441_v44, %v8305_v34  ;;  %v15596_v17 = vpack.i.bf16 %v8442_v37, %v8306_v41 }
 0x7b4   : > { %v11249_v60 = vpop.f32.mrf.mxu1 }
 0x7b5   : > { %8786 = vmatpush1.bf16.msra.mxu0 %v11769_v8 }
 0x7b6   : > { %8787 = vmatprep.subr.bf16.mxu0 %v11774_v54  ;;  %v7234_v14 = vpop.f32.mrf.mxu1 }
 0x7b8   : > { %v15614_v38 = vpop.f32.mrf.mxu1 }
 0x7b9   : > { %8788 = vmatpush1.bf16.msra.mxu0 %v11772_v58 }
 0x7ba   : > { %8789 = vmatprep.subr.bf16.mxu0 %v11777_v43  ;;  %v15618_v59 = vpop.f32.mrf.mxu1 }
 0x7bd   : > { %8790 = vmatpush1.bf16.msra.mxu0 %v11775_v27 }
 0x7be   : > { %8791 = vmatprep.subr.bf16.mxu0 %v11780_v12 }
 0x7c1   : > { %8792 = vmatpush1.bf16.msra.mxu0 %v11778_v22 }
 0x7c2   : > { %8793 = vmatprep.subr.bf16.mxu0 %v11783_v2 }
 0x7c4   : > { %v11257_v40 = vpop.f32.mrf.mxu0 }
 0x7c5   : > { %8794 = vmatpush2.bf16.msra.mxu0 %v11781_v42  ;;  %v7663_v24 = vcombine.low %v11241_v5, %v11257_v40  ;;  %v7664_v11 = vcombine.high %v11241_v5, %v11257_v40 }
 0x7c6   : > { %8795 = vmatprep.subr.bf16.mxu0 %v11786_v1  ;;  %v7289_v62 = vpop.f32.mrf.mxu0 }
 0x7c7   : > { %v7391_v35 = vcombine.low %v7179_v15, %v7289_v62  ;;  %v7392_v36 = vcombine.high %v7179_v15, %v7289_v62  ;;  %v7671_v4 = vrot.slane %v7663_v24, %v13485_v26  ;;  %v7678_v49 = vrot.slane %v7664_v11, %v13485_v26 }
 0x7c8   : > { %v11258_v3 = vpop.f32.mrf.mxu0 }
 0x7c9   : > { %8796 = vmatpush2.bf16.msra.mxu0 %v11784_v51  ;;  %v7799_v33 = vcombine.low %v11242_v25, %v11258_v3  ;;  %v7800_v0 = vcombine.high %v11242_v25, %v11258_v3  ;;  %v7399_v48 = vrot.slane %v7391_v35, %v13485_v26  ;;  %v7406_v44 = vrot.slane %v7392_v36, %v13485_v26 }
 0x7ca   : > { %8797 = vmatprep.subr.bf16.mxu0 %v11789_v23  ;;  %v7292_v31 = vpop.f32.mrf.mxu0 }
 0x7cb   : > { %v7527_v55 = vcombine.low %v7182_v13, %v7292_v31  ;;  %v7528_v39 = vcombine.high %v7182_v13, %v7292_v31  ;;  %v7807_v5 = vrot.slane %v7799_v33, %v13485_v26  ;;  %v7814_v58 = vrot.slane %v7800_v0, %v13485_v26 }
 0x7cd   : > { %8798 = vmatpush2.bf16.msra.mxu0 %v11787_v16  ;;  %v15630_v43 = vrot.slane %v7527_v55, %v13485_v26  ;;  %v15633_v15 = vrot.slane %v7528_v39, %v13485_v26 }
 0x7ce   : > { %8799 = vmatprep.subr.bf16.mxu0 %v11792_v21 }
 0x7d1   : > { %8800 = vmatpush2.bf16.msra.mxu0 %v11790_v19 }
 0x7d2   : > { %8801 = vmatprep.subr.bf16.mxu0 %v11795_v29 }
 0x7d5   : > { %8802 = vmatpush2.bf16.msra.mxu0 %v11793_v20 }
 0x7d7   : > { %v11265_v34 = vpop.f32.mrf.mxu1 }
 0x7d8   : > { %v7679_v61 = vcombine.low %v11249_v60, %v11265_v34  ;;  %v7680_v41 = vcombine.high %v11249_v60, %v11265_v34 }
 0x7d9   : > { %v7344_v37 = vpop.f32.mrf.mxu1 }
 0x7da   : > { %v7687_v6 = vrot.slane %v7679_v61, %v13485_v26  ;;  %v7694_v63 = vrot.slane %v7680_v41, %v13485_v26  ;;  %v7407_v8 = vcombine.low %v7234_v14, %v7344_v37  ;;  %v7408_v54 = vcombine.high %v7234_v14, %v7344_v37 }
 0x7db   : > { %v11266_v27 = vpop.f32.mrf.mxu1 }
 0x7dc   : > { %v7727_v12 = vcombine.low %v7671_v4, %v7687_v6  ;;  %v7728_v25 = vcombine.high %v7671_v4, %v7687_v6  ;;  %v7743_v22 = vcombine.low %v7678_v49, %v7694_v63  ;;  %v7744_v2 = vcombine.high %v7678_v49, %v7694_v63 }
 0x7dd   : > { %v7415_v13 = vrot.slane %v7407_v8, %v13485_v26  ;;  %v7422_v42 = vrot.slane %v7408_v54, %v13485_v26  ;;  %v7815_v1 = vcombine.low %v15614_v38, %v11266_v27  ;;  %v7816_v40 = vcombine.high %v15614_v38, %v11266_v27  ;;  %v7347_v20 = vpop.f32.mrf.mxu1 }
 0x7de   : > { %v7735_v60 = vrot.slane %v7727_v12, %v13510_v52  ;;  %v7742_v51 = vrot.slane %v7728_v25, %v13510_v52  ;;  %v7751_v23 = vrot.slane %v7743_v22, %v13510_v52  ;;  %v7758_v62 = vrot.slane %v7744_v2, %v13510_v52 }
 0x7df   : > { %v7455_v14 = vcombine.low %v7399_v48, %v7415_v13  ;;  %v7456_v16 = vcombine.high %v7399_v48, %v7415_v13  ;;  %v7471_v21 = vcombine.low %v7406_v44, %v7422_v42  ;;  %v7472_v3 = vcombine.high %v7406_v44, %v7422_v42 }
 0x7e0   : > { %v10880_v19 = vcombine.low %v7735_v60, %v7742_v51  ;;  %v10882_v29 = vcombine.high %v7735_v60, %v7742_v51  ;;  %v10884_v31 = vcombine.low %v7751_v23, %v7758_v62  ;;  %v10886_v24 = vcombine.high %v7751_v23, %v7758_v62 }
 0x7e1   : > { %v7463_v11 = vrot.slane %v7455_v14, %v13510_v52  ;;  %v7470_v38 = vrot.slane %v7456_v16, %v13510_v52  ;;  %v7479_v35 = vrot.slane %v7471_v21, %v13510_v52  ;;  %v7486_v36 = vrot.slane %v7472_v3, %v13510_v52 }
 0x7e2   : > { %v15648_v33 = vrot.slane %v10880_v19, %v13485_v26  ;;  %v15651_v0 = vrot.slane %v10882_v29, %v13485_v26  ;;  %v15654_v55 = vrot.slane %v10884_v31, %v13485_v26  ;;  %v15657_v39 = vrot.slane %v10886_v24, %v13485_v26 }
 0x7e3   : > { %v10864_v34 = vcombine.low %v7463_v11, %v7470_v38  ;;  %v10866_v61 = vcombine.high %v7463_v11, %v7470_v38  ;;  %v10868_v41 = vcombine.low %v7479_v35, %v7486_v36  ;;  %v10870_v4 = vcombine.high %v7479_v35, %v7486_v36  ;;  %v11796_v11 = vld [vmem:[%s13060_s11 + $0xa0] ss:$8 sps:$4 sm:$0xff]   ;;  %v11798_v38 = vld [vmem:[%s13060_s11 + $0xa4] ss:$8 sps:$4 sm:$0xff]  }
 0x7e4   : > { %v7823_v49 = vrot.slane %v7815_v1, %v13485_v26  ;;  %v7830_v48 = vrot.slane %v7816_v40, %v13485_v26  ;;  %v7543_v44 = vcombine.low %v15618_v59, %v7347_v20  ;;  %v7544_v37 = vcombine.high %v15618_v59, %v7347_v20  ;;  %8803 = vmatprep.subr.bf16.mxu0 %v11798_v38  ;;  %v11804_v38 = vld [vmem:[%s13060_s11 + $0x84] ss:$8 sps:$4 sm:$0xff]  }
 0x7e5   : > { %v15664_v6 = vrot.slane %v10864_v34, %v13485_v26  ;;  %v15667_v63 = vrot.slane %v10866_v61, %v13485_v26  ;;  %v15670_v8 = vrot.slane %v10868_v41, %v13485_v26  ;;  %v15673_v54 = vrot.slane %v10870_v4, %v13485_v26  ;;  %8804 = vmatpush2.bf16.msra.mxu0 %v11796_v11  ;;  %v11802_v11 = vld [vmem:[%s13060_s11 + $0x80] ss:$8 sps:$4 sm:$0xff]  }
 0x7e6   : > { %v7863_v27 = vcombine.low %v7807_v5, %v7823_v49  ;;  %v7864_v12 = vcombine.high %v7807_v5, %v7823_v49  ;;  %v7879_v25 = vcombine.low %v7814_v58, %v7830_v48  ;;  %v7880_v22 = vcombine.high %v7814_v58, %v7830_v48 }
 0x7e7   : > { %v7551_v2 = vrot.slane %v7543_v44, %v13485_v26  ;;  %v7558_v59 = vrot.slane %v7544_v37, %v13485_v26  ;;  %v8255_v13 = vcombine.low %v15648_v33, %v15651_v0  ;;  %v8287_v42 = vcombine.low %v15654_v55, %v15657_v39 }
 0x7e8   : > { %v7871_v1 = vrot.slane %v7863_v27, %v13510_v52  ;;  %v7878_v40 = vrot.slane %v7864_v12, %v13510_v52  ;;  %v7887_v5 = vrot.slane %v7879_v25, %v13510_v52  ;;  %v7894_v58 = vrot.slane %v7880_v22, %v13510_v52  ;;  %v11799_v22 = vld [vmem:[%s13060_s11 + $0x90] ss:$8 sps:$4 sm:$0xff]  }
 0x7e9   : > { %v7591_v60 = vcombine.low %v15630_v43, %v7551_v2  ;;  %v7592_v51 = vcombine.high %v15630_v43, %v7551_v2  ;;  %v7607_v23 = vcombine.low %v15633_v15, %v7558_v59  ;;  %v7608_v62 = vcombine.high %v15633_v15, %v7558_v59  ;;  %v11801_v2 = vld [vmem:[%s13060_s11 + $0x94] ss:$8 sps:$4 sm:$0xff]  }
 0x7ea   : > { %v10888_v14 = vcombine.low %v7871_v1, %v7878_v40  ;;  %v10890_v16 = vcombine.high %v7871_v1, %v7878_v40  ;;  %v10892_v21 = vcombine.low %v7887_v5, %v7894_v58  ;;  %v10894_v3 = vcombine.high %v7887_v5, %v7894_v58  ;;  %8805 = vmatprep.subr.bf16.mxu0 %v11801_v2 }
 0x7eb   : > { %v7599_v19 = vrot.slane %v7591_v60, %v13510_v52  ;;  %v7606_v29 = vrot.slane %v7592_v51, %v13510_v52  ;;  %v7615_v31 = vrot.slane %v7607_v23, %v13510_v52  ;;  %v7622_v24 = vrot.slane %v7608_v62, %v13510_v52  ;;  %8806 = vmatpush2.bf16.msra.mxu0 %v11799_v22 }
 0x7ec   : > { %v8326_v43 = vrot.slane %v10888_v14, %v13485_v26  ;;  %v8342_v35 = vrot.slane %v10890_v16, %v13485_v26  ;;  %v15698_v15 = vrot.slane %v10892_v21, %v13485_v26  ;;  %v8374_v36 = vrot.slane %v10894_v3, %v13485_v26  ;;  %8807 = vmatprep.subr.bf16.mxu0 %v11804_v38 }
 0x7ed   : > { %v10872_v20 = vcombine.low %v7599_v19, %v7606_v29  ;;  %v10874_v34 = vcombine.high %v7599_v19, %v7606_v29  ;;  %v10876_v61 = vcombine.low %v7615_v31, %v7622_v24  ;;  %v10878_v41 = vcombine.high %v7615_v31, %v7622_v24 }
 0x7ee   : > { %v15702_v4 = vrot.slane %v8255_v13, %v13510_v52  ;;  %v15705_v49 = vrot.slane %v8287_v42, %v13510_v52  ;;  %v8391_v48 = vcombine.low %v8326_v43, %v8342_v35  ;;  %v8423_v44 = vcombine.low %v15698_v15, %v8374_v36 }
 0x7ef   : > { %v8054_v37 = vrot.slane %v10872_v20, %v13485_v26  ;;  %v8070_v27 = vrot.slane %v10874_v34, %v13485_v26  ;;  %v8086_v12 = vrot.slane %v10876_v61, %v13485_v26  ;;  %v8102_v25 = vrot.slane %v10878_v41, %v13485_v26  ;;  %8808 = vmatpush2.bf16.msra.mxu0 %v11802_v11 }
 0x7f0   : > { %v8308_v59 = vcombine.high %v15702_v4, %v15705_v49  ;;  %v15717_v13 = vrot.slane %v8391_v48, %v13510_v52  ;;  %v15720_v42 = vrot.slane %v8423_v44, %v13510_v52  ;;  %v7983_v1 = vcombine.low %v15664_v6, %v15667_v63 }
 0x7f1   : > { %v8015_v40 = vcombine.low %v15670_v8, %v15673_v54  ;;  %v8119_v5 = vcombine.low %v8054_v37, %v8070_v27  ;;  %v8151_v58 = vcombine.low %v8086_v12, %v8102_v25  ;;  %v7984_v26 = vcombine.high %v15664_v6, %v15667_v63 }
 0x7f2   : > { %v8444_v60 = vcombine.high %v15717_v13, %v15720_v42  ;;  %v15731_v51 = vrot.slane %v7983_v1, %v13510_v52  ;;  %v8016_v23 = vcombine.high %v15670_v8, %v15673_v54  ;;  %v8120_v62 = vcombine.high %v8054_v37, %v8070_v27 }
 0x7f3   : > { %v15736_v14 = vrot.slane %v8015_v40, %v13510_v52  ;;  %v15739_v16 = vrot.slane %v8119_v5, %v13510_v52  ;;  %v15742_v6 = vrot.slane %v8151_v58, %v13510_v52  ;;  %v7998_v63 = vrot.slane %v7984_v26, %v13510_v52 }
 0x7f4   : > { %v11472_v21 = vpack.i.bf16 %v8444_v60, %v8308_v59  ;;  %v8030_v3 = vrot.slane %v8016_v23, %v13510_v52  ;;  %v8134_v19 = vrot.slane %v8120_v62, %v13510_v52  ;;  %v8152_v8 = vcombine.high %v8086_v12, %v8102_v25 }
 0x7f5   : > { %v8036_v54 = vcombine.high %v15731_v51, %v15736_v14  ;;  %v8172_v29 = vcombine.high %v15739_v16, %v15742_v6  ;;  %v8256_v31 = vcombine.high %v15648_v33, %v15651_v0  ;;  %v8288_v24 = vcombine.high %v15654_v55, %v15657_v39 }
 0x7f6   : > { %11473 = vrot.lane.b32.xlu0 %v11472_v21, %s12608_s3  ;;  %v8038_v20 = vcombine.high %v7998_v63, %v8030_v3  ;;  %v8166_v34 = vrot.slane %v8152_v8, %v13510_v52  ;;  %v8392_v61 = vcombine.high %v8326_v43, %v8342_v35  ;;  %v8424_v37 = vcombine.high %v15698_v15, %v8374_v36 }
 0x7f7   : > { %v11477_v41 = vpack.i.bf16 %v8172_v29, %v8036_v54  ;;  %v8270_v48 = vrot.slane %v8256_v31, %v13510_v52  ;;  %v8302_v44 = vrot.slane %v8288_v24, %v13510_v52  ;;  %v8307_v39 = vcombine.low %v15702_v4, %v15705_v49 }
 0x7f8   : > { %v8174_v33 = vcombine.high %v8134_v19, %v8166_v34  ;;  %v8173_v0 = vcombine.low %v8134_v19, %v8166_v34  ;;  %v8406_v55 = vrot.slane %v8392_v61, %v13510_v52  ;;  %v8037_v27 = vcombine.low %v7998_v63, %v8030_v3 }
 0x7f9   : > { %11478 = vrot.lane.b32.xlu1 %v11477_v41, %s12608_s3  ;;  %v8438_v43 = vrot.slane %v8424_v37, %v13510_v52  ;;  %v8443_v35 = vcombine.low %v15717_v13, %v15720_v42  ;;  %v8035_v15 = vcombine.low %v15731_v51, %v15736_v14  ;;  %v8171_v36 = vcombine.low %v15739_v16, %v15742_v6 }
 0x7fa   : > { %v11492_v12 = vpack.i.bf16 %v8174_v33, %v8038_v20  ;;  %v11482_v25 = vpack.i.bf16 %v8173_v0, %v8037_v27  ;;  %v8309_v2 = vcombine.low %v8270_v48, %v8302_v44  ;;  %v8310_v52 = vcombine.high %v8270_v48, %v8302_v44 }
 0x7fb   : > { %v8445_v22 = vcombine.low %v8406_v55, %v8438_v43  ;;  %v8446_v1 = vcombine.high %v8406_v55, %v8438_v43 }
 0x7fc   : > { %11493 = vrot.lane.b32.xlu0 %v11492_v12, %s12606_s21 }
 0x7fd   : > { %11483 = vrot.lane.b32.xlu1 %v11482_v25, %s12607_s10  ;;  %v11497_v59 = vpack.i.bf16 %v8445_v22, %v8309_v2  ;;  %v11507_v13 = vpack.i.bf16 %v8446_v1, %v8310_v52 }
 0x800   : > { %11498 = vrot.lane.b32.xlu0 %v11497_v59, %s12607_s10 }
 0x801   : > { %11488 = vrot.lane.b32.xlu1 %v15584_v46, %s12608_s3 }
 0x804   : > { %11508 = vrot.lane.b32.xlu0 %v11507_v13, %s12606_s21 }
 0x805   : > { %11503 = vrot.lane.b32.xlu1 %v15594_v9, %s12607_s10 }
 0x809   : > { %11513 = vrot.lane.b32.xlu1 %v15596_v17, %s12606_s21 }
 0x820   : > { %v11464_v42 = vpop.permute.xlu1 %11463  ;;  %v11459_v40 = vpop.permute.xlu0 %11458 }
 0x821   : > { %v11461_v5 = vunpack.i.h.bf16 %v11459_v40  ;;  %v11460_v58 = vunpack.i.l.bf16 %v11459_v40  ;;  %v11466_v26 = vunpack.i.h.bf16 %v11464_v42  ;;  %v11465_v60 = vunpack.i.l.bf16 %v11464_v42 }
 0x823   : > { %v8544_v46 = vsel %vm5993_vm0, %v8167_v56, %v11461_v5  ;;  %v8543_v51 = vsel %vm5993_vm0, %v8031_v18, %v11460_v58 }
 0x824   : > { %v11469_v9 = vpop.permute.xlu1 %11468  ;;  %v8548_v62 = vsel %vm8547_vm1, %v8543_v51, %v11465_v60  ;;  %v8549_v14 = vsel %vm8547_vm1, %v8544_v46, %v11466_v26  ;;  %v16512_v46 = vld [vmem:[#allocation42_spill] sm:$0xff] }
 0x825   : > { %v11471_v17 = vunpack.i.h.bf16 %v11469_v9  ;;  %v11470_v23 = vunpack.i.l.bf16 %v11469_v9  ;;  %v8614_v7 = vrot.slane %v8601_v32, %v16512_v46 }
 0x827   : > { %v8553_v16 = vsel %vm8552_vm2, %v8548_v62, %v11470_v23  ;;  %v8554_v50 = vsel %vm8552_vm2, %v8549_v14, %v11471_v17  ;;  %v12149_v23 = vld [vmem:[#allocation2 + $0x30] sm:$0xff]  ;;  %v12150_v14 = vld [vmem:[#allocation2] sm:$0xff] }
 0x828   : > { %v8602_v53 = vpack.c.bf16 %v8554_v50, %v8553_v16 }
 0x868   : > { %v11474_v56 = vpop.permute.xlu0 %11473 }
 0x869   : > { %v11476_v38 = vunpack.i.h.bf16 %v11474_v56  ;;  %v11475_v20 = vunpack.i.l.bf16 %v11474_v56 }
 0x86b   : > { %v11479_v6 = vpop.permute.xlu1 %11478  ;;  %v8560_v0 = vsel %vm5993_vm0, %v8443_v35, %v11476_v38  ;;  %v8559_v55 = vsel %vm5993_vm0, %v8307_v39, %v11475_v20 }
 0x86c   : > { %v11481_v63 = vunpack.i.h.bf16 %v11479_v6  ;;  %v11480_v45 = vunpack.i.l.bf16 %v11479_v6 }
 0x86e   : > { %v11494_v28 = vpop.permute.xlu0 %11493  ;;  %v8557_v19 = vsel %vm5993_vm0, %v8035_v15, %v11480_v45  ;;  %v8558_v8 = vsel %vm5993_vm0, %v8171_v36, %v11481_v63  ;;  %v12151_v63 = vld [vmem:[#allocation2 + $0x18] sm:$0xff] }
 0x86f   : > { %v11484_v18 = vpop.permute.xlu1 %11483  ;;  %v11496_v54 = vunpack.i.h.bf16 %v11494_v28  ;;  %v11495_v29 = vunpack.i.l.bf16 %v11494_v28  ;;  %v12152_v28 = vld [vmem:[#allocation2 + $0x10] sm:$0xff] }
 0x870   : > { %v11486_v21 = vunpack.i.h.bf16 %v11484_v18  ;;  %v11485_v3 = vunpack.i.l.bf16 %v11484_v18 }
 0x872   : > { %v8561_v31 = vsel %vm8547_vm1, %v8557_v19, %v11485_v3  ;;  %v8562_v24 = vsel %vm8547_vm1, %v8558_v8, %v11486_v21  ;;  %v11499_v11 = vpop.permute.xlu0 %11498 }
 0x873   : > { %v11489_v34 = vpop.permute.xlu1 %11488  ;;  %v8565_v61 = vsel %vm8552_vm2, %v8561_v31, %v11495_v29  ;;  %v8566_v41 = vsel %vm8552_vm2, %v8562_v24, %v11496_v54  ;;  %v11501_v48 = vunpack.i.h.bf16 %v11499_v11  ;;  %v11500_v44 = vunpack.i.l.bf16 %v11499_v11  ;;  %v12153_v31 = vld [vmem:[#allocation2 + $0x8] sm:$0xff]  ;;  %v12154_v11 = vld [vmem:[#allocation2 + $0x20] sm:$0xff] }
 0x874   : > { %v8603_v37 = vpack.c.bf16 %v8566_v41, %v8565_v61  ;;  %v11491_v25 = vunpack.i.h.bf16 %v11489_v34  ;;  %v11490_v22 = vunpack.i.l.bf16 %v11489_v34 }
 0x875   : > { %v8563_v15 = vsel %vm8547_vm1, %v8559_v55, %v11500_v44  ;;  %v8564_v36 = vsel %vm8547_vm1, %v8560_v0, %v11501_v48  ;;  %v12155_v48 = vld [vmem:[#allocation2 + $0x28] sm:$0xff] }
 0x876   : > { %v11509_v33 = vpop.permute.xlu0 %11508  ;;  %8809 = vmatprep.mubr.bf16.mxu0 %v8603_v37  ;;  %v8546_v39 = vsel %vm5993_vm0, %v8439_v10, %v11491_v25  ;;  %v8545_v52 = vsel %vm5993_vm0, %v8303_v47, %v11490_v22  ;;  %v8610_v10 = vrot.slane %v8601_v32, %v16511_v57  ;;  %v12156_v37 = vld [vmem:[#allocation2 + $0x38] sm:$0xff]  ;;  %v11814_v22 = vld [vmem:[%s13080_s7 + $0xc8] ss:$16 sps:$4 sm:$0xff]  }
 0x877   : > { %v11511_v27 = vunpack.i.h.bf16 %v11509_v33  ;;  %v11510_v43 = vunpack.i.l.bf16 %v11509_v33  ;;  %v11504_v12 = vpop.permute.xlu1 %11503  ;;  %8810 = vmatmul.mubr.bf16.vlgmr.msra.gmra.mxu0 %v8602_v53  ;;  %v11805_v55 = vld [vmem:[%s13080_s7 + $0xe0] ss:$16 sps:$4 sm:$0xff]   ;;  %v11838_v32 = vld [vmem:[%s13080_s7 + $0x48] ss:$16 sps:$4 sm:$0xff]  }
 0x878   : > { %v11506_v2 = vunpack.i.h.bf16 %v11504_v12  ;;  %v11505_v59 = vunpack.i.l.bf16 %v11504_v12  ;;  %v11810_v12 = vld [vmem:[%s13080_s7 + $0xec] ss:$16 sps:$4 sm:$0xff]   ;;  %v11811_v25 = vld [vmem:[%s13080_s7 + $0xc0] ss:$16 sps:$4 sm:$0xff]  }
 0x879   : > { %v8567_v35 = vsel %vm8552_vm2, %v8563_v15, %v11510_v43  ;;  %v8568_v1 = vsel %vm8552_vm2, %v8564_v36, %v11511_v27  ;;  %v11807_v27 = vld [vmem:[%s13080_s7 + $0xe4] ss:$16 sps:$4 sm:$0xff]   ;;  %v11808_v43 = vld [vmem:[%s13080_s7 + $0xe8] ss:$16 sps:$4 sm:$0xff]   ;;  %v11816_v36 = vld [vmem:[%s13080_s7 + $0xcc] ss:$16 sps:$4 sm:$0xff]   ;;  %9406 = vmatprep.subr.bf16.mxu0 %v11810_v12 }
 0x87a   : > { %v8605_v4 = vpack.c.bf16 %v8568_v1, %v8567_v35  ;;  %v8550_v40 = vsel %vm8547_vm1, %v8545_v52, %v11505_v59  ;;  %v8551_v5 = vsel %vm8547_vm1, %v8546_v39, %v11506_v2  ;;  %v11813_v15 = vld [vmem:[%s13080_s7 + $0xc4] ss:$16 sps:$4 sm:$0xff]   ;;  %9353 = vmatprep.subr.bf16.mxu1 %v11807_v27  ;;  %9407 = vmatpush1.bf16.msra.mxu0 %v11808_v43  ;;  %v11822_v59 = vld [vmem:[%s13080_s7 + $0xac] ss:$16 sps:$4 sm:$0xff]   ;;  %v11817_v35 = vld [vmem:[%s13080_s7 + $0xa0] ss:$16 sps:$4 sm:$0xff]  }
 0x87b   : > { %v11514_v49 = vpop.permute.xlu1 %11513  ;;  %9354 = vmatpush1.bf16.msra.mxu1 %v11805_v55  ;;  %v11819_v2 = vld [vmem:[%s13080_s7 + $0xa4] ss:$16 sps:$4 sm:$0xff]   ;;  %9408 = vmatprep.subr.bf16.mxu0 %v11816_v36  ;;  %v11820_v1 = vld [vmem:[%s13080_s7 + $0xa8] ss:$16 sps:$4 sm:$0xff]   ;;  %v11823_v39 = vld [vmem:[%s13080_s7 + $0x80] ss:$16 sps:$4 sm:$0xff]  }
 0x87c   : > { %v11516_v13 = vunpack.i.h.bf16 %v11514_v49  ;;  %v11515_v42 = vunpack.i.l.bf16 %v11514_v49  ;;  %8819 = vmatprep.mubr.bf16.mxu0 %v8605_v4  ;;  %9355 = vmatprep.subr.bf16.mxu1 %v11813_v15  ;;  %v11825_v4 = vld [vmem:[%s13080_s7 + $0x84] ss:$16 sps:$4 sm:$0xff]   ;;  %v11828_v49 = vld [vmem:[%s13080_s7 + $0x8c] ss:$16 sps:$4 sm:$0xff]   ;;  %v11826_v52 = vld [vmem:[%s13080_s7 + $0x88] ss:$16 sps:$4 sm:$0xff]  }
 0x87d   : > { %v11859_v15 = vld [vmem:[%s13080_s7 + $0x1c0] ss:$16 sps:$4 sm:$0xff]   ;;  %v11862_v36 = vld [vmem:[%s13080_s7 + $0x1c8] ss:$16 sps:$4 sm:$0xff]  }
 0x87e   : > { %v8555_v58 = vsel %vm8552_vm2, %v8550_v40, %v11515_v42  ;;  %v8556_v26 = vsel %vm8552_vm2, %v8551_v5, %v11516_v13  ;;  %9409 = vmatpush1.bf16.msra.mxu0 %v11814_v22  ;;  %v11831_v13 = vld [vmem:[%s13080_s7 + $0x64] ss:$16 sps:$4 sm:$0xff]   ;;  %v11834_v42 = vld [vmem:[%s13080_s7 + $0x6c] ss:$16 sps:$4 sm:$0xff]   ;;  %v11829_v40 = vld [vmem:[%s13080_s7 + $0x60] ss:$16 sps:$4 sm:$0xff]  }
 0x87f   : > { %v8604_v60 = vpack.c.bf16 %v8556_v26, %v8555_v58  ;;  %9356 = vmatpush1.bf16.msra.mxu1 %v11811_v25  ;;  %9410 = vmatprep.subr.bf16.mxu0 %v11822_v59  ;;  %v11832_v5 = vld [vmem:[%s13080_s7 + $0x68] ss:$16 sps:$4 sm:$0xff]   ;;  %v11837_v58 = vld [vmem:[%s13080_s7 + $0x44] ss:$16 sps:$4 sm:$0xff]   ;;  %v11840_v26 = vld [vmem:[%s13080_s7 + $0x4c] ss:$16 sps:$4 sm:$0xff]  }
 0x880   : > { %9357 = vmatprep.subr.bf16.mxu1 %v11819_v2  ;;  %v11865_v25 = vld [vmem:[%s13080_s7 + $0x1a0] ss:$16 sps:$4 sm:$0xff]   ;;  %v11867_v22 = vld [vmem:[%s13080_s7 + $0x1a4] ss:$16 sps:$4 sm:$0xff]   ;;  %v11868_v2 = vld [vmem:[%s13080_s7 + $0x1a8] ss:$16 sps:$4 sm:$0xff]  }
 0x881   : > { %8820 = vmatmul.mubr.bf16.gmra.mxu0 %v8604_v60  ;;  %v11835_v60 = vld [vmem:[%s13080_s7 + $0x40] ss:$16 sps:$4 sm:$0xff]   ;;  %v11870_v59 = vld [vmem:[%s13080_s7 + $0x1ac] ss:$16 sps:$4 sm:$0xff]  }
 0x882   : > { %9411 = vmatpush1.bf16.msra.mxu0 %v11820_v1  ;;  %v11873_v1 = vld [vmem:[%s13080_s7 + $0x184] ss:$16 sps:$4 sm:$0xff]  }
 0x883   : > { %9358 = vmatpush1.bf16.msra.mxu1 %v11817_v35  ;;  %9412 = vmatprep.subr.bf16.mxu0 %v11828_v49  ;;  %v11871_v35 = vld [vmem:[%s13080_s7 + $0x180] ss:$16 sps:$4 sm:$0xff]   ;;  %v11876_v49 = vld [vmem:[%s13080_s7 + $0x18c] ss:$16 sps:$4 sm:$0xff]  }
 0x884   : > { %9359 = vmatprep.subr.bf16.mxu1 %v11825_v4  ;;  %v11874_v4 = vld [vmem:[%s13080_s7 + $0x188] ss:$16 sps:$4 sm:$0xff]  }
 0x886   : > { %9413 = vmatpush1.bf16.msra.mxu0 %v11826_v52  ;;  %v11879_v52 = vld [vmem:[%s13080_s7 + $0x164] ss:$16 sps:$4 sm:$0xff]  }
 0x887   : > { %9360 = vmatpush1.bf16.msra.mxu1 %v11823_v39  ;;  %9414 = vmatprep.subr.bf16.mxu0 %v11834_v42  ;;  %v11877_v39 = vld [vmem:[%s13080_s7 + $0x160] ss:$16 sps:$4 sm:$0xff]   ;;  %v11882_v42 = vld [vmem:[%s13080_s7 + $0x16c] ss:$16 sps:$4 sm:$0xff]  }
 0x888   : > { %9361 = vmatprep.subr.bf16.mxu1 %v11831_v13  ;;  %v11880_v13 = vld [vmem:[%s13080_s7 + $0x168] ss:$16 sps:$4 sm:$0xff]  }
 0x88a   : > { %9415 = vmatpush1.bf16.msra.mxu0 %v11832_v5  ;;  %v11888_v5 = vld [vmem:[%s13080_s7 + $0x14c] ss:$16 sps:$4 sm:$0xff]  }
 0x88b   : > { %9362 = vmatpush1.bf16.msra.mxu1 %v11829_v40  ;;  %9416 = vmatprep.subr.bf16.mxu0 %v11840_v26  ;;  %v11885_v40 = vld [vmem:[%s13080_s7 + $0x144] ss:$16 sps:$4 sm:$0xff]   ;;  %v11886_v26 = vld [vmem:[%s13080_s7 + $0x148] ss:$16 sps:$4 sm:$0xff]  }
 0x88c   : > { %9363 = vmatprep.subr.bf16.mxu1 %v11837_v58  ;;  %v11883_v58 = vld [vmem:[%s13080_s7 + $0x140] ss:$16 sps:$4 sm:$0xff]  }
 0x88e   : > { %9417 = vmatpush1.bf16.msra.mxu0 %v11838_v32  ;;  %v11894_v32 = vld [vmem:[%s13080_s7 + $0x12c] ss:$16 sps:$4 sm:$0xff]  }
 0x88f   : > { %9364 = vmatpush1.bf16.msra.mxu1 %v11835_v60  ;;  %v11891_v60 = vld [vmem:[%s13080_s7 + $0x124] ss:$16 sps:$4 sm:$0xff]  }
 0x937   : > { %v8811_v30 = vpop.f32.mrf.mxu0 }
 0x938   : > { %v8812_v47 = vadd.f32 %v8811_v30, %v8610_v10  ;;  %v11841_v30 = vld [vmem:[%s13080_s7 + $0x20] ss:$16 sps:$4 sm:$0xff]  }
 0x939   : > { %v8813_v51 = vpop.f32.mrf.mxu0 }
 0x93a   : > { %v8814_v9 = vadd.f32 %v8813_v51, %v8614_v7  ;;  %v15825_v62 = vadd.f32 %v12149_v23, %v8812_v47  ;;  %v11844_v47 = vld [vmem:[%s13080_s7 + $0x28] ss:$16 sps:$4 sm:$0xff]   ;;  %v11849_v51 = vld [vmem:[%s13080_s7 + $0x4] ss:$16 sps:$4 sm:$0xff]  }
 0x93b   : > { %v8815_v17 = vpop.f32.mrf.mxu0  ;;  %v11850_v23 = vld [vmem:[%s13080_s7 + $0x8] ss:$16 sps:$4 sm:$0xff]  }
 0x93c   : > { %v15827_v16 = vadd.f32 %v12150_v14, %v8814_v9  ;;  %v8816_v50 = vadd.f32 %v8815_v17, %v8610_v10  ;;  %v11852_v9 = vld [vmem:[%s13080_s7 + $0xc] ss:$16 sps:$4 sm:$0xff]   ;;  %v11847_v17 = vld [vmem:[%s13080_s7] ss:$16 sps:$4 sm:$0xff]   ;;  %v11855_v14 = vld [vmem:[%s13080_s7 + $0x1e4] ss:$16 sps:$4 sm:$0xff]  }
 0x93d   : > { %v8817_v53 = vpop.f32.mrf.mxu0 }
 0x93e   : > { %v8818_v56 = vadd.f32 %v8817_v53, %v8614_v7  ;;  %v8840_v6 = vadd.f32 %v15827_v16, %v15825_v62  ;;  %v15831_v45 = vadd.f32 %v12151_v63, %v8816_v50  ;;  %v11858_v50 = vld [vmem:[%s13080_s7 + $0x1ec] ss:$16 sps:$4 sm:$0xff]   ;;  %v11853_v53 = vld [vmem:[%s13080_s7 + $0x1e0] ss:$16 sps:$4 sm:$0xff]  }
 0x940   : > { %v15833_v18 = vadd.f32 %v12152_v28, %v8818_v56  ;;  %8841 = vadd.xlane.f32.xlu0 %v8840_v6  ;;  %v11856_v56 = vld [vmem:[%s13080_s7 + $0x1e8] ss:$16 sps:$4 sm:$0xff]  }
 0x941   : > { %v8821_v21 = vpop.f32.mrf.mxu0 }
 0x942   : > { %v8822_v3 = vadd.f32 %v8821_v21, %v8610_v10  ;;  %v8843_v19 = vadd.f32 %v15833_v18, %v15831_v45 }
 0x943   : > { %v8823_v8 = vpop.f32.mrf.mxu0 }
 0x944   : > { %v8824_v54 = vadd.f32 %v8823_v8, %v8614_v7  ;;  %8844 = vadd.xlane.f32.xlu1 %v8843_v19  ;;  %v15837_v24 = vadd.f32 %v12153_v31, %v8822_v3 }
 0x945   : > { %v8825_v29 = vpop.f32.mrf.mxu0 }
 0x946   : > { %v15839_v38 = vadd.f32 %v12154_v11, %v8824_v54  ;;  %v8826_v20 = vadd.f32 %v8825_v29, %v8610_v10  ;;  %v11843_v10 = vld [vmem:[%s13080_s7 + $0x24] ss:$16 sps:$4 sm:$0xff]  }
 0x947   : > { %v8827_v34 = vpop.f32.mrf.mxu0  ;;  %9365 = vmatprep.subr.bf16.mxu1 %v11843_v10  ;;  %v11889_v10 = vld [vmem:[%s13080_s7 + $0x120] ss:$16 sps:$4 sm:$0xff]  }
 0x948   : > { %v8828_v61 = vadd.f32 %v8827_v34, %v8614_v7  ;;  %v8846_v41 = vadd.f32 %v15839_v38, %v15837_v24  ;;  %v15843_v44 = vadd.f32 %v12155_v48, %v8826_v20  ;;  %v11846_v7 = vld [vmem:[%s13080_s7 + $0x2c] ss:$16 sps:$4 sm:$0xff]   ;;  %9366 = vmatpush1.bf16.msra.mxu1 %v11841_v30  ;;  %v11897_v30 = vld [vmem:[%s13080_s7 + $0x104] ss:$16 sps:$4 sm:$0xff]  }
 0x949   : > { %9418 = vmatprep.subr.bf16.mxu0 %v11846_v7  ;;  %9367 = vmatprep.subr.bf16.mxu1 %v11849_v51  ;;  %v11892_v7 = vld [vmem:[%s13080_s7 + $0x128] ss:$16 sps:$4 sm:$0xff]   ;;  %v11895_v51 = vld [vmem:[%s13080_s7 + $0x100] ss:$16 sps:$4 sm:$0xff]  }
 0x94a   : > { %v15845_v33 = vadd.f32 %v12156_v37, %v8828_v61  ;;  %8847 = vadd.xlane.f32.xlu0 %v8846_v41  ;;  %9419 = vmatpush1.bf16.msra.mxu0 %v11844_v47  ;;  %v11900_v47 = vld [vmem:[%s13080_s7 + $0x10c] ss:$16 sps:$4 sm:$0xff]  }
 0x94b   : > { %9420 = vmatprep.subr.bf16.mxu0 %v11852_v9  ;;  %v11898_v9 = vld [vmem:[%s13080_s7 + $0x108] ss:$16 sps:$4 sm:$0xff]  }
 0x94c   : > { %v8849_v0 = vadd.f32 %v15845_v33, %v15843_v44  ;;  %9368 = vmatpush1.bf16.msra.mxu1 %v11847_v17  ;;  %v11903_v17 = vld [vmem:[%s13082_s1 + $0x74] ss:$8 sps:$4 sm:$0xff]  }
 0x94d   : > { %9369 = vmatprep.subr.bf16.mxu1 %v11855_v14 }
 0x94e   : > { %8850 = vadd.xlane.f32.xlu0 %v8849_v0  ;;  %9421 = vmatpush1.bf16.msra.mxu0 %v11850_v23  ;;  %v11906_v23 = vld [vmem:[%s13082_s1 + $0x174] ss:$8 sps:$4 sm:$0xff]  }
 0x94f   : > { %9422 = vmatprep.subr.bf16.mxu0 %v11858_v50 }
 0x950   : > { %9370 = vmatpush2.bf16.msra.mxu1 %v11853_v53 }
 0x952   : > { %9423 = vmatpush2.bf16.msra.mxu0 %v11856_v56 }
 0x9c9   : > { %v8842_v6 = vpop.xlane.xlu0 %8841 }
 0x9ca   : > { %v8853_v63 = vmul.f32 0.00390625, %v8842_v6 }
 0x9cc   : > { %v15886_v28 = vsub.f32 %v15825_v62, %v8853_v63  ;;  %v15889_v21 = vsub.f32 %v15827_v16, %v8853_v63 }
 0x9cd   : > { %v8845_v3 = vpop.xlane.xlu1 %8844 }
 0x9ce   : > { %v8865_v19 = vmul.f32 %v15886_v28, %v15886_v28  ;;  %v8866_v8 = vmul.f32 %v15889_v21, %v15889_v21  ;;  %v8854_v54 = vmul.f32 0.00390625, %v8845_v3 }
 0x9d0   : > { %v15896_v29 = vsub.f32 %v15831_v45, %v8854_v54  ;;  %v15899_v31 = vsub.f32 %v15833_v18, %v8854_v54  ;;  %v8873_v11 = vadd.f32 %v8866_v8, %v8865_v19 }
 0x9d2   : > { %v8867_v62 = vmul.f32 %v15896_v29, %v15896_v29  ;;  %v8868_v16 = vmul.f32 %v15899_v31, %v15899_v31  ;;  %8874 = vadd.xlane.f32.xlu1 %v8873_v11 }
 0x9d3   : > { %v8848_v20 = vpop.xlane.xlu0 %8847 }
 0x9d4   : > { %v8855_v34 = vmul.f32 0.00390625, %v8848_v20  ;;  %v8876_v61 = vadd.f32 %v8868_v16, %v8867_v62  ;;  %v8838_v62 = vld [vmem:[%s866_s0] sm:$0x3] }
 0x9d6   : > { %v15906_v41 = vsub.f32 %v15837_v24, %v8855_v34  ;;  %v15909_v45 = vsub.f32 %v15839_v38, %v8855_v34  ;;  %8877 = vadd.xlane.f32.xlu0 %v8876_v61  ;;  %v8909_v34 = vrot.slane %v8838_v62, %v16511_v57  ;;  %v8839_v61 = vld [vmem:[%s875_s25] sm:$0x3] }
 0x9d7   : > { %v8851_v18 = vpop.xlane.xlu0 %8850 }
 0x9d8   : > { %v8869_v48 = vmul.f32 %v15906_v41, %v15906_v41  ;;  %v8870_v37 = vmul.f32 %v15909_v45, %v15909_v45  ;;  %v8856_v0 = vmul.f32 0.00390625, %v8851_v18 }
 0x9da   : > { %v15916_v55 = vsub.f32 %v15843_v44, %v8856_v0  ;;  %v15919_v24 = vsub.f32 %v15845_v33, %v8856_v0  ;;  %v8879_v38 = vadd.f32 %v8870_v37, %v8869_v48  ;;  %v11861_v44 = vld [vmem:[%s13080_s7 + $0x1c4] ss:$16 sps:$4 sm:$0xff]   ;;  %v11864_v33 = vld [vmem:[%s13080_s7 + $0x1cc] ss:$16 sps:$4 sm:$0xff]   ;;  %v8913_v48 = vrot.slane %v8838_v62, %v16512_v46 }
 0x9db   : > { %9371 = vmatprep.subr.bf16.mxu1 %v11861_v44  ;;  %9424 = vmatprep.subr.bf16.mxu0 %v11864_v33  ;;  %v11942_v62 = vld [vmem:[%s13082_s1 + $0x114] ss:$8 sps:$4 sm:$0xff]  }
 0x9dc   : > { %v8871_v27 = vmul.f32 %v15916_v55, %v15916_v55  ;;  %v8872_v43 = vmul.f32 %v15919_v24, %v15919_v24  ;;  %8880 = vadd.xlane.f32.xlu1 %v8879_v38  ;;  %9372 = vmatpush2.bf16.msra.mxu1 %v11859_v15  ;;  %v8928_v38 = vrot.slane %v8839_v61, %v16511_v57 }
 0x9dd   : > { %9425 = vmatpush2.bf16.msra.mxu0 %v11862_v36  ;;  %9373 = vmatprep.subr.bf16.mxu1 %v11867_v22 }
 0x9de   : > { %v8882_v12 = vadd.f32 %v8872_v43, %v8871_v27  ;;  %9426 = vmatprep.subr.bf16.mxu0 %v11870_v59  ;;  %v8932_v27 = vrot.slane %v8839_v61, %v16512_v46  ;;  %v11948_v61 = vld [vmem:[%s13082_s1 + $0x104] ss:$8 sps:$4 sm:$0xff]  }
 0x9e0   : > { %8883 = vadd.xlane.f32.xlu0 %v8882_v12  ;;  %9374 = vmatpush2.bf16.msra.mxu1 %v11865_v25 }
 0x9e1   : > { %9427 = vmatpush2.bf16.msra.mxu0 %v11868_v2  ;;  %9375 = vmatprep.subr.bf16.mxu1 %v11873_v1  ;;  %v11901_v1 = vld [vmem:[%s13082_s1 + $0x70] ss:$8 sps:$4 sm:$0xff]  }
 0x9e2   : > { %9428 = vmatprep.subr.bf16.mxu0 %v11876_v49  ;;  %v11909_v49 = vld [vmem:[%s13082_s1 + $0x64] ss:$8 sps:$4 sm:$0xff]  }
 0x9e4   : > { %9376 = vmatpush2.bf16.msra.mxu1 %v11871_v35 }
 0x9e5   : > { %9429 = vmatpush2.bf16.msra.mxu0 %v11874_v4  ;;  %9377 = vmatprep.subr.bf16.mxu1 %v11879_v52  ;;  %v11904_v4 = vld [vmem:[%s13082_s1 + $0x170] ss:$8 sps:$4 sm:$0xff]  }
 0x9e6   : > { %9430 = vmatprep.subr.bf16.mxu0 %v11882_v42 }
 0x9e8   : > { %9378 = vmatpush2.bf16.msra.mxu1 %v11877_v39  ;;  %v11912_v39 = vld [vmem:[%s13082_s1 + $0x164] ss:$8 sps:$4 sm:$0xff]  }
 0x9e9   : > { %9431 = vmatpush2.bf16.msra.mxu0 %v11880_v13  ;;  %9379 = vmatprep.subr.bf16.mxu1 %v11885_v40 }
 0x9ea   : > { %9432 = vmatprep.subr.bf16.mxu0 %v11888_v5  ;;  %v11910_v5 = vld [vmem:[%s13082_s1 + $0x160] ss:$8 sps:$4 sm:$0xff]  }
 0x9ec   : > { %9380 = vmatpush2.bf16.msra.mxu1 %v11883_v58  ;;  %v11915_v58 = vld [vmem:[%s13082_s1 + $0x54] ss:$8 sps:$4 sm:$0xff]  }
 0x9ed   : > { %9433 = vmatpush2.bf16.msra.mxu0 %v11886_v26  ;;  %9381 = vmatprep.subr.bf16.mxu1 %v11891_v60 }
 0x9ee   : > { %9434 = vmatprep.subr.bf16.mxu0 %v11894_v32  ;;  %v11918_v32 = vld [vmem:[%s13082_s1 + $0x154] ss:$8 sps:$4 sm:$0xff]  }
 0x9f0   : > { %9382 = vmatpush2.bf16.msra.mxu1 %v11889_v10 }
 0x9f1   : > { %9435 = vmatpush2.bf16.msra.mxu0 %v11892_v7  ;;  %9383 = vmatprep.subr.bf16.mxu1 %v11897_v30 }
 0x9f2   : > { %9436 = vmatprep.subr.bf16.mxu0 %v11900_v47 }
 0x9f4   : > { %9384 = vmatpush2.bf16.msra.mxu1 %v11895_v51  ;;  %v11913_v51 = vld [vmem:[%s13082_s1 + $0x50] ss:$8 sps:$4 sm:$0xff]  }
 0x9f5   : > { %9437 = vmatpush2.bf16.msra.mxu0 %v11898_v9  ;;  %9879 = vmatprep.subr.bf16.mxu1 %v11903_v17  ;;  %v11916_v9 = vld [vmem:[%s13082_s1 + $0x150] ss:$8 sps:$4 sm:$0xff]   ;;  %v11921_v17 = vld [vmem:[%s13082_s1 + $0x44] ss:$8 sps:$4 sm:$0xff]  }
 0x9f6   : > { %9932 = vmatprep.subr.bf16.mxu0 %v11906_v23  ;;  %v11924_v23 = vld [vmem:[%s13082_s1 + $0x144] ss:$8 sps:$4 sm:$0xff]  }
 0xa5b   : > { %v8875_v14 = vpop.xlane.xlu1 %8874 }
 0xa5c   : > { %v8885_v50 = vmul.f32 0.00390625, %v8875_v14  ;;  %v11919_v14 = vld [vmem:[%s13082_s1 + $0x40] ss:$8 sps:$4 sm:$0xff]  }
 0xa5e   : > { %v8889_v53 = vadd.f32 1e-05, %v8885_v50  ;;  %v11922_v50 = vld [vmem:[%s13082_s1 + $0x140] ss:$8 sps:$4 sm:$0xff]  }
 0xa5f   : > { %v8878_v56 = vpop.xlane.xlu0 %8877 }
 0xa60   : > { %12125 = vrsqrt.f32 %v8889_v53  ;;  %v8886_v6 = vmul.f32 0.00390625, %v8878_v56  ;;  %v11927_v53 = vld [vmem:[%s13082_s1 + $0x34] ss:$8 sps:$4 sm:$0xff]  }
 0xa61   : > { %v11930_v56 = vld [vmem:[%s13082_s1 + $0x134] ss:$8 sps:$4 sm:$0xff]  }
 0xa62   : > { %v8890_v63 = vadd.f32 1e-05, %v8886_v6  ;;  %v11925_v6 = vld [vmem:[%s13082_s1 + $0x30] ss:$8 sps:$4 sm:$0xff]  }
 0xa64   : > { %12127 = vrsqrt.f32 %v8890_v63  ;;  %v11928_v63 = vld [vmem:[%s13082_s1 + $0x130] ss:$8 sps:$4 sm:$0xff]  }
 0xa65   : > { %v8881_v3 = vpop.xlane.xlu1 %8880 }
 0xa66   : > { %v8887_v19 = vmul.f32 0.00390625, %v8881_v3  ;;  %v11933_v3 = vld [vmem:[%s13082_s1 + $0x24] ss:$8 sps:$4 sm:$0xff]  }
 0xa68   : > { %v8891_v8 = vadd.f32 1e-05, %v8887_v19  ;;  %v11936_v19 = vld [vmem:[%s13082_s1 + $0x124] ss:$8 sps:$4 sm:$0xff]  }
 0xa69   : > { %v8884_v54 = vpop.xlane.xlu0 %8883 }
 0xa6a   : > { %12129 = vrsqrt.f32 %v8891_v8  ;;  %v8888_v11 = vmul.f32 0.00390625, %v8884_v54  ;;  %v11931_v8 = vld [vmem:[%s13082_s1 + $0x20] ss:$8 sps:$4 sm:$0xff]  }
 0xa6b   : > { %v11934_v54 = vld [vmem:[%s13082_s1 + $0x120] ss:$8 sps:$4 sm:$0xff]  }
 0xa6c   : > { %v8892_v16 = vadd.f32 1e-05, %v8888_v11  ;;  %v11939_v11 = vld [vmem:[%s13082_s1 + $0x14] ss:$8 sps:$4 sm:$0xff]  }
 0xa6d   : > { %v12126_v20 = vpop.eup %12125 }
 0xa6e   : > { %12131 = vrsqrt.f32 %v8892_v16  ;;  %v8898_v18 = vmul.f32 %v12126_v20, %v15889_v21  ;;  %v8897_v37 = vmul.f32 %v12126_v20, %v15886_v28  ;;  %v11937_v16 = vld [vmem:[%s13082_s1 + $0x10] ss:$8 sps:$4 sm:$0xff]  }
 0xa6f   : > { %v11940_v20 = vld [vmem:[%s13082_s1 + $0x110] ss:$8 sps:$4 sm:$0xff]  }
 0xa70   : > { %v8917_v12 = vmul.f32 %v8913_v48, %v8898_v18  ;;  %v8916_v44 = vmul.f32 %v8909_v34, %v8897_v37  ;;  %v11943_v18 = vld [vmem:[%s13082_s1] ss:$8 sps:$4 sm:$0xff]   ;;  %v11951_v37 = vld [vmem:[%s13082_s1 + $0xf4] ss:$8 sps:$4 sm:$0xff]  }
 0xa71   : > { %v12128_v0 = vpop.eup %12127 }
 0xa72   : > { %v8900_v43 = vmul.f32 %v12128_v0, %v15899_v31  ;;  %v8899_v15 = vmul.f32 %v12128_v0, %v15896_v29  ;;  %v15967_v33 = vadd.f32 %v8932_v27, %v8917_v12  ;;  %v15971_v25 = vadd.f32 %v8928_v38, %v8916_v44  ;;  %v11954_v0 = vld [vmem:[%s13082_s1 + $0x1f4] ss:$8 sps:$4 sm:$0xff]   ;;  %v11960_v12 = vld [vmem:[%s13082_s1 + $0x1e4] ss:$8 sps:$4 sm:$0xff]   ;;  %v11958_v44 = vld [vmem:[%s13082_s1 + $0x1e0] ss:$8 sps:$4 sm:$0xff]  }
 0xa74   : > { %v8919_v36 = vmul.f32 %v8913_v48, %v8900_v43  ;;  %v8918_v21 = vmul.f32 %v8909_v34, %v8899_v15  ;;  %v11957_v43 = vld [vmem:[%s13082_s1 + $0xe4] ss:$8 sps:$4 sm:$0xff]   ;;  %v11955_v15 = vld [vmem:[%s13082_s1 + $0xe0] ss:$8 sps:$4 sm:$0xff]  }
 0xa76   : > { %v15969_v28 = vadd.f32 %v8932_v27, %v8919_v36  ;;  %v15973_v22 = vadd.f32 %v8928_v38, %v8918_v21  ;;  %v11963_v36 = vld [vmem:[%s13082_s1 + $0xd4] ss:$8 sps:$4 sm:$0xff]  }
 0xa77   : > { %v12130_v2 = vpop.eup %12129  ;;  %v11966_v21 = vld [vmem:[%s13082_s1 + $0x1d4] ss:$8 sps:$4 sm:$0xff]  }
 0xa78   : > { %v9009_v31 = vpack.c.bf16 %v15969_v28, %v15967_v33  ;;  %v9008_v59 = vpack.c.bf16 %v15973_v22, %v15971_v25  ;;  %v8902_v29 = vmul.f32 %v12130_v2, %v15909_v45  ;;  %v8901_v35 = vmul.f32 %v12130_v2, %v15906_v41  ;;  %v11907_v41 = vld [vmem:[%s13082_s1 + $0x60] ss:$8 sps:$4 sm:$0xff]   ;;  %v11961_v2 = vld [vmem:[%s13082_s1 + $0xd0] ss:$8 sps:$4 sm:$0xff]  }
 0xa7a   : > { %9385 = vmatprep.mubr.bf16.mxu1 %v9009_v31  ;;  %9438 = vmatprep.mubr.bf16.mxu0 %v9009_v31  ;;  %v8921_v42 = vmul.f32 %v8913_v48, %v8902_v29  ;;  %v8920_v40 = vmul.f32 %v8909_v34, %v8901_v35  ;;  %v11964_v31 = vld [vmem:[%s13082_s1 + $0x1d0] ss:$8 sps:$4 sm:$0xff]   ;;  %v11972_v29 = vld [vmem:[%s13082_s1 + $0x1c4] ss:$8 sps:$4 sm:$0xff]   ;;  %v11967_v35 = vld [vmem:[%s13082_s1 + $0xc0] ss:$8 sps:$4 sm:$0xff]  }
 0xa7b   : > { %v12132_v52 = vpop.eup %12131  ;;  %9386 = vmatmul.mubr.bf16.vlgmr.msra.gmra.mxu1 %v9008_v59  ;;  %9439 = vmatmul.mubr.bf16.vlgmr.msra.gmra.mxu0 %v9008_v59  ;;  %v11969_v59 = vld [vmem:[%s13082_s1 + $0xc4] ss:$8 sps:$4 sm:$0xff]  }
 0xa7c   : > { %v8904_v13 = vmul.f32 %v12132_v52, %v15919_v24  ;;  %v8903_v45 = vmul.f32 %v12132_v52, %v15916_v55  ;;  %9880 = vmatpush1.bf16.msra.mxu1 %v11901_v1  ;;  %9933 = vmatpush1.bf16.msra.mxu0 %v11904_v4  ;;  %v15991_v10 = vadd.f32 %v8932_v27, %v8921_v42  ;;  %v11970_v1 = vld [vmem:[%s13082_s1 + $0x1c0] ss:$8 sps:$4 sm:$0xff]   ;;  %v11975_v4 = vld [vmem:[%s13082_s1 + $0xb4] ss:$8 sps:$4 sm:$0xff]   ;;  %v11976_v52 = vld [vmem:[%s13082_s1 + $0x1b0] ss:$8 sps:$4 sm:$0xff]  }
 0xa7d   : > { %9881 = vmatprep.subr.bf16.mxu1 %v11909_v49  ;;  %9934 = vmatprep.subr.bf16.mxu0 %v11912_v39  ;;  %v15995_v55 = vadd.f32 %v8928_v38, %v8920_v40  ;;  %v11978_v49 = vld [vmem:[%s13082_s1 + $0x1b4] ss:$8 sps:$4 sm:$0xff]   ;;  %v11973_v39 = vld [vmem:[%s13082_s1 + $0xb0] ss:$8 sps:$4 sm:$0xff]   ;;  %v11981_v42 = vld [vmem:[%s13082_s1 + $0xa4] ss:$8 sps:$4 sm:$0xff]  }
 0xa7e   : > { %v8923_v26 = vmul.f32 %v8913_v48, %v8904_v13  ;;  %v8922_v60 = vmul.f32 %v8909_v34, %v8903_v45  ;;  %v11945_v34 = vld [vmem:[%s13082_s1 + $0x4] ss:$8 sps:$4 sm:$0xff]   ;;  %v11946_v48 = vld [vmem:[%s13082_s1 + $0x100] ss:$8 sps:$4 sm:$0xff]  }
 0xa7f   : > { %v11979_v13 = vld [vmem:[%s13082_s1 + $0xa0] ss:$8 sps:$4 sm:$0xff]   ;;  %v11984_v40 = vld [vmem:[%s13082_s1 + $0x1a4] ss:$8 sps:$4 sm:$0xff]  }
 0xa80   : > { %v15993_v24 = vadd.f32 %v8932_v27, %v8923_v26  ;;  %v15997_v7 = vadd.f32 %v8928_v38, %v8922_v60  ;;  %9882 = vmatpush1.bf16.msra.mxu1 %v11907_v41  ;;  %9935 = vmatpush1.bf16.msra.mxu0 %v11910_v5  ;;  %v11949_v38 = vld [vmem:[%s13082_s1 + $0xf0] ss:$8 sps:$4 sm:$0xff]   ;;  %v11982_v45 = vld [vmem:[%s13082_s1 + $0x1a0] ss:$8 sps:$4 sm:$0xff]   ;;  %v11987_v5 = vld [vmem:[%s13082_s1 + $0x94] ss:$8 sps:$4 sm:$0xff]  }
 0xa81   : > { %9883 = vmatprep.subr.bf16.mxu1 %v11915_v58  ;;  %9936 = vmatprep.subr.bf16.mxu0 %v11918_v32  ;;  %v11952_v27 = vld [vmem:[%s13082_s1 + $0x1f0] ss:$8 sps:$4 sm:$0xff]   ;;  %v11990_v26 = vld [vmem:[%s13082_s1 + $0x194] ss:$8 sps:$4 sm:$0xff]   ;;  %v11993_v60 = vld [vmem:[%s13082_s1 + $0x84] ss:$8 sps:$4 sm:$0xff]  }
 0xa82   : > { %v9011_v30 = vpack.c.bf16 %v15993_v24, %v15991_v10  ;;  %v9010_v47 = vpack.c.bf16 %v15997_v7, %v15995_v55  ;;  %v11985_v41 = vld [vmem:[%s13082_s1 + $0x90] ss:$8 sps:$4 sm:$0xff]   ;;  %v11991_v32 = vld [vmem:[%s13082_s1 + $0x80] ss:$8 sps:$4 sm:$0xff]  }
 0xa83   : > { %v11988_v58 = vld [vmem:[%s13082_s1 + $0x190] ss:$8 sps:$4 sm:$0xff]  }
 0xa84   : > { %9395 = vmatprep.mubr.bf16.mxu1 %v9011_v30  ;;  %9448 = vmatprep.mubr.bf16.mxu0 %v9011_v30  ;;  %v11996_v30 = vld [vmem:[%s13082_s1 + $0x184] ss:$8 sps:$4 sm:$0xff]  }
 0xa85   : > { %9396 = vmatmul.mubr.bf16.gmra.mxu1 %v9010_v47  ;;  %9449 = vmatmul.mubr.bf16.gmra.mxu0 %v9010_v47  ;;  %v11994_v47 = vld [vmem:[%s13082_s1 + $0x180] ss:$8 sps:$4 sm:$0xff]  }
 0xa86   : > { %9884 = vmatpush1.bf16.msra.mxu1 %v11913_v51  ;;  %9937 = vmatpush1.bf16.msra.mxu0 %v11916_v9  ;;  %v9007_v51 = vld [vmem:[%s1081_s9] sm:$0xf] }
 0xa87   : > { %9885 = vmatprep.subr.bf16.mxu1 %v11921_v17  ;;  %9938 = vmatprep.subr.bf16.mxu0 %v11924_v23  ;;  %v9020_v23 = vrot.slane %v9007_v51, %v16512_v46 }
 0xa8a   : > { %9886 = vmatpush1.bf16.msra.mxu1 %v11919_v14  ;;  %9939 = vmatpush1.bf16.msra.mxu0 %v11922_v50  ;;  %v16514_v14 = vld [vmem:[#allocation45_spill] sm:$0xff] }
 0xa8b   : > { %9887 = vmatprep.subr.bf16.mxu1 %v11927_v53  ;;  %9940 = vmatprep.subr.bf16.mxu0 %v11930_v56  ;;  %v9028_v50 = vrot.slane %v9007_v51, %v16514_v14  ;;  %v9016_v53 = vrot.slane %v9007_v51, %v16511_v57  ;;  %v16515_v56 = vld [vmem:[#allocation44_spill] sm:$0xff] }
 0xa8e   : > { %9888 = vmatpush1.bf16.msra.mxu1 %v11925_v6  ;;  %9941 = vmatpush1.bf16.msra.mxu0 %v11928_v63  ;;  %v9024_v6 = vrot.slane %v9007_v51, %v16515_v56 }
 0xa8f   : > { %9889 = vmatprep.subr.bf16.mxu1 %v11933_v3  ;;  %9942 = vmatprep.subr.bf16.mxu0 %v11936_v19 }
 0xa92   : > { %9890 = vmatpush1.bf16.msra.mxu1 %v11931_v8  ;;  %9943 = vmatpush1.bf16.msra.mxu0 %v11934_v54 }
 0xa93   : > { %9891 = vmatprep.subr.bf16.mxu1 %v11939_v11  ;;  %9944 = vmatprep.subr.bf16.mxu0 %v11942_v62 }
 0xa96   : > { %9892 = vmatpush1.bf16.msra.mxu1 %v11937_v16  ;;  %9945 = vmatpush1.bf16.msra.mxu0 %v11940_v20 }
 0xa97   : > { %9893 = vmatprep.subr.bf16.mxu1 %v11945_v34  ;;  %9946 = vmatprep.subr.bf16.mxu0 %v11948_v61 }
 0xa9a   : > { %9894 = vmatpush1.bf16.msra.mxu1 %v11943_v18  ;;  %9947 = vmatpush1.bf16.msra.mxu0 %v11946_v48 }
 0xa9b   : > { %9895 = vmatprep.subr.bf16.mxu1 %v11951_v37  ;;  %9948 = vmatprep.subr.bf16.mxu0 %v11954_v0 }
 0xa9e   : > { %9896 = vmatpush2.bf16.msra.mxu1 %v11949_v38  ;;  %9949 = vmatpush2.bf16.msra.mxu0 %v11952_v27 }
 0xa9f   : > { %9897 = vmatprep.subr.bf16.mxu1 %v11957_v43  ;;  %9950 = vmatprep.subr.bf16.mxu0 %v11960_v12 }
 0xaa2   : > { %9898 = vmatpush2.bf16.msra.mxu1 %v11955_v15  ;;  %9951 = vmatpush2.bf16.msra.mxu0 %v11958_v44 }
 0xaa3   : > { %9899 = vmatprep.subr.bf16.mxu1 %v11963_v36  ;;  %9952 = vmatprep.subr.bf16.mxu0 %v11966_v21 }
 0xaa6   : > { %9900 = vmatpush2.bf16.msra.mxu1 %v11961_v2  ;;  %9953 = vmatpush2.bf16.msra.mxu0 %v11964_v31 }
 0xaa7   : > { %9901 = vmatprep.subr.bf16.mxu1 %v11969_v59  ;;  %9954 = vmatprep.subr.bf16.mxu0 %v11972_v29 }
 0xaaa   : > { %9902 = vmatpush2.bf16.msra.mxu1 %v11967_v35  ;;  %9955 = vmatpush2.bf16.msra.mxu0 %v11970_v1 }
 0xaab   : > { %9903 = vmatprep.subr.bf16.mxu1 %v11975_v4  ;;  %9956 = vmatprep.subr.bf16.mxu0 %v11978_v49 }
 0xaae   : > { %9904 = vmatpush2.bf16.msra.mxu1 %v11973_v39  ;;  %9957 = vmatpush2.bf16.msra.mxu0 %v11976_v52 }
 0xaaf   : > { %9905 = vmatprep.subr.bf16.mxu1 %v11981_v42  ;;  %9958 = vmatprep.subr.bf16.mxu0 %v11984_v40 }
 0xab2   : > { %9906 = vmatpush2.bf16.msra.mxu1 %v11979_v13  ;;  %9959 = vmatpush2.bf16.msra.mxu0 %v11982_v45 }
 0xab3   : > { %9907 = vmatprep.subr.bf16.mxu1 %v11987_v5  ;;  %9960 = vmatprep.subr.bf16.mxu0 %v11990_v26 }
 0xab6   : > { %9908 = vmatpush2.bf16.msra.mxu1 %v11985_v41  ;;  %9961 = vmatpush2.bf16.msra.mxu0 %v11988_v58 }
 0xab7   : > { %9909 = vmatprep.subr.bf16.mxu1 %v11993_v60  ;;  %9962 = vmatprep.subr.bf16.mxu0 %v11996_v30 }
 0xaba   : > { %9910 = vmatpush2.bf16.msra.mxu1 %v11991_v32  ;;  %9963 = vmatpush2.bf16.msra.mxu0 %v11994_v47 }
 0xb3b   : > { %v9387_v9 = vpop.f32.mrf.mxu1  ;;  %v9440_v17 = vpop.f32.mrf.mxu0 }
 0xb3c   : > { %v9388_v20 = vadd.f32 %v9387_v9, %v9016_v53  ;;  %v9441_v34 = vadd.f32 %v9440_v17, %v9024_v6 }
 0xb3d   : > { %v9389_v63 = vpop.f32.mrf.mxu1  ;;  %v9442_v3 = vpop.f32.mrf.mxu0 }
 0xb3e   : > { %v9390_v54 = vadd.f32 %v9389_v63, %v9020_v23  ;;  %v9443_v11 = vadd.f32 %v9442_v3, %v9028_v50  ;;  %v9459_v44 = vmax.f32 %v9388_v20, 0.0  ;;  %v9461_v36 = vmax.f32 %v9441_v34, 0.0 }
 0xb3f   : > { %v9391_v19 = vpop.f32.mrf.mxu1  ;;  %v9444_v8 = vpop.f32.mrf.mxu0 }
 0xb40   : > { %v9392_v62 = vadd.f32 %v9391_v19, %v9016_v53  ;;  %v9445_v16 = vadd.f32 %v9444_v8, %v9024_v6  ;;  %v9460_v27 = vmax.f32 %v9390_v54, 0.0  ;;  %v9462_v43 = vmax.f32 %v9443_v11, 0.0 }
 0xb41   : > { %v9393_v61 = vpop.f32.mrf.mxu1  ;;  %v9446_v18 = vpop.f32.mrf.mxu0 }
 0xb42   : > { %v9394_v48 = vadd.f32 %v9393_v61, %v9020_v23  ;;  %v9447_v37 = vadd.f32 %v9446_v18, %v9028_v50  ;;  %v9463_v0 = vmax.f32 %v9392_v62, 0.0  ;;  %v9465_v38 = vmax.f32 %v9445_v16, 0.0 }
 0xb44   : > { %v9464_v12 = vmax.f32 %v9394_v48, 0.0  ;;  %v9466_v15 = vmax.f32 %v9447_v37, 0.0  ;;  %v9540_v29 = vpack.c.bf16 %v9463_v0, %v9459_v44  ;;  %v9542_v35 = vpack.c.bf16 %v9465_v38, %v9461_v36 }
 0xb45   : > { %v9397_v21 = vpop.f32.mrf.mxu1  ;;  %v9450_v2 = vpop.f32.mrf.mxu0 }
 0xb46   : > { %v9541_v31 = vpack.c.bf16 %v9464_v12, %v9460_v27  ;;  %v9543_v59 = vpack.c.bf16 %v9466_v15, %v9462_v43  ;;  %v9398_v40 = vadd.f32 %v9397_v21, %v9016_v53  ;;  %v9451_v41 = vadd.f32 %v9450_v2, %v9024_v6 }
 0xb47   : > { %v9399_v1 = vpop.f32.mrf.mxu1  ;;  %v9452_v4 = vpop.f32.mrf.mxu0 }
 0xb48   : > { %9911 = vmatprep.mubr.bf16.mxu1 %v9541_v31  ;;  %9964 = vmatprep.mubr.bf16.mxu0 %v9543_v59  ;;  %v9400_v52 = vadd.f32 %v9399_v1, %v9020_v23  ;;  %v9453_v13 = vadd.f32 %v9452_v4, %v9028_v50  ;;  %v9467_v14 = vmax.f32 %v9398_v40, 0.0  ;;  %v9469_v56 = vmax.f32 %v9451_v41, 0.0 }
 0xb49   : > { %v9401_v49 = vpop.f32.mrf.mxu1  ;;  %v9454_v39 = vpop.f32.mrf.mxu0  ;;  %9912 = vmatmul.mubr.bf16.vlgmr.msra.gmra.mxu1 %v9540_v29  ;;  %9965 = vmatmul.mubr.bf16.vlgmr.msra.gmra.mxu0 %v9542_v35 }
 0xb4a   : > { %v9402_v42 = vadd.f32 %v9401_v49, %v9016_v53  ;;  %v9455_v45 = vadd.f32 %v9454_v39, %v9024_v6  ;;  %v9468_v47 = vmax.f32 %v9400_v52, 0.0  ;;  %v9470_v51 = vmax.f32 %v9453_v13, 0.0 }
 0xb4b   : > { %v9403_v5 = vpop.f32.mrf.mxu1  ;;  %v9456_v58 = vpop.f32.mrf.mxu0 }
 0xb4c   : > { %v9404_v26 = vadd.f32 %v9403_v5, %v9020_v23  ;;  %v9457_v60 = vadd.f32 %v9456_v58, %v9028_v50  ;;  %v9471_v32 = vmax.f32 %v9402_v42, 0.0  ;;  %v9473_v30 = vmax.f32 %v9455_v45, 0.0  ;;  %v9539_v23 = vld [vmem:[%s902_s14] sm:$0x3] }
 0xb4d   : > { %v9552_v50 = vrot.slane %v9539_v23, %v16511_v57  ;;  %v9556_v53 = vrot.slane %v9539_v23, %v16512_v46 }
 0xb4e   : > { %v9472_v9 = vmax.f32 %v9404_v26, 0.0  ;;  %v9474_v17 = vmax.f32 %v9457_v60, 0.0  ;;  %v9544_v19 = vpack.c.bf16 %v9471_v32, %v9467_v14  ;;  %v9546_v8 = vpack.c.bf16 %v9473_v30, %v9469_v56 }
 0xb50   : > { %v9545_v63 = vpack.c.bf16 %v9472_v9, %v9468_v47  ;;  %v9547_v3 = vpack.c.bf16 %v9474_v17, %v9470_v51 }
 0xb52   : > { %9921 = vmatprep.mubr.bf16.mxu1 %v9545_v63  ;;  %9974 = vmatprep.mubr.bf16.mxu0 %v9547_v3 }
 0xb53   : > { %9922 = vmatmul.mubr.bf16.gmra.mxu1 %v9544_v19  ;;  %9975 = vmatmul.mubr.bf16.gmra.mxu0 %v9546_v8 }
 0xc09   : > { %v9913_v6 = vpop.f32.mrf.mxu1  ;;  %v9966_v54 = vpop.f32.mrf.mxu0 }
 0xc0a   : > { %v9914_v11 = vadd.f32 %v9913_v6, %v9552_v50 }
 0xc0b   : > { %v9915_v62 = vpop.f32.mrf.mxu1  ;;  %v9968_v16 = vpop.f32.mrf.mxu0 }
 0xc0c   : > { %v9967_v20 = vadd.f32 %v9966_v54, %v9914_v11  ;;  %v9916_v34 = vadd.f32 %v9915_v62, %v9556_v53 }
 0xc0d   : > { %v9917_v61 = vpop.f32.mrf.mxu1  ;;  %v9970_v18 = vpop.f32.mrf.mxu0 }
 0xc0e   : > { %v9969_v48 = vadd.f32 %v9968_v16, %v9916_v34  ;;  %v9918_v37 = vadd.f32 %v9917_v61, %v9552_v50  ;;  %v9985_v38 = vadd.f32 %v9967_v20, %v15971_v25 }
 0xc0f   : > { %v9919_v0 = vpop.f32.mrf.mxu1  ;;  %v9972_v15 = vpop.f32.mrf.mxu0 }
 0xc10   : > { %v9986_v27 = vadd.f32 %v9969_v48, %v15967_v33  ;;  %v9971_v43 = vadd.f32 %v9970_v18, %v9918_v37  ;;  %v9920_v12 = vadd.f32 %v9919_v0, %v9556_v53 }
 0xc12   : > { %v9973_v44 = vadd.f32 %v9972_v15, %v9920_v12  ;;  %v9995_v36 = vadd.f32 %v9986_v27, %v9985_v38  ;;  %v9987_v31 = vadd.f32 %v9971_v43, %v15973_v22 }
 0xc13   : > { %v9923_v21 = vpop.f32.mrf.mxu1  ;;  %v9976_v2 = vpop.f32.mrf.mxu0 }
 0xc14   : > { %v9988_v59 = vadd.f32 %v9973_v44, %v15969_v28  ;;  %v9924_v29 = vadd.f32 %v9923_v21, %v9552_v50  ;;  %9996 = vadd.xlane.f32.xlu1 %v9995_v36  ;;  %v9993_v21 = vld [vmem:[%s911_s12] sm:$0x3] }
 0xc15   : > { %v9925_v35 = vpop.f32.mrf.mxu1  ;;  %v9978_v1 = vpop.f32.mrf.mxu0 }
 0xc16   : > { %v9977_v4 = vadd.f32 %v9976_v2, %v9924_v29  ;;  %v9926_v49 = vadd.f32 %v9925_v35, %v9556_v53  ;;  %v9998_v25 = vadd.f32 %v9988_v59, %v9987_v31  ;;  %v10063_v29 = vrot.slane %v9993_v21, %v16511_v57 }
 0xc17   : > { %v9927_v39 = vpop.f32.mrf.mxu1  ;;  %v9980_v33 = vpop.f32.mrf.mxu0  ;;  %v10067_v35 = vrot.slane %v9993_v21, %v16512_v46 }
 0xc18   : > { %v9979_v52 = vadd.f32 %v9978_v1, %v9926_v49  ;;  %v9928_v13 = vadd.f32 %v9927_v39, %v9552_v50  ;;  %9999 = vadd.xlane.f32.xlu0 %v9998_v25  ;;  %v9989_v45 = vadd.f32 %v9977_v4, %v15995_v55 }
 0xc19   : > { %v9929_v42 = vpop.f32.mrf.mxu1  ;;  %v9982_v28 = vpop.f32.mrf.mxu0 }
 0xc1a   : > { %v9990_v40 = vadd.f32 %v9979_v52, %v15991_v10  ;;  %v9981_v22 = vadd.f32 %v9980_v33, %v9928_v13  ;;  %v9930_v41 = vadd.f32 %v9929_v42, %v9556_v53 }
 0xc1c   : > { %v9983_v5 = vadd.f32 %v9982_v28, %v9930_v41  ;;  %v10001_v58 = vadd.f32 %v9990_v40, %v9989_v45  ;;  %v9991_v26 = vadd.f32 %v9981_v22, %v15997_v7 }
 0xc1e   : > { %v9992_v60 = vadd.f32 %v9983_v5, %v15993_v24  ;;  %10002 = vadd.xlane.f32.xlu1 %v10001_v58 }
 0xc20   : > { %v10004_v32 = vadd.f32 %v9992_v60, %v9991_v26 }
 0xc22   : > { %10005 = vadd.xlane.f32.xlu0 %v10004_v32 }
 0xc9d   : > { %v9997_v30 = vpop.xlane.xlu1 %9996 }
 0xc9e   : > { %v10007_v47 = vmul.f32 0.00390625, %v9997_v30 }
 0xca0   : > { %v10011_v51 = vsub.f32 %v9985_v38, %v10007_v47  ;;  %v10012_v9 = vsub.f32 %v9986_v27, %v10007_v47 }
 0xca1   : > { %v10000_v17 = vpop.xlane.xlu0 %9999 }
 0xca2   : > { %v10019_v55 = vmul.f32 %v10011_v51, %v10011_v51  ;;  %v10020_v14 = vmul.f32 %v10012_v9, %v10012_v9  ;;  %v10008_v10 = vmul.f32 0.00390625, %v10000_v17 }
 0xca4   : > { %v10013_v56 = vsub.f32 %v9987_v31, %v10008_v10  ;;  %v10014_v63 = vsub.f32 %v9988_v59, %v10008_v10  ;;  %v10027_v3 = vadd.f32 %v10020_v14, %v10019_v55  ;;  %v9994_v31 = vld [vmem:[%s920_s15] sm:$0x3] }
 0xca5   : > { %v10082_v49 = vrot.slane %v9994_v31, %v16511_v57  ;;  %v10086_v25 = vrot.slane %v9994_v31, %v16512_v46 }
 0xca6   : > { %v10021_v19 = vmul.f32 %v10013_v56, %v10013_v56  ;;  %v10022_v8 = vmul.f32 %v10014_v63, %v10014_v63  ;;  %10028 = vadd.xlane.f32.xlu1 %v10027_v3 }
 0xca7   : > { %v10003_v7 = vpop.xlane.xlu1 %10002 }
 0xca8   : > { %v10009_v23 = vmul.f32 0.00390625, %v10003_v7  ;;  %v10030_v24 = vadd.f32 %v10022_v8, %v10021_v19 }
 0xcaa   : > { %v10015_v50 = vsub.f32 %v9989_v45, %v10009_v23  ;;  %v10016_v53 = vsub.f32 %v9990_v40, %v10009_v23  ;;  %10031 = vadd.xlane.f32.xlu0 %v10030_v24 }
 0xcab   : > { %v10006_v6 = vpop.xlane.xlu0 %10005 }
 0xcac   : > { %v10023_v54 = vmul.f32 %v10015_v50, %v10015_v50  ;;  %v10024_v11 = vmul.f32 %v10016_v53, %v10016_v53  ;;  %v10010_v62 = vmul.f32 0.00390625, %v10006_v6 }
 0xcae   : > { %v10017_v16 = vsub.f32 %v9991_v26, %v10010_v62  ;;  %v10018_v20 = vsub.f32 %v9992_v60, %v10010_v62  ;;  %v10033_v34 = vadd.f32 %v10024_v11, %v10023_v54 }
 0xcb0   : > { %v10025_v61 = vmul.f32 %v10017_v16, %v10017_v16  ;;  %v10026_v18 = vmul.f32 %v10018_v20, %v10018_v20  ;;  %10034 = vadd.xlane.f32.xlu1 %v10033_v34 }
 0xcb2   : > { %v10036_v48 = vadd.f32 %v10026_v18, %v10025_v61 }
 0xcb4   : > { %10037 = vadd.xlane.f32.xlu0 %v10036_v48 }
 0xd2f   : > { %v10029_v37 = vpop.xlane.xlu1 %10028 }
 0xd30   : > { %v10039_v0 = vmul.f32 0.00390625, %v10029_v37 }
 0xd32   : > { %v10043_v38 = vadd.f32 1e-05, %v10039_v0 }
 0xd33   : > { %v10032_v27 = vpop.xlane.xlu0 %10031 }
 0xd34   : > { %12133 = vrsqrt.f32 %v10043_v38  ;;  %v10040_v43 = vmul.f32 0.00390625, %v10032_v27 }
 0xd36   : > { %v10044_v12 = vadd.f32 1e-05, %v10040_v43 }
 0xd38   : > { %12135 = vrsqrt.f32 %v10044_v12 }
 0xd39   : > { %v10035_v15 = vpop.xlane.xlu1 %10034 }
 0xd3a   : > { %v10041_v44 = vmul.f32 0.00390625, %v10035_v15 }
 0xd3c   : > { %v10045_v36 = vadd.f32 1e-05, %v10041_v44 }
 0xd3d   : > { %v10038_v2 = vpop.xlane.xlu0 %10037 }
 0xd3e   : > { %12137 = vrsqrt.f32 %v10045_v36  ;;  %v10042_v59 = vmul.f32 0.00390625, %v10038_v2 }
 0xd40   : > { %v10046_v1 = vadd.f32 1e-05, %v10042_v59 }
 0xd41   : > { %v12134_v4 = vpop.eup %12133 }
 0xd42   : > { %v10051_v39 = vmul.f32 %v12134_v4, %v10011_v51  ;;  %v10052_v33 = vmul.f32 %v12134_v4, %v10012_v9  ;;  %12139 = vrsqrt.f32 %v10046_v1 }
 0xd44   : > { %v10070_v52 = vmul.f32 %v10063_v29, %v10051_v39  ;;  %v10071_v13 = vmul.f32 %v10067_v35, %v10052_v33 }
 0xd45   : > { %v12136_v42 = vpop.eup %12135 }
 0xd46   : > { %v10089_v45 = vadd.f32 %v10082_v49, %v10070_v52  ;;  %v10090_v40 = vadd.f32 %v10086_v25, %v10071_v13  ;;  %v10053_v22 = vmul.f32 %v12136_v42, %v10013_v56  ;;  %v10054_v41 = vmul.f32 %v12136_v42, %v10014_v63 }
 0xd48   : > { %10097 = vst [vmem:[#allocation2 + $0x30] sm:$0xff] %v10089_v45  ;;  %10098 = vst [vmem:[#allocation2] sm:$0xff] %v10090_v40  ;;  %v10072_v28 = vmul.f32 %v10063_v29, %v10053_v22  ;;  %v10073_v5 = vmul.f32 %v10067_v35, %v10054_v41 }
 0xd4a   : > { %v10091_v58 = vadd.f32 %v10082_v49, %v10072_v28  ;;  %v10092_v26 = vadd.f32 %v10086_v25, %v10073_v5 }
 0xd4b   : > { %v12138_v60 = vpop.eup %12137 }
 0xd4c   : > { %10099 = vst [vmem:[#allocation2 + $0x18] sm:$0xff] %v10091_v58  ;;  %10100 = vst [vmem:[#allocation2 + $0x10] sm:$0xff] %v10092_v26  ;;  %v10055_v57 = vmul.f32 %v12138_v60, %v10015_v50  ;;  %v10056_v46 = vmul.f32 %v12138_v60, %v10016_v53 }
 0xd4e   : > { %v10074_v32 = vmul.f32 %v10063_v29, %v10055_v57  ;;  %v10075_v30 = vmul.f32 %v10067_v35, %v10056_v46 }
 0xd4f   : > { %v12140_v47 = vpop.eup %12139 }
 0xd50   : > { %v10093_v51 = vadd.f32 %v10082_v49, %v10074_v32  ;;  %v10094_v9 = vadd.f32 %v10086_v25, %v10075_v30  ;;  %v10057_v17 = vmul.f32 %v12140_v47, %v10017_v16  ;;  %v10058_v55 = vmul.f32 %v12140_v47, %v10018_v20 }
 0xd52   : > { %10101 = vst [vmem:[#allocation2 + $0x8] sm:$0xff] %v10093_v51  ;;  %10102 = vst [vmem:[#allocation2 + $0x20] sm:$0xff] %v10094_v9  ;;  %v10076_v14 = vmul.f32 %v10063_v29, %v10057_v17  ;;  %v10077_v10 = vmul.f32 %v10067_v35, %v10058_v55  ;;  %10108 = sbr.rel (%p11055_p8) target bundleno = 3419 (0xd5b), region = 144 }
 0xd54   : > { %v10095_v56 = vadd.f32 %v10082_v49, %v10076_v14  ;;  %v10096_v63 = vadd.f32 %v10086_v25, %v10077_v10 }
 0xd56   : > { %10103 = vst [vmem:[#allocation2 + $0x28] sm:$0xff] %v10095_v56  ;;  %10104 = vst [vmem:[#allocation2 + $0x38] sm:$0xff] %v10096_v63 }
 0xd57   : > { %10109 = vst [vmem:[%s13074_s30] sm:$0xff] %v10089_v45  ;;  %10110 = vst [vmem:[%s13074_s30 + $0x8] sm:$0xff] %v10090_v40 }
 0xd58   : > { %10111 = vst [vmem:[%s13074_s30 + $0x10] sm:$0xff] %v10091_v58  ;;  %10112 = vst [vmem:[%s13074_s30 + $0x18] sm:$0xff] %v10092_v26 }
 0xd59   : > { %10113 = vst [vmem:[%s13074_s30 + $0x20] sm:$0xff] %v10093_v51  ;;  %10114 = vst [vmem:[%s13074_s30 + $0x28] sm:$0xff] %v10094_v9 }
 0xd5a   : > { %10115 = vst [vmem:[%s13074_s30 + $0x30] sm:$0xff] %v10095_v56  ;;  %10116 = vst [vmem:[%s13074_s30 + $0x38] sm:$0xff] %v10096_v63 }
 0xd5b PF: > { %s16517_s17 = sld [smem:[#allocation28_spill]]  ;;  %s10141_s23 = sshll.u32 %s13087_s16, 4  ;;  %s16098_s23 = int_to_ptr.vmem [resolvable:$true] %s10141_s23 }
 0xd5c   : > { %s16518_s13 = sld [smem:[#allocation27_spill]]  ;;  %s12461_s20 = scalar_lea.vmem %s16098_s23, 512 }
 0xd5d   : > { %s16519_s27 = sld [smem:[#allocation23_spill]]  ;;  %p12462_p12 = scmp.ne.s32.totalorder %s16098_s23, %s12461_s20 }
 0xd5e   : > { %s16520_s29 = sld [smem:[#allocation34_spill]]  ;;  %s12611_s16 = smov [#allocation17]  }
 0xd5f   : > { %s16521_s1 = sld [smem:[#allocation100_spill]]  ;;  %s12465_s22 = sshll.u32 %s12611_s16, 4  ;;  %s12466_s22 = int_to_ptr.vmem [resolvable:$false] %s12465_s22 }
 0xd60   : > { %s12467_s28 = scalar_lea.vmem %s12466_s22, 1024  ;;  %p12468_p3 = scmp.lt.s32.totalorder %s16098_s23, %s12466_s22 }
 0xd61   : > { %s11057_s9 = sshll.u32 %s16517_s17, 2  ;;  %p12469_p5 = scmp.lt.s32.totalorder %s12467_s28, %s12461_s20 }
 0xd62   : > { %s11058_s19 = sshll.u32 %s16518_s13, 3 }
 0xd63   : > { %s10138_s6 = sadd.s32 %s11058_s19, %s11057_s9  ;;  %s16523_s12 = sand.u32 1, %s16519_s27  }
 0xd64   : > { %s11059_s0 = sshll.u32 %s10138_s6, 7  ;;  %s16107_s15 = scalar_lea.sflag [#allocation5], %s16523_s12 }
 0xd65   : > { %s16522_s14 = smov %s16521_s1  ;;  %s16103_s30 = scalar_lea.hbm %s16521_s1, %s11059_s0 }
 0xd66   : > { %p16524_p9 = scmp.ne.s32.totalorder %s16520_s29, 0  ;;  %p12470_p1 = por %p12469_p5, %p12468_p3 }
 0xd68   : > { %p12463_p11 = pnand %p12462_p12, %p16524_p9 }
 0xd6a   : > { %p12464_p13 = pneg %p12463_p11 }
 0xd6c   : > { %p12471_p2 = pnand %p12470_p1, %p12464_p13 }
 0xd6e   : > { %12474 = shalt.err (!%p12471_p2)
}
 0xd6f   : > { %s12475_s8 = scalar_lea.hbm %s16103_s30, 512  ;;  %s12479_s26 = scalar_lea.hbm %s16522_s14, 2048 }
 0xd70   : > { %p12476_p4 = scmp.ne.s32.totalorder %s16103_s30, %s12475_s8  ;;  %p12480_p7 = scmp.lt.s32.totalorder %s16103_s30, %s16522_s14 }
 0xd71   : > { %p12481_p6 = scmp.lt.s32.totalorder %s12479_s26, %s12475_s8 }
 0xd72   : > { %p12477_p10 = pnand %p12476_p4, %p16524_p9 }
 0xd73   : > { %p12482_p8 = por %p12481_p6, %p12480_p7 }
 0xd74   : > { %p12478_p0 = pneg %p12477_p10 }
 0xd76   : > { %p12483_p12 = pnand %p12482_p8, %p12478_p0 }
 0xd78   : > { %12486 = shalt.err (!%p12483_p12)
}
 0xd79   : > { %s12612_s3 = smov 128   ;;  %s12613_s11 = smov 8  }
 0xd7a   : > { %11309 = dma.vmem_to_hbm [thread:$0]  (%p16524_p9), %s16098_s23, 512, %s16103_s30, %s16107_s15, %s12612_s3, %s12612_s3, %s12613_s11  }
 0xd7b PF: > { %s16525_s24 = sld [smem:[#allocation31_spill]] }
 0xd7c   : > { %s16526_s2 = sld [smem:[#allocation22_spill]] }
 0xd7d   : > { %s16527_s4 = sld [smem:[#allocation35_spill]] }
 0xd81   : > { %p11355_p11 = scmp.ge.s32.totalorder %s16525_s24, 2 }
 0xd82   : > { %s10164_s17 = sand.u32 1, %s16526_s2  }
 0xd83   : > { %p16528_p13 = scmp.ne.s32.totalorder %s16527_s4, 0  ;;  %s10165_s13 = scalar_lea.sflag [#allocation5], %s10164_s17 }
 0xd85   : > { %p11347_p3 = pnand %p11355_p11, %p16528_p13 }
 0xd87   : > { %p11348_p5 = pneg %p11347_p3 }
 0xd89   : > { %12544 = dma.done.wait (%p11348_p5), %s10165_s13, 512  }
 0xd8a   : > { %12546 = vsyncadd (%p11348_p5), %s10165_s13, 4294966784  ;;  %s35_s3 = sadd.s32 1, %s16525_s24   ;;  %s16529_s0 = sld [smem:[#allocation23_spill]] }
 0xd8b   : > { %p32_p1 = scmp.ge.s32.totalorder %s35_s3, 6   ;;  %s16530_s30 = sld [smem:[#allocation24_spill]] }
 0xd8c   : > { %s16531_s20 = sld [smem:[#allocation41_spill]] }
 0xd8d   : > { %s16532_s21 = sld [smem:[#allocation25_spill]] }
 0xd8e   : > { %s16533_s1 = sld [smem:[#allocation26_spill]] }
 0xd8f   : > { %s16534_s22 = sld [smem:[#allocation40_spill]]  ;;  %34 = sbr.rel (!%p32_p1) target bundleno = 30 (0x1e), region = 273 }
 0xd90   : > { %s16535_s2 = sld [smem:[#allocation29_spill]] }
 0xd91   : > { %s16536_s23 = sld [smem:[#allocation30_spill]] }
 0xd92   : > { %s16537_s24 = sld [smem:[#allocation38_spill]] }
 0xd93   : > { %s16538_s25 = sld [smem:[#allocation39_spill]] }
 0xd94   :  { %10170 = vsyncpa [#allocation4], 1 }
 0xd95   :  { %10172 = vsyncpa [#allocation4 + $0x1], 1 }
 0xd96   :  { %10173 = vsyncpa [#allocation7], 1 }
 0xd97   :  { %10174 = vsyncpa [#allocation5], 1 }
 0xd98   :  { %10176 = vsyncpa [#allocation5 + $0x1], 1 }

</bundles_post_ra>
